<compile_context>
chip_gen: v7x
topology: tpu7x:2x2x1
jax: 0.10.0
libtpu: 0.0.40
codegen_flags: <defaults>
</compile_context>

<pallas_src>
import functools

import jax
import jax.numpy as jnp
import numpy as np
from jax import lax
from jax.experimental import pallas as pl
from jax.experimental.pallas import tpu as pltpu

_LANE = 128   # channel axes are zero-padded to a multiple of the 128 lanes


def _round_up(x, m):
    return (x + m - 1) // m * m


def _physical_vmem_bytes():
    try:
        return int(getattr(pltpu.get_tpu_info(), "vmem_capacity_bytes",
                           64 << 20))
    except Exception:          # off-TPU / older jax: be conservative (v7x TC)
        return 64 << 20


def _pick_batch_block(n, h, w, *, min_rows=512, max_rows=4096):
    """Sub-batch per grid step: keep B_sub*H*W >= ~512 matmul rows (MXU
    occupancy for small-spatial layers) but bounded, and dividing n."""
    rows = h * w
    b = min(n, max(1, -(-min_rows // rows)))
    b = min(b, max(1, max_rows // rows))
    while n % b:
        b -= 1
    return b


# ------------------------------ fused kernel --------------------------------


def _inverted_residual_kernel(*refs, expand, stride, use_shortcut, pad_l,
                              matmul_dtype):
    if expand:
        (x_ref, we_ref, be_ref, wd_ref, bd_ref, wp_ref, bp_ref,
         o_ref, hpad_ref) = refs
    else:
        (x_ref, wd_ref, bd_ref, wp_ref, bp_ref, o_ref, hpad_ref) = refs

    B, H, W, Cin = x_ref.shape
    Chid = wd_ref.shape[-1]
    _, Ho, Wo, Cout = o_ref.shape

    x = x_ref[...]                       # original dtype (exact skip path)
    x2d = x.reshape(B * H * W, Cin)

    # -- stage 1: 1x1 expand conv (BN scale pre-folded) + bias + ReLU6 (MXU) --
    if expand:
        h = jnp.dot(x2d.astype(matmul_dtype), we_ref[...],
                    preferred_element_type=jnp.float32)
        h = jnp.clip(h + be_ref[...], 0.0, 6.0)
    else:
        h = x2d.astype(jnp.float32)

    # -- stage 2: depthwise 3x3 + bias + ReLU6 (VPU, f32 accumulation) --------
    # Interior store starts at the (sub)lane-tile-aligned column `pad_l`; only
    # the halo strips the taps actually read are zeroed (NOT the whole
    # scratch) since the interior is fully overwritten every step.
    hpad_ref[:, 1:H + 1, pad_l:pad_l + W, :] = (
        h.reshape(B, H, W, Chid).astype(hpad_ref.dtype))
    zrow = jnp.zeros((B, 1, W + 2, Chid), hpad_ref.dtype)
    hpad_ref[:, 0:1, pad_l - 1:pad_l + W + 1, :] = zrow
    hpad_ref[:, H + 1:H + 2, pad_l - 1:pad_l + W + 1, :] = zrow
    zcol = jnp.zeros((B, H, 1, Chid), hpad_ref.dtype)
    hpad_ref[:, 1:H + 1, pad_l - 1:pad_l, :] = zcol
    hpad_ref[:, 1:H + 1, pad_l + W:pad_l + W + 1, :] = zcol

    wd = wd_ref[...]                     # (9, Chid) f32, BN scale pre-folded
    acc = jnp.zeros((B, Ho, Wo, Chid), jnp.float32)
    if stride == 1:
        for kh in range(3):
            for kw in range(3):
                c0 = pad_l - 1 + kw
                patch = hpad_ref[:, kh:kh + Ho, c0:c0 + Wo, :]
                acc = acc + patch.astype(jnp.float32) * wd[kh * 3 + kw, :]
    else:
        # stride == 2: deinterleave even/odd W columns ONCE, then each tap is
        # a contiguous slice (2 relayout passes instead of 9 strided slices).
        full = hpad_ref[:, :, pad_l - 1:pad_l + 2 * Wo, :].astype(jnp.float32)
        odd = full[:, :, 0::2, :]        # cols pad_l-1, pad_l+1, ... (Wo+1)
        even = full[:, :, 1::2, :]       # cols pad_l,   pad_l+2, ... (Wo)
        for kh in range(3):
            rsl = slice(kh, kh + 2 * Ho - 1, 2)
            taps = (odd[:, rsl, 0:Wo, :],
                    even[:, rsl, 0:Wo, :],
                    odd[:, rsl, 1:Wo + 1, :])
            for kw in range(3):
                acc = acc + taps[kw] * wd[kh * 3 + kw, :]
    d = jnp.clip(acc + bd_ref[...], 0.0, 6.0)

    # -- stage 3: 1x1 project conv (MXU) + bias (+ fused residual add) --------
    p = jnp.dot(d.reshape(B * Ho * Wo, Chid).astype(matmul_dtype), wp_ref[...],
                preferred_element_type=jnp.float32)
    p = p + bp_ref[...]
    if use_shortcut:
        p = p + x2d.astype(jnp.float32)  # x kept in original dtype: exact skip
    o_ref[...] = p.reshape(B, Ho, Wo, Cout).astype(o_ref.dtype)


# ----------------------------- module wrappers --------------------------------


def inverted_residual_nhwc(x, params, stride, expand_ratio, *,
                           matmul_dtype=jnp.bfloat16,
                           hidden_dtype=jnp.bfloat16,
                           out_dtype=None):
    """Fused InvertedResidual on an NHWC tensor whose channel axis is already
    zero-padded to a multiple of 128.  Returns NHWC, channels padded to a
    multiple of 128, in `out_dtype` (default: x.dtype).  This is the layout
    intended for chaining blocks without depad / transpose passes."""
    n, h, w, cpx = x.shape
    expand = expand_ratio != 1
    cin = params["expand_w"].shape[0] if expand else params["dw_w"].shape[-1]
    chid = cin * expand_ratio
    cout = params["proj_w"].shape[1]
    use_shortcut = (stride == 1) and (cin == cout)
    out_dtype = x.dtype if out_dtype is None else out_dtype

    cp_in = _round_up(cin, _LANE)
    cp_hid = _round_up(chid, _LANE)
    cp_out = _round_up(cout, _LANE)
    assert cpx == cp_in, "input channel axis must be lane-padded to %d" % cp_in
    ho = (h - 1) // stride + 1
    wo = (w - 1) // stride + 1

    def pad2(a, rows, cols):
        return jnp.pad(a, ((0, rows - a.shape[0]), (0, cols - a.shape[1])))

    # Fold the eval-mode BN scale into the conv weights; only +bias in-kernel.
    wd = pad2((params["dw_w"] * params["dw_scale"]).reshape(9, chid),
              9, cp_hid).astype(jnp.float32)
    bd = pad2(params["dw_bias"], 1, cp_hid).astype(jnp.float32)
    wp = pad2(params["proj_w"] * params["proj_scale"],
              cp_hid, cp_out).astype(matmul_dtype)
    bp = pad2(params["proj_bias"], 1, cp_out).astype(jnp.float32)

    b_sub = _pick_batch_block(n, h, w)
    # Scratch interior starts at a dtype-native sublane-tile boundary; right
    # padding only covers the single used halo column (rounded to 8).
    pad_l = 8 * max(1, 4 // jnp.dtype(hidden_dtype).itemsize)
    w_scr = pad_l + _round_up(w + 1, 8)

    x_spec = pl.BlockSpec((b_sub, h, w, cp_in), lambda b: (b, 0, 0, 0))
    whole2d = lambda a: pl.BlockSpec(a.shape, lambda b: (0, 0))

    args, in_specs = [x], [x_spec]
    if expand:
        we = pad2(params["expand_w"] * params["expand_scale"],
                  cp_in, cp_hid).astype(matmul_dtype)
        be = pad2(params["expand_bias"], 1, cp_hid).astype(jnp.float32)
        args += [we, be]
        in_specs += [whole2d(we), whole2d(be)]
    args += [wd, bd, wp, bp]
    in_specs += [whole2d(wd), whole2d(bd), whole2d(wp), whole2d(bp)]

    # VMEM budget from the real live set: x/out blocks double-buffered,
    # weights single-buffered (constant index_map), plus scratch and the
    # Mosaic-materialised f32 intermediates (h, depthwise acc, project out).
    hid_isz = jnp.dtype(hidden_dtype).itemsize
    x_blk = b_sub * h * w * cp_in * x.dtype.itemsize
    o_blk = b_sub * ho * wo * cp_out * jnp.dtype(out_dtype).itemsize
    wgt_bytes = sum(int(a.size) * a.dtype.itemsize for a in args[1:])
    scratch_bytes = b_sub * (h + 2) * w_scr * cp_hid * hid_isz
    interm_bytes = (b_sub * (2 * h * w + ho * wo) * cp_hid * 4
                    + b_sub * ho * wo * cp_out * 4)
    live = 2 * (x_blk + o_blk) + wgt_bytes + scratch_bytes + interm_bytes
    phys = _physical_vmem_bytes()
    vmem_limit = int(min(max(live * 5 // 4, 32 << 20), (phys * 9) // 10))

    kernel = functools.partial(
        _inverted_residual_kernel, expand=expand, stride=stride,
        use_shortcut=use_shortcut, pad_l=pad_l, matmul_dtype=matmul_dtype)

    return pl.pallas_call(
        kernel,
        grid=(n // b_sub,),
        in_specs=in_specs,
        out_specs=pl.BlockSpec((b_sub, ho, wo, cp_out),
                               lambda b: (b, 0, 0, 0)),
        out_shape=jax.ShapeDtypeStruct((n, ho, wo, cp_out), out_dtype),
        scratch_shapes=[
            pltpu.VMEM((b_sub, h + 2, w_scr, cp_hid), hidden_dtype)],
        compiler_params=pltpu.CompilerParams(
            dimension_semantics=("parallel",),
            vmem_limit_bytes=vmem_limit),
    )(*args)


def inverted_residual_forward(x_nchw, params, stride, expand_ratio, **kwargs):
    """NCHW in / NCHW out convenience wrapper (PyTorch layout parity). For
    chained blocks prefer inverted_residual_nhwc (no depad / transpose)."""
    n, cin, h, w = x_nchw.shape
    cp_in = _round_up(cin, _LANE)
    cout = params["proj_w"].shape[1]
    x = jnp.transpose(x_nchw, (0, 2, 3, 1))
    x = jnp.pad(x, ((0, 0), (0, 0), (0, 0), (0, cp_in - cin)))
    out = inverted_residual_nhwc(x, params, stride, expand_ratio, **kwargs)
    return jnp.transpose(out[..., :cout], (0, 3, 1, 2))


# ------------------------------- parameters ----------------------------------


def _bn_fold(gamma, beta, mean, var, eps=1e-5):
    scale = gamma / jnp.sqrt(var + eps)
    bias = beta - mean * scale
    return scale.reshape(1, -1), bias.reshape(1, -1)


def init_inverted_residual_params(key, in_ch, out_ch, expand_ratio):
    hidden = in_ch * expand_ratio
    keys = jax.random.split(key, 16)
    p = {}

    def bn_params(k0, k1, k2, k3, c):
        gamma = 0.5 + jax.random.uniform(k0, (c,), jnp.float32)
        beta = 0.1 * jax.random.normal(k1, (c,), jnp.float32)
        mean = 0.1 * jax.random.normal(k2, (c,), jnp.float32)
        var = 0.5 + jax.random.uniform(k3, (c,), jnp.float32)
        return _bn_fold(gamma, beta, mean, var)

    if expand_ratio != 1:
        p["expand_w"] = 0.1 * jax.random.normal(keys[0], (in_ch, hidden),
                                                jnp.float32)
        p["expand_scale"], p["expand_bias"] = bn_params(*keys[1:5], hidden)

    p["dw_w"] = 0.1 * jax.random.normal(keys[5], (3, 3, hidden), jnp.float32)
    p["dw_scale"], p["dw_bias"] = bn_params(*keys[6:10], hidden)

    p["proj_w"] = 0.1 * jax.random.normal(keys[10], (hidden, out_ch),
                                          jnp.float32)
    p["proj_scale"], p["proj_bias"] = bn_params(*keys[11:15], out_ch)
    return p


# ----------------------------- pure-JAX reference ----------------------------


def reference_forward(x_nchw, params, stride, expand_ratio):
    dn = ("NHWC", "HWIO", "NHWC")
    x = jnp.transpose(x_nchw, (0, 2, 3, 1))
    cin = x.shape[-1]
    h = x
    if expand_ratio != 1:
        chid = params["expand_w"].shape[1]
        w1 = params["expand_w"].reshape(1, 1, cin, chid)
        h = lax.conv_general_dilated(h, w1, (1, 1), "VALID",
                                     dimension_numbers=dn)
        h = jnp.clip(h * params["expand_scale"].reshape(1, 1, 1, -1)
                     + params["expand_bias"].reshape(1, 1, 1, -1), 0.0, 6.0)
    else:
        chid = cin
    wd = params["dw_w"].reshape(3, 3, 1, chid)
    h = lax.conv_general_dilated(h, wd, (stride, stride), ((1, 1), (1, 1)),
                                 dimension_numbers=dn,
                                 feature_group_count=chid)
    h = jnp.clip(h * params["dw_scale"].reshape(1, 1, 1, -1)
                 + params["dw_bias"].reshape(1, 1, 1, -1), 0.0, 6.0)
    cout = params["proj_w"].shape[1]
    wp = params["proj_w"].reshape(1, 1, chid, cout)
    h = lax.conv_general_dilated(h, wp, (1, 1), "VALID", dimension_numbers=dn)
    h = h * params["proj_scale"].reshape(1, 1, 1, -1) \
        + params["proj_bias"].reshape(1, 1, 1, -1)
    if stride == 1 and cin == cout:
        h = h + x
    return jnp.transpose(h, (0, 3, 1, 2))


# ----------------------------------- main ------------------------------------

if __name__ == "__main__":
    key = jax.random.PRNGKey(0)

    #            N  Cin  H   W  Cout stride expand
    configs = [(2,  8, 16, 16,   8,    1,     2),   # expand + shortcut
               (2,  8, 16, 16,  16,    2,     6),   # stride-2 depthwise path
               (2, 16, 16, 16,  16,    1,     1)]   # expand_ratio==1 + shortcut

    for i, (N, CIN, H, W, COUT, STRIDE, EXPAND) in enumerate(configs):
        k_x, k_p = jax.random.split(jax.random.fold_in(key, i))
        x = jax.random.normal(k_x, (N, CIN, H, W), jnp.float32)
        params = init_inverted_residual_params(k_p, CIN, COUT, EXPAND)

        out = jax.block_until_ready(
            inverted_residual_forward(x, params, STRIDE, EXPAND))
        ref = jax.block_until_ready(
            reference_forward(x, params, STRIDE, EXPAND))
        # bf16 MXU operands / bf16 hidden scratch with f32 accumulation.
        np.testing.assert_allclose(np.asarray(out), np.asarray(ref),
                                   rtol=5e-2, atol=5e-2)

    print("KERNEL_OK")
</pallas_src>

<mosaic_0001>
module attributes {stable_mosaic.version = 11 : i64} {
  func.func @_inverted_residual_kernel(%arg0: i32, %arg1: memref<2x16x16x128xf32, #tpu.memory_space<vmem>>, %arg2: memref<128x128xbf16, #tpu.memory_space<vmem>>, %arg3: memref<1x128xf32, #tpu.memory_space<vmem>>, %arg4: memref<9x128xf32, #tpu.memory_space<vmem>>, %arg5: memref<1x128xf32, #tpu.memory_space<vmem>>, %arg6: memref<128x128xbf16, #tpu.memory_space<vmem>>, %arg7: memref<1x128xf32, #tpu.memory_space<vmem>>, %arg8: memref<2x16x16x128xf32, #tpu.memory_space<vmem>>, %arg9: memref<2x18x40x128xbf16, #tpu.memory_space<vmem>>) attributes {dimension_semantics = [#tpu.dimension_semantics<parallel>], iteration_bounds = array<i64: 1>, scalar_prefetch = 0 : i64, scratch_operands = 1 : i64, tpu.core_type = #tpu.core_type<tc>, window_params = [{transform_indices = @transform_0, window_bounds = array<i64: 2, 16, 16, 128>}, {pipeline_mode = #tpu.pipeline_mode<synchronous>, transform_indices = @transform_1, window_bounds = array<i64: 128, 128>}, {pipeline_mode = #tpu.pipeline_mode<synchronous>, transform_indices = @transform_2, window_bounds = array<i64: 1, 128>}, {pipeline_mode = #tpu.pipeline_mode<synchronous>, transform_indices = @transform_3, window_bounds = array<i64: 9, 128>}, {pipeline_mode = #tpu.pipeline_mode<synchronous>, transform_indices = @transform_4, window_bounds = array<i64: 1, 128>}, {pipeline_mode = #tpu.pipeline_mode<synchronous>, transform_indices = @transform_5, window_bounds = array<i64: 128, 128>}, {pipeline_mode = #tpu.pipeline_mode<synchronous>, transform_indices = @transform_6, window_bounds = array<i64: 1, 128>}, {transform_indices = @transform_7, window_bounds = array<i64: 2, 16, 16, 128>}]} {
    %c0 = arith.constant 0 : index
    %c0_0 = arith.constant 0 : index
    %c0_1 = arith.constant 0 : index
    %c0_2 = arith.constant 0 : index
    %0 = vector.load %arg1[%c0, %c0_0, %c0_1, %c0_2] : memref<2x16x16x128xf32, #tpu.memory_space<vmem>>, vector<2x16x16x128xf32>
    %1 = vector.shape_cast %0 : vector<2x16x16x128xf32> to vector<512x128xf32>
    %2 = arith.truncf %1 : vector<512x128xf32> to vector<512x128xbf16>
    %c0_3 = arith.constant 0 : index
    %c0_4 = arith.constant 0 : index
    %3 = vector.load %arg2[%c0_3, %c0_4] : memref<128x128xbf16, #tpu.memory_space<vmem>>, vector<128x128xbf16>
    %cst = arith.constant dense<0.000000e+00> : vector<512x128xf32>
    %4 = tpu.matmul %2, %3, %cst {dimension_numbers = #tpu.dot_dimension_numbers<[1], [0], [0], [1], [0, 0, 1, 1], [], []>} : vector<512x128xbf16>, vector<128x128xbf16>, vector<512x128xf32> -> vector<512x128xf32>
    %c0_5 = arith.constant 0 : index
    %c0_6 = arith.constant 0 : index
    %5 = vector.load %arg3[%c0_5, %c0_6] : memref<1x128xf32, #tpu.memory_space<vmem>>, vector<1x128xf32>
    %6 = vector.broadcast %5 : vector<1x128xf32> to vector<512x128xf32>
    %7 = arith.addf %4, %6 : vector<512x128xf32>
    %cst_7 = arith.constant 0.000000e+00 : f32
    %cst_8 = arith.constant 6.000000e+00 : f32
    %8 = vector.broadcast %cst_7 : f32 to vector<512x128xf32>
    %9 = arith.maximumf %8, %7 : vector<512x128xf32>
    %10 = vector.broadcast %cst_8 : f32 to vector<512x128xf32>
    %11 = arith.minimumf %10, %9 : vector<512x128xf32>
    %12 = vector.shape_cast %11 : vector<512x128xf32> to vector<2x16x16x128xf32>
    %13 = arith.truncf %12 : vector<2x16x16x128xf32> to vector<2x16x16x128xbf16>
    %c0_9 = arith.constant 0 : index
    %c1 = arith.constant 1 : index
    %c16 = arith.constant 16 : index
    %c0_10 = arith.constant 0 : index
    %14 = vector.load %arg9[%c0_9, %c1, %c16, %c0_10] : memref<2x18x40x128xbf16, #tpu.memory_space<vmem>>, vector<2x16x16x128xbf16>
    tpu.vector_store %arg9[%c0_9, %c1, %c16, %c0_10], %13 {strides = array<i32>} : memref<2x18x40x128xbf16, #tpu.memory_space<vmem>>, vector<2x16x16x128xbf16>,
    %cst_11 = arith.constant 0.000000e+00 : bf16
    %15 = vector.broadcast %cst_11 : bf16 to vector<2x1x18x128xbf16>
    %c0_12 = arith.constant 0 : index
    %c0_13 = arith.constant 0 : index
    %c15 = arith.constant 15 : index
    %c0_14 = arith.constant 0 : index
    %16 = vector.load %arg9[%c0_12, %c0_13, %c15, %c0_14] : memref<2x18x40x128xbf16, #tpu.memory_space<vmem>>, vector<2x1x18x128xbf16>
    tpu.vector_store %arg9[%c0_12, %c0_13, %c15, %c0_14], %15 {strides = array<i32>} : memref<2x18x40x128xbf16, #tpu.memory_space<vmem>>, vector<2x1x18x128xbf16>,
    %c0_15 = arith.constant 0 : index
    %c17 = arith.constant 17 : index
    %c15_16 = arith.constant 15 : index
    %c0_17 = arith.constant 0 : index
    %17 = vector.load %arg9[%c0_15, %c17, %c15_16, %c0_17] : memref<2x18x40x128xbf16, #tpu.memory_space<vmem>>, vector<2x1x18x128xbf16>
    tpu.vector_store %arg9[%c0_15, %c17, %c15_16, %c0_17], %15 {strides = array<i32>} : memref<2x18x40x128xbf16, #tpu.memory_space<vmem>>, vector<2x1x18x128xbf16>,
    %cst_18 = arith.constant 0.000000e+00 : bf16
    %18 = vector.broadcast %cst_18 : bf16 to vector<2x16x1x128xbf16>
    %c0_19 = arith.constant 0 : index
    %c1_20 = arith.constant 1 : index
    %c15_21 = arith.constant 15 : index
    %c0_22 = arith.constant 0 : index
    %19 = vector.load %arg9[%c0_19, %c1_20, %c15_21, %c0_22] : memref<2x18x40x128xbf16, #tpu.memory_space<vmem>>, vector<2x16x1x128xbf16>
    tpu.vector_store %arg9[%c0_19, %c1_20, %c15_21, %c0_22], %18 {strides = array<i32>} : memref<2x18x40x128xbf16, #tpu.memory_space<vmem>>, vector<2x16x1x128xbf16>,
    %c0_23 = arith.constant 0 : index
    %c1_24 = arith.constant 1 : index
    %c32 = arith.constant 32 : index
    %c0_25 = arith.constant 0 : index
    %20 = vector.load %arg9[%c0_23, %c1_24, %c32, %c0_25] : memref<2x18x40x128xbf16, #tpu.memory_space<vmem>>, vector<2x16x1x128xbf16>
    tpu.vector_store %arg9[%c0_23, %c1_24, %c32, %c0_25], %18 {strides = array<i32>} : memref<2x18x40x128xbf16, #tpu.memory_space<vmem>>, vector<2x16x1x128xbf16>,
    %c0_26 = arith.constant 0 : index
    %c0_27 = arith.constant 0 : index
    %21 = vector.load %arg4[%c0_26, %c0_27] : memref<9x128xf32, #tpu.memory_space<vmem>>, vector<9x128xf32>
    %cst_28 = arith.constant 0.000000e+00 : f32
    %22 = vector.broadcast %cst_28 : f32 to vector<2x16x16x128xf32>
    %c0_29 = arith.constant 0 : index
    %c0_30 = arith.constant 0 : index
    %c15_31 = arith.constant 15 : index
    %c0_32 = arith.constant 0 : index
    %23 = vector.load %arg9[%c0_29, %c0_30, %c15_31, %c0_32] : memref<2x18x40x128xbf16, #tpu.memory_space<vmem>>, vector<2x16x16x128xbf16>
    %24 = arith.extf %23 : vector<2x16x16x128xbf16> to vector<2x16x16x128xf32>
    %25 = vector.extract_strided_slice %21 {offsets = [0, 0], sizes = [1, 128], strides = [1, 1]} : vector<9x128xf32> to vector<1x128xf32>
    %26 = vector.shape_cast %25 : vector<1x128xf32> to vector<128xf32>
    %27 = vector.shape_cast %26 : vector<128xf32> to vector<1x1x1x128xf32>
    %28 = vector.broadcast %27 : vector<1x1x1x128xf32> to vector<2x16x16x128xf32>
    %29 = arith.mulf %24, %28 : vector<2x16x16x128xf32>
    %30 = arith.addf %22, %29 : vector<2x16x16x128xf32>
    %c0_33 = arith.constant 0 : index
    %c0_34 = arith.constant 0 : index
    %c16_35 = arith.constant 16 : index
    %c0_36 = arith.constant 0 : index
    %31 = vector.load %arg9[%c0_33, %c0_34, %c16_35, %c0_36] : memref<2x18x40x128xbf16, #tpu.memory_space<vmem>>, vector<2x16x16x128xbf16>
    %32 = arith.extf %31 : vector<2x16x16x128xbf16> to vector<2x16x16x128xf32>
    %33 = vector.extract_strided_slice %21 {offsets = [1, 0], sizes = [1, 128], strides = [1, 1]} : vector<9x128xf32> to vector<1x128xf32>
    %34 = vector.shape_cast %33 : vector<1x128xf32> to vector<128xf32>
    %35 = vector.shape_cast %34 : vector<128xf32> to vector<1x1x1x128xf32>
    %36 = vector.broadcast %35 : vector<1x1x1x128xf32> to vector<2x16x16x128xf32>
    %37 = arith.mulf %32, %36 : vector<2x16x16x128xf32>
    %38 = arith.addf %30, %37 : vector<2x16x16x128xf32>
    %c0_37 = arith.constant 0 : index
    %c0_38 = arith.constant 0 : index
    %c17_39 = arith.constant 17 : index
    %c0_40 = arith.constant 0 : index
    %39 = vector.load %arg9[%c0_37, %c0_38, %c17_39, %c0_40] : memref<2x18x40x128xbf16, #tpu.memory_space<vmem>>, vector<2x16x16x128xbf16>
    %40 = arith.extf %39 : vector<2x16x16x128xbf16> to vector<2x16x16x128xf32>
    %41 = vector.extract_strided_slice %21 {offsets = [2, 0], sizes = [1, 128], strides = [1, 1]} : vector<9x128xf32> to vector<1x128xf32>
    %42 = vector.shape_cast %41 : vector<1x128xf32> to vector<128xf32>
    %43 = vector.shape_cast %42 : vector<128xf32> to vector<1x1x1x128xf32>
    %44 = vector.broadcast %43 : vector<1x1x1x128xf32> to vector<2x16x16x128xf32>
    %45 = arith.mulf %40, %44 : vector<2x16x16x128xf32>
    %46 = arith.addf %38, %45 : vector<2x16x16x128xf32>
    %c0_41 = arith.constant 0 : index
    %c1_42 = arith.constant 1 : index
    %c15_43 = arith.constant 15 : index
    %c0_44 = arith.constant 0 : index
    %47 = vector.load %arg9[%c0_41, %c1_42, %c15_43, %c0_44] : memref<2x18x40x128xbf16, #tpu.memory_space<vmem>>, vector<2x16x16x128xbf16>
    %48 = arith.extf %47 : vector<2x16x16x128xbf16> to vector<2x16x16x128xf32>
    %49 = vector.extract_strided_slice %21 {offsets = [3, 0], sizes = [1, 128], strides = [1, 1]} : vector<9x128xf32> to vector<1x128xf32>
    %50 = vector.shape_cast %49 : vector<1x128xf32> to vector<128xf32>
    %51 = vector.shape_cast %50 : vector<128xf32> to vector<1x1x1x128xf32>
    %52 = vector.broadcast %51 : vector<1x1x1x128xf32> to vector<2x16x16x128xf32>
    %53 = arith.mulf %48, %52 : vector<2x16x16x128xf32>
    %54 = arith.addf %46, %53 : vector<2x16x16x128xf32>
    %c0_45 = arith.constant 0 : index
    %c1_46 = arith.constant 1 : index
    %c16_47 = arith.constant 16 : index
    %c0_48 = arith.constant 0 : index
    %55 = vector.load %arg9[%c0_45, %c1_46, %c16_47, %c0_48] : memref<2x18x40x128xbf16, #tpu.memory_space<vmem>>, vector<2x16x16x128xbf16>
    %56 = arith.extf %55 : vector<2x16x16x128xbf16> to vector<2x16x16x128xf32>
    %57 = vector.extract_strided_slice %21 {offsets = [4, 0], sizes = [1, 128], strides = [1, 1]} : vector<9x128xf32> to vector<1x128xf32>
    %58 = vector.shape_cast %57 : vector<1x128xf32> to vector<128xf32>
    %59 = vector.shape_cast %58 : vector<128xf32> to vector<1x1x1x128xf32>
    %60 = vector.broadcast %59 : vector<1x1x1x128xf32> to vector<2x16x16x128xf32>
    %61 = arith.mulf %56, %60 : vector<2x16x16x128xf32>
    %62 = arith.addf %54, %61 : vector<2x16x16x128xf32>
    %c0_49 = arith.constant 0 : index
    %c1_50 = arith.constant 1 : index
    %c17_51 = arith.constant 17 : index
    %c0_52 = arith.constant 0 : index
    %63 = vector.load %arg9[%c0_49, %c1_50, %c17_51, %c0_52] : memref<2x18x40x128xbf16, #tpu.memory_space<vmem>>, vector<2x16x16x128xbf16>
    %64 = arith.extf %63 : vector<2x16x16x128xbf16> to vector<2x16x16x128xf32>
    %65 = vector.extract_strided_slice %21 {offsets = [5, 0], sizes = [1, 128], strides = [1, 1]} : vector<9x128xf32> to vector<1x128xf32>
    %66 = vector.shape_cast %65 : vector<1x128xf32> to vector<128xf32>
    %67 = vector.shape_cast %66 : vector<128xf32> to vector<1x1x1x128xf32>
    %68 = vector.broadcast %67 : vector<1x1x1x128xf32> to vector<2x16x16x128xf32>
    %69 = arith.mulf %64, %68 : vector<2x16x16x128xf32>
    %70 = arith.addf %62, %69 : vector<2x16x16x128xf32>
    %c0_53 = arith.constant 0 : index
    %c2 = arith.constant 2 : index
    %c15_54 = arith.constant 15 : index
    %c0_55 = arith.constant 0 : index
    %71 = vector.load %arg9[%c0_53, %c2, %c15_54, %c0_55] : memref<2x18x40x128xbf16, #tpu.memory_space<vmem>>, vector<2x16x16x128xbf16>
    %72 = arith.extf %71 : vector<2x16x16x128xbf16> to vector<2x16x16x128xf32>
    %73 = vector.extract_strided_slice %21 {offsets = [6, 0], sizes = [1, 128], strides = [1, 1]} : vector<9x128xf32> to vector<1x128xf32>
    %74 = vector.shape_cast %73 : vector<1x128xf32> to vector<128xf32>
    %75 = vector.shape_cast %74 : vector<128xf32> to vector<1x1x1x128xf32>
    %76 = vector.broadcast %75 : vector<1x1x1x128xf32> to vector<2x16x16x128xf32>
    %77 = arith.mulf %72, %76 : vector<2x16x16x128xf32>
    %78 = arith.addf %70, %77 : vector<2x16x16x128xf32>
    %c0_56 = arith.constant 0 : index
    %c2_57 = arith.constant 2 : index
    %c16_58 = arith.constant 16 : index
    %c0_59 = arith.constant 0 : index
    %79 = vector.load %arg9[%c0_56, %c2_57, %c16_58, %c0_59] : memref<2x18x40x128xbf16, #tpu.memory_space<vmem>>, vector<2x16x16x128xbf16>
    %80 = arith.extf %79 : vector<2x16x16x128xbf16> to vector<2x16x16x128xf32>
    %81 = vector.extract_strided_slice %21 {offsets = [7, 0], sizes = [1, 128], strides = [1, 1]} : vector<9x128xf32> to vector<1x128xf32>
    %82 = vector.shape_cast %81 : vector<1x128xf32> to vector<128xf32>
    %83 = vector.shape_cast %82 : vector<128xf32> to vector<1x1x1x128xf32>
    %84 = vector.broadcast %83 : vector<1x1x1x128xf32> to vector<2x16x16x128xf32>
    %85 = arith.mulf %80, %84 : vector<2x16x16x128xf32>
    %86 = arith.addf %78, %85 : vector<2x16x16x128xf32>
    %c0_60 = arith.constant 0 : index
    %c2_61 = arith.constant 2 : index
    %c17_62 = arith.constant 17 : index
    %c0_63 = arith.constant 0 : index
    %87 = vector.load %arg9[%c0_60, %c2_61, %c17_62, %c0_63] : memref<2x18x40x128xbf16, #tpu.memory_space<vmem>>, vector<2x16x16x128xbf16>
    %88 = arith.extf %87 : vector<2x16x16x128xbf16> to vector<2x16x16x128xf32>
    %89 = vector.extract_strided_slice %21 {offsets = [8, 0], sizes = [1, 128], strides = [1, 1]} : vector<9x128xf32> to vector<1x128xf32>
    %90 = vector.shape_cast %89 : vector<1x128xf32> to vector<128xf32>
    %91 = vector.shape_cast %90 : vector<128xf32> to vector<1x1x1x128xf32>
    %92 = vector.broadcast %91 : vector<1x1x1x128xf32> to vector<2x16x16x128xf32>
    %93 = arith.mulf %88, %92 : vector<2x16x16x128xf32>
    %94 = arith.addf %86, %93 : vector<2x16x16x128xf32>
    %c0_64 = arith.constant 0 : index
    %c0_65 = arith.constant 0 : index
    %95 = vector.load %arg5[%c0_64, %c0_65] : memref<1x128xf32, #tpu.memory_space<vmem>>, vector<1x128xf32>
    %96 = vector.shape_cast %95 : vector<1x128xf32> to vector<1x1x1x128xf32>
    %97 = vector.broadcast %96 : vector<1x1x1x128xf32> to vector<2x16x16x128xf32>
    %98 = arith.addf %94, %97 : vector<2x16x16x128xf32>
    %cst_66 = arith.constant 0.000000e+00 : f32
    %cst_67 = arith.constant 6.000000e+00 : f32
    %99 = vector.broadcast %cst_66 : f32 to vector<2x16x16x128xf32>
    %100 = arith.maximumf %99, %98 : vector<2x16x16x128xf32>
    %101 = vector.broadcast %cst_67 : f32 to vector<2x16x16x128xf32>
    %102 = arith.minimumf %101, %100 : vector<2x16x16x128xf32>
    %103 = vector.shape_cast %102 : vector<2x16x16x128xf32> to vector<512x128xf32>
    %104 = arith.truncf %103 : vector<512x128xf32> to vector<512x128xbf16>
    %c0_68 = arith.constant 0 : index
    %c0_69 = arith.constant 0 : index
    %105 = vector.load %arg6[%c0_68, %c0_69] : memref<128x128xbf16, #tpu.memory_space<vmem>>, vector<128x128xbf16>
    %cst_70 = arith.constant dense<0.000000e+00> : vector<512x128xf32>
    %106 = tpu.matmul %104, %105, %cst_70 {dimension_numbers = #tpu.dot_dimension_numbers<[1], [0], [0], [1], [0, 0, 1, 1], [], []>} : vector<512x128xbf16>, vector<128x128xbf16>, vector<512x128xf32> -> vector<512x128xf32>
    %c0_71 = arith.constant 0 : index
    %c0_72 = arith.constant 0 : index
    %107 = vector.load %arg7[%c0_71, %c0_72] : memref<1x128xf32, #tpu.memory_space<vmem>>, vector<1x128xf32>
    %108 = vector.broadcast %107 : vector<1x128xf32> to vector<512x128xf32>
    %109 = arith.addf %106, %108 : vector<512x128xf32>
    %110 = arith.addf %109, %1 : vector<512x128xf32>
    %111 = vector.shape_cast %110 : vector<512x128xf32> to vector<2x16x16x128xf32>
    %c0_73 = arith.constant 0 : index
    %c0_74 = arith.constant 0 : index
    %c0_75 = arith.constant 0 : index
    %c0_76 = arith.constant 0 : index
    %112 = vector.load %arg8[%c0_73, %c0_74, %c0_75, %c0_76] : memref<2x16x16x128xf32, #tpu.memory_space<vmem>>, vector<2x16x16x128xf32>
    tpu.vector_store %arg8[%c0_73, %c0_74, %c0_75, %c0_76], %111 {strides = array<i32>} : memref<2x16x16x128xf32, #tpu.memory_space<vmem>>, vector<2x16x16x128xf32>,
    return
  }
  func.func @transform_0(%arg0: i32) -> (i32, i32, i32, i32) {
    %c0_i32 = arith.constant 0 : i32
    %c0_i32_0 = arith.constant 0 : i32
    %c0_i32_1 = arith.constant 0 : i32
    %c0_i32_2 = arith.constant 0 : i32
    return %arg0, %c0_i32, %c0_i32_0, %c0_i32_1 : i32, i32, i32, i32
  }
  func.func @transform_1(%arg0: i32) -> (i32, i32) {
    %c0_i32 = arith.constant 0 : i32
    %c0_i32_0 = arith.constant 0 : i32
    %c0_i32_1 = arith.constant 0 : i32
    return %c0_i32, %c0_i32_0 : i32, i32
  }
  func.func @transform_2(%arg0: i32) -> (i32, i32) {
    %c0_i32 = arith.constant 0 : i32
    %c0_i32_0 = arith.constant 0 : i32
    %c0_i32_1 = arith.constant 0 : i32
    return %c0_i32, %c0_i32_0 : i32, i32
  }
  func.func @transform_3(%arg0: i32) -> (i32, i32) {
    %c0_i32 = arith.constant 0 : i32
    %c0_i32_0 = arith.constant 0 : i32
    %c0_i32_1 = arith.constant 0 : i32
    return %c0_i32, %c0_i32_0 : i32, i32
  }
  func.func @transform_4(%arg0: i32) -> (i32, i32) {
    %c0_i32 = arith.constant 0 : i32
    %c0_i32_0 = arith.constant 0 : i32
    %c0_i32_1 = arith.constant 0 : i32
    return %c0_i32, %c0_i32_0 : i32, i32
  }
  func.func @transform_5(%arg0: i32) -> (i32, i32) {
    %c0_i32 = arith.constant 0 : i32
    %c0_i32_0 = arith.constant 0 : i32
    %c0_i32_1 = arith.constant 0 : i32
    return %c0_i32, %c0_i32_0 : i32, i32
  }
  func.func @transform_6(%arg0: i32) -> (i32, i32) {
    %c0_i32 = arith.constant 0 : i32
    %c0_i32_0 = arith.constant 0 : i32
    %c0_i32_1 = arith.constant 0 : i32
    return %c0_i32, %c0_i32_0 : i32, i32
  }
  func.func @transform_7(%arg0: i32) -> (i32, i32, i32, i32) {
    %c0_i32 = arith.constant 0 : i32
    %c0_i32_0 = arith.constant 0 : i32
    %c0_i32_1 = arith.constant 0 : i32
    %c0_i32_2 = arith.constant 0 : i32
    return %arg0, %c0_i32, %c0_i32_0, %c0_i32_1 : i32, i32, i32, i32
  }
}

</mosaic_0001>

<bundles_post_ra>
// kernel: tpu_custom_call.1
= control target key start
LH: loop header
LB: loop body
LE: loop exit
PB: predicated region body
PF: predicated region fallthrough
CT: control target
= control target key end

     0   :  { %12 = vsyncpa [#allocation4], 0  ;;  %s10116_s0 = inlined_call_operand.hbm [shape: f32[2,16,16,128], index: 0, kind: input, shape index: {}]   ;;  %s10117_s1 = inlined_call_operand.hbm [shape: bf16[128,128], index: 1, kind: input, shape index: {}]   ;;  %s10118_s2 = inlined_call_operand.vmem [shape: f32[1,128], index: 2, kind: input, shape index: {}]   ;;  %s10119_s3 = inlined_call_operand.hbm [shape: f32[9,128], index: 3, kind: input, shape index: {}]   ;;  %s10120_s4 = inlined_call_operand.vmem [shape: f32[1,128], index: 4, kind: input, shape index: {}]   ;;  %s10121_s5 = inlined_call_operand.hbm [shape: bf16[128,128], index: 5, kind: input, shape index: {}]   ;;  %s10122_s6 = inlined_call_operand.vmem [shape: f32[1,128], index: 6, kind: input, shape index: {}]   ;;  %s10123_s7 = inlined_call_operand.hbm [shape: f32[2,16,16,128], index: 7, kind: output, shape index: {}]  }
   0x1   :  { %13 = vsyncpa [#allocation7], 0 }
   0x2   :  { %14 = vsyncpa [#allocation10], 0 }
   0x3   :  { %15 = vsyncpa [#allocation5], 0  ;;  %s7587_s24 = smov [#allocation6]   ;;  %s7469_s28 = scalar_lea.hbm %s10117_s1, 1024 }
   0x4   :  { %s33_s25 = sshll.u32 %s7587_s24, 4  ;;  %p7470_p0 = scmp.ne.s32.totalorder %s10117_s1, %s7469_s28  ;;  %s34_s25 = int_to_ptr.vmem [resolvable:$true] %s33_s25 }
   0x5   :  { %p7473_p1 = scmp.lt.u32.totalorder %s7469_s28, %s10117_s1 }
   0x7   :  { %p7475_p2 = pnand %p7473_p1, %p7470_p0 }
   0x9   :  { %7478 = shalt.err (!%p7475_p2)
}
   0xa   :  { %s7479_s10 = scalar_lea.vmem %s34_s25, 1024  ;;  %p7484_p4 = scmp.lt.s32.totalorder %s34_s25, %s34_s25 }
   0xb   :  { %p7480_p3 = scmp.ne.s32.totalorder %s34_s25, %s7479_s10  ;;  %p7485_p5 = scmp.lt.s32.totalorder %s7479_s10, %s7479_s10 }
   0xd   :  { %p7486_p6 = por %p7485_p5, %p7484_p4 }
   0xf   :  { %p7487_p7 = pnand %p7486_p6, %p7480_p3 }
  0x11   :  { %7490 = shalt.err (!%p7487_p7)
}
  0x12   :  { %s7588_s11 = smov 64   ;;  %s7589_s12 = smov 4  }
  0x13   :  { %39 = dma.hbm_to_vmem [thread:$0]  %s10117_s1, 1024, %s34_s25, [#allocation7], %s7588_s11, %s7588_s11, %s7589_s12  }
  0x14   :  { %s7590_s15 = smov [#allocation3]   ;;  %s7491_s19 = scalar_lea.hbm %s10116_s0, 8192 }
  0x15   :  { %s21_s16 = sshll.u32 %s7590_s15, 4  ;;  %p7492_p8 = scmp.ne.s32.totalorder %s10116_s0, %s7491_s19  ;;  %s22_s16 = int_to_ptr.vmem [resolvable:$true] %s21_s16 }
  0x16   :  { %p7495_p9 = scmp.lt.u32.totalorder %s7491_s19, %s10116_s0 }
  0x18   :  { %p7497_p10 = pnand %p7495_p9, %p7492_p8 }
  0x1a   :  { %7500 = shalt.err (!%p7497_p10)
}
  0x1b   :  { %s7501_s24 = scalar_lea.vmem %s22_s16, 8192  ;;  %p7506_p12 = scmp.lt.s32.totalorder %s22_s16, %s22_s16 }
  0x1c   :  { %p7502_p11 = scmp.ne.s32.totalorder %s22_s16, %s7501_s24  ;;  %p7507_p13 = scmp.lt.s32.totalorder %s7501_s24, %s7501_s24 }
  0x1e   :  { %p7508_p0 = por %p7507_p13, %p7506_p12 }
  0x20   :  { %p7509_p1 = pnand %p7508_p0, %p7502_p11 }
  0x22   :  { %7512 = shalt.err (!%p7509_p1)
}
  0x23   :  { %s7591_s1 = smov 128   ;;  %s7592_s25 = smov 8  }
  0x24   :  { %27 = dma.hbm_to_vmem [thread:$0]  %s10116_s0, 8192, %s22_s16, [#allocation4], %s7591_s1, %s7591_s1, %s7592_s25  }
  0x25   :  { %s7593_s28 = smov [#allocation8]   ;;  %s7594_s30 = smov [#allocation9]  }
  0x26   :  { %s47_s29 = sshll.u32 %s7593_s28, 4  ;;  %s61_s8 = sshll.u32 %s7594_s30, 4  ;;  %s48_s29 = int_to_ptr.vmem [resolvable:$true] %s47_s29  ;;  %s7667_s8 = int_to_ptr.vmem [resolvable:$true] %s61_s8 }
  0x27   :  { %s7513_s13 = scalar_lea.hbm %s10119_s3, 256 }
  0x28   :  { %p7514_p2 = scmp.ne.s32.totalorder %s10119_s3, %s7513_s13  ;;  %p7517_p3 = scmp.lt.u32.totalorder %s7513_s13, %s10119_s3 }
  0x2a   :  { %p7519_p4 = pnand %p7517_p3, %p7514_p2 }
  0x2c   :  { %7522 = shalt.err (!%p7519_p4)
}
  0x2d   :  { %s7523_s0 = scalar_lea.vmem %s48_s29, 256  ;;  %p7528_p6 = scmp.lt.s32.totalorder %s48_s29, %s48_s29 }
  0x2e   :  { %p7524_p5 = scmp.ne.s32.totalorder %s48_s29, %s7523_s0  ;;  %p7529_p7 = scmp.lt.s32.totalorder %s7523_s0, %s7523_s0 }
  0x30   :  { %p7530_p8 = por %p7529_p7, %p7528_p6 }
  0x32   :  { %p7531_p9 = pnand %p7530_p8, %p7524_p5 }
  0x34   :  { %7534 = shalt.err (!%p7531_p9)
}
  0x35   :  { %53 = dma.hbm_to_vmem [thread:$0]  %s10119_s3, 256, %s48_s29, [#allocation7], %s7591_s1, %s7591_s1, %s7592_s25  }
  0x36   :  { %s7535_s22 = scalar_lea.hbm %s10121_s5, 1024 }
  0x37   :  { %p7536_p10 = scmp.ne.s32.totalorder %s10121_s5, %s7535_s22  ;;  %p7539_p11 = scmp.lt.u32.totalorder %s7535_s22, %s10121_s5 }
  0x39   :  { %p7541_p12 = pnand %p7539_p11, %p7536_p10 }
  0x3b   :  { %7544 = shalt.err (!%p7541_p12)
}
  0x3c   :  { %s7545_s28 = scalar_lea.vmem %s7667_s8, 1024  ;;  %p7550_p0 = scmp.lt.s32.totalorder %s7667_s8, %s7667_s8 }
  0x3d   :  { %p7546_p13 = scmp.ne.s32.totalorder %s7667_s8, %s7545_s28  ;;  %p7551_p1 = scmp.lt.s32.totalorder %s7545_s28, %s7545_s28 }
  0x3f   :  { %p7552_p2 = por %p7551_p1, %p7550_p0 }
  0x41   :  { %p7553_p3 = pnand %p7552_p2, %p7546_p13 }
  0x43   :  { %7556 = shalt.err (!%p7553_p3)
}
  0x44   :  { %67 = dma.hbm_to_vmem [thread:$0]  %s10121_s5, 1024, %s7667_s8, [#allocation10], %s7588_s11, %s7588_s11, %s7589_s12  }
  0x45   :  { %7579 = dma.done.wait [#allocation4], 8192  }
  0x46   :  { %7580 = vsyncadd [#allocation4], 4294959104 }
  0x47   :  { %7581 = dma.done.wait [#allocation7], 1280  }
  0x48   :  { %7582 = vsyncadd [#allocation7], 4294966016 }
  0x49   :  { %7583 = dma.done.wait [#allocation10], 1024  }
  0x4a   :  { %7584 = vsyncadd [#allocation10], 4294966272  ;;  %v7373_v0 = vld [vmem:[#allocation6] sm:$0xff]   ;;  %v7374_v1 = vld [vmem:[#allocation6 + $0x8] sm:$0xff]   ;;  %vm996_vm0 = vcmask 1040384   ;;  %vm988_vm3 = vcmask 1043459  }
  0x4b   :  { %7203 = vmatprep.subr.bf16.mxu0 %v7373_v0  ;;  %v7375_v2 = vld [vmem:[#allocation6 + $0x10] sm:$0xff]   ;;  %v7376_v3 = vld [vmem:[#allocation6 + $0x18] sm:$0xff]   ;;  %v83_v4 = vld [vmem:[#allocation3] sm:$0xff]  ;;  %vm997_vm1 = vsmask.f32 256  ;;  %vm1741_vm6 = vcmask 1046528  }
  0x4c   :  { %7204 = vmatpush3.bf16.msra.mxu0 %v7373_v0  ;;  %v84_v5 = vld [vmem:[#allocation3 + $0x8] sm:$0xff]  ;;  %v7377_v7 = vld [vmem:[#allocation6 + $0x20] sm:$0xff]   ;;  %v7379_v9 = vld [vmem:[#allocation6 + $0x30] sm:$0xff]   ;;  %vm989_vm4 = vsmask.f32 7950  ;;  %vm2290_vm7 = vcmask 1045504  }
  0x4d   :  { %7205 = vmatprep.subr.bf16.mxu0 %v7374_v1  ;;  %v147_v6 = vpack.c.bf16 %v84_v5, %v83_v4  ;;  %v7378_v8 = vld [vmem:[#allocation6 + $0x28] sm:$0xff]   ;;  %v7380_v10 = vld [vmem:[#allocation6 + $0x38] sm:$0xff]   ;;  %v85_v11 = vld [vmem:[#allocation3 + $0x10] sm:$0xff] }
  0x4e   :  { %v86_v12 = vld [vmem:[#allocation3 + $0x18] sm:$0xff]  ;;  %v87_v13 = vld [vmem:[#allocation3 + $0x20] sm:$0xff]  ;;  %v88_v14 = vld [vmem:[#allocation3 + $0x28] sm:$0xff] }
  0x4f   :  { %7219 = vmatprep.mubr.bf16.mxu0 %v147_v6  ;;  %v148_v15 = vpack.c.bf16 %v86_v12, %v85_v11  ;;  %v149_v16 = vpack.c.bf16 %v88_v14, %v87_v13  ;;  %v89_v17 = vld [vmem:[#allocation3 + $0x30] sm:$0xff]  ;;  %v90_v18 = vld [vmem:[#allocation3 + $0x38] sm:$0xff]  ;;  %v91_v19 = vld [vmem:[#allocation3 + $0x40] sm:$0xff] }
  0x50   :  { %7206 = vmatpush3.bf16.msra.mxu0 %v7374_v1  ;;  %v92_v20 = vld [vmem:[#allocation3 + $0x48] sm:$0xff]  ;;  %v150_v21 = vpack.c.bf16 %v90_v18, %v89_v17  ;;  %v93_v23 = vld [vmem:[#allocation3 + $0x50] sm:$0xff]  ;;  %v94_v24 = vld [vmem:[#allocation3 + $0x58] sm:$0xff]  ;;  %v10139_v18 = vmov 0 }
  0x51   :  { %7207 = vmatprep.subr.bf16.mxu0 %v7375_v2  ;;  %v151_v22 = vpack.c.bf16 %v92_v20, %v91_v19  ;;  %v95_v25 = vld [vmem:[#allocation3 + $0x60] sm:$0xff]  ;;  %v96_v26 = vld [vmem:[#allocation3 + $0x68] sm:$0xff]  ;;  %v152_v27 = vpack.c.bf16 %v94_v24, %v93_v23  ;;  %v97_v29 = vld [vmem:[#allocation3 + $0x70] sm:$0xff] }
  0x52   :  { %v153_v28 = vpack.c.bf16 %v96_v26, %v95_v25  ;;  %v98_v30 = vld [vmem:[#allocation3 + $0x78] sm:$0xff]  ;;  %v99_v31 = vld [vmem:[#allocation3 + $0x80] sm:$0xff]  ;;  %v100_v32 = vld [vmem:[#allocation3 + $0x88] sm:$0xff]  ;;  %v7595_v25 = vmov 0  }
  0x53   :  { %v154_v33 = vpack.c.bf16 %v98_v30, %v97_v29  ;;  %v155_v34 = vpack.c.bf16 %v100_v32, %v99_v31  ;;  %v101_v35 = vld [vmem:[#allocation3 + $0x90] sm:$0xff]  ;;  %v102_v36 = vld [vmem:[#allocation3 + $0x98] sm:$0xff]  ;;  %v103_v37 = vld [vmem:[#allocation3 + $0xa0] sm:$0xff]  ;;  %994 = vst [vmem:[#allocation2 + $0x8] sm:$0xf] %v7595_v25 }
  0x54   :  { %7208 = vmatpush3.bf16.msra.mxu0 %v7375_v2  ;;  %v104_v38 = vld [vmem:[#allocation3 + $0xa8] sm:$0xff]  ;;  %v156_v39 = vpack.c.bf16 %v102_v36, %v101_v35  ;;  %v105_v41 = vld [vmem:[#allocation3 + $0xb0] sm:$0xff]  ;;  %v106_v42 = vld [vmem:[#allocation3 + $0xb8] sm:$0xff]  ;;  %995 = vst [vmem:[#allocation2 + $0xc] sm:$0xf] %v7595_v25 }
  0x55   :  { %7209 = vmatprep.subr.bf16.mxu0 %v7376_v3  ;;  %v157_v40 = vpack.c.bf16 %v104_v38, %v103_v37  ;;  %v107_v43 = vld [vmem:[#allocation3 + $0xc0] sm:$0xff]  ;;  %v108_v44 = vld [vmem:[#allocation3 + $0xc8] sm:$0xff]  ;;  %v158_v45 = vpack.c.bf16 %v106_v42, %v105_v41  ;;  %v109_v47 = vld [vmem:[#allocation3 + $0xd0] sm:$0xff]  ;;  %1005 = vst [vmem:[#allocation2 + $0x170] sm:$0xf] %v7595_v25 }
  0x56   :  { %v159_v46 = vpack.c.bf16 %v108_v44, %v107_v43  ;;  %v110_v48 = vld [vmem:[#allocation3 + $0xd8] sm:$0xff]  ;;  %v111_v49 = vld [vmem:[#allocation3 + $0xe0] sm:$0xff]  ;;  %v112_v50 = vld [vmem:[#allocation3 + $0xe8] sm:$0xff]  ;;  %1006 = vst [vmem:[#allocation2 + $0x174] sm:$0xf] %v7595_v25 }
  0x57   :  { %v160_v51 = vpack.c.bf16 %v110_v48, %v109_v47  ;;  %v161_v52 = vpack.c.bf16 %v112_v50, %v111_v49  ;;  %v113_v53 = vld [vmem:[#allocation3 + $0xf0] sm:$0xff]  ;;  %v114_v54 = vld [vmem:[#allocation3 + $0xf8] sm:$0xff]  ;;  %v115_v55 = vld [vmem:[#allocation3 + $0x100] sm:$0xff]  ;;  %1014 = vst [vmem:[#allocation2 + $0x15c] sm:$0xf] %v7595_v25 }
  0x58   :  { %7210 = vmatpush3.bf16.msra.mxu0 %v7376_v3  ;;  %v116_v56 = vld [vmem:[#allocation3 + $0x108] sm:$0xff]  ;;  %v162_v57 = vpack.c.bf16 %v114_v54, %v113_v53  ;;  %v117_v59 = vld [vmem:[#allocation3 + $0x110] sm:$0xff]  ;;  %v118_v60 = vld [vmem:[#allocation3 + $0x118] sm:$0xff]  ;;  %1015 = vst [vmem:[#allocation2 + $0x160] sm:$0xf] %v7595_v25 }
  0x59   :  { %7211 = vmatprep.subr.bf16.mxu0 %v7377_v7  ;;  %v163_v58 = vpack.c.bf16 %v116_v56, %v115_v55  ;;  %v119_v61 = vld [vmem:[#allocation3 + $0x120] sm:$0xff]  ;;  %v120_v62 = vld [vmem:[#allocation3 + $0x128] sm:$0xff]  ;;  %v164_v63 = vpack.c.bf16 %v118_v60, %v117_v59  ;;  %v121_v1 = vld [vmem:[#allocation3 + $0x130] sm:$0xff]  ;;  %1022 = vst [vmem:[#allocation2 + $0x2c4] sm:$0xf] %v7595_v25 }
  0x5a   :  { %v165_v0 = vpack.c.bf16 %v120_v62, %v119_v61  ;;  %v122_v2 = vld [vmem:[#allocation3 + $0x138] sm:$0xff]  ;;  %v123_v3 = vld [vmem:[#allocation3 + $0x140] sm:$0xff]  ;;  %v124_v4 = vld [vmem:[#allocation3 + $0x148] sm:$0xff]  ;;  %1023 = vst [vmem:[#allocation2 + $0x2c8] sm:$0xf] %v7595_v25 }
  0x5b   :  { %v166_v5 = vpack.c.bf16 %v122_v2, %v121_v1  ;;  %v167_v6 = vpack.c.bf16 %v124_v4, %v123_v3  ;;  %v129_v13 = vld [vmem:[#allocation3 + $0x170] sm:$0xff]  ;;  %v130_v14 = vld [vmem:[#allocation3 + $0x178] sm:$0xff]  ;;  %vm7705_vm2 = vmand %vm996_vm0, %vm997_vm1 }
  0x5c   :  { %7212 = vmatpush3.bf16.msra.mxu0 %v7377_v7  ;;  %v125_v7 = vld [vmem:[#allocation3 + $0x150] sm:$0xff]  ;;  %v170_v17 = vpack.c.bf16 %v130_v14, %v129_v13  ;;  %v10140_v18 = vsel %vm7705_vm2, 4294967295, %v10139_v18  ;;  %v1126_v19 = vld [vmem:[#allocation2 + $0x38] sm:$0x1]  ;;  %vm7711_vm5 = vmand %vm988_vm3, %vm989_vm4 }
  0x5d   :  { %7213 = vmatprep.subr.bf16.mxu0 %v7378_v8  ;;  %10141 = vst [vmem:[#allocation16_spill] sm:$0xff] %v10140_v18  ;;  %v1030_v23 = vld [vmem:[#allocation2 + $0x2c] sm:$0x8]  ;;  %v999_v26 = vld [vmem:[#allocation2 + $0x10] sm:$0x1]  ;;  %v136_v32 = vld [vmem:[#allocation3 + $0x1a8] sm:$0xff] }
  0x5e   :  { %v1031_v24 = vsel %vm7711_vm5, 0, %v1030_v23  ;;  %v991_v29 = vld [vmem:[#allocation2 + $0x4] sm:$0x8]  ;;  %v1000_v30 = vsel %vm7705_vm2, 0, %v999_v26  ;;  %v135_v31 = vld [vmem:[#allocation3 + $0x1a0] sm:$0xff]  ;;  %v138_v43 = vld [vmem:[#allocation3 + $0x1b8] sm:$0xff] }
  0x5f   :  { %1032 = vst [vmem:[#allocation2 + $0x2c] sm:$0x8] %v1031_v24  ;;  %1001 = vst [vmem:[#allocation2 + $0x10] sm:$0x1] %v1000_v30  ;;  %v173_v35 = vpack.c.bf16 %v136_v32, %v135_v31  ;;  %v1027_v36 = vld [vmem:[#allocation2 + $0x18] sm:$0x8] }
  0x60   :  { %7214 = vmatpush3.bf16.msra.mxu0 %v7378_v8  ;;  %v126_v8 = vld [vmem:[#allocation3 + $0x158] sm:$0xff]  ;;  %v1123_v37 = vld [vmem:[#allocation2 + $0x24] sm:$0x1]  ;;  %v1028_v38 = vsel %vm7711_vm5, 0, %v1027_v36  ;;  %v139_v44 = vld [vmem:[#allocation3 + $0x1c0] sm:$0xff] }
  0x61   :  { %7215 = vmatprep.subr.bf16.mxu0 %v7379_v9  ;;  %v168_v11 = vpack.c.bf16 %v126_v8, %v125_v7  ;;  %1029 = vst [vmem:[#allocation2 + $0x18] sm:$0x8] %v1028_v38  ;;  %v137_v42 = vld [vmem:[#allocation3 + $0x1b0] sm:$0xff]  ;;  %v142_v50 = vld [vmem:[#allocation3 + $0x1d8] sm:$0xff]  ;;  %v7384_v61 = vld [vmem:[#allocation9 + $0x18] sm:$0xff]  }
  0x62   :  { %v7381_v48 = vld [vmem:[#allocation9] sm:$0xff]   ;;  %v1129_v53 = vld [vmem:[#allocation2 + $0x4c] sm:$0x1]  ;;  %v7387_v1 = vld [vmem:[#allocation9 + $0x30] sm:$0xff]  }
  0x63   :  { %v141_v49 = vld [vmem:[#allocation3 + $0x1d0] sm:$0xff]  ;;  %7283 = vmatprep.subr.bf16.mxu1 %v7381_v48  ;;  %v7382_v54 = vld [vmem:[#allocation9 + $0x8] sm:$0xff]   ;;  %v1130_v55 = vsel %vm7705_vm2, 0, %v1129_v53  ;;  %v7388_v2 = vld [vmem:[#allocation9 + $0x38] sm:$0xff]  }
  0x64   :  { %7216 = vmatpush3.bf16.msra.mxu0 %v7379_v9  ;;  %v127_v9 = vld [vmem:[#allocation3 + $0x160] sm:$0xff]  ;;  %7284 = vmatpush3.bf16.msra.mxu1 %v7381_v48  ;;  %v176_v56 = vpack.c.bf16 %v142_v50, %v141_v49  ;;  %1131 = vst [vmem:[#allocation2 + $0x4c] sm:$0x1] %v1130_v55  ;;  %v145_v59 = vld [vmem:[#allocation3 + $0x1f0] sm:$0xff]  ;;  %v146_v60 = vld [vmem:[#allocation3 + $0x1f8] sm:$0xff] }
  0x65   :  { %7217 = vmatprep.subr.bf16.mxu0 %v7380_v10  ;;  %7285 = vmatprep.subr.bf16.mxu1 %v7382_v54  ;;  %v178_v62 = vpack.c.bf16 %v146_v60, %v145_v59  ;;  %v1132_v3 = vld [vmem:[#allocation2 + $0x60] sm:$0x1]  ;;  %v1039_v7 = vld [vmem:[#allocation2 + $0x68] sm:$0x8] }
  0x66   :  { %v1133_v4 = vsel %vm7705_vm2, 0, %v1132_v3  ;;  %v1040_v8 = vsel %vm7711_vm5, 0, %v1039_v7  ;;  %v7075_v13 = vld [vmem:[#allocation2 + $0x8] sm:$0xff]   ;;  %v2030_v25 = vld [vmem:[#allocation2 + $0x10] sm:$0x1] }
  0x67   :  { %1134 = vst [vmem:[#allocation2 + $0x60] sm:$0x1] %v1133_v4  ;;  %1041 = vst [vmem:[#allocation2 + $0x68] sm:$0x8] %v1040_v8  ;;  %v2062_v32 = vunpack.c.l.bf16 %v2030_v25  ;;  %v4064_v4 = vld [vmem:[#allocation2 + $0x2c] sm:$0x8] }
  0x68   :  { %7218 = vmatpush3.bf16.msra.mxu0 %v7380_v10  ;;  %v128_v10 = vld [vmem:[#allocation3 + $0x168] sm:$0xff]  ;;  %7286 = vmatpush3.bf16.msra.mxu1 %v7382_v54 }
  0x69   :  { %v169_v12 = vpack.c.bf16 %v128_v10, %v127_v9  ;;  %v1135_v9 = vld [vmem:[#allocation2 + $0x74] sm:$0x1] }
  0x6a   :  { %v1136_v10 = vsel %vm7705_vm2, 0, %v1135_v9 }
  0x6b   :  { %7220 = vmatmul.mubr.bf16.vlgmr.msra.gmra.mrb[0].mxu0 %v148_v15  ;;  %v131_v15 = vld [vmem:[#allocation3 + $0x180] sm:$0xff]  ;;  %1137 = vst [vmem:[#allocation2 + $0x74] sm:$0x1] %v1136_v10  ;;  %v4873_v10 = vld [vmem:[#allocation2 + $0x4c] sm:$0x1] }
  0x6c   :  { %7223 = vmatprep.mubr.bf16.mxu0 %v149_v16  ;;  %v132_v16 = vld [vmem:[#allocation3 + $0x188] sm:$0xff] }
  0x6d   :  { %v171_v20 = vpack.c.bf16 %v132_v16, %v131_v15  ;;  %v7740_v15 = vld [vmem:[#allocation8] sm:$0xff]  ;;  %v1138_v16 = vld [vmem:[#allocation2 + $0x88] sm:$0x1] }
  0x73   :  { %7224 = vmatmul.mubr.bf16.gmra.mrb[4].mxu0 %v150_v21  ;;  %v1127_v21 = vsel %vm7705_vm2, 0, %v1126_v19  ;;  %v6870_v19 = vunpack.c.h.bf16 %v7075_v13 }
  0x74   :  { %7227 = vmatprep.mubr.bf16.mxu0 %v151_v22  ;;  %v10142_v22 = vmov 0  ;;  %1128 = vst [vmem:[#allocation2 + $0x38] sm:$0x1] %v1127_v21  ;;  %v1042_v21 = vld [vmem:[#allocation2 + $0x7c] sm:$0x8] }
  0x75   :  { %v10143_v22 = vsel %vm7711_vm5, 4294967295, %v10142_v22 }
  0x76   :  { %10144 = vst [vmem:[#allocation17_spill] sm:$0xff] %v10143_v22 }
  0x7b   :  { %7228 = vmatmul.mubr.bf16.gmra.mrb[8].mxu0 %v152_v27  ;;  %v133_v27 = vld [vmem:[#allocation3 + $0x190] sm:$0xff] }
  0x7c   :  { %7231 = vmatprep.mubr.bf16.mxu0 %v153_v28  ;;  %v134_v28 = vld [vmem:[#allocation3 + $0x198] sm:$0xff] }
  0x83   :  { %7232 = vmatmul.mubr.bf16.gmra.mrb[12].mxu0 %v154_v33  ;;  %v992_v33 = vsel %vm7711_vm5, 0, %v991_v29 }
  0x84   :  { %7235 = vmatprep.mubr.bf16.mxu0 %v155_v34  ;;  %993 = vst [vmem:[#allocation2 + $0x4] sm:$0x8] %v992_v33  ;;  %v172_v34 = vpack.c.bf16 %v134_v28, %v133_v27  ;;  %v1043_v27 = vsel %vm7711_vm5, 0, %v1042_v21 }
  0x85   :  { %1044 = vst [vmem:[#allocation2 + $0x7c] sm:$0x8] %v1043_v27 }
  0x8b   :  { %7236 = vmatmul.mubr.bf16.gmra.mrb[16].mxu0 %v156_v39  ;;  %v1124_v39 = vsel %vm7705_vm2, 0, %v1123_v37  ;;  %v1221_v23 = vld [vmem:[#allocation2 + $0x4] sm:$0x8] }
  0x8c   :  { %7239 = vmatprep.mubr.bf16.mxu0 %v157_v40  ;;  %1125 = vst [vmem:[#allocation2 + $0x24] sm:$0x1] %v1124_v39  ;;  %v1033_v40 = vld [vmem:[#allocation2 + $0x40] sm:$0x8]  ;;  %v1317_v31 = vunpack.c.l.bf16 %v1221_v23 }
  0x8d   :  { %v1034_v41 = vsel %vm7711_vm5, 0, %v1033_v40 }
  0x8e   :  { %1035 = vst [vmem:[#allocation2 + $0x40] sm:$0x8] %v1034_v41  ;;  %v2643_v41 = vld [vmem:[#allocation2 + $0x18] sm:$0x8] }
  0x8f   :  { %v2739_v54 = vunpack.c.l.bf16 %v2643_v41 }
  0x93   :  { %7240 = vmatmul.mubr.bf16.gmra.mrb[20].mxu0 %v158_v45  ;;  %v140_v45 = vld [vmem:[#allocation3 + $0x1c8] sm:$0xff] }
  0x94   :  { %7243 = vmatprep.mubr.bf16.mxu0 %v159_v46  ;;  %v174_v46 = vpack.c.bf16 %v138_v43, %v137_v42  ;;  %v175_v47 = vpack.c.bf16 %v140_v45, %v139_v44  ;;  %v4872_v43 = vld [vmem:[#allocation2 + $0x38] sm:$0x1]  ;;  %v3451_v45 = vld [vmem:[#allocation2 + $0x24] sm:$0x1] }
  0x95   :  { %v4904_v55 = vunpack.c.l.bf16 %v4872_v43 }
  0x9b   :  { %7244 = vmatmul.mubr.bf16.gmra.mrb[24].mxu0 %v160_v51  ;;  %v143_v51 = vld [vmem:[#allocation3 + $0x1e0] sm:$0xff] }
  0x9c   :  { %7247 = vmatprep.mubr.bf16.mxu0 %v161_v52  ;;  %v144_v52 = vld [vmem:[#allocation3 + $0x1e8] sm:$0xff] }
  0xa3   :  { %7248 = vmatmul.mubr.bf16.gmra.mrb[28].mxu0 %v162_v57  ;;  %v177_v57 = vpack.c.bf16 %v144_v52, %v143_v51 }
  0xa4   :  { %7251 = vmatprep.mubr.bf16.mxu0 %v163_v58  ;;  %v7383_v58 = vld [vmem:[#allocation9 + $0x10] sm:$0xff]  }
  0xa5   :  { %7287 = vmatprep.subr.bf16.mxu1 %v7383_v58 }
  0xa6   :  { %7288 = vmatpush3.bf16.msra.mxu1 %v7383_v58  ;;  %v3483_v58 = vunpack.c.l.bf16 %v3451_v45 }
  0xa7   :  { %7289 = vmatprep.subr.bf16.mxu1 %v7384_v61 }
  0xaa   :  { %7290 = vmatpush3.bf16.msra.mxu1 %v7384_v61 }
  0xab   :  { %7252 = vmatmul.mubr.bf16.gmra.mrb[32].mxu0 %v164_v63  ;;  %v7385_v63 = vld [vmem:[#allocation9 + $0x20] sm:$0xff]  }
  0xac   :  { %7255 = vmatprep.mubr.bf16.mxu0 %v165_v0  ;;  %7291 = vmatprep.subr.bf16.mxu1 %v7385_v63  ;;  %v7386_v0 = vld [vmem:[#allocation9 + $0x28] sm:$0xff]  }
  0xae   :  { %7292 = vmatpush3.bf16.msra.mxu1 %v7385_v63  ;;  %v3452_v63 = vld [vmem:[#allocation2 + $0x38] sm:$0x1] }
  0xaf   :  { %7293 = vmatprep.subr.bf16.mxu1 %v7386_v0 }
  0xb2   :  { %7294 = vmatpush3.bf16.msra.mxu1 %v7386_v0 }
  0xb3   :  { %7256 = vmatmul.mubr.bf16.gmra.mrb[36].mxu0 %v166_v5  ;;  %7295 = vmatprep.subr.bf16.mxu1 %v7387_v1  ;;  %v1036_v5 = vld [vmem:[#allocation2 + $0x54] sm:$0x8] }
  0xb4   :  { %7259 = vmatprep.mubr.bf16.mxu0 %v167_v6  ;;  %v1037_v6 = vsel %vm7711_vm5, 0, %v1036_v5  ;;  %v1224_v5 = vld [vmem:[#allocation2 + $0x18] sm:$0x8] }
  0xb5   :  { %1038 = vst [vmem:[#allocation2 + $0x54] sm:$0x8] %v1037_v6  ;;  %v1320_v25 = vunpack.c.l.bf16 %v1224_v5  ;;  %v2034_v5 = vld [vmem:[#allocation2 + $0x60] sm:$0x1] }
  0xb6   :  { %7296 = vmatpush3.bf16.msra.mxu1 %v7387_v1 }
  0xb7   :  { %7297 = vmatprep.subr.bf16.mxu1 %v7388_v2 }
  0xba   :  { %7298 = vmatpush3.bf16.msra.mxu1 %v7388_v2 }
  0xbb   :  { %7260 = vmatmul.mubr.bf16.gmra.mrb[40].mxu0 %v168_v11  ;;  %v1413_v11 = vlaneseq }
  0xbc   :  { %7263 = vmatprep.mubr.bf16.mxu0 %v169_v12 }
  0xbd   :  { %v7737_v12 = vshrl.u32 %v1413_v11, 7  ;;  %v2032_v11 = vld [vmem:[#allocation2 + $0x38] sm:$0x1] }
  0xbf   :  { %v1611_v14 = vsub.s32 1, %v7737_v12  ;;  %v2096_v26 = vsub.s32 2, %v7737_v12  ;;  %v1415_v28 = vsub.s32 0, %v7737_v12  ;;  %v2837_v42 = vsub.s32 3, %v7737_v12 }
  0xc0   :  { %v4258_v61 = vsub.s32 6, %v7737_v12 }
  0xc1   :  { %v7745_v24 = vrot.slane %v7740_v15, %v1611_v14  ;;  %v7754_v33 = vrot.slane %v7740_v15, %v2096_v26  ;;  %v7772_v60 = vrot.slane %v7740_v15, %v2837_v42  ;;  %v4874_v26 = vld [vmem:[#allocation2 + $0x60] sm:$0x1]  ;;  %v2649_v42 = vld [vmem:[#allocation2 + $0x40] sm:$0x8] }
  0xc2   :  { %v7795_v21 = vrot.slane %v7740_v15, %v4258_v61  ;;  %v4906_v43 = vunpack.c.l.bf16 %v4874_v26 }
  0xc3   :  { %7264 = vmatmul.mubr.bf16.gmra.mrb[44].mxu0 %v170_v17  ;;  %v6869_v17 = vunpack.c.l.bf16 %v7075_v13  ;;  %v1614_v30 = vmul.f32 %v6870_v19, %v7745_v24  ;;  %v2099_v38 = vmul.f32 %v6870_v19, %v7754_v33  ;;  %v2100_v40 = vmul.f32 %v7754_v33, %v2062_v32 }
  0xc4   :  { %7267 = vmatprep.mubr.bf16.mxu0 %v171_v20  ;;  %v1139_v20 = vsel %vm7705_vm2, 0, %v1138_v16  ;;  %v2839_v8 = vmul.f32 %v7772_v60, %v2739_v54  ;;  %v2646_v16 = vld [vmem:[#allocation2 + $0x2c] sm:$0x8]  ;;  %v2064_v32 = vunpack.c.l.bf16 %v2032_v11 }
  0xc5   :  { %1140 = vst [vmem:[#allocation2 + $0x88] sm:$0x1] %v1139_v20  ;;  %v1613_v29 = vmul.f32 %v6869_v17, %v7745_v24  ;;  %v1743_v36 = vrot.slane %v1614_v30, 1  ;;  %v2098_v37 = vmul.f32 %v6869_v17, %v7754_v33  ;;  %v2292_v51 = vrot.slane %v2099_v38, 2 }
  0xc6   :  { %v2294_v53 = vrot.slane %v2100_v40, 2  ;;  %v4160_v20 = vunpack.c.l.bf16 %v4064_v4  ;;  %v4905_v30 = vunpack.c.l.bf16 %v4873_v10 }
  0xc7   :  { %v2291_v50 = vrot.slane %v2098_v37, 2  ;;  %v2742_v37 = vunpack.c.l.bf16 %v2646_v16  ;;  %v1233_v16 = vld [vmem:[#allocation2 + $0x54] sm:$0x8] }
  0xc8   :  { %v2295_v6 = vsel %vm2290_vm7, %v2292_v51, %v2294_v53  ;;  %v7813_v45 = vmul.f32 %v7795_v21, %v4160_v20  ;;  %v7822_v53 = vmul.f32 %v7754_v33, %v2064_v32 }
  0xc9   :  { %v2293_v2 = vsel %vm2290_vm7, %v2291_v50, %v2292_v51  ;;  %v1045_v51 = vld [vmem:[#allocation2 + $0x90] sm:$0x8] }
  0xcb   :  { %7268 = vmatmul.mubr.bf16.gmra.mrb[48].mxu0 %v172_v34  ;;  %v7757_v34 = vrot.slane %v7740_v15, %v1415_v28 }
  0xcc   :  { %7271 = vmatprep.mubr.bf16.mxu0 %v173_v35  ;;  %v1742_v35 = vrot.slane %v1613_v29, 1  ;;  %v4067_v29 = vld [vmem:[#allocation2 + $0x40] sm:$0x8] }
  0xcd   :  { %v1417_v39 = vmul.f32 %v7757_v34, %v1317_v31  ;;  %v1418_v44 = vmul.f32 %v6869_v17, %v7757_v34  ;;  %v1419_v48 = vmul.f32 %v6870_v19, %v7757_v34  ;;  %v3484_v17 = vunpack.c.l.bf16 %v3452_v63  ;;  %v3453_v19 = vld [vmem:[#allocation2 + $0x4c] sm:$0x1]  ;;  %v1227_v31 = vld [vmem:[#allocation2 + $0x2c] sm:$0x8] }
  0xce   :  { %v1744_v49 = vsel %vm1741_vm6, %v1742_v35, %v1743_v36  ;;  %v3485_v38 = vunpack.c.l.bf16 %v3453_v19 }
  0xcf   :  { %v1934_v52 = vadd.f32 %v1742_v35, %v1417_v39  ;;  %v1935_v0 = vadd.f32 %v1744_v49, %v1418_v44  ;;  %v1936_v1 = vadd.f32 %v1743_v36, %v1419_v48  ;;  %v2033_v39 = vld [vmem:[#allocation2 + $0x4c] sm:$0x1]  ;;  %v3454_v44 = vld [vmem:[#allocation2 + $0x60] sm:$0x1]  ;;  %v1323_v48 = vunpack.c.l.bf16 %v1227_v31  ;;  %v4070_v49 = vld [vmem:[#allocation2 + $0x54] sm:$0x8] }
  0xd0   :  { %v2065_v54 = vunpack.c.l.bf16 %v2033_v39  ;;  %v3486_v63 = vunpack.c.l.bf16 %v3454_v44  ;;  %v4876_v39 = vld [vmem:[#allocation2 + $0x88] sm:$0x1] }
  0xd1   :  { %v2547_v7 = vadd.f32 %v2291_v50, %v1934_v52  ;;  %v7800_v27 = vadd.f32 %v2293_v2, %v1935_v0  ;;  %v7802_v28 = vadd.f32 %v2295_v6, %v1936_v1  ;;  %v1230_v50 = vld [vmem:[#allocation2 + $0x40] sm:$0x8]  ;;  %v4166_v1 = vunpack.c.l.bf16 %v4070_v49  ;;  %v1141_v6 = vld [vmem:[#allocation2 + $0x9c] sm:$0x1] }
  0xd2   :  { %v1326_v4 = vunpack.c.l.bf16 %v1230_v50  ;;  %v7845_v10 = vmul.f32 %v7757_v34, %v1323_v48  ;;  %v1329_v48 = vunpack.c.l.bf16 %v1233_v16 }
  0xd3   :  { %7272 = vmatmul.mubr.bf16.gmra.mrb[52].mxu0 %v174_v46  ;;  %v3517_v46 = vsub.s32 5, %v7737_v12  ;;  %v7804_v35 = vadd.f32 %v2839_v8, %v2547_v7  ;;  %v7839_v7 = vld [vmem:[%s10118_s2] ss:$0 sm:$0xff] }
  0xd4   :  { %7275 = vmatprep.mubr.bf16.mxu0 %v175_v47  ;;  %v2031_v47 = vld [vmem:[#allocation2 + $0x24] sm:$0x1] }
  0xd5   :  { %v2063_v59 = vunpack.c.l.bf16 %v2031_v47  ;;  %v7778_v3 = vrot.slane %v7740_v15, %v3517_v46  ;;  %v7816_v46 = vmul.f32 %v7757_v34, %v1320_v25  ;;  %v4163_v47 = vunpack.c.l.bf16 %v4067_v29  ;;  %v4073_v29 = vld [vmem:[#allocation2 + $0x68] sm:$0x8] }
  0xd6   :  { %v7852_v25 = vmul.f32 %v7754_v33, %v2065_v54 }
  0xd7   :  { %v7789_v13 = vmul.f32 %v7778_v3, %v3483_v58  ;;  %v7792_v14 = vmul.f32 %v7754_v33, %v2063_v59  ;;  %v7810_v41 = vmul.f32 %v7778_v3, %v3484_v17  ;;  %v7827_v58 = vmul.f32 %v7772_v60, %v2742_v37 }
  0xd8   :  { %v2745_v59 = vunpack.c.l.bf16 %v2649_v42  ;;  %v7830_v61 = vmul.f32 %v7778_v3, %v3485_v38  ;;  %v7842_v8 = vmul.f32 %v7795_v21, %v4163_v47  ;;  %v1142_v17 = vsel %vm7705_vm2, 0, %v1141_v6  ;;  %10146 = vst [vmem:[#allocation19_spill] sm:$0xff] %v7852_v25 }
  0xd9   :  { %1143 = vst [vmem:[#allocation2 + $0x9c] sm:$0x1] %v1142_v17  ;;  %v7859_v37 = vmul.f32 %v7778_v3, %v3486_v63  ;;  %v2066_v38 = vunpack.c.l.bf16 %v2034_v5  ;;  %v7866_v47 = vmul.f32 %v7757_v34, %v1326_v4  ;;  %v4908_v4 = vunpack.c.l.bf16 %v4876_v39  ;;  %v1236_v17 = vld [vmem:[#allocation2 + $0x68] sm:$0x8] }
  0xda   :  { %v7855_v31 = vmul.f32 %v7772_v60, %v2745_v59 }
  0xdb   :  { %7276 = vmatmul.mubr.bf16.gmra.mrb[56].mxu0 %v176_v56  ;;  %v7768_v56 = vld [vmem:[#allocation8 + $0x8] ss:$0 sm:$0xff]  ;;  %10147 = vst [vmem:[#allocation20_spill] sm:$0xff] %v7859_v37  ;;  %10148 = vst [vmem:[#allocation21_spill] sm:$0xff] %v7866_v47 }
  0xdc   :  { %7279 = vmatprep.mubr.bf16.mxu0 %v177_v57  ;;  %v3033_v57 = vsub.s32 4, %v7737_v12  ;;  %v7783_v9 = vmul.f32 %v7768_v56, %v4904_v55  ;;  %v7819_v52 = vmul.f32 %v7768_v56, %v4905_v30  ;;  %v4875_v55 = vld [vmem:[#allocation2 + $0x74] sm:$0x1]  ;;  %v7834_v2 = vmul.f32 %v7768_v56, %v4906_v43 }
  0xdd   :  { %v4907_v11 = vunpack.c.l.bf16 %v4875_v55  ;;  %v3455_v30 = vld [vmem:[#allocation2 + $0x74] sm:$0x1]  ;;  %v7862_v43 = vmul.f32 %v7795_v21, %v4166_v1  ;;  %v2655_v55 = vld [vmem:[#allocation2 + $0x68] sm:$0x8] }
  0xde   :  { %10145 = vst [vmem:[#allocation18_spill] sm:$0xff] %v7834_v2  ;;  %v2751_v63 = vunpack.c.l.bf16 %v2655_v55 }
  0xdf   :  { %v7870_v54 = vmul.f32 %v7768_v56, %v4907_v11  ;;  %v7880_v11 = vmul.f32 %v7754_v33, %v2066_v38 }
  0xe1   :  { %10149 = vst [vmem:[#allocation22_spill] sm:$0xff] %v7870_v54  ;;  %10151 = vst [vmem:[#allocation24_spill] sm:$0xff] %v7880_v11 }
  0xe3   :  { %7280 = vmatmul.mubr.bf16.gmra.mrb[60].mxu0 %v178_v62  ;;  %v4454_v62 = vsub.s32 7, %v7737_v12  ;;  %v7786_v12 = vrot.slane %v7740_v15, %v3033_v57  ;;  %v1046_v57 = vsel %vm7711_vm5, 0, %v1045_v51  ;;  %v4169_v51 = vunpack.c.l.bf16 %v4073_v29  ;;  %v4076_v29 = vld [vmem:[#allocation2 + $0x7c] sm:$0x8] }
  0xe4   :  { %1047 = vst [vmem:[#allocation2 + $0x90] sm:$0x8] %v1046_v57  ;;  %v3487_v57 = vunpack.c.l.bf16 %v3455_v30  ;;  %v4172_v32 = vunpack.c.l.bf16 %v4076_v29 }
  0xe5   :  { %v7798_v23 = vrot.slane %v7740_v15, %v4454_v62  ;;  %v2652_v62 = vld [vmem:[#allocation2 + $0x54] sm:$0x8]  ;;  %v7887_v39 = vmul.f32 %v7795_v21, %v4169_v51 }
  0xe6   :  { %v2748_v26 = vunpack.c.l.bf16 %v2652_v62 }
  0xe7   :  { %10153 = vst [vmem:[#allocation26_spill] sm:$0xff] %v7887_v39 }
  0xe8   :  { %v7875_v1 = vmul.f32 %v7772_v60, %v2748_v26 }
  0xea   :  { %10150 = vst [vmem:[#allocation23_spill] sm:$0xff] %v7875_v1 }
 0x13e   :  { %v7221_v42 = vpop.f32.mrb[0].mxu0 }
 0x13f   :  { %v293_v49 = vadd.f32 %v7221_v42, %v7839_v7  ;;  %v284_v50 = vpop.f32.mrb[1].mxu0 }
 0x140   :  { %v285_v59 = vadd.f32 %v7839_v7, %v284_v50  ;;  %v7222_v62 = vpop.f32.mrb[2].mxu0  ;;  %v7884_v50 = vmul.f32 %v7757_v34, %v1329_v48 }
 0x141   :  { %v541_v5 = vmax.f32 %v293_v49, 0.0  ;;  %v296_v6 = vadd.f32 %v7222_v62, %v7839_v7  ;;  %v287_v16 = vpop.f32.mrb[3].mxu0  ;;  %v7891_v62 = vmul.f32 %v7778_v3, %v3487_v57  ;;  %v7898_v49 = vmul.f32 %v7772_v60, %v2751_v63 }
 0x142   :  { %v539_v30 = vmax.f32 %v285_v59, 0.0  ;;  %v288_v42 = vadd.f32 %v7839_v7, %v287_v16  ;;  %10152 = vst [vmem:[#allocation25_spill] sm:$0xff] %v7884_v50  ;;  %v7894_v59 = vmul.f32 %v7768_v56, %v4908_v4  ;;  %v2035_v16 = vld [vmem:[#allocation2 + $0x74] sm:$0x1]  ;;  %v1332_v57 = vunpack.c.l.bf16 %v1236_v17 }
 0x143   :  { %v542_v26 = vmax.f32 %v296_v6, 0.0  ;;  %10154 = vst [vmem:[#allocation27_spill] sm:$0xff] %v7891_v62  ;;  %v605_v48 = vmin.f32 %v541_v5, 6.0  ;;  %v2067_v6 = vunpack.c.l.bf16 %v2035_v16  ;;  %10156 = vst [vmem:[#allocation29_spill] sm:$0xff] %v7898_v49 }
 0x144   :  { %v603_v38 = vmin.f32 %v539_v30, 6.0  ;;  %v540_v44 = vmax.f32 %v288_v42, 0.0  ;;  %10155 = vst [vmem:[#allocation28_spill] sm:$0xff] %v7894_v59 }
 0x145   :  { %v606_v20 = vmin.f32 %v542_v26, 6.0  ;;  %v7903_v42 = vmul.f32 %v7754_v33, %v2067_v6 }
 0x146   :  { %v6723_v51 = vpack.c.bf16 %v603_v38, %v603_v38  ;;  %v604_v19 = vmin.f32 %v540_v44, 6.0  ;;  %v7225_v0 = vpop.f32.mrb[4].mxu0  ;;  %v7907_v44 = vmul.f32 %v7795_v21, %v4172_v32 }
 0x147   :  { %v6790_v40 = vpack.c.bf16 %v606_v20, %v605_v48  ;;  %v309_v30 = vadd.f32 %v7225_v0, %v7839_v7  ;;  %v300_v29 = vpop.f32.mrb[5].mxu0  ;;  %10157 = vst [vmem:[#allocation30_spill] sm:$0xff] %v7903_v42 }
 0x148   :  { %924 = vst [vmem:[#allocation2 + $0x1c] sm:$0xf] %v6723_v51  ;;  %v6724_v5 = vpack.c.bf16 %v604_v19, %v604_v19  ;;  %v301_v26 = vadd.f32 %v7839_v7, %v300_v29  ;;  %v7226_v38 = vpop.f32.mrb[6].mxu0  ;;  %10158 = vst [vmem:[#allocation31_spill] sm:$0xff] %v7907_v44  ;;  %v7917_v51 = vmul.f32 %v7757_v34, %v1332_v57 }
 0x149   :  { %v545_v17 = vmax.f32 %v309_v30, 0.0  ;;  %v312_v20 = vadd.f32 %v7226_v38, %v7839_v7  ;;  %v303_v0 = vpop.f32.mrb[7].mxu0  ;;  %v7911_v16 = vunpack.c.l.bf16 %v6790_v40  ;;  %v7913_v48 = vunpack.c.h.bf16 %v6790_v40 }
 0x14a   :  { %925 = vst [vmem:[#allocation2 + $0x20] sm:$0xf] %v6724_v5  ;;  %v543_v6 = vmax.f32 %v301_v26, 0.0  ;;  %v304_v19 = vadd.f32 %v7839_v7, %v303_v0  ;;  %10159 = vst [vmem:[#allocation32_spill] sm:$0xff] %v7917_v51 }
 0x14b   :  { %v609_v29 = vmin.f32 %v545_v17, 6.0  ;;  %v546_v4 = vmax.f32 %v312_v20, 0.0  ;;  %v7922_v30 = vmul.f32 %v7911_v16, %v7795_v21  ;;  %v7926_v38 = vmul.f32 %v7913_v48, %v7795_v21 }
 0x14c   :  { %v607_v40 = vmin.f32 %v543_v6, 6.0  ;;  %v544_v5 = vmax.f32 %v304_v19, 0.0  ;;  %v7930_v26 = vmul.f32 %v7911_v16, %v7798_v23  ;;  %v7934_v57 = vmul.f32 %v7913_v48, %v7798_v23 }
 0x14d   :  { %v610_v17 = vmin.f32 %v546_v4, 6.0  ;;  %v7938_v20 = vmul.f32 %v7911_v16, %v7768_v56  ;;  %v4941_v0 = vmul.f32 %v7913_v48, %v7768_v56  ;;  %v7944_v6 = vmul.f32 %v7911_v16, %v7772_v60 }
 0x14e   :  { %v6727_v19 = vpack.c.bf16 %v607_v40, %v607_v40  ;;  %v608_v32 = vmin.f32 %v544_v5, 6.0  ;;  %v7229_v63 = vpop.f32.mrb[8].mxu0  ;;  %v10131_v55 = vrot.slane %v7930_v26, 1  ;;  %v10130_v15 = vrot.slane %v7934_v57, 1 }
 0x14f   :  { %v6795_v36 = vpack.c.bf16 %v610_v17, %v609_v29  ;;  %v325_v4 = vadd.f32 %v7229_v63, %v7839_v7  ;;  %v316_v18 = vpop.f32.mrb[9].mxu0  ;;  %v10134_v22 = vrot.slane %v7938_v20, 2  ;;  %v5133_v42 = vrot.slane %v4941_v0, 2 }
 0x150   :  { %928 = vst [vmem:[#allocation2 + $0x44] sm:$0xf] %v6727_v19  ;;  %v6728_v51 = vpack.c.bf16 %v608_v32, %v608_v32  ;;  %v317_v59 = vadd.f32 %v7839_v7, %v316_v18  ;;  %v7230_v44 = vpop.f32.mrb[10].mxu0  ;;  %v7956_v40 = vsel %vm1741_vm6, %v10131_v55, %v10130_v15  ;;  %v7960_v29 = vmul.f32 %v7913_v48, %v7772_v60 }
 0x151   :  { %7060 = vst [vmem:[#allocation2 + $0x58] sm:$0xff] %v6795_v36   ;;  %v549_v63 = vmax.f32 %v325_v4, 0.0  ;;  %v328_v5 = vadd.f32 %v7230_v44, %v7839_v7  ;;  %v319_v17 = vpop.f32.mrb[11].mxu0  ;;  %v2644_v32 = vld [vmem:[#allocation2 + $0x1c] sm:$0xff]   ;;  %v7966_v18 = vsel %vm2290_vm7, %v10134_v22, %v5133_v42  ;;  %v10160_v0 = vrot.slane %v7783_v9, 2 }
 0x152   :  { %v1225_v15 = vld [vmem:[#allocation2 + $0x1c] sm:$0xff]   ;;  %929 = vst [vmem:[#allocation2 + $0x48] sm:$0xf] %v6728_v51  ;;  %v547_v55 = vmax.f32 %v317_v59, 0.0  ;;  %v320_v36 = vadd.f32 %v7839_v7, %v319_v17  ;;  %v2740_v4 = vunpack.c.l.bf16 %v2644_v32  ;;  %v2741_v62 = vunpack.c.h.bf16 %v2644_v32 }
 0x153   :  { %v7971_v19 = vsel %vm2290_vm7, %v5133_v42, %v10160_v0  ;;  %v613_v44 = vmin.f32 %v549_v63, 6.0  ;;  %v550_v49 = vmax.f32 %v328_v5, 0.0  ;;  %v7974_v11 = vunpack.c.l.bf16 %v1225_v15 }
 0x154   :  { %v7976_v50 = vunpack.c.h.bf16 %v1225_v15  ;;  %v611_v22 = vmin.f32 %v547_v55, 6.0  ;;  %v548_v54 = vmax.f32 %v320_v36, 0.0  ;;  %v2840_v9 = vmul.f32 %v7772_v60, %v2740_v4 }
 0x155   :  { %v2841_v42 = vmul.f32 %v7772_v60, %v2741_v62  ;;  %v614_v0 = vmin.f32 %v550_v49, 6.0  ;;  %v3035_v51 = vmul.f32 %v7786_v12, %v2740_v4  ;;  %v3036_v59 = vmul.f32 %v7786_v12, %v2741_v62 }
 0x156   :  { %v3519_v17 = vmul.f32 %v7778_v3, %v2740_v4  ;;  %v6731_v32 = vpack.c.bf16 %v611_v22, %v611_v22  ;;  %v612_v63 = vmin.f32 %v548_v54, 6.0  ;;  %v7233_v5 = vpop.f32.mrb[12].mxu0  ;;  %v2936_v39 = vadd.f32 %v2840_v9, %v7800_v27 }
 0x157   :  { %v2937_v15 = vadd.f32 %v2841_v42, %v7802_v28  ;;  %v6800_v55 = vpack.c.bf16 %v614_v0, %v613_v44  ;;  %v341_v36 = vadd.f32 %v7233_v5, %v7839_v7  ;;  %v332_v37 = vpop.f32.mrb[13].mxu0  ;;  %v3163_v1 = vrot.slane %v3035_v51, 1 }
 0x158   :  { %v3164_v25 = vrot.slane %v3036_v59, 1  ;;  %932 = vst [vmem:[#allocation2 + $0x6c] sm:$0xf] %v6731_v32  ;;  %v6732_v49 = vpack.c.bf16 %v612_v63, %v612_v63  ;;  %v333_v47 = vadd.f32 %v7839_v7, %v332_v37  ;;  %v7234_v2 = vpop.f32.mrb[14].mxu0  ;;  %v3520_v4 = vmul.f32 %v7778_v3, %v2741_v62 }
 0x159   :  { %v3711_v22 = vrot.slane %v3519_v17, 2  ;;  %7061 = vst [vmem:[#allocation2 + $0x80] sm:$0xff] %v6800_v55   ;;  %v553_v54 = vmax.f32 %v341_v36, 0.0  ;;  %v344_v27 = vadd.f32 %v7234_v2, %v7839_v7  ;;  %v335_v9 = vpop.f32.mrb[15].mxu0  ;;  %v3355_v44 = vadd.f32 %v3163_v1, %v7804_v35 }
 0x15a   :  { %v3165_v28 = vsel %vm1741_vm6, %v3163_v1, %v3164_v25  ;;  %933 = vst [vmem:[#allocation2 + $0x70] sm:$0xf] %v6732_v49  ;;  %v551_v42 = vmax.f32 %v333_v47, 0.0  ;;  %v336_v0 = vadd.f32 %v7839_v7, %v335_v9  ;;  %v3357_v59 = vadd.f32 %v3164_v25, %v2937_v15 }
 0x15b   :  { %v3356_v51 = vadd.f32 %v3165_v28, %v2936_v39  ;;  %v617_v37 = vmin.f32 %v553_v54, 6.0  ;;  %v554_v32 = vmax.f32 %v344_v27, 0.0  ;;  %v3712_v63 = vrot.slane %v3520_v4, 2 }
 0x15c   :  { %v3967_v62 = vadd.f32 %v3711_v22, %v3355_v44  ;;  %v615_v17 = vmin.f32 %v551_v42, 6.0  ;;  %v552_v5 = vmax.f32 %v336_v0, 0.0  ;;  %v7994_v2 = vmul.f32 %v7757_v34, %v7974_v11 }
 0x15d   :  { %v7998_v55 = vmul.f32 %v7757_v34, %v7976_v50  ;;  %v618_v35 = vmin.f32 %v554_v32, 6.0  ;;  %v3713_v47 = vsel %vm2290_vm7, %v3711_v22, %v3712_v63  ;;  %v10161_v1 = vrot.slane %v7789_v13, 2 }
 0x15e   :  { %v4356_v39 = vadd.f32 %v7813_v45, %v3967_v62  ;;  %v6735_v15 = vpack.c.bf16 %v615_v17, %v615_v17  ;;  %v616_v36 = vmin.f32 %v552_v5, 6.0  ;;  %v7237_v49 = vpop.f32.mrb[16].mxu0  ;;  %v3968_v4 = vadd.f32 %v3713_v47, %v3356_v51 }
 0x15f   :  { %v3715_v25 = vsel %vm2290_vm7, %v3712_v63, %v10161_v1  ;;  %v6805_v27 = vpack.c.bf16 %v618_v35, %v617_v37  ;;  %v357_v9 = vadd.f32 %v7237_v49, %v7839_v7  ;;  %v348_v28 = vpop.f32.mrb[17].mxu0  ;;  %v10162_v44 = vrot.slane %v7930_v26, 1 }
 0x160   :  { %v3969_v54 = vadd.f32 %v3715_v25, %v3357_v59  ;;  %v1615_v22 = vmul.f32 %v7745_v24, %v7974_v11  ;;  %936 = vst [vmem:[#allocation2 + $0x94] sm:$0xf] %v6735_v15  ;;  %v6736_v13 = vpack.c.bf16 %v616_v36, %v616_v36  ;;  %v349_v0 = vadd.f32 %v7839_v7, %v348_v28  ;;  %v7238_v45 = vpop.f32.mrb[18].mxu0  ;;  %v8016_v59 = vld [vmem:[%s10120_s4] ss:$0 sm:$0xff] }
 0x161   :  { %v4776_v42 = vadd.f32 %v10162_v44, %v4356_v39  ;;  %v4357_v32 = vadd.f32 %v7922_v30, %v3968_v4  ;;  %7062 = vst [vmem:[#allocation2 + $0xa8] sm:$0xff] %v6805_v27   ;;  %v557_v26 = vmax.f32 %v357_v9, 0.0  ;;  %v360_v37 = vadd.f32 %v7238_v45, %v7839_v7  ;;  %v351_v63 = vpop.f32.mrb[19].mxu0 }
 0x162   :  { %v4358_v51 = vadd.f32 %v7926_v38, %v3969_v54  ;;  %v10163_v62 = vrot.slane %v7938_v20, 2  ;;  %v1616_v5 = vmul.f32 %v7745_v24, %v7976_v50  ;;  %937 = vst [vmem:[#allocation2 + $0x98] sm:$0xf] %v6736_v13  ;;  %v555_v30 = vmax.f32 %v349_v0, 0.0 }
 0x163   :  { %v352_v38 = vadd.f32 %v7839_v7, %v351_v63  ;;  %v4777_v35 = vadd.f32 %v7956_v40, %v4357_v32  ;;  %v10164_v47 = vrot.slane %v7934_v57, 1  ;;  %v621_v25 = vmin.f32 %v557_v26, 6.0 }
 0x164   :  { %v5388_v17 = vadd.f32 %v10163_v62, %v4776_v42  ;;  %v558_v39 = vmax.f32 %v360_v37, 0.0  ;;  %v1745_v36 = vrot.slane %v1615_v22, 1  ;;  %v619_v49 = vmin.f32 %v555_v30, 6.0 }
 0x165   :  { %v4778_v1 = vadd.f32 %v10164_v47, %v4358_v51  ;;  %v556_v20 = vmax.f32 %v352_v38, 0.0  ;;  %v5389_v4 = vadd.f32 %v7966_v18, %v4777_v35  ;;  %v1746_v28 = vrot.slane %v1616_v5, 1 }
 0x166   :  { %v5491_v15 = vadd.f32 %v8016_v59, %v5388_v17  ;;  %v622_v27 = vmin.f32 %v558_v39, 6.0  ;;  %v1937_v44 = vadd.f32 %v1745_v36, %v7816_v46  ;;  %v6739_v40 = vpack.c.bf16 %v619_v49, %v619_v49  ;;  %v7241_v57 = vpop.f32.mrb[20].mxu0 }
 0x167   :  { %v5390_v54 = vadd.f32 %v7971_v19, %v4778_v1  ;;  %v620_v42 = vmin.f32 %v556_v20, 6.0  ;;  %v5492_v13 = vadd.f32 %v8016_v59, %v5389_v4  ;;  %v373_v22 = vadd.f32 %v7241_v57, %v7839_v7  ;;  %v364_v32 = vpop.f32.mrb[21].mxu0 }
 0x168   :  { %v5587_v9 = vmax.f32 %v5491_v15, 0.0  ;;  %v6810_v45 = vpack.c.bf16 %v622_v27, %v621_v25  ;;  %v1747_v18 = vsel %vm1741_vm6, %v1745_v36, %v1746_v28  ;;  %940 = vst [vmem:[#allocation2 + $0xbc] sm:$0xf] %v6739_v40  ;;  %v365_v26 = vadd.f32 %v7839_v7, %v364_v32  ;;  %v7242_v37 = vpop.f32.mrb[22].mxu0 }
 0x169   :  { %v5493_v0 = vadd.f32 %v8016_v59, %v5390_v54  ;;  %v6740_v19 = vpack.c.bf16 %v620_v42, %v620_v42  ;;  %v5588_v46 = vmax.f32 %v5492_v13, 0.0  ;;  %v561_v62 = vmax.f32 %v373_v22, 0.0  ;;  %v367_v5 = vpop.f32.mrb[23].mxu0 }
 0x16a   :  { %v5683_v51 = vmin.f32 %v5587_v9, 6.0  ;;  %7063 = vst [vmem:[#allocation2 + $0xd0] sm:$0xff] %v6810_v45   ;;  %v376_v17 = vadd.f32 %v7242_v37, %v7839_v7  ;;  %v1938_v38 = vadd.f32 %v1747_v18, %v7994_v2  ;;  %v559_v35 = vmax.f32 %v365_v26, 0.0 }
 0x16b   :  { %v5589_v63 = vmax.f32 %v5493_v0, 0.0  ;;  %941 = vst [vmem:[#allocation2 + $0xc0] sm:$0xf] %v6740_v19  ;;  %v368_v47 = vadd.f32 %v7839_v7, %v367_v5  ;;  %v5684_v1 = vmin.f32 %v5588_v46, 6.0  ;;  %v625_v39 = vmin.f32 %v561_v62, 6.0 }
 0x16c   :  { %v5876_v30 = vrot.slane %v5683_v51, 7  ;;  %v562_v15 = vmax.f32 %v376_v17, 0.0  ;;  %v1939_v36 = vadd.f32 %v1746_v28, %v7998_v55  ;;  %v2101_v49 = vmul.f32 %v7754_v33, %v7974_v11 }
 0x16d   :  { %v5685_v25 = vmin.f32 %v5589_v63, 6.0  ;;  %v623_v20 = vmin.f32 %v559_v35, 6.0  ;;  %v560_v4 = vmax.f32 %v368_v47, 0.0  ;;  %v5877_v54 = vrot.slane %v5684_v1, 7 }
 0x16e   :  { %v626_v9 = vmin.f32 %v562_v15, 6.0  ;;  %v2102_v2 = vmul.f32 %v7754_v33, %v7976_v50  ;;  %v2296_v40 = vrot.slane %v2101_v49, 2  ;;  %v3037_v42 = vmul.f32 %v7911_v16, %v7786_v12  ;;  %v7245_v0 = vpop.f32.mrb[24].mxu0 }
 0x16f   :  { %v5879_v27 = vrot.slane %v5685_v25, 7  ;;  %v6743_v57 = vpack.c.bf16 %v623_v20, %v623_v20  ;;  %v624_v13 = vmin.f32 %v560_v4, 6.0  ;;  %v5878_v55 = vsel %vm996_vm0, %v5876_v30, %v5877_v54  ;;  %v380_v32 = vpop.f32.mrb[25].mxu0  ;;  %v4068_v20 = vld [vmem:[#allocation2 + $0x44] sm:$0xff]  }
 0x170   :  { %v6815_v11 = vpack.c.bf16 %v626_v9, %v625_v39  ;;  %v389_v45 = vadd.f32 %v7245_v0, %v7839_v7  ;;  %v2297_v51 = vrot.slane %v2102_v2, 2  ;;  %v381_v50 = vadd.f32 %v7839_v7, %v380_v32  ;;  %v7246_v19 = vpop.f32.mrb[26].mxu0 }
 0x171   :  { %v5880_v28 = vsel %vm996_vm0, %v5877_v54, %v5879_v27  ;;  %944 = vst [vmem:[#allocation2 + $0xe4] sm:$0xf] %v6743_v57  ;;  %v6744_v18 = vpack.c.bf16 %v624_v13, %v624_v13  ;;  %v2550_v26 = vadd.f32 %v2296_v40, %v1937_v44  ;;  %v3038_v37 = vmul.f32 %v7913_v48, %v7786_v12  ;;  %v383_v62 = vpop.f32.mrb[27].mxu0 }
 0x172   :  { %v6100_v22 = vpack.c.bf16 %v5880_v28, %v5878_v55  ;;  %7064 = vst [vmem:[#allocation2 + $0xf8] sm:$0xff] %v6815_v11   ;;  %v565_v46 = vmax.f32 %v389_v45, 0.0  ;;  %v392_v63 = vadd.f32 %v7246_v19, %v7839_v7  ;;  %v2298_v17 = vsel %vm2290_vm7, %v2296_v40, %v2297_v51 }
 0x173   :  { %v10165_v5 = vrot.slane %v7792_v14, 2  ;;  %945 = vst [vmem:[#allocation2 + $0xe8] sm:$0xf] %v6744_v18  ;;  %v563_v35 = vmax.f32 %v381_v50, 0.0  ;;  %v384_v47 = vadd.f32 %v7839_v7, %v383_v62  ;;  %v2551_v44 = vadd.f32 %v2298_v17, %v1938_v38 }
 0x174   :  { %7299 = vmatprep.mubr.bf16.mxu1 %v6100_v22  ;;  %v629_v25 = vmin.f32 %v565_v46, 6.0  ;;  %v566_v39 = vmax.f32 %v392_v63, 0.0  ;;  %v2938_v15 = vadd.f32 %v7827_v58, %v2550_v26  ;;  %v3166_v49 = vrot.slane %v3037_v42, 1 }
 0x175   :  { %v2300_v30 = vsel %vm2290_vm7, %v2297_v51, %v10165_v5  ;;  %v627_v4 = vmin.f32 %v563_v35, 6.0  ;;  %v564_v54 = vmax.f32 %v384_v47, 0.0  ;;  %v2939_v27 = vadd.f32 %v7944_v6, %v2551_v44 }
 0x176   :  { %v2552_v1 = vadd.f32 %v2300_v30, %v1939_v36  ;;  %v630_v9 = vmin.f32 %v566_v39, 6.0  ;;  %v3167_v2 = vrot.slane %v3038_v37, 1  ;;  %v3358_v40 = vadd.f32 %v3166_v49, %v2938_v15  ;;  %v7249_v42 = vpop.f32.mrb[28].mxu0 }
 0x177   :  { %v3522_v57 = vmul.f32 %v7911_v16, %v7778_v3  ;;  %v6747_v38 = vpack.c.bf16 %v627_v4, %v627_v4  ;;  %v628_v36 = vmin.f32 %v564_v54, 6.0  ;;  %v3523_v13 = vmul.f32 %v7913_v48, %v7778_v3  ;;  %v8066_v11 = vpop.f32.mrb[29].mxu0 }
 0x178   :  { %v2940_v14 = vadd.f32 %v7960_v29, %v2552_v1  ;;  %v4164_v58 = vunpack.c.l.bf16 %v4068_v20  ;;  %v6820_v0 = vpack.c.bf16 %v630_v9, %v629_v25  ;;  %v3168_v55 = vsel %vm1741_vm6, %v3166_v49, %v3167_v2  ;;  %v8068_v51 = vpop.f32.mrb[30].mxu0 }
 0x179   :  { %v3716_v6 = vrot.slane %v3522_v57, 2  ;;  %948 = vst [vmem:[#allocation2 + $0x10c] sm:$0xf] %v6747_v38  ;;  %v6748_v29 = vpack.c.bf16 %v628_v36, %v628_v36  ;;  %v3359_v45 = vadd.f32 %v3168_v55, %v2939_v27  ;;  %v3717_v22 = vrot.slane %v3523_v13, 2  ;;  %v8073_v37 = vpop.f32.mrb[31].mxu0  ;;  %v2650_v36 = vld [vmem:[#allocation2 + $0x44] sm:$0xff]  }
 0x17a   :  { %v3360_v28 = vadd.f32 %v3167_v2, %v2940_v14  ;;  %v4165_v32 = vunpack.c.h.bf16 %v4068_v20  ;;  %7065 = vst [vmem:[#allocation2 + $0x120] sm:$0xff] %v6820_v0   ;;  %v4264_v50 = vmul.f32 %v7795_v21, %v4164_v58  ;;  %v4458_v19 = vmul.f32 %v7798_v23, %v4164_v58 }
 0x17b   :  { %v3970_v18 = vadd.f32 %v3716_v6, %v3358_v40  ;;  %v4943_v26 = vmul.f32 %v7768_v56, %v4164_v58  ;;  %949 = vst [vmem:[#allocation2 + $0x110] sm:$0xf] %v6748_v29  ;;  %v3718_v46 = vsel %vm2290_vm7, %v3716_v6, %v3717_v22  ;;  %v10166_v63 = vrot.slane %v7810_v41, 2 }
 0x17c   :  { %v4265_v17 = vmul.f32 %v7795_v21, %v4165_v32  ;;  %v4459_v5 = vmul.f32 %v7798_v23, %v4165_v32  ;;  %v3971_v30 = vadd.f32 %v3718_v46, %v3359_v45  ;;  %v4587_v44 = vrot.slane %v4458_v19, 1 }
 0x17d   :  { %v3720_v62 = vsel %vm2290_vm7, %v3717_v22, %v10166_v63  ;;  %v4359_v47 = vadd.f32 %v7842_v8, %v3970_v18  ;;  %v4944_v25 = vmul.f32 %v7768_v56, %v4165_v32  ;;  %v5137_v39 = vrot.slane %v4943_v26, 2 }
 0x17e   :  { %v3972_v35 = vadd.f32 %v3720_v62, %v3360_v28  ;;  %v4588_v1 = vrot.slane %v4459_v5, 1  ;;  %v405_v15 = vadd.f32 %v7249_v42, %v7839_v7  ;;  %v4360_v49 = vadd.f32 %v4264_v50, %v3971_v30  ;;  %v8089_v9 = vpop.f32.mrb[32].mxu0 }
 0x17f   :  { %v4779_v41 = vadd.f32 %v4587_v44, %v4359_v47  ;;  %v1424_v4 = vmul.f32 %v7911_v16, %v7757_v34  ;;  %v5138_v27 = vrot.slane %v4944_v25, 2  ;;  %v1425_v8 = vmul.f32 %v7913_v48, %v7757_v34  ;;  %v8093_v13 = vpop.f32.mrb[33].mxu0 }
 0x180   :  { %v4361_v20 = vadd.f32 %v4265_v17, %v3972_v35  ;;  %v4589_v54 = vsel %vm1741_vm6, %v4587_v44, %v4588_v1  ;;  %v569_v14 = vmax.f32 %v405_v15, 0.0  ;;  %v1617_v38 = vmul.f32 %v7911_v16, %v7745_v24  ;;  %v8103_v6 = vpop.f32.mrb[34].mxu0 }
 0x181   :  { %v4780_v2 = vadd.f32 %v4589_v54, %v4360_v49  ;;  %v5391_v57 = vadd.f32 %v5137_v39, %v4779_v41  ;;  %v5139_v58 = vsel %vm2290_vm7, %v5137_v39, %v5138_v27  ;;  %v10167_v42 = vrot.slane %v7819_v52, 2  ;;  %v8106_v18 = vpop.f32.mrb[35].mxu0 }
 0x182   :  { %v4781_v40 = vadd.f32 %v4588_v1, %v4361_v20  ;;  %v8099_v55 = vmin.f32 %v569_v14, 6.0  ;;  %v1618_v28 = vmul.f32 %v7913_v48, %v7745_v24  ;;  %v1748_v32 = vrot.slane %v1617_v38, 1 }
 0x183   :  { %v5141_v0 = vsel %vm2290_vm7, %v5138_v27, %v10167_v42  ;;  %v5392_v29 = vadd.f32 %v5139_v58, %v4780_v2  ;;  %v5494_v22 = vadd.f32 %v8016_v59, %v5391_v57  ;;  %v2104_v52 = vmul.f32 %v7911_v16, %v7754_v33 }
 0x184   :  { %v5393_v45 = vadd.f32 %v5141_v0, %v4781_v40  ;;  %v1749_v50 = vrot.slane %v1618_v28, 1  ;;  %v2105_v19 = vmul.f32 %v7913_v48, %v7754_v33  ;;  %v2746_v26 = vunpack.c.l.bf16 %v2650_v36  ;;  %v7108_v0 = vld [vmem:[#allocation2 + $0x58] sm:$0xff]  }
 0x185   :  { %v5495_v46 = vadd.f32 %v8016_v59, %v5392_v29  ;;  %v5590_v62 = vmax.f32 %v5494_v22, 0.0  ;;  %v1940_v17 = vadd.f32 %v1748_v32, %v7845_v10  ;;  %v2301_v35 = vrot.slane %v2104_v52, 2 }
 0x186   :  { %v5496_v63 = vadd.f32 %v8016_v59, %v5393_v45  ;;  %v1750_v5 = vsel %vm1741_vm6, %v1748_v32, %v1749_v50  ;;  %v1942_v30 = vadd.f32 %v1749_v50, %v1425_v8  ;;  %v2302_v47 = vrot.slane %v2105_v19, 2  ;;  %v8120_v41 = vpop.f32.mrb[36].mxu0 }
 0x187   :  { %v5591_v44 = vmax.f32 %v5495_v46, 0.0  ;;  %v5686_v25 = vmin.f32 %v5590_v62, 6.0  ;;  %v1941_v16 = vadd.f32 %v1750_v5, %v1424_v4  ;;  %v10168_v48 = vrot.slane %v7822_v53, 2  ;;  %v8122_v8 = vpop.f32.mrb[37].mxu0 }
 0x188   :  { %v5592_v1 = vmax.f32 %v5496_v63, 0.0  ;;  %v2303_v39 = vsel %vm2290_vm7, %v2301_v35, %v2302_v47  ;;  %v2553_v49 = vadd.f32 %v2301_v35, %v1940_v17  ;;  %v2747_v20 = vunpack.c.h.bf16 %v2650_v36  ;;  %v8127_v53 = vpop.f32.mrb[38].mxu0 }
 0x189   :  { %v2305_v15 = vsel %vm2290_vm7, %v2302_v47, %v10168_v48  ;;  %v5687_v10 = vmin.f32 %v5591_v44, 6.0  ;;  %v5881_v27 = vrot.slane %v5686_v25, 7  ;;  %v2554_v14 = vadd.f32 %v2303_v39, %v1941_v16  ;;  %v8131_v28 = vpop.f32.mrb[39].mxu0 }
 0x18a   :  { %v5688_v54 = vmin.f32 %v5592_v1, 6.0  ;;  %v2555_v2 = vadd.f32 %v2305_v15, %v1942_v30  ;;  %v2846_v40 = vmul.f32 %v7772_v60, %v2746_v26  ;;  %v2847_v4 = vmul.f32 %v7772_v60, %v2747_v20 }
 0x18b   :  { %v2941_v57 = vadd.f32 %v7855_v31, %v2553_v49  ;;  %v5882_v38 = vrot.slane %v5687_v10, 7  ;;  %v3039_v36 = vmul.f32 %v7786_v12, %v2746_v26  ;;  %v3040_v42 = vmul.f32 %v7786_v12, %v2747_v20 }
 0x18c   :  { %v5884_v58 = vrot.slane %v5688_v54, 7  ;;  %v2942_v29 = vadd.f32 %v2846_v40, %v2554_v14  ;;  %v2943_v45 = vadd.f32 %v2847_v4, %v2555_v2  ;;  %v3525_v22 = vmul.f32 %v7778_v3, %v2746_v26 }
 0x18d   :  { %v3526_v32 = vmul.f32 %v7778_v3, %v2747_v20  ;;  %v5883_v50 = vsel %vm996_vm0, %v5881_v27, %v5882_v38  ;;  %v3169_v52 = vrot.slane %v3039_v36, 1  ;;  %v3170_v19 = vrot.slane %v3040_v42, 1 }
 0x18e   :  { %v5885_v31 = vsel %vm996_vm0, %v5882_v38, %v5884_v58  ;;  %v3721_v63 = vrot.slane %v3525_v22, 2  ;;  %v8137_v17 = vunpack.c.l.bf16 %v7108_v0  ;;  %v8140_v47 = vunpack.c.h.bf16 %v7108_v0 }
 0x18f   :  { %v6101_v46 = vpack.c.bf16 %v5885_v31, %v5883_v50  ;;  %v3722_v62 = vrot.slane %v3526_v32, 2  ;;  %v3171_v5 = vsel %vm1741_vm6, %v3169_v52, %v3170_v19  ;;  %v3361_v30 = vadd.f32 %v3169_v52, %v2941_v57  ;;  %v10170_v32 = vld [vmem:[#allocation18_spill] sm:$0xff] }
 0x190   :  { %v3363_v35 = vadd.f32 %v3170_v19, %v2943_v45  ;;  %v3362_v26 = vadd.f32 %v3171_v5, %v2942_v29  ;;  %v10169_v1 = vrot.slane %v7830_v61, 2  ;;  %v4267_v16 = vmul.f32 %v8137_v17, %v7795_v21 }
 0x191   :  { %7300 = vmatmul.mubr.bf16.vlgmr.msra.gmra.mrb[0].mxu1 %v6101_v46  ;;  %v3723_v44 = vsel %vm2290_vm7, %v3721_v63, %v3722_v62  ;;  %v3973_v39 = vadd.f32 %v3721_v63, %v3361_v30  ;;  %v4268_v15 = vmul.f32 %v8140_v47, %v7795_v21  ;;  %v4460_v49 = vmul.f32 %v8137_v17, %v7798_v23 }
 0x192   :  { %v3725_v25 = vsel %vm2290_vm7, %v3722_v62, %v10169_v1  ;;  %v3974_v20 = vadd.f32 %v3723_v44, %v3362_v26  ;;  %v4461_v10 = vmul.f32 %v8140_v47, %v7798_v23  ;;  %v4946_v61 = vmul.f32 %v8137_v17, %v7768_v56 }
 0x193   :  { %v3975_v48 = vadd.f32 %v3725_v25, %v3363_v35  ;;  %v4947_v54 = vmul.f32 %v8140_v47, %v7768_v56  ;;  %v4362_v27 = vadd.f32 %v7862_v43, %v3973_v39  ;;  %v4590_v2 = vrot.slane %v4460_v49, 1  ;;  %v1231_v56 = vld [vmem:[#allocation2 + $0x44] sm:$0xff]  }
 0x194   :  { %v397_v40 = vadd.f32 %v7839_v7, %v8066_v11  ;;  %v4363_v4 = vadd.f32 %v4267_v16, %v3974_v20  ;;  %v4591_v57 = vrot.slane %v4461_v10, 1  ;;  %v5142_v38 = vrot.slane %v4946_v61, 2 }
 0x195   :  { %v4364_v14 = vadd.f32 %v4268_v15, %v3975_v48  ;;  %v5143_v58 = vrot.slane %v4947_v54, 2  ;;  %v4782_v36 = vadd.f32 %v4590_v2, %v4362_v27  ;;  %v408_v0 = vadd.f32 %v8068_v51, %v7839_v7 }
 0x196   :  { %v567_v42 = vmax.f32 %v397_v40, 0.0  ;;  %v400_v29 = vadd.f32 %v7839_v7, %v8073_v37  ;;  %v4592_v43 = vsel %vm1741_vm6, %v4590_v2, %v4591_v57  ;;  %v10171_v11 = vrot.slane %v10170_v32, 2 }
 0x197   :  { %v4784_v45 = vadd.f32 %v4591_v57, %v4364_v14  ;;  %v5144_v22 = vsel %vm2290_vm7, %v5142_v38, %v5143_v58  ;;  %v4783_v31 = vadd.f32 %v4592_v43, %v4363_v4  ;;  %v5394_v52 = vadd.f32 %v5142_v38, %v4782_v36 }
 0x198   :  { %v5146_v50 = vsel %vm2290_vm7, %v5143_v58, %v10171_v11  ;;  %v631_v19 = vmin.f32 %v567_v42, 6.0  ;;  %v570_v46 = vmax.f32 %v408_v0, 0.0  ;;  %v568_v62 = vmax.f32 %v400_v29, 0.0  ;;  %v10172_v42 = vld [vmem:[#allocation21_spill] sm:$0xff] }
 0x199   :  { %v5396_v63 = vadd.f32 %v5146_v50, %v4784_v45  ;;  %v1327_v51 = vunpack.c.l.bf16 %v1231_v56  ;;  %v1328_v5 = vunpack.c.h.bf16 %v1231_v56  ;;  %v5395_v30 = vadd.f32 %v5144_v22, %v4783_v31  ;;  %v10173_v31 = vld [vmem:[#allocation19_spill] sm:$0xff] }
 0x19a   :  { %v5497_v37 = vadd.f32 %v8016_v59, %v5394_v52  ;;  %v6751_v35 = vpack.c.bf16 %v631_v19, %v631_v19  ;;  %v634_v26 = vmin.f32 %v570_v46, 6.0  ;;  %v632_v1 = vmin.f32 %v568_v62, 6.0 }
 0x19b   :  { %v5499_v44 = vadd.f32 %v8016_v59, %v5396_v63  ;;  %v1427_v25 = vmul.f32 %v7757_v34, %v1327_v51  ;;  %v1428_v16 = vmul.f32 %v7757_v34, %v1328_v5  ;;  %v5498_v39 = vadd.f32 %v8016_v59, %v5395_v30 }
 0x19c   :  { %v5593_v48 = vmax.f32 %v5497_v37, 0.0  ;;  %952 = vst [vmem:[#allocation2 + $0x134] sm:$0xf] %v6751_v35  ;;  %v6825_v15 = vpack.c.bf16 %v634_v26, %v8099_v55  ;;  %v1619_v49 = vmul.f32 %v7745_v24, %v1327_v51  ;;  %v6752_v10 = vpack.c.bf16 %v632_v1, %v632_v1 }
 0x19d   :  { %v5595_v20 = vmax.f32 %v5499_v44, 0.0  ;;  %v1620_v61 = vmul.f32 %v7745_v24, %v1328_v5  ;;  %v2107_v54 = vmul.f32 %v7754_v33, %v1327_v51  ;;  %v5594_v27 = vmax.f32 %v5498_v39, 0.0  ;;  %v4074_v44 = vld [vmem:[#allocation2 + $0x6c] sm:$0xff]  }
 0x19e   :  { %v5689_v14 = vmin.f32 %v5593_v48, 6.0  ;;  %7066 = vst [vmem:[#allocation2 + $0x148] sm:$0xff] %v6825_v15   ;;  %v1751_v2 = vrot.slane %v1619_v49, 1  ;;  %v2108_v40 = vmul.f32 %v7754_v33, %v1328_v5  ;;  %953 = vst [vmem:[#allocation2 + $0x138] sm:$0xf] %v6752_v10  ;;  %v2849_v55 = vmul.f32 %v8137_v17, %v7772_v60  ;;  %v8194_v5 = vpop.f32.mrb[40].mxu0 }
 0x19f   :  { %v5691_v4 = vmin.f32 %v5595_v20, 6.0  ;;  %v1752_v57 = vrot.slane %v1620_v61, 1  ;;  %v2306_v38 = vrot.slane %v2107_v54, 2  ;;  %v5690_v58 = vmin.f32 %v5594_v27, 6.0 }
 0x1a0   :  { %v5886_v36 = vrot.slane %v5689_v14, 7  ;;  %v1943_v0 = vadd.f32 %v1751_v2, %v10172_v42  ;;  %v2307_v29 = vrot.slane %v2108_v40, 2  ;;  %v2850_v22 = vmul.f32 %v8140_v47, %v7772_v60 }
 0x1a1   :  { %v5889_v56 = vrot.slane %v5691_v4, 7  ;;  %v1753_v43 = vsel %vm1741_vm6, %v1751_v2, %v1752_v57  ;;  %v1945_v45 = vadd.f32 %v1752_v57, %v1428_v16  ;;  %v5887_v32 = vrot.slane %v5690_v58, 7 }
 0x1a2   :  { %v1944_v11 = vadd.f32 %v1753_v43, %v1427_v25  ;;  %v2308_v50 = vsel %vm2290_vm7, %v2306_v38, %v2307_v29  ;;  %v10174_v52 = vrot.slane %v10173_v31, 2  ;;  %v2556_v46 = vadd.f32 %v2306_v38, %v1943_v0  ;;  %v10175_v25 = vld [vmem:[#allocation23_spill] sm:$0xff]  ;;  %v10176_v0 = vld [vmem:[#allocation20_spill] sm:$0xff] }
 0x1a3   :  { %v3041_v62 = vmul.f32 %v8137_v17, %v7786_v12  ;;  %v3042_v51 = vmul.f32 %v8140_v47, %v7786_v12  ;;  %v5888_v30 = vsel %vm996_vm0, %v5886_v36, %v5887_v32  ;;  %v5890_v37 = vsel %vm996_vm0, %v5887_v32, %v5889_v56 }
 0x1a4   :  { %v2310_v19 = vsel %vm2290_vm7, %v2307_v29, %v10174_v52  ;;  %v2557_v35 = vadd.f32 %v2308_v50, %v1944_v11  ;;  %v3528_v26 = vmul.f32 %v8137_v17, %v7778_v3  ;;  %v6102_v1 = vpack.c.bf16 %v5890_v37, %v5888_v30  ;;  %v8217_v11 = vld [vmem:[#allocation8 + $0x8] ss:$0 sm:$0xff] }
 0x1a5   :  { %v2558_v63 = vadd.f32 %v2310_v19, %v1945_v45  ;;  %v2944_v16 = vadd.f32 %v10175_v25, %v2556_v46  ;;  %v3172_v48 = vrot.slane %v3041_v62, 1  ;;  %v3173_v49 = vrot.slane %v3042_v51, 1 }
 0x1a6   :  { %v2945_v15 = vadd.f32 %v2849_v55, %v2557_v35  ;;  %v3529_v20 = vmul.f32 %v8140_v47, %v7778_v3  ;;  %v3726_v10 = vrot.slane %v3528_v26, 2  ;;  %7303 = vmatprep.mubr.bf16.mxu1 %v6102_v1  ;;  %v4170_v54 = vunpack.c.l.bf16 %v4074_v44 }
 0x1a7   :  { %v2946_v39 = vadd.f32 %v2850_v22, %v2558_v63  ;;  %v3364_v61 = vadd.f32 %v3172_v48, %v2944_v16  ;;  %v4171_v27 = vunpack.c.h.bf16 %v4074_v44  ;;  %v421_v14 = vadd.f32 %v8089_v9, %v7839_v7  ;;  %v10178_v22 = vld [vmem:[#allocation26_spill] sm:$0xff] }
 0x1a8   :  { %v3174_v2 = vsel %vm1741_vm6, %v3172_v48, %v3173_v49  ;;  %v3727_v4 = vrot.slane %v3529_v20, 2  ;;  %v1430_v57 = vmul.f32 %v8137_v17, %v7757_v34  ;;  %v4270_v58 = vmul.f32 %v7795_v21, %v4170_v54  ;;  %v2656_v48 = vld [vmem:[#allocation2 + $0x6c] sm:$0xff]  }
 0x1a9   :  { %v3366_v40 = vadd.f32 %v3173_v49, %v2946_v39  ;;  %v3365_v38 = vadd.f32 %v3174_v2, %v2945_v15  ;;  %v3976_v55 = vadd.f32 %v3726_v10, %v3364_v61  ;;  %v4271_v36 = vmul.f32 %v7795_v21, %v4171_v27  ;;  %v10179_v49 = vld [vmem:[#allocation22_spill] sm:$0xff] }
 0x1aa   :  { %v3728_v42 = vsel %vm2290_vm7, %v3726_v10, %v3727_v4  ;;  %v10177_v29 = vrot.slane %v10176_v0, 2  ;;  %v4462_v7 = vmul.f32 %v7798_v23, %v4170_v54  ;;  %v4463_v9 = vmul.f32 %v7798_v23, %v4171_v27 }
 0x1ab   :  { %v3977_v43 = vadd.f32 %v3728_v42, %v3365_v38  ;;  %v4365_v32 = vadd.f32 %v10178_v22, %v3976_v55  ;;  %v4949_v50 = vmul.f32 %v8217_v11, %v4170_v54  ;;  %v4950_v19 = vmul.f32 %v8217_v11, %v4171_v27 }
 0x1ac   :  { %v3730_v56 = vsel %vm2290_vm7, %v3727_v4, %v10177_v29  ;;  %v4593_v31 = vrot.slane %v4462_v7, 1  ;;  %v4594_v52 = vrot.slane %v4463_v9, 1  ;;  %v573_v46 = vmax.f32 %v421_v14, 0.0  ;;  %v10181_v29 = vld [vmem:[#allocation25_spill] sm:$0xff] }
 0x1ad   :  { %v3978_v45 = vadd.f32 %v3730_v56, %v3366_v40  ;;  %v4366_v63 = vadd.f32 %v4270_v58, %v3977_v43  ;;  %v5147_v51 = vrot.slane %v4949_v50, 2  ;;  %v1431_v30 = vmul.f32 %v8140_v47, %v7757_v34 }
 0x1ae   :  { %v4595_v37 = vsel %vm1741_vm6, %v4593_v31, %v4594_v52  ;;  %v4785_v35 = vadd.f32 %v4593_v31, %v4365_v32  ;;  %v5148_v26 = vrot.slane %v4950_v19, 2  ;;  %v8224_v44 = vmin.f32 %v573_v46, 6.0 }
 0x1af   :  { %v4367_v62 = vadd.f32 %v4271_v36, %v3978_v45  ;;  %v4786_v1 = vadd.f32 %v4595_v37, %v4366_v63  ;;  %v1621_v16 = vmul.f32 %v8137_v17, %v7745_v24  ;;  %v1622_v39 = vmul.f32 %v8140_v47, %v7745_v24 }
 0x1b0   :  { %v5149_v15 = vsel %vm2290_vm7, %v5147_v51, %v5148_v26  ;;  %v10180_v20 = vrot.slane %v10179_v49, 2  ;;  %v5397_v61 = vadd.f32 %v5147_v51, %v4785_v35  ;;  %v2110_v54 = vmul.f32 %v8137_v17, %v7754_v33 }
 0x1b1   :  { %v4787_v25 = vadd.f32 %v4594_v52, %v4367_v62  ;;  %v5398_v27 = vadd.f32 %v5149_v15, %v4786_v1  ;;  %v1754_v2 = vrot.slane %v1621_v16, 1  ;;  %v1755_v40 = vrot.slane %v1622_v39, 1  ;;  %v10182_v52 = vld [vmem:[#allocation24_spill] sm:$0xff] }
 0x1b2   :  { %v5151_v10 = vsel %vm2290_vm7, %v5148_v26, %v10180_v20  ;;  %v5500_v4 = vadd.f32 %v8016_v59, %v5397_v61  ;;  %v2111_v38 = vmul.f32 %v8140_v47, %v7754_v33  ;;  %v2311_v55 = vrot.slane %v2110_v54, 2  ;;  %v10184_v26 = vld [vmem:[#allocation29_spill] sm:$0xff]  ;;  %v7109_v16 = vld [vmem:[#allocation2 + $0x80] sm:$0xff]  }
 0x1b3   :  { %v5399_v14 = vadd.f32 %v5151_v10, %v4787_v25  ;;  %v2752_v58 = vunpack.c.l.bf16 %v2656_v48  ;;  %v5501_v36 = vadd.f32 %v8016_v59, %v5398_v27  ;;  %v1756_v0 = vsel %vm1741_vm6, %v1754_v2, %v1755_v40 }
 0x1b4   :  { %v1946_v56 = vadd.f32 %v1754_v2, %v10181_v29  ;;  %v5596_v17 = vmax.f32 %v5500_v4, 0.0  ;;  %v1947_v7 = vadd.f32 %v1756_v0, %v1430_v57  ;;  %v1948_v9 = vadd.f32 %v1755_v40, %v1431_v30  ;;  %v8258_v4 = vpop.f32.mrb[41].mxu0 }
 0x1b5   :  { %v5502_v42 = vadd.f32 %v8016_v59, %v5399_v14  ;;  %v2312_v43 = vrot.slane %v2111_v38, 2  ;;  %v5597_v45 = vmax.f32 %v5501_v36, 0.0  ;;  %v2753_v50 = vunpack.c.h.bf16 %v2656_v48  ;;  %v8260_v0 = vpop.f32.mrb[42].mxu0 }
 0x1b6   :  { %v2559_v32 = vadd.f32 %v2311_v55, %v1946_v56  ;;  %v5692_v31 = vmin.f32 %v5596_v17, 6.0  ;;  %v10183_v19 = vrot.slane %v10182_v52, 2  ;;  %v2852_v63 = vmul.f32 %v7772_v60, %v2752_v58 }
 0x1b7   :  { %v5598_v22 = vmax.f32 %v5502_v42, 0.0  ;;  %v2313_v47 = vsel %vm2290_vm7, %v2311_v55, %v2312_v43  ;;  %v5693_v62 = vmin.f32 %v5597_v45, 6.0  ;;  %v2853_v30 = vmul.f32 %v7772_v60, %v2753_v50  ;;  %v10185_v45 = vld [vmem:[#allocation27_spill] sm:$0xff] }
 0x1b8   :  { %v2315_v46 = vsel %vm2290_vm7, %v2312_v43, %v10183_v19  ;;  %v2560_v37 = vadd.f32 %v2313_v47, %v1947_v7  ;;  %v5891_v57 = vrot.slane %v5692_v31, 7  ;;  %v2947_v1 = vadd.f32 %v10184_v26, %v2559_v32  ;;  %v8267_v7 = vpop.f32.mrb[43].mxu0  ;;  %v8287_v26 = vld [vmem:[%s10118_s2] ss:$0 sm:$0xff] }
 0x1b9   :  { %v5694_v51 = vmin.f32 %v5598_v22, 6.0  ;;  %v2561_v35 = vadd.f32 %v2315_v46, %v1948_v9  ;;  %v3043_v25 = vmul.f32 %v7786_v12, %v2752_v58  ;;  %v5892_v39 = vrot.slane %v5693_v62, 7 }
 0x1ba   :  { %v2948_v15 = vadd.f32 %v2852_v63, %v2560_v37  ;;  %v3044_v49 = vmul.f32 %v7786_v12, %v2753_v50  ;;  %v3531_v61 = vmul.f32 %v7778_v3, %v2752_v58  ;;  %v3532_v54 = vmul.f32 %v7778_v3, %v2753_v50  ;;  %v10187_v63 = vld [vmem:[#allocation31_spill] sm:$0xff] }
 0x1bb   :  { %v5894_v48 = vrot.slane %v5694_v51, 7  ;;  %v2949_v20 = vadd.f32 %v2853_v30, %v2561_v35  ;;  %v3175_v10 = vrot.slane %v3043_v25, 1  ;;  %v5893_v27 = vsel %vm996_vm0, %v5891_v57, %v5892_v39 }
 0x1bc   :  { %v3176_v2 = vrot.slane %v3044_v49, 1  ;;  %v8256_v40 = vunpack.c.l.bf16 %v7109_v16  ;;  %v3731_v36 = vrot.slane %v3531_v61, 2  ;;  %v3732_v42 = vrot.slane %v3532_v54, 2  ;;  %v1237_v61 = vld [vmem:[#allocation2 + $0x6c] sm:$0xff]  }
 0x1bd   :  { %v5895_v14 = vsel %vm996_vm0, %v5892_v39, %v5894_v48  ;;  %v3367_v55 = vadd.f32 %v3175_v10, %v2947_v1  ;;  %v8263_v56 = vunpack.c.h.bf16 %v7109_v16  ;;  %v10186_v22 = vrot.slane %v10185_v45, 2 }
 0x1be   :  { %v6103_v38 = vpack.c.bf16 %v5895_v14, %v5893_v27  ;;  %v3177_v29 = vsel %vm1741_vm6, %v3175_v10, %v3176_v2  ;;  %v3369_v58 = vadd.f32 %v3176_v2, %v2949_v20  ;;  %v4273_v17 = vmul.f32 %v8256_v40, %v7795_v21  ;;  %v10188_v14 = vld [vmem:[#allocation28_spill] sm:$0xff] }
 0x1bf   :  { %v3368_v9 = vadd.f32 %v3177_v29, %v2948_v15  ;;  %v3733_v43 = vsel %vm2290_vm7, %v3731_v36, %v3732_v42  ;;  %v3735_v32 = vsel %vm2290_vm7, %v3732_v42, %v10186_v22  ;;  %v3979_v50 = vadd.f32 %v3731_v36, %v3367_v55 }
 0x1c0   :  { %7304 = vmatmul.mubr.bf16.gmra.mrb[4].mxu1 %v6103_v38  ;;  %v3981_v31 = vadd.f32 %v3735_v32, %v3369_v58  ;;  %v4274_v47 = vmul.f32 %v8263_v56, %v7795_v21  ;;  %v4464_v52 = vmul.f32 %v8256_v40, %v7798_v23  ;;  %v4465_v19 = vmul.f32 %v8263_v56, %v7798_v23 }
 0x1c1   :  { %v3980_v46 = vadd.f32 %v3733_v43, %v3368_v9  ;;  %v4368_v62 = vadd.f32 %v10187_v63, %v3979_v50  ;;  %v4952_v51 = vmul.f32 %v8217_v11, %v8256_v40  ;;  %v4953_v37 = vmul.f32 %v8217_v11, %v8263_v56 }
 0x1c2   :  { %v4370_v35 = vadd.f32 %v4274_v47, %v3981_v31  ;;  %v4596_v57 = vrot.slane %v4464_v52, 1  ;;  %v4597_v30 = vrot.slane %v4465_v19, 1  ;;  %v413_v1 = vadd.f32 %v8287_v26, %v8093_v13 }
 0x1c3   :  { %v4369_v25 = vadd.f32 %v4273_v17, %v3980_v46  ;;  %v5152_v16 = vrot.slane %v4952_v51, 2  ;;  %v5153_v39 = vrot.slane %v4953_v37, 2  ;;  %v424_v48 = vadd.f32 %v8287_v26, %v8103_v6 }
 0x1c4   :  { %v4598_v15 = vsel %vm1741_vm6, %v4596_v57, %v4597_v30  ;;  %v4788_v49 = vadd.f32 %v4596_v57, %v4368_v62  ;;  %v4790_v20 = vadd.f32 %v4597_v30, %v4370_v35  ;;  %v571_v10 = vmax.f32 %v413_v1, 0.0  ;;  %v2658_v35 = vld [vmem:[#allocation2 + $0x7c] sm:$0x8] }
 0x1c5   :  { %v4789_v54 = vadd.f32 %v4598_v15, %v4369_v25  ;;  %v5154_v27 = vsel %vm2290_vm7, %v5152_v16, %v5153_v39  ;;  %v10189_v2 = vrot.slane %v10188_v14, 2  ;;  %v574_v13 = vmax.f32 %v424_v48, 0.0 }
 0x1c6   :  { %v5400_v55 = vadd.f32 %v5152_v16, %v4788_v49  ;;  %v635_v42 = vmin.f32 %v571_v10, 6.0  ;;  %v416_v6 = vadd.f32 %v8287_v26, %v8106_v18  ;;  %v1333_v17 = vunpack.c.l.bf16 %v1237_v61 }
 0x1c7   :  { %v5156_v38 = vsel %vm2290_vm7, %v5153_v39, %v10189_v2  ;;  %v5401_v29 = vadd.f32 %v5154_v27, %v4789_v54  ;;  %v638_v58 = vmin.f32 %v574_v13, 6.0  ;;  %v1334_v9 = vunpack.c.h.bf16 %v1237_v61  ;;  %v10191_v13 = vld [vmem:[#allocation30_spill] sm:$0xff] }
 0x1c8   :  { %v5402_v36 = vadd.f32 %v5156_v38, %v4790_v20  ;;  %v5503_v43 = vadd.f32 %v8016_v59, %v5400_v55  ;;  %v6755_v22 = vpack.c.bf16 %v635_v42, %v635_v42  ;;  %v572_v32 = vmax.f32 %v416_v6, 0.0  ;;  %v10190_v20 = vld [vmem:[#allocation32_spill] sm:$0xff] }
 0x1c9   :  { %v5504_v50 = vadd.f32 %v8016_v59, %v5401_v29  ;;  %v6830_v31 = vpack.c.bf16 %v638_v58, %v8224_v44  ;;  %v1433_v47 = vmul.f32 %v7757_v34, %v1333_v17  ;;  %v1434_v52 = vmul.f32 %v7757_v34, %v1334_v9  ;;  %v3456_v29 = vld [vmem:[#allocation2 + $0x88] sm:$0x1] }
 0x1ca   :  { %v5505_v45 = vadd.f32 %v8016_v59, %v5402_v36  ;;  %v5599_v19 = vmax.f32 %v5503_v43, 0.0  ;;  %956 = vst [vmem:[#allocation2 + $0x184] sm:$0xf] %v6755_v22  ;;  %v636_v46 = vmin.f32 %v572_v32, 6.0  ;;  %v1623_v63 = vmul.f32 %v7745_v24, %v1333_v17 }
 0x1cb   :  { %v5600_v62 = vmax.f32 %v5504_v50, 0.0  ;;  %7067 = vst [vmem:[#allocation2 + $0x198] sm:$0xff] %v6830_v31   ;;  %v1624_v51 = vmul.f32 %v7745_v24, %v1334_v9  ;;  %v2113_v37 = vmul.f32 %v7754_v33, %v1333_v17  ;;  %v2114_v59 = vmul.f32 %v7754_v33, %v1334_v9 }
 0x1cc   :  { %v5601_v18 = vmax.f32 %v5505_v45, 0.0  ;;  %v5695_v44 = vmin.f32 %v5599_v19, 6.0  ;;  %v6756_v30 = vpack.c.bf16 %v636_v46, %v636_v46  ;;  %v1757_v1 = vrot.slane %v1623_v63, 1  ;;  %v4079_v45 = vld [vmem:[#allocation2 + $0x90] sm:$0x8]  ;;  %v4080_v46 = vld [vmem:[#allocation2 + $0x94] sm:$0xff]  }
 0x1cd   :  { %v5696_v25 = vmin.f32 %v5600_v62, 6.0  ;;  %v1758_v16 = vrot.slane %v1624_v51, 1  ;;  %v2316_v39 = vrot.slane %v2113_v37, 2  ;;  %v2317_v48 = vrot.slane %v2114_v59, 2 }
 0x1ce   :  { %v5697_v57 = vmin.f32 %v5601_v18, 6.0  ;;  %v5896_v15 = vrot.slane %v5695_v44, 7  ;;  %957 = vst [vmem:[#allocation2 + $0x188] sm:$0xf] %v6756_v30  ;;  %v1949_v10 = vadd.f32 %v1757_v1, %v10190_v20  ;;  %v2754_v61 = vunpack.c.l.bf16 %v2658_v35  ;;  %v4877_v20 = vld [vmem:[#allocation2 + $0x9c] sm:$0x1] }
 0x1cf   :  { %v5897_v54 = vrot.slane %v5696_v25, 7  ;;  %v1759_v27 = vsel %vm1741_vm6, %v1757_v1, %v1758_v16  ;;  %v1951_v14 = vadd.f32 %v1758_v16, %v1434_v52  ;;  %v2318_v2 = vsel %vm2290_vm7, %v2316_v39, %v2317_v48 }
 0x1d0   :  { %v5899_v49 = vrot.slane %v5697_v57, 7  ;;  %v1950_v38 = vadd.f32 %v1759_v27, %v1433_v47  ;;  %v10192_v55 = vrot.slane %v10191_v13, 2  ;;  %v2562_v42 = vadd.f32 %v2316_v39, %v1949_v10 }
 0x1d1   :  { %v2854_v6 = vmul.f32 %v7772_v60, %v2754_v61  ;;  %v5898_v58 = vsel %vm996_vm0, %v5896_v15, %v5897_v54  ;;  %v2855_v43 = vmul.f32 %v8256_v40, %v7772_v60  ;;  %v2856_v50 = vmul.f32 %v8263_v56, %v7772_v60 }
 0x1d2   :  { %v2320_v36 = vsel %vm2290_vm7, %v2317_v48, %v10192_v55  ;;  %v5900_v17 = vsel %vm996_vm0, %v5897_v54, %v5899_v49  ;;  %v2563_v32 = vadd.f32 %v2318_v2, %v1950_v38  ;;  %v3045_v47 = vmul.f32 %v8256_v40, %v7786_v12 }
 0x1d3   :  { %v2564_v9 = vadd.f32 %v2320_v36, %v1951_v14  ;;  %v6104_v22 = vpack.c.bf16 %v5900_v17, %v5898_v58  ;;  %v2950_v31 = vadd.f32 %v2854_v6, %v2562_v42  ;;  %v3046_v52 = vmul.f32 %v8263_v56, %v7786_v12  ;;  %v8337_v14 = vpop.f32.mrb[44].mxu0 }
 0x1d4   :  { %v3488_v19 = vunpack.c.l.bf16 %v3456_v29  ;;  %v3534_v18 = vmul.f32 %v8256_v40, %v7778_v3  ;;  %v2951_v63 = vadd.f32 %v2855_v43, %v2563_v32  ;;  %v3535_v51 = vmul.f32 %v8263_v56, %v7778_v3 }
 0x1d5   :  { %7307 = vmatprep.mubr.bf16.mxu1 %v6104_v22  ;;  %v2952_v62 = vadd.f32 %v2856_v50, %v2564_v9  ;;  %v4175_v37 = vunpack.c.l.bf16 %v4079_v45  ;;  %v3178_v59 = vrot.slane %v3045_v47, 1  ;;  %v3179_v35 = vrot.slane %v3046_v52, 1  ;;  %v1048_v45 = vld [vmem:[#allocation2 + $0xa4] sm:$0x8]  ;;  %v1144_v47 = vld [vmem:[#allocation2 + $0xb0] sm:$0x1] }
 0x1d6   :  { %v3536_v44 = vmul.f32 %v7778_v3, %v3488_v19  ;;  %v3736_v57 = vrot.slane %v3534_v18, 2  ;;  %v3737_v30 = vrot.slane %v3535_v51, 2  ;;  %v4176_v1 = vunpack.c.l.bf16 %v4080_v46 }
 0x1d7   :  { %v4177_v25 = vunpack.c.h.bf16 %v4080_v46  ;;  %v4275_v16 = vmul.f32 %v7795_v21, %v4175_v37  ;;  %v3180_v39 = vsel %vm1741_vm6, %v3178_v59, %v3179_v35  ;;  %v3370_v48 = vadd.f32 %v3178_v59, %v2950_v31 }
 0x1d8   :  { %v3372_v15 = vadd.f32 %v3179_v35, %v2952_v62  ;;  %v3739_v49 = vrot.slane %v3536_v44, 2  ;;  %v3371_v10 = vadd.f32 %v3180_v39, %v2951_v63  ;;  %v3738_v61 = vsel %vm2290_vm7, %v3736_v57, %v3737_v30  ;;  %v1239_v63 = vld [vmem:[#allocation2 + $0x7c] sm:$0x8] }
 0x1d9   :  { %v4276_v54 = vmul.f32 %v7795_v21, %v4176_v1  ;;  %v4277_v27 = vmul.f32 %v7795_v21, %v4177_v25  ;;  %v3982_v38 = vadd.f32 %v3736_v57, %v3370_v48  ;;  %v4466_v13 = vmul.f32 %v7798_v23, %v4176_v1 }
 0x1da   :  { %v3740_v2 = vsel %vm2290_vm7, %v3737_v30, %v3739_v49  ;;  %v4467_v55 = vmul.f32 %v7798_v23, %v4177_v25  ;;  %v3983_v36 = vadd.f32 %v3738_v61, %v3371_v10  ;;  %v4909_v6 = vunpack.c.l.bf16 %v4877_v20  ;;  %v8359_v20 = vld [vmem:[%s10120_s4] ss:$0 sm:$0xff] }
 0x1db   :  { %v3984_v42 = vadd.f32 %v3740_v2, %v3372_v15  ;;  %v4955_v29 = vmul.f32 %v8217_v11, %v4176_v1  ;;  %v4371_v58 = vadd.f32 %v4275_v16, %v3982_v38  ;;  %v4599_v17 = vrot.slane %v4466_v13, 1  ;;  %v2036_v15 = vld [vmem:[#allocation2 + $0x88] sm:$0x1]  ;;  %v9930_v1 = vld [vmem:[%s10120_s4] ss:$0 sm:$0xff] }
 0x1dc   :  { %v4600_v9 = vrot.slane %v4467_v55, 1  ;;  %v4956_v43 = vmul.f32 %v8217_v11, %v4177_v25  ;;  %v4372_v22 = vadd.f32 %v4276_v54, %v3983_v36  ;;  %v4957_v50 = vmul.f32 %v8217_v11, %v4909_v6 }
 0x1dd   :  { %v4373_v32 = vadd.f32 %v4277_v27, %v3984_v42  ;;  %v5157_v31 = vrot.slane %v4955_v29, 2  ;;  %v4791_v19 = vadd.f32 %v4599_v17, %v4371_v58  ;;  %v437_v46 = vadd.f32 %v8287_v26, %v8120_v41 }
 0x1de   :  { %v4601_v52 = vsel %vm1741_vm6, %v4599_v17, %v4600_v9  ;;  %v5158_v18 = vrot.slane %v4956_v43, 2  ;;  %v5160_v37 = vrot.slane %v4957_v50, 2  ;;  %v1049_v35 = vsel %vm7711_vm5, 0, %v1048_v45  ;;  %v2661_v50 = vld [vmem:[#allocation2 + $0x90] sm:$0x8] }
 0x1df   :  { %v4792_v62 = vadd.f32 %v4601_v52, %v4372_v22  ;;  %v4793_v51 = vadd.f32 %v4600_v9, %v4373_v32  ;;  %v5403_v57 = vadd.f32 %v5157_v31, %v4791_v19  ;;  %v577_v30 = vmax.f32 %v437_v46, 0.0  ;;  %1050 = vst [vmem:[#allocation2 + $0xa4] sm:$0x8] %v1049_v35 }
 0x1e0   :  { %v5159_v44 = vsel %vm2290_vm7, %v5157_v31, %v5158_v18  ;;  %v1145_v25 = vsel %vm7705_vm2, 0, %v1144_v47  ;;  %v5161_v16 = vsel %vm2290_vm7, %v5158_v18, %v5160_v37  ;;  %v1335_v41 = vunpack.c.l.bf16 %v1239_v63  ;;  %v2662_v18 = vld [vmem:[#allocation2 + $0x94] sm:$0xff]  }
 0x1e1   :  { %v5404_v39 = vadd.f32 %v5159_v44, %v4792_v62  ;;  %1146 = vst [vmem:[#allocation2 + $0xb0] sm:$0x1] %v1145_v25  ;;  %v1436_v48 = vmul.f32 %v8256_v40, %v7757_v34  ;;  %v5405_v49 = vadd.f32 %v5161_v16, %v4793_v51  ;;  %v5506_v10 = vadd.f32 %v8359_v20, %v5403_v57 }
 0x1e2   :  { %v8362_v61 = vmin.f32 %v577_v30, 6.0  ;;  %v1437_v54 = vmul.f32 %v8263_v56, %v7757_v34  ;;  %v1435_v2 = vmul.f32 %v7757_v34, %v1335_v41  ;;  %v1625_v38 = vmul.f32 %v8256_v40, %v7745_v24 }
 0x1e3   :  { %v5507_v27 = vadd.f32 %v8359_v20, %v5404_v39  ;;  %v1626_v13 = vmul.f32 %v8263_v56, %v7745_v24  ;;  %v5508_v55 = vadd.f32 %v8359_v20, %v5405_v49  ;;  %v5602_v36 = vmax.f32 %v5506_v10, 0.0  ;;  %v3457_v49 = vld [vmem:[#allocation2 + $0x9c] sm:$0x1] }
 0x1e4   :  { %v2068_v42 = vunpack.c.l.bf16 %v2036_v15  ;;  %v2116_v6 = vmul.f32 %v8256_v40, %v7754_v33  ;;  %v1760_v58 = vrot.slane %v1625_v38, 1  ;;  %v2117_v9 = vmul.f32 %v8263_v56, %v7754_v33 }
 0x1e5   :  { %v5603_v29 = vmax.f32 %v5507_v27, 0.0  ;;  %v1761_v17 = vrot.slane %v1626_v13, 1  ;;  %v5604_v43 = vmax.f32 %v5508_v55, 0.0  ;;  %v5698_v45 = vmin.f32 %v5602_v36, 6.0 }
 0x1e6   :  { %v2118_v22 = vmul.f32 %v7754_v33, %v2068_v42  ;;  %v2321_v32 = vrot.slane %v2116_v6, 2  ;;  %v1952_v52 = vadd.f32 %v1760_v58, %v1435_v2  ;;  %v2322_v62 = vrot.slane %v2117_v9, 2  ;;  %v7110_v2 = vld [vmem:[#allocation2 + $0xa8] sm:$0xff]   ;;  %v4082_v42 = vld [vmem:[#allocation2 + $0xa4] sm:$0x8] }
 0x1e7   :  { %v5699_v31 = vmin.f32 %v5603_v29, 6.0  ;;  %v1762_v47 = vsel %vm1741_vm6, %v1760_v58, %v1761_v17  ;;  %v1954_v19 = vadd.f32 %v1761_v17, %v1437_v54  ;;  %v5700_v46 = vmin.f32 %v5604_v43, 6.0 }
 0x1e8   :  { %v5901_v40 = vrot.slane %v5698_v45, 7  ;;  %v1953_v63 = vadd.f32 %v1762_v47, %v1436_v48  ;;  %v2324_v37 = vrot.slane %v2118_v22, 2  ;;  %v2565_v35 = vadd.f32 %v2321_v32, %v1952_v52 }
 0x1e9   :  { %v5902_v51 = vrot.slane %v5699_v31, 7  ;;  %v2757_v56 = vunpack.c.l.bf16 %v2661_v50  ;;  %v5904_v44 = vrot.slane %v5700_v46, 7  ;;  %v2323_v57 = vsel %vm2290_vm7, %v2321_v32, %v2322_v62 }
 0x1ea   :  { %v2758_v30 = vunpack.c.l.bf16 %v2662_v18  ;;  %v2759_v25 = vunpack.c.h.bf16 %v2662_v18  ;;  %v2325_v39 = vsel %vm2290_vm7, %v2322_v62, %v2324_v37  ;;  %v2566_v41 = vadd.f32 %v2323_v57, %v1953_v63 }
 0x1eb   :  { %v5903_v16 = vsel %vm996_vm0, %v5901_v40, %v5902_v51  ;;  %v2857_v15 = vmul.f32 %v7772_v60, %v2757_v56  ;;  %v5905_v48 = vsel %vm996_vm0, %v5902_v51, %v5904_v44  ;;  %v2567_v10 = vadd.f32 %v2325_v39, %v1954_v19  ;;  %v4878_v40 = vld [vmem:[#allocation2 + $0xb0] sm:$0x1] }
 0x1ec   :  { %v2858_v54 = vmul.f32 %v7772_v60, %v2758_v30  ;;  %v2859_v27 = vmul.f32 %v7772_v60, %v2759_v25  ;;  %v6105_v38 = vpack.c.bf16 %v5905_v48, %v5903_v16  ;;  %v3047_v55 = vmul.f32 %v7786_v12, %v2758_v30 }
 0x1ed   :  { %v2953_v13 = vadd.f32 %v2857_v15, %v2565_v35  ;;  %v3048_v36 = vmul.f32 %v7786_v12, %v2759_v25  ;;  %v3489_v58 = vunpack.c.l.bf16 %v3457_v49  ;;  %v3537_v17 = vmul.f32 %v7778_v3, %v2758_v30  ;;  %v8404_v30 = vpop.f32.mrb[45].mxu0 }
 0x1ee   :  { %v2954_v6 = vadd.f32 %v2858_v54, %v2566_v41  ;;  %v2955_v29 = vadd.f32 %v2859_v27, %v2567_v10  ;;  %7308 = vmatmul.mubr.bf16.gmra.mrb[8].mxu1 %v6105_v38  ;;  %v3181_v9 = vrot.slane %v3047_v55, 1  ;;  %v3538_v45 = vmul.f32 %v7778_v3, %v2759_v25  ;;  %v8409_v15 = vpop.f32.mrb[46].mxu0 }
 0x1ef   :  { %v3182_v43 = vrot.slane %v3048_v36, 1  ;;  %v8390_v22 = vunpack.c.l.bf16 %v7110_v2  ;;  %v3539_v32 = vmul.f32 %v7778_v3, %v3489_v58  ;;  %v3741_v50 = vrot.slane %v3537_v17, 2  ;;  %v8413_v27 = vpop.f32.mrb[47].mxu0 }
 0x1f0   :  { %v8393_v31 = vunpack.c.h.bf16 %v7110_v2  ;;  %v4178_v47 = vunpack.c.l.bf16 %v4082_v42  ;;  %v3373_v19 = vadd.f32 %v3181_v9, %v2953_v13  ;;  %v3742_v46 = vrot.slane %v3538_v45, 2 }
 0x1f1   :  { %v3183_v52 = vsel %vm1741_vm6, %v3181_v9, %v3182_v43  ;;  %v3375_v18 = vadd.f32 %v3182_v43, %v2955_v29  ;;  %v3744_v62 = vrot.slane %v3539_v32, 2  ;;  %v4279_v37 = vmul.f32 %v8390_v22, %v7795_v21 }
 0x1f2   :  { %v3374_v63 = vadd.f32 %v3183_v52, %v2954_v6  ;;  %v4278_v51 = vmul.f32 %v7795_v21, %v4178_v47  ;;  %v3743_v35 = vsel %vm2290_vm7, %v3741_v50, %v3742_v46  ;;  %v3985_v56 = vadd.f32 %v3741_v50, %v3373_v19  ;;  %v1051_v52 = vld [vmem:[#allocation2 + $0xb8] sm:$0x8]  ;;  %v1147_v19 = vld [vmem:[#allocation2 + $0xc4] sm:$0x1] }
 0x1f3   :  { %v4280_v44 = vmul.f32 %v8393_v31, %v7795_v21  ;;  %v4468_v57 = vmul.f32 %v8390_v22, %v7798_v23  ;;  %v3745_v25 = vsel %vm2290_vm7, %v3742_v46, %v3744_v62  ;;  %v4469_v39 = vmul.f32 %v8393_v31, %v7798_v23 }
 0x1f4   :  { %v3986_v16 = vadd.f32 %v3743_v35, %v3374_v63  ;;  %v4910_v41 = vunpack.c.l.bf16 %v4878_v40  ;;  %v3987_v49 = vadd.f32 %v3745_v25, %v3375_v18  ;;  %v4374_v48 = vadd.f32 %v4278_v51, %v3985_v56  ;;  %v1243_v35 = vld [vmem:[#allocation2 + $0x94] sm:$0xff]  }
 0x1f5   :  { %v4602_v10 = vrot.slane %v4468_v57, 1  ;;  %v4958_v54 = vmul.f32 %v8217_v11, %v8390_v22  ;;  %v4603_v38 = vrot.slane %v4469_v39, 1  ;;  %v4959_v13 = vmul.f32 %v8217_v11, %v8393_v31 }
 0x1f6   :  { %v4375_v2 = vadd.f32 %v4279_v37, %v3986_v16  ;;  %v4960_v55 = vmul.f32 %v8217_v11, %v4910_v41  ;;  %v4376_v36 = vadd.f32 %v4280_v44, %v3987_v49  ;;  %v429_v29 = vadd.f32 %v8287_v26, %v8122_v8 }
 0x1f7   :  { %v4794_v42 = vadd.f32 %v4602_v10, %v4374_v48  ;;  %v5162_v6 = vrot.slane %v4958_v54, 2  ;;  %v4604_v58 = vsel %vm1741_vm6, %v4602_v10, %v4603_v38  ;;  %v5163_v17 = vrot.slane %v4959_v13, 2 }
 0x1f8   :  { %v5165_v9 = vrot.slane %v4960_v55, 2  ;;  %v440_v43 = vadd.f32 %v8287_v26, %v8127_v53  ;;  %v4795_v45 = vadd.f32 %v4604_v58, %v4375_v2  ;;  %v4796_v32 = vadd.f32 %v4603_v38, %v4376_v36  ;;  %v1242_v53 = vld [vmem:[#allocation2 + $0x90] sm:$0x8]  ;;  %v2037_v36 = vld [vmem:[#allocation2 + $0x9c] sm:$0x1] }
 0x1f9   :  { %v5406_v50 = vadd.f32 %v5162_v6, %v4794_v42  ;;  %v575_v47 = vmax.f32 %v429_v29, 0.0  ;;  %v5164_v18 = vsel %vm2290_vm7, %v5162_v6, %v5163_v17  ;;  %v432_v8 = vadd.f32 %v8287_v26, %v8131_v28 }
 0x1fa   :  { %v5166_v46 = vsel %vm2290_vm7, %v5163_v17, %v5165_v9  ;;  %v578_v40 = vmax.f32 %v440_v43, 0.0  ;;  %v5407_v63 = vadd.f32 %v5164_v18, %v4795_v45  ;;  %v1052_v57 = vsel %vm7711_vm5, 0, %v1051_v52  ;;  %v2664_v17 = vld [vmem:[#allocation2 + $0xa4] sm:$0x8] }
 0x1fb   :  { %v5408_v62 = vadd.f32 %v5166_v46, %v4796_v32  ;;  %v5509_v51 = vadd.f32 %v8359_v20, %v5406_v50  ;;  %v639_v37 = vmin.f32 %v575_v47, 6.0  ;;  %v576_v44 = vmax.f32 %v432_v8, 0.0  ;;  %1053 = vst [vmem:[#allocation2 + $0xb8] sm:$0x8] %v1052_v57 }
 0x1fc   :  { %v642_v56 = vmin.f32 %v578_v40, 6.0  ;;  %v1148_v25 = vsel %vm7705_vm2, 0, %v1147_v19  ;;  %v5510_v16 = vadd.f32 %v8359_v20, %v5407_v63  ;;  %v1338_v10 = vunpack.c.l.bf16 %v1242_v53 }
 0x1fd   :  { %v5511_v39 = vadd.f32 %v8359_v20, %v5408_v62  ;;  %v5605_v28 = vmax.f32 %v5509_v51, 0.0  ;;  %v6759_v41 = vpack.c.bf16 %v639_v37, %v639_v37  ;;  %1149 = vst [vmem:[#allocation2 + $0xc4] sm:$0x1] %v1148_v25  ;;  %v640_v48 = vmin.f32 %v576_v44, 6.0 }
 0x1fe   :  { %v6835_v49 = vpack.c.bf16 %v642_v56, %v8362_v61  ;;  %v1339_v54 = vunpack.c.l.bf16 %v1243_v35  ;;  %v5606_v2 = vmax.f32 %v5510_v16, 0.0  ;;  %v1340_v55 = vunpack.c.h.bf16 %v1243_v35 }
 0x1ff   :  { %v5607_v38 = vmax.f32 %v5511_v39, 0.0  ;;  %v5701_v13 = vmin.f32 %v5605_v28, 6.0  ;;  %960 = vst [vmem:[#allocation2 + $0x1ac] sm:$0xf] %v6759_v41  ;;  %v6760_v42 = vpack.c.bf16 %v640_v48, %v640_v48  ;;  %v1438_v6 = vmul.f32 %v7757_v34, %v1338_v10  ;;  %v3458_v39 = vld [vmem:[#allocation2 + $0xb0] sm:$0x1] }
 0x200   :  { %7068 = vst [vmem:[#allocation2 + $0x1c0] sm:$0xff] %v6835_v49   ;;  %v1439_v29 = vmul.f32 %v7757_v34, %v1339_v54  ;;  %v1627_v58 = vmul.f32 %v7745_v24, %v1339_v54  ;;  %v5702_v9 = vmin.f32 %v5606_v2, 6.0  ;;  %v1440_v45 = vmul.f32 %v7757_v34, %v1340_v55 }
 0x201   :  { %v5703_v61 = vmin.f32 %v5607_v38, 6.0  ;;  %v5906_v43 = vrot.slane %v5701_v13, 7  ;;  %961 = vst [vmem:[#allocation2 + $0x1b0] sm:$0xf] %v6760_v42  ;;  %v1628_v32 = vmul.f32 %v7745_v24, %v1340_v55  ;;  %v2069_v47 = vunpack.c.l.bf16 %v2037_v36 }
 0x202   :  { %v1763_v50 = vrot.slane %v1627_v58, 1  ;;  %v2119_v52 = vmul.f32 %v7754_v33, %v1339_v54  ;;  %v5907_v19 = vrot.slane %v5702_v9, 7  ;;  %v2120_v46 = vmul.f32 %v7754_v33, %v1340_v55  ;;  %v4085_v13 = vld [vmem:[#allocation2 + $0xb8] sm:$0x8] }
 0x203   :  { %v5909_v18 = vrot.slane %v5703_v61, 7  ;;  %v2760_v40 = vunpack.c.l.bf16 %v2664_v17  ;;  %v1764_v8 = vrot.slane %v1628_v32, 1  ;;  %v2121_v62 = vmul.f32 %v7754_v33, %v2069_v47  ;;  %v4086_v61 = vld [vmem:[#allocation2 + $0xbc] sm:$0xff]  }
 0x204   :  { %v1955_v63 = vadd.f32 %v1763_v50, %v1438_v6  ;;  %v2326_v51 = vrot.slane %v2119_v52, 2  ;;  %v5908_v37 = vsel %vm996_vm0, %v5906_v43, %v5907_v19  ;;  %v2327_v35 = vrot.slane %v2120_v46, 2 }
 0x205   :  { %v5910_v53 = vsel %vm996_vm0, %v5907_v19, %v5909_v18  ;;  %v2860_v56 = vmul.f32 %v7772_v60, %v2760_v40  ;;  %v1765_v57 = vsel %vm1741_vm6, %v1763_v50, %v1764_v8  ;;  %v1957_v25 = vadd.f32 %v1764_v8, %v1440_v45 }
 0x206   :  { %v6106_v44 = vpack.c.bf16 %v5910_v53, %v5908_v37  ;;  %v2329_v16 = vrot.slane %v2121_v62, 2  ;;  %v1956_v28 = vadd.f32 %v1765_v57, %v1439_v29  ;;  %v2328_v41 = vsel %vm2290_vm7, %v2326_v51, %v2327_v35 }
 0x207   :  { %v2568_v49 = vadd.f32 %v2326_v51, %v1955_v63  ;;  %v2861_v48 = vmul.f32 %v8390_v22, %v7772_v60  ;;  %v2862_v54 = vmul.f32 %v8393_v31, %v7772_v60  ;;  %v3049_v2 = vmul.f32 %v8390_v22, %v7786_v12 }
 0x208   :  { %7311 = vmatprep.mubr.bf16.mxu1 %v6106_v44  ;;  %v2330_v10 = vsel %vm2290_vm7, %v2327_v35, %v2329_v16  ;;  %v3050_v38 = vmul.f32 %v8393_v31, %v7786_v12  ;;  %v2569_v55 = vadd.f32 %v2328_v41, %v1956_v28  ;;  %v3490_v6 = vunpack.c.l.bf16 %v3458_v39  ;;  %v4879_v35 = vld [vmem:[#allocation2 + $0xc4] sm:$0x1]  ;;  %v8468_v16 = vpop.f32.mrb[48].mxu0 }
 0x209   :  { %v2570_v36 = vadd.f32 %v2330_v10, %v1957_v25  ;;  %v2956_v42 = vadd.f32 %v2860_v56, %v2568_v49  ;;  %v3184_v29 = vrot.slane %v3049_v2, 1  ;;  %v3540_v17 = vmul.f32 %v8390_v22, %v7778_v3 }
 0x20a   :  { %v3185_v58 = vrot.slane %v3050_v38, 1  ;;  %v3541_v9 = vmul.f32 %v8393_v31, %v7778_v3  ;;  %v2957_v43 = vadd.f32 %v2861_v48, %v2569_v55  ;;  %v3542_v32 = vmul.f32 %v7778_v3, %v3490_v6  ;;  %v1054_v48 = vld [vmem:[#allocation2 + $0xcc] sm:$0x8]  ;;  %v1150_v6 = vld [vmem:[#allocation2 + $0xd8] sm:$0x1] }
 0x20b   :  { %v2958_v45 = vadd.f32 %v2862_v54, %v2570_v36  ;;  %v4181_v50 = vunpack.c.l.bf16 %v4085_v13  ;;  %v3376_v52 = vadd.f32 %v3184_v29, %v2956_v42  ;;  %v3746_v19 = vrot.slane %v3540_v17, 2 }
 0x20c   :  { %v3186_v47 = vsel %vm1741_vm6, %v3184_v29, %v3185_v58  ;;  %v3747_v18 = vrot.slane %v3541_v9, 2  ;;  %v3749_v8 = vrot.slane %v3542_v32, 2  ;;  %v4182_v63 = vunpack.c.l.bf16 %v4086_v61 }
 0x20d   :  { %v3377_v46 = vadd.f32 %v3186_v47, %v2957_v43  ;;  %v3378_v40 = vadd.f32 %v3185_v58, %v2958_v45  ;;  %v3988_v51 = vadd.f32 %v3746_v19, %v3376_v52  ;;  %v4183_v37 = vunpack.c.h.bf16 %v4086_v61  ;;  %v1245_v61 = vld [vmem:[#allocation2 + $0xa4] sm:$0x8] }
 0x20e   :  { %v3748_v62 = vsel %vm2290_vm7, %v3746_v19, %v3747_v18  ;;  %v4281_v53 = vmul.f32 %v7795_v21, %v4181_v50  ;;  %v3750_v56 = vsel %vm2290_vm7, %v3747_v18, %v3749_v8  ;;  %v4282_v57 = vmul.f32 %v7795_v21, %v4182_v63  ;;  %v2038_v8 = vld [vmem:[#allocation2 + $0xb0] sm:$0x1] }
 0x20f   :  { %v3989_v44 = vadd.f32 %v3748_v62, %v3377_v46  ;;  %v4470_v25 = vmul.f32 %v7798_v23, %v4182_v63  ;;  %v3990_v39 = vadd.f32 %v3750_v56, %v3378_v40  ;;  %v4283_v28 = vmul.f32 %v7795_v21, %v4183_v37 }
 0x210   :  { %v4377_v41 = vadd.f32 %v4281_v53, %v3988_v51  ;;  %v4471_v49 = vmul.f32 %v7798_v23, %v4183_v37  ;;  %v4911_v2 = vunpack.c.l.bf16 %v4879_v35  ;;  %v4961_v38 = vmul.f32 %v8217_v11, %v4182_v63 }
 0x211   :  { %v4378_v10 = vadd.f32 %v4282_v57, %v3989_v44  ;;  %v4605_v54 = vrot.slane %v4470_v25, 1  ;;  %v4379_v13 = vadd.f32 %v4283_v28, %v3990_v39  ;;  %v4962_v36 = vmul.f32 %v8217_v11, %v4183_v37 }
 0x212   :  { %v4606_v55 = vrot.slane %v4471_v49, 1  ;;  %v453_v42 = vadd.f32 %v8287_v26, %v8194_v5  ;;  %v4963_v58 = vmul.f32 %v8217_v11, %v4911_v2  ;;  %v5167_v17 = vrot.slane %v4961_v38, 2 }
 0x213   :  { %v4797_v29 = vadd.f32 %v4605_v54, %v4377_v41  ;;  %v1055_v9 = vsel %vm7711_vm5, 0, %v1054_v48  ;;  %v5168_v32 = vrot.slane %v4962_v36, 2  ;;  %v1151_v5 = vsel %vm7705_vm2, 0, %v1150_v6 }
 0x214   :  { %v4607_v43 = vsel %vm1741_vm6, %v4605_v54, %v4606_v55  ;;  %v4799_v45 = vadd.f32 %v4606_v55, %v4379_v13  ;;  %v581_v50 = vmax.f32 %v453_v42, 0.0  ;;  %1056 = vst [vmem:[#allocation2 + $0xcc] sm:$0x8] %v1055_v9  ;;  %v5170_v52 = vrot.slane %v4963_v58, 2  ;;  %1152 = vst [vmem:[#allocation2 + $0xd8] sm:$0x1] %v1151_v5 }
 0x215   :  { %v4798_v47 = vadd.f32 %v4607_v43, %v4378_v10  ;;  %v5409_v19 = vadd.f32 %v5167_v17, %v4797_v29  ;;  %v5169_v18 = vsel %vm2290_vm7, %v5167_v17, %v5168_v32  ;;  %v1341_v46 = vunpack.c.l.bf16 %v1245_v61  ;;  %v2667_v55 = vld [vmem:[#allocation2 + $0xb8] sm:$0x8]  ;;  %v2668_v58 = vld [vmem:[#allocation2 + $0xbc] sm:$0xff]  }
 0x216   :  { %v8483_v11 = vmin.f32 %v581_v50, 6.0  ;;  %v1442_v40 = vmul.f32 %v8390_v22, %v7757_v34  ;;  %v5171_v63 = vsel %vm2290_vm7, %v5168_v32, %v5170_v52  ;;  %v1443_v37 = vmul.f32 %v8393_v31, %v7757_v34 }
 0x217   :  { %v5410_v62 = vadd.f32 %v5169_v18, %v4798_v47  ;;  %v5512_v51 = vadd.f32 %v8359_v20, %v5409_v19  ;;  %v5411_v53 = vadd.f32 %v5171_v63, %v4799_v45  ;;  %v1441_v35 = vmul.f32 %v7757_v34, %v1341_v46  ;;  %v3459_v63 = vld [vmem:[#allocation2 + $0xc4] sm:$0x1] }
 0x218   :  { %v1629_v56 = vmul.f32 %v8390_v22, %v7745_v24  ;;  %v1630_v44 = vmul.f32 %v8393_v31, %v7745_v24  ;;  %v2070_v39 = vunpack.c.l.bf16 %v2038_v8  ;;  %v2122_v28 = vmul.f32 %v8390_v22, %v7754_v33 }
 0x219   :  { %v5513_v57 = vadd.f32 %v8359_v20, %v5410_v62  ;;  %v5608_v25 = vmax.f32 %v5512_v51, 0.0  ;;  %v5514_v41 = vadd.f32 %v8359_v20, %v5411_v53  ;;  %v2123_v10 = vmul.f32 %v8393_v31, %v7754_v33 }
 0x21a   :  { %v1766_v49 = vrot.slane %v1629_v56, 1  ;;  %v1767_v48 = vrot.slane %v1630_v44, 1  ;;  %v2124_v38 = vmul.f32 %v7754_v33, %v2070_v39  ;;  %v2331_v13 = vrot.slane %v2122_v28, 2 }
 0x21b   :  { %v5609_v54 = vmax.f32 %v5513_v57, 0.0  ;;  %v5704_v2 = vmin.f32 %v5608_v25, 6.0  ;;  %v5610_v36 = vmax.f32 %v5514_v41, 0.0  ;;  %v2332_v61 = vrot.slane %v2123_v10, 2  ;;  %v4088_v57 = vld [vmem:[#allocation2 + $0xcc] sm:$0x8] }
 0x21c   :  { %v1768_v42 = vsel %vm1741_vm6, %v1766_v49, %v1767_v48  ;;  %v1958_v6 = vadd.f32 %v1766_v49, %v1441_v35  ;;  %v1960_v29 = vadd.f32 %v1767_v48, %v1443_v37  ;;  %v2334_v45 = vrot.slane %v2124_v38, 2  ;;  %v7111_v25 = vld [vmem:[#allocation2 + $0xd0] sm:$0xff]  }
 0x21d   :  { %v5705_v22 = vmin.f32 %v5609_v54, 6.0  ;;  %v5911_v17 = vrot.slane %v5704_v2, 7  ;;  %v1959_v9 = vadd.f32 %v1768_v42, %v1442_v40  ;;  %v5706_v43 = vmin.f32 %v5610_v36, 6.0 }
 0x21e   :  { %v2571_v32 = vadd.f32 %v2331_v13, %v1958_v6  ;;  %v2763_v31 = vunpack.c.l.bf16 %v2667_v55  ;;  %v2333_v47 = vsel %vm2290_vm7, %v2331_v13, %v2332_v61  ;;  %v2764_v52 = vunpack.c.l.bf16 %v2668_v58 }
 0x21f   :  { %v5912_v50 = vrot.slane %v5705_v22, 7  ;;  %v2765_v19 = vunpack.c.h.bf16 %v2668_v58  ;;  %v5914_v5 = vrot.slane %v5706_v43, 7  ;;  %v2335_v18 = vsel %vm2290_vm7, %v2332_v61, %v2334_v45  ;;  %v4880_v22 = vld [vmem:[#allocation2 + $0xd8] sm:$0x1] }
 0x220   :  { %v2572_v46 = vadd.f32 %v2333_v47, %v1959_v9  ;;  %v2863_v8 = vmul.f32 %v7772_v60, %v2763_v31  ;;  %v2573_v40 = vadd.f32 %v2335_v18, %v1960_v29  ;;  %v2864_v51 = vmul.f32 %v7772_v60, %v2764_v52  ;;  %v8528_v47 = vpop.f32.mrb[49].mxu0 }
 0x221   :  { %v5913_v62 = vsel %vm996_vm0, %v5911_v17, %v5912_v50  ;;  %v2865_v37 = vmul.f32 %v7772_v60, %v2765_v19  ;;  %v5915_v53 = vsel %vm996_vm0, %v5912_v50, %v5914_v5  ;;  %v3051_v56 = vmul.f32 %v7786_v12, %v2764_v52 }
 0x222   :  { %v2959_v35 = vadd.f32 %v2863_v8, %v2571_v32  ;;  %v3052_v44 = vmul.f32 %v7786_v12, %v2765_v19  ;;  %v6107_v39 = vpack.c.bf16 %v5915_v53, %v5913_v62  ;;  %v2960_v28 = vadd.f32 %v2864_v51, %v2572_v46  ;;  %v8534_v46 = vpop.f32.mrb[50].mxu0  ;;  %v8538_v53 = vld [vmem:[#allocation8 + $0x8] ss:$0 sm:$0xff] }
 0x223   :  { %v2961_v41 = vadd.f32 %v2865_v37, %v2573_v40  ;;  %v3491_v49 = vunpack.c.l.bf16 %v3459_v63  ;;  %v3187_v48 = vrot.slane %v3051_v56, 1  ;;  %v3543_v54 = vmul.f32 %v7778_v3, %v2764_v52  ;;  %v8536_v51 = vpop.f32.mrb[51].mxu0 }
 0x224   :  { %v3188_v10 = vrot.slane %v3052_v44, 1  ;;  %v3544_v2 = vmul.f32 %v7778_v3, %v2765_v19  ;;  %7312 = vmatmul.mubr.bf16.gmra.mrb[12].mxu1 %v6107_v39  ;;  %v8516_v13 = vunpack.c.l.bf16 %v7111_v25  ;;  %v8518_v55 = vunpack.c.h.bf16 %v7111_v25 }
 0x225   :  { %v3545_v38 = vmul.f32 %v7778_v3, %v3491_v49  ;;  %v4184_v36 = vunpack.c.l.bf16 %v4088_v57  ;;  %v3379_v6 = vadd.f32 %v3187_v48, %v2959_v35  ;;  %v3751_v58 = vrot.slane %v3543_v54, 2 }
 0x226   :  { %v3189_v42 = vsel %vm1741_vm6, %v3187_v48, %v3188_v10  ;;  %v3381_v29 = vadd.f32 %v3188_v10, %v2961_v41  ;;  %v3752_v9 = vrot.slane %v3544_v2, 2  ;;  %v4285_v32 = vmul.f32 %v8516_v13, %v7795_v21 }
 0x227   :  { %v3380_v17 = vadd.f32 %v3189_v42, %v2960_v28  ;;  %v3754_v61 = vrot.slane %v3545_v38, 2  ;;  %v4284_v43 = vmul.f32 %v7795_v21, %v4184_v36  ;;  %v3991_v45 = vadd.f32 %v3751_v58, %v3379_v6  ;;  %v1057_v42 = vld [vmem:[#allocation2 + $0xe0] sm:$0x8]  ;;  %v1153_v6 = vld [vmem:[#allocation2 + $0xec] sm:$0x1] }
 0x228   :  { %v4286_v31 = vmul.f32 %v8518_v55, %v7795_v21  ;;  %v4472_v50 = vmul.f32 %v8516_v13, %v7798_v23  ;;  %v3753_v52 = vsel %vm2290_vm7, %v3751_v58, %v3752_v9  ;;  %v4473_v5 = vmul.f32 %v8518_v55, %v7798_v23 }
 0x229   :  { %v3755_v19 = vsel %vm2290_vm7, %v3752_v9, %v3754_v61  ;;  %v4912_v18 = vunpack.c.l.bf16 %v4880_v22  ;;  %v3992_v8 = vadd.f32 %v3753_v52, %v3380_v17  ;;  %v4380_v62 = vadd.f32 %v4284_v43, %v3991_v45  ;;  %v1248_v45 = vld [vmem:[#allocation2 + $0xb8] sm:$0x8] }
 0x22a   :  { %v3993_v63 = vadd.f32 %v3755_v19, %v3381_v29  ;;  %v4608_v40 = vrot.slane %v4472_v50, 1  ;;  %v4609_v37 = vrot.slane %v4473_v5, 1  ;;  %v4964_v35 = vmul.f32 %v8538_v53, %v8516_v13 }
 0x22b   :  { %v4965_v56 = vmul.f32 %v8538_v53, %v8518_v55  ;;  %v4966_v44 = vmul.f32 %v8538_v53, %v4912_v18  ;;  %v4381_v57 = vadd.f32 %v4285_v32, %v3992_v8  ;;  %v445_v28 = vadd.f32 %v8287_v26, %v8258_v4  ;;  %v1249_v32 = vld [vmem:[#allocation2 + $0xbc] sm:$0xff]  }
 0x22c   :  { %v4382_v25 = vadd.f32 %v4286_v31, %v3993_v63  ;;  %v4800_v39 = vadd.f32 %v4608_v40, %v4380_v62  ;;  %v4610_v41 = vsel %vm1741_vm6, %v4608_v40, %v4609_v37  ;;  %v5172_v49 = vrot.slane %v4964_v35, 2 }
 0x22d   :  { %v5173_v48 = vrot.slane %v4965_v56, 2  ;;  %v5175_v10 = vrot.slane %v4966_v44, 2  ;;  %v4801_v54 = vadd.f32 %v4610_v41, %v4381_v57  ;;  %v579_v38 = vmax.f32 %v445_v28, 0.0  ;;  %v2039_v44 = vld [vmem:[#allocation2 + $0xc4] sm:$0x1] }
 0x22e   :  { %v4802_v2 = vadd.f32 %v4609_v37, %v4382_v25  ;;  %v456_v36 = vadd.f32 %v8287_v26, %v8260_v0  ;;  %v5412_v22 = vadd.f32 %v5172_v49, %v4800_v39  ;;  %v448_v4 = vadd.f32 %v8287_v26, %v8267_v7 }
 0x22f   :  { %v5174_v29 = vsel %vm2290_vm7, %v5172_v49, %v5173_v48  ;;  %v5176_v58 = vsel %vm2290_vm7, %v5173_v48, %v5175_v10  ;;  %v643_v61 = vmin.f32 %v579_v38, 6.0  ;;  %v1058_v0 = vsel %vm7711_vm5, 0, %v1057_v42 }
 0x230   :  { %v5413_v17 = vadd.f32 %v5174_v29, %v4801_v54  ;;  %v5414_v9 = vadd.f32 %v5176_v58, %v4802_v2  ;;  %v582_v43 = vmax.f32 %v456_v36, 0.0  ;;  %v5515_v31 = vadd.f32 %v8359_v20, %v5412_v22  ;;  %1059 = vst [vmem:[#allocation2 + $0xe0] sm:$0x8] %v1058_v0  ;;  %v2670_v54 = vld [vmem:[#allocation2 + $0xcc] sm:$0x8] }
 0x231   :  { %v580_v50 = vmax.f32 %v448_v4, 0.0  ;;  %v1154_v52 = vsel %vm7705_vm2, 0, %v1153_v6  ;;  %v6763_v7 = vpack.c.bf16 %v643_v61, %v643_v61  ;;  %v1344_v63 = vunpack.c.l.bf16 %v1248_v45 }
 0x232   :  { %v5516_v19 = vadd.f32 %v8359_v20, %v5413_v17  ;;  %v5517_v5 = vadd.f32 %v8359_v20, %v5414_v9  ;;  %v646_v26 = vmin.f32 %v582_v43, 6.0  ;;  %1155 = vst [vmem:[#allocation2 + $0xec] sm:$0x1] %v1154_v52  ;;  %v5611_v18 = vmax.f32 %v5515_v31, 0.0 }
 0x233   :  { %v644_v8 = vmin.f32 %v580_v50, 6.0  ;;  %v1345_v62 = vunpack.c.l.bf16 %v1249_v32  ;;  %964 = vst [vmem:[#allocation2 + $0x1d4] sm:$0xf] %v6763_v7  ;;  %v1346_v56 = vunpack.c.h.bf16 %v1249_v32  ;;  %v1444_v39 = vmul.f32 %v7757_v34, %v1344_v63 }
 0x234   :  { %v5612_v40 = vmax.f32 %v5516_v19, 0.0  ;;  %v5613_v37 = vmax.f32 %v5517_v5, 0.0  ;;  %v6840_v35 = vpack.c.bf16 %v646_v26, %v8483_v11  ;;  %v5707_v57 = vmin.f32 %v5611_v18, 6.0  ;;  %v3460_v18 = vld [vmem:[#allocation2 + $0xd8] sm:$0x1] }
 0x235   :  { %v6764_v25 = vpack.c.bf16 %v644_v8, %v644_v8  ;;  %v1445_v28 = vmul.f32 %v7757_v34, %v1345_v62  ;;  %v1446_v48 = vmul.f32 %v7757_v34, %v1346_v56  ;;  %v1631_v10 = vmul.f32 %v7745_v24, %v1345_v62 }
 0x236   :  { %v5708_v41 = vmin.f32 %v5612_v40, 6.0  ;;  %v5709_v49 = vmin.f32 %v5613_v37, 6.0  ;;  %7069 = vst [vmem:[#allocation2 + $0x1e8] sm:$0xff] %v6840_v35   ;;  %v5916_v2 = vrot.slane %v5707_v57, 7  ;;  %v1632_v11 = vmul.f32 %v7745_v24, %v1346_v56 }
 0x237   :  { %965 = vst [vmem:[#allocation2 + $0x1d8] sm:$0xf] %v6764_v25  ;;  %v2071_v38 = vunpack.c.l.bf16 %v2039_v44  ;;  %v2125_v36 = vmul.f32 %v7754_v33, %v1345_v62  ;;  %v1769_v29 = vrot.slane %v1631_v10, 1  ;;  %v2126_v58 = vmul.f32 %v7754_v33, %v1346_v56  ;;  %v4091_v37 = vld [vmem:[#allocation2 + $0xe0] sm:$0x8] }
 0x238   :  { %v5917_v42 = vrot.slane %v5708_v41, 7  ;;  %v5919_v6 = vrot.slane %v5709_v49, 7  ;;  %v1770_v22 = vrot.slane %v1632_v11, 1  ;;  %v2766_v9 = vunpack.c.l.bf16 %v2670_v54  ;;  %v4092_v49 = vld [vmem:[#allocation2 + $0xe4] sm:$0xff]  }
 0x239   :  { %v2127_v4 = vmul.f32 %v7754_v33, %v2071_v38  ;;  %v2336_v17 = vrot.slane %v2125_v36, 2  ;;  %v1961_v45 = vadd.f32 %v1769_v29, %v1444_v39  ;;  %v2337_v32 = vrot.slane %v2126_v58, 2 }
 0x23a   :  { %v5918_v61 = vsel %vm996_vm0, %v5916_v2, %v5917_v42  ;;  %v5920_v43 = vsel %vm996_vm0, %v5917_v42, %v5919_v6  ;;  %v1771_v50 = vsel %vm1741_vm6, %v1769_v29, %v1770_v22  ;;  %v1963_v0 = vadd.f32 %v1770_v22, %v1446_v48 }
 0x23b   :  { %v6108_v31 = vpack.c.bf16 %v5920_v43, %v5918_v61  ;;  %v2339_v52 = vrot.slane %v2127_v4, 2  ;;  %v1962_v19 = vadd.f32 %v1771_v50, %v1445_v28  ;;  %v2338_v5 = vsel %vm2290_vm7, %v2336_v17, %v2337_v32  ;;  %v4881_v4 = vld [vmem:[#allocation2 + $0xec] sm:$0x1] }
 0x23c   :  { %v2574_v7 = vadd.f32 %v2336_v17, %v1961_v45  ;;  %v2866_v26 = vmul.f32 %v7772_v60, %v2766_v9  ;;  %v2867_v63 = vmul.f32 %v8516_v13, %v7772_v60  ;;  %v2868_v62 = vmul.f32 %v8518_v55, %v7772_v60 }
 0x23d   :  { %7315 = vmatprep.mubr.bf16.mxu1 %v6108_v31  ;;  %v2340_v8 = vsel %vm2290_vm7, %v2337_v32, %v2339_v52  ;;  %v3053_v40 = vmul.f32 %v8516_v13, %v7786_v12  ;;  %v2575_v35 = vadd.f32 %v2338_v5, %v1962_v19  ;;  %v3054_v57 = vmul.f32 %v8518_v55, %v7786_v12 }
 0x23e   :  { %v2576_v56 = vadd.f32 %v2340_v8, %v1963_v0  ;;  %v2962_v44 = vadd.f32 %v2866_v26, %v2574_v7  ;;  %v3492_v39 = vunpack.c.l.bf16 %v3460_v18  ;;  %v3546_v28 = vmul.f32 %v8516_v13, %v7778_v3  ;;  %v8595_v0 = vpop.f32.mrb[52].mxu0 }
 0x23f   :  { %v3190_v25 = vrot.slane %v3053_v40, 1  ;;  %v3547_v41 = vmul.f32 %v8518_v55, %v7778_v3  ;;  %v2963_v48 = vadd.f32 %v2867_v63, %v2575_v35  ;;  %v3191_v54 = vrot.slane %v3054_v57, 1 }
 0x240   :  { %v2964_v10 = vadd.f32 %v2868_v62, %v2576_v56  ;;  %v4187_v2 = vunpack.c.l.bf16 %v4091_v37  ;;  %v3548_v38 = vmul.f32 %v7778_v3, %v3492_v39  ;;  %v3756_v36 = vrot.slane %v3546_v28, 2  ;;  %v1060_v62 = vld [vmem:[#allocation2 + $0xf4] sm:$0x8]  ;;  %v8605_v39 = vld [vmem:[%s10118_s2] ss:$0 sm:$0xff] }
 0x241   :  { %v3382_v11 = vadd.f32 %v3190_v25, %v2962_v44  ;;  %v3757_v42 = vrot.slane %v3547_v41, 2  ;;  %v3192_v6 = vsel %vm1741_vm6, %v3190_v25, %v3191_v54  ;;  %v4188_v58 = vunpack.c.l.bf16 %v4092_v49  ;;  %v1156_v41 = vld [vmem:[#allocation2 + $0x100] sm:$0x1] }
 0x242   :  { %v3384_v29 = vadd.f32 %v3191_v54, %v2964_v10  ;;  %v4189_v22 = vunpack.c.h.bf16 %v4092_v49  ;;  %v3383_v17 = vadd.f32 %v3192_v6, %v2963_v48  ;;  %v3759_v61 = vrot.slane %v3548_v38, 2  ;;  %v1251_v49 = vld [vmem:[#allocation2 + $0xcc] sm:$0x8] }
 0x243   :  { %v3758_v9 = vsel %vm2290_vm7, %v3756_v36, %v3757_v42  ;;  %v3994_v43 = vadd.f32 %v3756_v36, %v3382_v11  ;;  %v4287_v45 = vmul.f32 %v7795_v21, %v4187_v2  ;;  %v4288_v32 = vmul.f32 %v7795_v21, %v4188_v58 }
 0x244   :  { %v4289_v31 = vmul.f32 %v7795_v21, %v4189_v22  ;;  %v4474_v50 = vmul.f32 %v7798_v23, %v4188_v58  ;;  %v3760_v52 = vsel %vm2290_vm7, %v3757_v42, %v3759_v61  ;;  %v3995_v19 = vadd.f32 %v3758_v9, %v3383_v17  ;;  %v2040_v61 = vld [vmem:[#allocation2 + $0xd8] sm:$0x1] }
 0x245   :  { %v4475_v5 = vmul.f32 %v7798_v23, %v4189_v22  ;;  %v4913_v7 = vunpack.c.l.bf16 %v4881_v4  ;;  %v3996_v26 = vadd.f32 %v3760_v52, %v3384_v29  ;;  %v4383_v18 = vadd.f32 %v4287_v45, %v3994_v43 }
 0x246   :  { %v4611_v8 = vrot.slane %v4474_v50, 1  ;;  %v4967_v63 = vmul.f32 %v8538_v53, %v4188_v58  ;;  %v4384_v40 = vadd.f32 %v4288_v32, %v3995_v19  ;;  %v4968_v35 = vmul.f32 %v8538_v53, %v4189_v22 }
 0x247   :  { %v4612_v37 = vrot.slane %v4475_v5, 1  ;;  %v4969_v56 = vmul.f32 %v8538_v53, %v4913_v7  ;;  %v4385_v44 = vadd.f32 %v4289_v31, %v3996_v26  ;;  %v469_v28 = vadd.f32 %v8605_v39, %v8337_v14 }
 0x248   :  { %v4803_v57 = vadd.f32 %v4611_v8, %v4383_v18  ;;  %v5177_v25 = vrot.slane %v4967_v63, 2  ;;  %v5178_v10 = vrot.slane %v4968_v35, 2  ;;  %v1061_v2 = vsel %vm7711_vm5, 0, %v1060_v62 }
 0x249   :  { %v4613_v48 = vsel %vm1741_vm6, %v4611_v8, %v4612_v37  ;;  %v5180_v54 = vrot.slane %v4969_v56, 2  ;;  %v4805_v38 = vadd.f32 %v4612_v37, %v4385_v44  ;;  %v585_v42 = vmax.f32 %v469_v28, 0.0  ;;  %1062 = vst [vmem:[#allocation2 + $0xf4] sm:$0x8] %v1061_v2 }
 0x24a   :  { %v4804_v11 = vadd.f32 %v4613_v48, %v4384_v40  ;;  %v5415_v36 = vadd.f32 %v5177_v25, %v4803_v57  ;;  %v5179_v6 = vsel %vm2290_vm7, %v5177_v25, %v5178_v10  ;;  %v1157_v14 = vsel %vm7705_vm2, 0, %v1156_v41  ;;  %v2673_v57 = vld [vmem:[#allocation2 + $0xe0] sm:$0x8]  ;;  %v2674_v48 = vld [vmem:[#allocation2 + $0xe4] sm:$0xff]  }
 0x24b   :  { %v5181_v29 = vsel %vm2290_vm7, %v5178_v10, %v5180_v54  ;;  %v1347_v58 = vunpack.c.l.bf16 %v1251_v49  ;;  %v8617_v9 = vmin.f32 %v585_v42, 6.0  ;;  %1158 = vst [vmem:[#allocation2 + $0x100] sm:$0x1] %v1157_v14  ;;  %v1448_v45 = vmul.f32 %v8516_v13, %v7757_v34 }
 0x24c   :  { %v5416_v22 = vadd.f32 %v5179_v6, %v4804_v11  ;;  %v5417_v4 = vadd.f32 %v5181_v29, %v4805_v38  ;;  %v5518_v17 = vadd.f32 %v8359_v20, %v5415_v36  ;;  %v1449_v32 = vmul.f32 %v8518_v55, %v7757_v34 }
 0x24d   :  { %v1447_v43 = vmul.f32 %v7757_v34, %v1347_v58  ;;  %v1633_v31 = vmul.f32 %v8516_v13, %v7745_v24  ;;  %v1634_v5 = vmul.f32 %v8518_v55, %v7745_v24  ;;  %v2072_v26 = vunpack.c.l.bf16 %v2040_v61  ;;  %v3461_v58 = vld [vmem:[#allocation2 + $0xec] sm:$0x1] }
 0x24e   :  { %v5519_v50 = vadd.f32 %v8359_v20, %v5416_v22  ;;  %v5520_v52 = vadd.f32 %v8359_v20, %v5417_v4  ;;  %v5614_v19 = vmax.f32 %v5518_v17, 0.0  ;;  %v2128_v18 = vmul.f32 %v8516_v13, %v7754_v33 }
 0x24f   :  { %v1772_v7 = vrot.slane %v1633_v31, 1  ;;  %v2129_v8 = vmul.f32 %v8518_v55, %v7754_v33  ;;  %v1773_v37 = vrot.slane %v1634_v5, 1  ;;  %v2130_v56 = vmul.f32 %v7754_v33, %v2072_v26 }
 0x250   :  { %v5615_v63 = vmax.f32 %v5519_v50, 0.0  ;;  %v5616_v62 = vmax.f32 %v5520_v52, 0.0  ;;  %v5710_v40 = vmin.f32 %v5614_v19, 6.0  ;;  %v2341_v20 = vrot.slane %v2128_v18, 2  ;;  %v7112_v50 = vld [vmem:[#allocation2 + $0xf8] sm:$0xff]  }
 0x251   :  { %v1964_v35 = vadd.f32 %v1772_v7, %v1447_v43  ;;  %v2342_v44 = vrot.slane %v2129_v8, 2  ;;  %v1774_v49 = vsel %vm1741_vm6, %v1772_v7, %v1773_v37  ;;  %v1966_v10 = vadd.f32 %v1773_v37, %v1449_v32  ;;  %v4094_v26 = vld [vmem:[#allocation2 + $0xf4] sm:$0x8] }
 0x252   :  { %v5711_v25 = vmin.f32 %v5615_v63, 6.0  ;;  %v5712_v28 = vmin.f32 %v5616_v62, 6.0  ;;  %v5921_v41 = vrot.slane %v5710_v40, 7  ;;  %v1965_v13 = vadd.f32 %v1774_v49, %v1448_v45 }
 0x253   :  { %v2343_v55 = vsel %vm2290_vm7, %v2341_v20, %v2342_v44  ;;  %v2344_v54 = vrot.slane %v2130_v56, 2  ;;  %v2577_v38 = vadd.f32 %v2341_v20, %v1964_v35  ;;  %v2769_v36 = vunpack.c.l.bf16 %v2673_v57 }
 0x254   :  { %v5922_v2 = vrot.slane %v5711_v25, 7  ;;  %v5924_v11 = vrot.slane %v5712_v28, 7  ;;  %v2578_v6 = vadd.f32 %v2343_v55, %v1965_v13  ;;  %v2770_v29 = vunpack.c.l.bf16 %v2674_v48  ;;  %v4882_v13 = vld [vmem:[#allocation2 + $0x100] sm:$0x1] }
 0x255   :  { %v2345_v42 = vsel %vm2290_vm7, %v2342_v44, %v2344_v54  ;;  %v2771_v14 = vunpack.c.h.bf16 %v2674_v48  ;;  %v2869_v61 = vmul.f32 %v7772_v60, %v2769_v36  ;;  %v3493_v5 = vunpack.c.l.bf16 %v3461_v58 }
 0x256   :  { %v5923_v22 = vsel %vm996_vm0, %v5921_v41, %v5922_v2  ;;  %v5925_v4 = vsel %vm996_vm0, %v5922_v2, %v5924_v11  ;;  %v2579_v17 = vadd.f32 %v2345_v42, %v1966_v10  ;;  %v2870_v45 = vmul.f32 %v7772_v60, %v2770_v29  ;;  %v8657_v11 = vpop.f32.mrb[53].mxu0 }
 0x257   :  { %v6109_v43 = vpack.c.bf16 %v5925_v4, %v5923_v22  ;;  %v2871_v32 = vmul.f32 %v7772_v60, %v2771_v14  ;;  %v3055_v31 = vmul.f32 %v7786_v12, %v2770_v29  ;;  %v2965_v52 = vadd.f32 %v2869_v61, %v2577_v38 }
 0x258   :  { %v3056_v19 = vmul.f32 %v7786_v12, %v2771_v14  ;;  %v3549_v7 = vmul.f32 %v7778_v3, %v2770_v29  ;;  %v2966_v18 = vadd.f32 %v2870_v45, %v2578_v6  ;;  %v3550_v62 = vmul.f32 %v7778_v3, %v2771_v14  ;;  %v8666_v29 = vpop.f32.mrb[54].mxu0 }
 0x259   :  { %7316 = vmatmul.mubr.bf16.gmra.mrb[16].mxu1 %v6109_v43  ;;  %v2967_v8 = vadd.f32 %v2871_v32, %v2579_v17  ;;  %v3193_v63 = vrot.slane %v3055_v31, 1  ;;  %v3551_v37 = vmul.f32 %v7778_v3, %v3493_v5  ;;  %v8648_v56 = vunpack.c.l.bf16 %v7112_v50  ;;  %v8668_v17 = vpop.f32.mrb[55].mxu0 }
 0x25a   :  { %v3194_v40 = vrot.slane %v3056_v19, 1  ;;  %v3761_v35 = vrot.slane %v3549_v7, 2  ;;  %v3762_v44 = vrot.slane %v3550_v62, 2  ;;  %v8650_v57 = vunpack.c.h.bf16 %v7112_v50 }
 0x25b   :  { %v3385_v20 = vadd.f32 %v3193_v63, %v2965_v52  ;;  %v4190_v25 = vunpack.c.l.bf16 %v4094_v26  ;;  %v3764_v49 = vrot.slane %v3551_v37, 2  ;;  %v4291_v48 = vmul.f32 %v8648_v56, %v7795_v21 }
 0x25c   :  { %v3195_v28 = vsel %vm1741_vm6, %v3193_v63, %v3194_v40  ;;  %v3387_v41 = vadd.f32 %v3194_v40, %v2967_v8  ;;  %v3763_v55 = vsel %vm2290_vm7, %v3761_v35, %v3762_v44  ;;  %v4292_v36 = vmul.f32 %v8650_v57, %v7795_v21  ;;  %v1063_v8 = vld [vmem:[#allocation2 + $0x108] sm:$0x8] }
 0x25d   :  { %v3386_v10 = vadd.f32 %v3195_v28, %v2966_v18  ;;  %v3997_v54 = vadd.f32 %v3761_v35, %v3385_v20  ;;  %v4290_v2 = vmul.f32 %v7795_v21, %v4190_v25  ;;  %v3765_v38 = vsel %vm2290_vm7, %v3762_v44, %v3764_v49  ;;  %v1254_v28 = vld [vmem:[#allocation2 + $0xe0] sm:$0x8] }
 0x25e   :  { %v4476_v42 = vmul.f32 %v8648_v56, %v7798_v23  ;;  %v4477_v6 = vmul.f32 %v8650_v57, %v7798_v23  ;;  %v3999_v58 = vadd.f32 %v3765_v38, %v3387_v41  ;;  %v4914_v4 = vunpack.c.l.bf16 %v4882_v13 }
 0x25f   :  { %v3998_v14 = vadd.f32 %v3763_v55, %v3386_v10  ;;  %v4386_v22 = vadd.f32 %v4290_v2, %v3997_v54  ;;  %v4970_v45 = vmul.f32 %v8538_v53, %v8648_v56  ;;  %v4971_v32 = vmul.f32 %v8538_v53, %v8650_v57  ;;  %v8689_v55 = vld [vmem:[%s10120_s4] ss:$0 sm:$0xff] }
 0x260   :  { %v4614_v61 = vrot.slane %v4476_v42, 1  ;;  %v4615_v43 = vrot.slane %v4477_v6, 1  ;;  %v4388_v50 = vadd.f32 %v4292_v36, %v3999_v58  ;;  %v4972_v52 = vmul.f32 %v8538_v53, %v4914_v4 }
 0x261   :  { %v4387_v31 = vadd.f32 %v4291_v48, %v3998_v14  ;;  %v461_v19 = vadd.f32 %v8605_v39, %v8404_v30  ;;  %v5182_v26 = vrot.slane %v4970_v45, 2  ;;  %v5183_v18 = vrot.slane %v4971_v32, 2  ;;  %v1159_v30 = vld [vmem:[#allocation2 + $0x114] sm:$0x1] }
 0x262   :  { %v4616_v5 = vsel %vm1741_vm6, %v4614_v61, %v4615_v43  ;;  %v4806_v7 = vadd.f32 %v4614_v61, %v4386_v22  ;;  %v4808_v62 = vadd.f32 %v4615_v43, %v4388_v50  ;;  %v5185_v40 = vrot.slane %v4972_v52, 2 }
 0x263   :  { %v4807_v63 = vadd.f32 %v4616_v5, %v4387_v31  ;;  %v583_v37 = vmax.f32 %v461_v19, 0.0  ;;  %v5184_v35 = vsel %vm2290_vm7, %v5182_v26, %v5183_v18  ;;  %v472_v44 = vadd.f32 %v8605_v39, %v8409_v15  ;;  %v2041_v31 = vld [vmem:[#allocation2 + $0xec] sm:$0x1] }
 0x264   :  { %v5418_v20 = vadd.f32 %v5182_v26, %v4806_v7  ;;  %v464_v25 = vadd.f32 %v8605_v39, %v8413_v27  ;;  %v5186_v41 = vsel %vm2290_vm7, %v5183_v18, %v5185_v40  ;;  %v1064_v13 = vsel %vm7711_vm5, 0, %v1063_v8  ;;  %v1255_v27 = vld [vmem:[#allocation2 + $0xe4] sm:$0xff]  }
 0x265   :  { %v5419_v49 = vadd.f32 %v5184_v35, %v4807_v63  ;;  %v647_v48 = vmin.f32 %v583_v37, 6.0  ;;  %v5420_v10 = vadd.f32 %v5186_v41, %v4808_v62  ;;  %v586_v54 = vmax.f32 %v472_v44, 0.0  ;;  %1065 = vst [vmem:[#allocation2 + $0x108] sm:$0x8] %v1064_v13  ;;  %v2676_v63 = vld [vmem:[#allocation2 + $0xf4] sm:$0x8] }
 0x266   :  { %v5521_v15 = vadd.f32 %v8689_v55, %v5418_v20  ;;  %v584_v2 = vmax.f32 %v464_v25, 0.0  ;;  %v1160_v42 = vsel %vm7705_vm2, 0, %v1159_v30  ;;  %v1350_v6 = vunpack.c.l.bf16 %v1254_v28 }
 0x267   :  { %v5522_v38 = vadd.f32 %v8689_v55, %v5419_v49  ;;  %v6767_v36 = vpack.c.bf16 %v647_v48, %v647_v48  ;;  %v5523_v14 = vadd.f32 %v8689_v55, %v5420_v10  ;;  %v650_v22 = vmin.f32 %v586_v54, 6.0  ;;  %1161 = vst [vmem:[#allocation2 + $0x114] sm:$0x1] %v1160_v42 }
 0x268   :  { %v5617_v58 = vmax.f32 %v5521_v15, 0.0  ;;  %v648_v4 = vmin.f32 %v584_v2, 6.0  ;;  %v1351_v43 = vunpack.c.l.bf16 %v1255_v27  ;;  %v1352_v45 = vunpack.c.h.bf16 %v1255_v27 }
 0x269   :  { %v5618_v61 = vmax.f32 %v5522_v38, 0.0  ;;  %968 = vst [vmem:[#allocation2 + $0x1fc] sm:$0xf] %v6767_v36  ;;  %v1450_v32 = vmul.f32 %v7757_v34, %v1350_v6  ;;  %v5619_v50 = vmax.f32 %v5523_v14, 0.0  ;;  %v6845_v19 = vpack.c.bf16 %v650_v22, %v8617_v9 }
 0x26a   :  { %v5713_v52 = vmin.f32 %v5617_v58, 6.0  ;;  %v6768_v5 = vpack.c.bf16 %v648_v4, %v648_v4  ;;  %v1451_v26 = vmul.f32 %v7757_v34, %v1351_v43  ;;  %v1452_v18 = vmul.f32 %v7757_v34, %v1352_v45  ;;  %v3462_v58 = vld [vmem:[#allocation2 + $0x100] sm:$0x1] }
 0x26b   :  { %v5714_v7 = vmin.f32 %v5618_v61, 6.0  ;;  %v1635_v8 = vmul.f32 %v7745_v24, %v1351_v43  ;;  %v5715_v62 = vmin.f32 %v5619_v50, 6.0  ;;  %7070 = vst [vmem:[#allocation2 + $0x210] sm:$0xff] %v6845_v19   ;;  %v1636_v37 = vmul.f32 %v7745_v24, %v1352_v45 }
 0x26c   :  { %v5926_v40 = vrot.slane %v5713_v52, 7  ;;  %969 = vst [vmem:[#allocation2 + $0x200] sm:$0xf] %v6768_v5  ;;  %v2073_v35 = vunpack.c.l.bf16 %v2041_v31  ;;  %v2131_v9 = vmul.f32 %v7754_v33, %v1351_v43  ;;  %v2132_v25 = vmul.f32 %v7754_v33, %v1352_v45  ;;  %v4097_v52 = vld [vmem:[#allocation2 + $0x108] sm:$0x8] }
 0x26d   :  { %v5927_v20 = vrot.slane %v5714_v7, 7  ;;  %v1775_v44 = vrot.slane %v1635_v8, 1  ;;  %v5929_v30 = vrot.slane %v5715_v62, 7  ;;  %v1776_v28 = vrot.slane %v1636_v37, 1 }
 0x26e   :  { %v2133_v41 = vmul.f32 %v7754_v33, %v2073_v35  ;;  %v2772_v49 = vunpack.c.l.bf16 %v2676_v63  ;;  %v2346_v10 = vrot.slane %v2131_v9, 2  ;;  %v2347_v15 = vrot.slane %v2132_v25, 2 }
 0x26f   :  { %v5928_v48 = vsel %vm996_vm0, %v5926_v40, %v5927_v20  ;;  %v1967_v13 = vadd.f32 %v1775_v44, %v1450_v32  ;;  %v5930_v54 = vsel %vm996_vm0, %v5927_v20, %v5929_v30  ;;  %v1777_v2 = vsel %vm1741_vm6, %v1775_v44, %v1776_v28 }
 0x270   :  { %v1969_v27 = vadd.f32 %v1776_v28, %v1452_v18  ;;  %v2349_v38 = vrot.slane %v2133_v41, 2  ;;  %v6110_v36 = vpack.c.bf16 %v5930_v54, %v5928_v48  ;;  %v1968_v42 = vadd.f32 %v1777_v2, %v1451_v26  ;;  %v4098_v18 = vld [vmem:[#allocation2 + $0x10c] sm:$0xff]  }
 0x271   :  { %v2348_v6 = vsel %vm2290_vm7, %v2346_v10, %v2347_v15  ;;  %v2580_v14 = vadd.f32 %v2346_v10, %v1967_v13  ;;  %v2872_v4 = vmul.f32 %v7772_v60, %v2772_v49  ;;  %v2873_v61 = vmul.f32 %v8648_v56, %v7772_v60  ;;  %v4883_v10 = vld [vmem:[#allocation2 + $0x114] sm:$0x1] }
 0x272   :  { %v2350_v22 = vsel %vm2290_vm7, %v2347_v15, %v2349_v38  ;;  %v2874_v43 = vmul.f32 %v8650_v57, %v7772_v60  ;;  %7319 = vmatprep.mubr.bf16.mxu1 %v6110_v36  ;;  %v2581_v45 = vadd.f32 %v2348_v6, %v1968_v42  ;;  %v3057_v31 = vmul.f32 %v8648_v56, %v7786_v12 }
 0x273   :  { %v2582_v32 = vadd.f32 %v2350_v22, %v1969_v27  ;;  %v3058_v50 = vmul.f32 %v8650_v57, %v7786_v12  ;;  %v2968_v19 = vadd.f32 %v2872_v4, %v2580_v14  ;;  %v3494_v5 = vunpack.c.l.bf16 %v3462_v58  ;;  %v8732_v14 = vpop.f32.mrb[56].mxu0 }
 0x274   :  { %v3552_v7 = vmul.f32 %v8648_v56, %v7778_v3  ;;  %v3553_v26 = vmul.f32 %v8650_v57, %v7778_v3  ;;  %v2969_v8 = vadd.f32 %v2873_v61, %v2581_v45  ;;  %v3196_v62 = vrot.slane %v3057_v31, 1 }
 0x275   :  { %v2970_v63 = vadd.f32 %v2874_v43, %v2582_v32  ;;  %v3197_v40 = vrot.slane %v3058_v50, 1  ;;  %v3554_v37 = vmul.f32 %v7778_v3, %v3494_v5  ;;  %v4193_v44 = vunpack.c.l.bf16 %v4097_v52  ;;  %v1066_v43 = vld [vmem:[#allocation2 + $0x11c] sm:$0x8] }
 0x276   :  { %v3766_v35 = vrot.slane %v3552_v7, 2  ;;  %v3767_v20 = vrot.slane %v3553_v26, 2  ;;  %v3388_v25 = vadd.f32 %v3196_v62, %v2968_v19  ;;  %v4194_v28 = vunpack.c.l.bf16 %v4098_v18  ;;  %v1162_v26 = vld [vmem:[#allocation2 + $0x128] sm:$0x1] }
 0x277   :  { %v3198_v9 = vsel %vm1741_vm6, %v3196_v62, %v3197_v40  ;;  %v3390_v30 = vadd.f32 %v3197_v40, %v2970_v63  ;;  %v3769_v48 = vrot.slane %v3554_v37, 2  ;;  %v4195_v13 = vunpack.c.h.bf16 %v4098_v18  ;;  %v1257_v18 = vld [vmem:[#allocation2 + $0xf4] sm:$0x8] }
 0x278   :  { %v3389_v41 = vadd.f32 %v3198_v9, %v2969_v8  ;;  %v3768_v49 = vsel %vm2290_vm7, %v3766_v35, %v3767_v20  ;;  %v4000_v15 = vadd.f32 %v3766_v35, %v3388_v25  ;;  %v4293_v54 = vmul.f32 %v7795_v21, %v4193_v44 }
 0x279   :  { %v4294_v2 = vmul.f32 %v7795_v21, %v4194_v28  ;;  %v4478_v27 = vmul.f32 %v7798_v23, %v4194_v28  ;;  %v3770_v38 = vsel %vm2290_vm7, %v3767_v20, %v3769_v48  ;;  %v4295_v42 = vmul.f32 %v7795_v21, %v4195_v13 }
 0x27a   :  { %v4001_v36 = vadd.f32 %v3768_v49, %v3389_v41  ;;  %v4479_v6 = vmul.f32 %v7798_v23, %v4195_v13  ;;  %v4002_v58 = vadd.f32 %v3770_v38, %v3390_v30  ;;  %v4389_v22 = vadd.f32 %v4293_v54, %v4000_v15 }
 0x27b   :  { %v4617_v4 = vrot.slane %v4478_v27, 1  ;;  %v4915_v61 = vunpack.c.l.bf16 %v4883_v10  ;;  %v4973_v31 = vmul.f32 %v8538_v53, %v4194_v28  ;;  %v4974_v50 = vmul.f32 %v8538_v53, %v4195_v13  ;;  %v2042_v28 = vld [vmem:[#allocation2 + $0x100] sm:$0x1] }
 0x27c   :  { %v4390_v45 = vadd.f32 %v4294_v2, %v4001_v36  ;;  %v4618_v32 = vrot.slane %v4479_v6, 1  ;;  %v4391_v52 = vadd.f32 %v4295_v42, %v4002_v58  ;;  %v485_v7 = vadd.f32 %v8605_v39, %v8468_v16 }
 0x27d   :  { %v4809_v19 = vadd.f32 %v4617_v4, %v4389_v22  ;;  %v4975_v5 = vmul.f32 %v8538_v53, %v4915_v61  ;;  %v5187_v63 = vrot.slane %v4973_v31, 2  ;;  %v5188_v62 = vrot.slane %v4974_v50, 2 }
 0x27e   :  { %v4619_v8 = vsel %vm1741_vm6, %v4617_v4, %v4618_v32  ;;  %v1067_v40 = vsel %vm7711_vm5, 0, %v1066_v43  ;;  %v4811_v35 = vadd.f32 %v4618_v32, %v4391_v52  ;;  %v589_v44 = vmax.f32 %v485_v7, 0.0 }
 0x27f   :  { %v4810_v37 = vadd.f32 %v4619_v8, %v4390_v45  ;;  %v5190_v20 = vrot.slane %v4975_v5, 2  ;;  %1068 = vst [vmem:[#allocation2 + $0x11c] sm:$0x8] %v1067_v40  ;;  %v5189_v9 = vsel %vm2290_vm7, %v5187_v63, %v5188_v62  ;;  %v5421_v25 = vadd.f32 %v5187_v63, %v4809_v19  ;;  %v2679_v5 = vld [vmem:[#allocation2 + $0x108] sm:$0x8]  ;;  %v2680_v63 = vld [vmem:[#allocation2 + $0x10c] sm:$0xff]  }
 0x280   :  { %v1163_v16 = vsel %vm7705_vm2, 0, %v1162_v26  ;;  %v1353_v30 = vunpack.c.l.bf16 %v1257_v18  ;;  %v8746_v48 = vmin.f32 %v589_v44, 6.0  ;;  %v1454_v13 = vmul.f32 %v8648_v56, %v7757_v34 }
 0x281   :  { %v5191_v41 = vsel %vm2290_vm7, %v5188_v62, %v5190_v20  ;;  %v5422_v49 = vadd.f32 %v5189_v9, %v4810_v37  ;;  %1164 = vst [vmem:[#allocation2 + $0x128] sm:$0x1] %v1163_v16  ;;  %v5524_v15 = vadd.f32 %v8689_v55, %v5421_v25  ;;  %v1455_v2 = vmul.f32 %v8650_v57, %v7757_v34  ;;  %v3463_v37 = vld [vmem:[#allocation2 + $0x114] sm:$0x1] }
 0x282   :  { %v5423_v10 = vadd.f32 %v5191_v41, %v4811_v35  ;;  %v1453_v54 = vmul.f32 %v7757_v34, %v1353_v30  ;;  %v1637_v38 = vmul.f32 %v8648_v56, %v7745_v24  ;;  %v1638_v36 = vmul.f32 %v8650_v57, %v7745_v24 }
 0x283   :  { %v5525_v27 = vadd.f32 %v8689_v55, %v5422_v49  ;;  %v2074_v42 = vunpack.c.l.bf16 %v2042_v28  ;;  %v5620_v58 = vmax.f32 %v5524_v15, 0.0  ;;  %v2134_v22 = vmul.f32 %v8648_v56, %v7754_v33 }
 0x284   :  { %v5526_v6 = vadd.f32 %v8689_v55, %v5423_v10  ;;  %v2135_v4 = vmul.f32 %v8650_v57, %v7754_v33  ;;  %v1778_v43 = vrot.slane %v1637_v38, 1  ;;  %v1779_v45 = vrot.slane %v1638_v36, 1  ;;  %v7113_v38 = vld [vmem:[#allocation2 + $0x120] sm:$0xff]  }
 0x285   :  { %v5621_v61 = vmax.f32 %v5525_v27, 0.0  ;;  %v2136_v32 = vmul.f32 %v7754_v33, %v2074_v42  ;;  %v5716_v50 = vmin.f32 %v5620_v58, 6.0  ;;  %v2351_v52 = vrot.slane %v2134_v22, 2 }
 0x286   :  { %v5622_v31 = vmax.f32 %v5526_v6, 0.0  ;;  %v2352_v19 = vrot.slane %v2135_v4, 2  ;;  %v1780_v26 = vsel %vm1741_vm6, %v1778_v43, %v1779_v45  ;;  %v1970_v18 = vadd.f32 %v1778_v43, %v1453_v54  ;;  %v4100_v22 = vld [vmem:[#allocation2 + $0x11c] sm:$0x8] }
 0x287   :  { %v5717_v7 = vmin.f32 %v5621_v61, 6.0  ;;  %v1972_v8 = vadd.f32 %v1779_v45, %v1455_v2  ;;  %v5931_v62 = vrot.slane %v5716_v50, 7  ;;  %v1971_v40 = vadd.f32 %v1780_v26, %v1454_v13 }
 0x288   :  { %v5718_v56 = vmin.f32 %v5622_v31, 6.0  ;;  %v2353_v57 = vsel %vm2290_vm7, %v2351_v52, %v2352_v19  ;;  %v2354_v20 = vrot.slane %v2136_v32, 2  ;;  %v2583_v44 = vadd.f32 %v2351_v52, %v1970_v18 }
 0x289   :  { %v5932_v35 = vrot.slane %v5717_v7, 7  ;;  %v2775_v9 = vunpack.c.l.bf16 %v2679_v5  ;;  %v2584_v16 = vadd.f32 %v2353_v57, %v1971_v40  ;;  %v2776_v30 = vunpack.c.l.bf16 %v2680_v63 }
 0x28a   :  { %v5934_v25 = vrot.slane %v5718_v56, 7  ;;  %v2777_v28 = vunpack.c.h.bf16 %v2680_v63  ;;  %v2355_v49 = vsel %vm2290_vm7, %v2352_v19, %v2354_v20  ;;  %v3495_v15 = vunpack.c.l.bf16 %v3463_v37 }
 0x28b   :  { %v5933_v41 = vsel %vm996_vm0, %v5931_v62, %v5932_v35  ;;  %v2875_v10 = vmul.f32 %v7772_v60, %v2775_v9  ;;  %v2585_v54 = vadd.f32 %v2355_v49, %v1972_v8  ;;  %v2876_v2 = vmul.f32 %v7772_v60, %v2776_v30  ;;  %v4884_v62 = vld [vmem:[#allocation2 + $0x128] sm:$0x1] }
 0x28c   :  { %v5935_v13 = vsel %vm996_vm0, %v5932_v35, %v5934_v25  ;;  %v2877_v27 = vmul.f32 %v7772_v60, %v2777_v28  ;;  %v3059_v6 = vmul.f32 %v7786_v12, %v2776_v30  ;;  %v3060_v58 = vmul.f32 %v7786_v12, %v2777_v28 }
 0x28d   :  { %v6111_v36 = vpack.c.bf16 %v5935_v13, %v5933_v41  ;;  %v2971_v42 = vadd.f32 %v2875_v10, %v2583_v44  ;;  %v2972_v4 = vadd.f32 %v2876_v2, %v2584_v16  ;;  %v3555_v43 = vmul.f32 %v7778_v3, %v2776_v30 }
 0x28e   :  { %v2973_v61 = vadd.f32 %v2877_v27, %v2585_v54  ;;  %v3556_v45 = vmul.f32 %v7778_v3, %v2777_v28  ;;  %v3199_v32 = vrot.slane %v3059_v6, 1  ;;  %v3200_v31 = vrot.slane %v3060_v58, 1  ;;  %v8798_v54 = vpop.f32.mrb[57].mxu0 }
 0x28f   :  { %7320 = vmatmul.mubr.bf16.gmra.mrb[20].mxu1 %v6111_v36  ;;  %v3557_v50 = vmul.f32 %v7778_v3, %v3495_v15  ;;  %v8778_v52 = vunpack.c.l.bf16 %v7113_v38  ;;  %v3771_v19 = vrot.slane %v3555_v43, 2  ;;  %v8780_v7 = vunpack.c.h.bf16 %v7113_v38 }
 0x290   :  { %v3772_v5 = vrot.slane %v3556_v45, 2  ;;  %v4196_v26 = vunpack.c.l.bf16 %v4100_v22  ;;  %v3201_v18 = vsel %vm1741_vm6, %v3199_v32, %v3200_v31  ;;  %v3391_v8 = vadd.f32 %v3199_v32, %v2971_v42  ;;  %v8801_v42 = vpop.f32.mrb[58].mxu0 }
 0x291   :  { %v3393_v63 = vadd.f32 %v3200_v31, %v2973_v61  ;;  %v3774_v56 = vrot.slane %v3557_v50, 2  ;;  %v3392_v40 = vadd.f32 %v3201_v18, %v2972_v4  ;;  %v4297_v35 = vmul.f32 %v8778_v52, %v7795_v21  ;;  %v1069_v61 = vld [vmem:[#allocation2 + $0x130] sm:$0x8]  ;;  %v8805_v43 = vpop.f32.mrb[59].mxu0  ;;  %v1165_v18 = vld [vmem:[#allocation2 + $0x13c] sm:$0x1] }
 0x292   :  { %v3773_v57 = vsel %vm2290_vm7, %v3771_v19, %v3772_v5  ;;  %v4296_v37 = vmul.f32 %v7795_v21, %v4196_v26  ;;  %v4003_v44 = vadd.f32 %v3771_v19, %v3391_v8  ;;  %v4298_v9 = vmul.f32 %v8780_v7, %v7795_v21  ;;  %v1260_v8 = vld [vmem:[#allocation2 + $0x108] sm:$0x8] }
 0x293   :  { %v3775_v20 = vsel %vm2290_vm7, %v3772_v5, %v3774_v56  ;;  %v4480_v25 = vmul.f32 %v8778_v52, %v7798_v23  ;;  %v4004_v16 = vadd.f32 %v3773_v57, %v3392_v40  ;;  %v4481_v28 = vmul.f32 %v8780_v7, %v7798_v23 }
 0x294   :  { %v4005_v30 = vadd.f32 %v3775_v20, %v3393_v63  ;;  %v4916_v41 = vunpack.c.l.bf16 %v4884_v62  ;;  %v4392_v49 = vadd.f32 %v4296_v37, %v4003_v44  ;;  %v4976_v15 = vmul.f32 %v8538_v53, %v8778_v52 }
 0x295   :  { %v4620_v10 = vrot.slane %v4480_v25, 1  ;;  %v4977_v13 = vmul.f32 %v8538_v53, %v8780_v7  ;;  %v4393_v2 = vadd.f32 %v4297_v35, %v4004_v16  ;;  %v4621_v38 = vrot.slane %v4481_v28, 1  ;;  %v1261_v35 = vld [vmem:[#allocation2 + $0x10c] sm:$0xff]  }
 0x296   :  { %v4394_v27 = vadd.f32 %v4298_v9, %v4005_v30  ;;  %v4978_v36 = vmul.f32 %v8538_v53, %v4916_v41  ;;  %v5192_v58 = vrot.slane %v4976_v15, 2  ;;  %v477_v4 = vadd.f32 %v8605_v39, %v8528_v47 }
 0x297   :  { %v4812_v6 = vadd.f32 %v4620_v10, %v4392_v49  ;;  %v5193_v22 = vrot.slane %v4977_v13, 2  ;;  %v4622_v45 = vsel %vm1741_vm6, %v4620_v10, %v4621_v38  ;;  %v488_v50 = vadd.f32 %v8605_v39, %v8534_v46 }
 0x298   :  { %v4814_v32 = vadd.f32 %v4621_v38, %v4394_v27  ;;  %v5195_v31 = vrot.slane %v4978_v36, 2  ;;  %v4813_v19 = vadd.f32 %v4622_v45, %v4393_v2  ;;  %v587_v26 = vmax.f32 %v477_v4, 0.0  ;;  %v2043_v36 = vld [vmem:[#allocation2 + $0x114] sm:$0x1] }
 0x299   :  { %v5194_v53 = vsel %vm2290_vm7, %v5192_v58, %v5193_v22  ;;  %v5424_v5 = vadd.f32 %v5192_v58, %v4812_v6  ;;  %v590_v47 = vmax.f32 %v488_v50, 0.0  ;;  %v480_v56 = vadd.f32 %v8605_v39, %v8536_v51 }
 0x29a   :  { %v5196_v63 = vsel %vm2290_vm7, %v5193_v22, %v5195_v31  ;;  %v1070_v62 = vsel %vm7711_vm5, 0, %v1069_v61  ;;  %v5425_v40 = vadd.f32 %v5194_v53, %v4813_v19  ;;  %v651_v37 = vmin.f32 %v587_v26, 6.0  ;;  %v2682_v61 = vld [vmem:[#allocation2 + $0x11c] sm:$0x8] }
 0x29b   :  { %v5426_v57 = vadd.f32 %v5196_v63, %v4814_v32  ;;  %v5527_v46 = vadd.f32 %v8689_v55, %v5424_v5  ;;  %1071 = vst [vmem:[#allocation2 + $0x130] sm:$0x8] %v1070_v62  ;;  %v654_v20 = vmin.f32 %v590_v47, 6.0  ;;  %v588_v44 = vmax.f32 %v480_v56, 0.0 }
 0x29c   :  { %v1166_v9 = vsel %vm7705_vm2, 0, %v1165_v18  ;;  %v1356_v25 = vunpack.c.l.bf16 %v1260_v8  ;;  %v5528_v16 = vadd.f32 %v8689_v55, %v5425_v40  ;;  %v6771_v28 = vpack.c.bf16 %v651_v37, %v651_v37 }
 0x29d   :  { %v5529_v51 = vadd.f32 %v8689_v55, %v5426_v57  ;;  %v5623_v30 = vmax.f32 %v5527_v46, 0.0  ;;  %1167 = vst [vmem:[#allocation2 + $0x13c] sm:$0x1] %v1166_v9  ;;  %v6850_v41 = vpack.c.bf16 %v654_v20, %v8746_v48  ;;  %v652_v49 = vmin.f32 %v588_v44, 6.0 }
 0x29e   :  { %v1357_v10 = vunpack.c.l.bf16 %v1261_v35  ;;  %v1358_v15 = vunpack.c.h.bf16 %v1261_v35  ;;  %v5624_v13 = vmax.f32 %v5528_v16, 0.0  ;;  %972 = vst [vmem:[#allocation2 + $0x224] sm:$0xf] %v6771_v28  ;;  %v1456_v38 = vmul.f32 %v7757_v34, %v1356_v25  ;;  %v3464_v16 = vld [vmem:[#allocation2 + $0x128] sm:$0x1] }
 0x29f   :  { %v5625_v2 = vmax.f32 %v5529_v51, 0.0  ;;  %v5719_v27 = vmin.f32 %v5623_v30, 6.0  ;;  %7071 = vst [vmem:[#allocation2 + $0x238] sm:$0xff] %v6850_v41   ;;  %v6772_v6 = vpack.c.bf16 %v652_v49, %v652_v49  ;;  %v2075_v19 = vunpack.c.l.bf16 %v2043_v36 }
 0x2a0   :  { %v1457_v58 = vmul.f32 %v7757_v34, %v1357_v10  ;;  %v1458_v22 = vmul.f32 %v7757_v34, %v1358_v15  ;;  %v1639_v4 = vmul.f32 %v7745_v24, %v1357_v10  ;;  %v5720_v48 = vmin.f32 %v5624_v13, 6.0 }
 0x2a1   :  { %v5721_v45 = vmin.f32 %v5625_v2, 6.0  ;;  %v5936_v32 = vrot.slane %v5719_v27, 7  ;;  %v1640_v31 = vmul.f32 %v7745_v24, %v1358_v15  ;;  %973 = vst [vmem:[#allocation2 + $0x228] sm:$0xf] %v6772_v6  ;;  %v2137_v53 = vmul.f32 %v7754_v33, %v1357_v10 }
 0x2a2   :  { %v1781_v50 = vrot.slane %v1639_v4, 1  ;;  %v2138_v5 = vmul.f32 %v7754_v33, %v1358_v15  ;;  %v5937_v26 = vrot.slane %v5720_v48, 7  ;;  %v2778_v63 = vunpack.c.l.bf16 %v2682_v61  ;;  %v4103_v2 = vld [vmem:[#allocation2 + $0x130] sm:$0x8] }
 0x2a3   :  { %v5939_v18 = vrot.slane %v5721_v45, 7  ;;  %v1782_v8 = vrot.slane %v1640_v31, 1  ;;  %v2139_v56 = vmul.f32 %v7754_v33, %v2075_v19  ;;  %v2356_v62 = vrot.slane %v2137_v53, 2 }
 0x2a4   :  { %v1973_v47 = vadd.f32 %v1781_v50, %v1456_v38  ;;  %v2357_v40 = vrot.slane %v2138_v5, 2  ;;  %v5938_v57 = vsel %vm996_vm0, %v5936_v32, %v5937_v26  ;;  %v2878_v30 = vmul.f32 %v7772_v60, %v2778_v63 }
 0x2a5   :  { %v5940_v46 = vsel %vm996_vm0, %v5937_v26, %v5939_v18  ;;  %v1783_v37 = vsel %vm1741_vm6, %v1781_v50, %v1782_v8  ;;  %v1975_v35 = vadd.f32 %v1782_v8, %v1458_v22  ;;  %v2359_v25 = vrot.slane %v2139_v56, 2  ;;  %v4885_v56 = vld [vmem:[#allocation2 + $0x13c] sm:$0x1] }
 0x2a6   :  { %v6112_v20 = vpack.c.bf16 %v5940_v46, %v5938_v57  ;;  %v1974_v44 = vadd.f32 %v1783_v37, %v1457_v58  ;;  %v2358_v9 = vsel %vm2290_vm7, %v2356_v62, %v2357_v40  ;;  %v2586_v51 = vadd.f32 %v2356_v62, %v1973_v47  ;;  %v4104_v58 = vld [vmem:[#allocation2 + $0x134] sm:$0xff]  }
 0x2a7   :  { %v2879_v28 = vmul.f32 %v8778_v52, %v7772_v60  ;;  %v2880_v41 = vmul.f32 %v8780_v7, %v7772_v60  ;;  %v2360_v49 = vsel %vm2290_vm7, %v2357_v40, %v2359_v25  ;;  %v3061_v15 = vmul.f32 %v8778_v52, %v7786_v12 }
 0x2a8   :  { %7323 = vmatprep.mubr.bf16.mxu1 %v6112_v20  ;;  %v2587_v10 = vadd.f32 %v2358_v9, %v1974_v44  ;;  %v3062_v13 = vmul.f32 %v8780_v7, %v7786_v12  ;;  %v2588_v27 = vadd.f32 %v2360_v49, %v1975_v35  ;;  %v2974_v38 = vadd.f32 %v2878_v30, %v2586_v51  ;;  %v1072_v30 = vld [vmem:[#allocation2 + $0x144] sm:$0x8] }
 0x2a9   :  { %v3496_v36 = vunpack.c.l.bf16 %v3464_v16  ;;  %v3558_v6 = vmul.f32 %v8778_v52, %v7778_v3  ;;  %v3202_v4 = vrot.slane %v3061_v15, 1  ;;  %v3559_v48 = vmul.f32 %v8780_v7, %v7778_v3 }
 0x2aa   :  { %v2975_v22 = vadd.f32 %v2879_v28, %v2587_v10  ;;  %v3203_v61 = vrot.slane %v3062_v13, 1  ;;  %v2976_v45 = vadd.f32 %v2880_v41, %v2588_v27  ;;  %v4199_v50 = vunpack.c.l.bf16 %v4103_v2  ;;  %v8857_v28 = vpop.f32.mrb[60].mxu0  ;;  %v8859_v10 = vld [vmem:[#allocation8 + $0x8] ss:$0 sm:$0xff] }
 0x2ab   :  { %v3560_v32 = vmul.f32 %v7778_v3, %v3496_v36  ;;  %v3776_v31 = vrot.slane %v3558_v6, 2  ;;  %v3394_v53 = vadd.f32 %v3202_v4, %v2974_v38  ;;  %v3777_v5 = vrot.slane %v3559_v48, 2  ;;  %v1168_v6 = vld [vmem:[#allocation2 + $0x150] sm:$0x1]  ;;  %v1263_v48 = vld [vmem:[#allocation2 + $0x11c] sm:$0x8] }
 0x2ac   :  { %v3204_v19 = vsel %vm1741_vm6, %v3202_v4, %v3203_v61  ;;  %v4200_v26 = vunpack.c.l.bf16 %v4104_v58  ;;  %v3396_v8 = vadd.f32 %v3203_v61, %v2976_v45  ;;  %v4201_v47 = vunpack.c.h.bf16 %v4104_v58 }
 0x2ad   :  { %v3395_v18 = vadd.f32 %v3204_v19, %v2975_v22  ;;  %v3779_v63 = vrot.slane %v3560_v32, 2  ;;  %v3778_v62 = vsel %vm2290_vm7, %v3776_v31, %v3777_v5  ;;  %v4006_v40 = vadd.f32 %v3776_v31, %v3394_v53 }
 0x2ae   :  { %v4299_v57 = vmul.f32 %v7795_v21, %v4199_v50  ;;  %v4300_v46 = vmul.f32 %v7795_v21, %v4200_v26  ;;  %v4301_v20 = vmul.f32 %v7795_v21, %v4201_v47  ;;  %v4482_v44 = vmul.f32 %v7798_v23, %v4200_v26 }
 0x2af   :  { %v3780_v37 = vsel %vm2290_vm7, %v3777_v5, %v3779_v63  ;;  %v4007_v35 = vadd.f32 %v3778_v62, %v3395_v18  ;;  %v4483_v16 = vmul.f32 %v7798_v23, %v4201_v47  ;;  %v4917_v51 = vunpack.c.l.bf16 %v4885_v56 }
 0x2b0   :  { %v4008_v9 = vadd.f32 %v3780_v37, %v3396_v8  ;;  %v4395_v25 = vadd.f32 %v4299_v57, %v4006_v40  ;;  %v4623_v49 = vrot.slane %v4482_v44, 1  ;;  %v4979_v15 = vmul.f32 %v8859_v10, %v4200_v26 }
 0x2b1   :  { %v4396_v41 = vadd.f32 %v4300_v46, %v4007_v35  ;;  %v4980_v13 = vmul.f32 %v8859_v10, %v4201_v47  ;;  %v4624_v27 = vrot.slane %v4483_v16, 1  ;;  %v4981_v38 = vmul.f32 %v8859_v10, %v4917_v51 }
 0x2b2   :  { %v4397_v2 = vadd.f32 %v4301_v20, %v4008_v9  ;;  %v501_v36 = vadd.f32 %v8605_v39, %v8595_v0  ;;  %v4815_v58 = vadd.f32 %v4623_v49, %v4395_v25  ;;  %v5197_v22 = vrot.slane %v4979_v15, 2  ;;  %v2044_v39 = vld [vmem:[#allocation2 + $0x128] sm:$0x1] }
 0x2b3   :  { %v5198_v4 = vrot.slane %v4980_v13, 2  ;;  %v1073_v61 = vsel %vm7711_vm5, 0, %v1072_v30  ;;  %v4625_v45 = vsel %vm1741_vm6, %v4623_v49, %v4624_v27  ;;  %v5200_v31 = vrot.slane %v4981_v38, 2 }
 0x2b4   :  { %v4817_v32 = vadd.f32 %v4624_v27, %v4397_v2  ;;  %v593_v50 = vmax.f32 %v501_v36, 0.0  ;;  %1074 = vst [vmem:[#allocation2 + $0x144] sm:$0x8] %v1073_v61  ;;  %v4816_v19 = vadd.f32 %v4625_v45, %v4396_v41  ;;  %v5427_v5 = vadd.f32 %v5197_v22, %v4815_v58  ;;  %v2685_v27 = vld [vmem:[#allocation2 + $0x130] sm:$0x8] }
 0x2b5   :  { %v5199_v53 = vsel %vm2290_vm7, %v5197_v22, %v5198_v4  ;;  %v1169_v0 = vsel %vm7705_vm2, 0, %v1168_v6  ;;  %v5201_v26 = vsel %vm2290_vm7, %v5198_v4, %v5200_v31  ;;  %v1359_v8 = vunpack.c.l.bf16 %v1263_v48  ;;  %v2686_v22 = vld [vmem:[#allocation2 + $0x134] sm:$0xff]   ;;  %v3465_v45 = vld [vmem:[#allocation2 + $0x13c] sm:$0x1] }
 0x2b6   :  { %v8873_v18 = vmin.f32 %v593_v50, 6.0  ;;  %1170 = vst [vmem:[#allocation2 + $0x150] sm:$0x1] %v1169_v0  ;;  %v1460_v63 = vmul.f32 %v8778_v52, %v7757_v34  ;;  %v5428_v47 = vadd.f32 %v5199_v53, %v4816_v19  ;;  %v5429_v56 = vadd.f32 %v5201_v26, %v4817_v32 }
 0x2b7   :  { %v5530_v62 = vadd.f32 %v8689_v55, %v5427_v5  ;;  %v1461_v40 = vmul.f32 %v8780_v7, %v7757_v34  ;;  %v1459_v57 = vmul.f32 %v7757_v34, %v1359_v8  ;;  %v1641_v46 = vmul.f32 %v8778_v52, %v7745_v24 }
 0x2b8   :  { %v1642_v37 = vmul.f32 %v8780_v7, %v7745_v24  ;;  %v2076_v35 = vunpack.c.l.bf16 %v2044_v39  ;;  %v5531_v20 = vadd.f32 %v8689_v55, %v5428_v47  ;;  %v5532_v44 = vadd.f32 %v8689_v55, %v5429_v56 }
 0x2b9   :  { %v5626_v9 = vmax.f32 %v5530_v62, 0.0  ;;  %v2140_v25 = vmul.f32 %v8778_v52, %v7754_v33  ;;  %v1784_v16 = vrot.slane %v1641_v46, 1  ;;  %v2141_v30 = vmul.f32 %v8780_v7, %v7754_v33 }
 0x2ba   :  { %v1785_v51 = vrot.slane %v1642_v37, 1  ;;  %v2142_v41 = vmul.f32 %v7754_v33, %v2076_v35  ;;  %v5627_v49 = vmax.f32 %v5531_v20, 0.0  ;;  %v5628_v15 = vmax.f32 %v5532_v44, 0.0 }
 0x2bb   :  { %v5722_v13 = vmin.f32 %v5626_v9, 6.0  ;;  %v2361_v2 = vrot.slane %v2140_v25, 2  ;;  %v1976_v36 = vadd.f32 %v1784_v16, %v1459_v57  ;;  %v2362_v58 = vrot.slane %v2141_v30, 2  ;;  %v7114_v57 = vld [vmem:[#allocation2 + $0x148] sm:$0xff]  }
 0x2bc   :  { %v1786_v38 = vsel %vm1741_vm6, %v1784_v16, %v1785_v51  ;;  %v1978_v6 = vadd.f32 %v1785_v51, %v1461_v40  ;;  %v5723_v4 = vmin.f32 %v5627_v49, 6.0  ;;  %v5724_v52 = vmin.f32 %v5628_v15, 6.0  ;;  %v4106_v51 = vld [vmem:[#allocation2 + $0x144] sm:$0x8] }
 0x2bd   :  { %v5941_v61 = vrot.slane %v5722_v13, 7  ;;  %v1977_v48 = vadd.f32 %v1786_v38, %v1460_v63  ;;  %v2363_v7 = vsel %vm2290_vm7, %v2361_v2, %v2362_v58  ;;  %v2364_v32 = vrot.slane %v2142_v41, 2 }
 0x2be   :  { %v2589_v31 = vadd.f32 %v2361_v2, %v1976_v36  ;;  %v2781_v50 = vunpack.c.l.bf16 %v2685_v27  ;;  %v5942_v19 = vrot.slane %v5723_v4, 7  ;;  %v5944_v53 = vrot.slane %v5724_v52, 7  ;;  %v4886_v4 = vld [vmem:[#allocation2 + $0x150] sm:$0x1] }
 0x2bf   :  { %v2590_v5 = vadd.f32 %v2363_v7, %v1977_v48  ;;  %v2782_v0 = vunpack.c.l.bf16 %v2686_v22  ;;  %v2365_v39 = vsel %vm2290_vm7, %v2362_v58, %v2364_v32  ;;  %v2783_v26 = vunpack.c.h.bf16 %v2686_v22 }
 0x2c0   :  { %v2881_v8 = vmul.f32 %v7772_v60, %v2781_v50  ;;  %v3497_v47 = vunpack.c.l.bf16 %v3465_v45  ;;  %v5943_v56 = vsel %vm996_vm0, %v5941_v61, %v5942_v19  ;;  %v5945_v63 = vsel %vm996_vm0, %v5942_v19, %v5944_v53 }
 0x2c1   :  { %v2591_v62 = vadd.f32 %v2365_v39, %v1978_v6  ;;  %v2882_v40 = vmul.f32 %v7772_v60, %v2782_v0  ;;  %v6113_v46 = vpack.c.bf16 %v5945_v63, %v5943_v56  ;;  %v2883_v37 = vmul.f32 %v7772_v60, %v2783_v26  ;;  %v8921_v39 = vpop.f32.mrb[61].mxu0 }
 0x2c2   :  { %v2977_v35 = vadd.f32 %v2881_v8, %v2589_v31  ;;  %v3063_v20 = vmul.f32 %v7786_v12, %v2782_v0  ;;  %v3064_v9 = vmul.f32 %v7786_v12, %v2783_v26  ;;  %v3561_v25 = vmul.f32 %v7778_v3, %v2782_v0  ;;  %v8927_v63 = vpop.f32.mrb[62].mxu0 }
 0x2c3   :  { %v2978_v44 = vadd.f32 %v2882_v40, %v2590_v5  ;;  %v3562_v16 = vmul.f32 %v7778_v3, %v2783_v26  ;;  %7324 = vmatmul.mubr.bf16.gmra.mrb[24].mxu1 %v6113_v46  ;;  %v2979_v30 = vadd.f32 %v2883_v37, %v2591_v62  ;;  %v3563_v49 = vmul.f32 %v7778_v3, %v3497_v47  ;;  %v8930_v37 = vpop.f32.mrb[63].mxu0 }
 0x2c4   :  { %v3205_v41 = vrot.slane %v3063_v20, 1  ;;  %v8905_v15 = vunpack.c.l.bf16 %v7114_v57  ;;  %v3206_v13 = vrot.slane %v3064_v9, 1  ;;  %v3781_v2 = vrot.slane %v3561_v25, 2  ;;  %v8935_v9 = vld [vmem:[%s10118_s2] ss:$0 sm:$0xff] }
 0x2c5   :  { %v3782_v27 = vrot.slane %v3562_v16, 2  ;;  %v8907_v38 = vunpack.c.h.bf16 %v7114_v57  ;;  %v3784_v6 = vrot.slane %v3563_v49, 2  ;;  %v4202_v58 = vunpack.c.l.bf16 %v4106_v51  ;;  %v1011_v16 = vld [vmem:[#allocation2 + $0x158] sm:$0x8] }
 0x2c6   :  { %v3397_v36 = vadd.f32 %v3205_v41, %v2977_v35  ;;  %v4303_v22 = vmul.f32 %v8905_v15, %v7795_v21  ;;  %v3207_v52 = vsel %vm1741_vm6, %v3205_v41, %v3206_v13  ;;  %v3399_v61 = vadd.f32 %v3206_v13, %v2979_v30 }
 0x2c7   :  { %v3783_v48 = vsel %vm2290_vm7, %v3781_v2, %v3782_v27  ;;  %v4304_v45 = vmul.f32 %v8907_v38, %v7795_v21  ;;  %v3398_v7 = vadd.f32 %v3207_v52, %v2978_v44  ;;  %v3785_v32 = vsel %vm2290_vm7, %v3782_v27, %v3784_v6  ;;  %v1016_v6 = vld [vmem:[#allocation2 + $0x164] sm:$0x1] }
 0x2c8   :  { %v4009_v31 = vadd.f32 %v3781_v2, %v3397_v36  ;;  %v4302_v50 = vmul.f32 %v7795_v21, %v4202_v58  ;;  %v4011_v19 = vadd.f32 %v3785_v32, %v3399_v61  ;;  %v4484_v53 = vmul.f32 %v8905_v15, %v7798_v23  ;;  %v1266_v58 = vld [vmem:[#allocation2 + $0x130] sm:$0x8]  ;;  %v1267_v32 = vld [vmem:[#allocation2 + $0x134] sm:$0xff]  }
 0x2c9   :  { %v4485_v5 = vmul.f32 %v8907_v38, %v7798_v23  ;;  %v4918_v0 = vunpack.c.l.bf16 %v4886_v4  ;;  %v4010_v26 = vadd.f32 %v3783_v48, %v3398_v7  ;;  %v4982_v47 = vmul.f32 %v8859_v10, %v8905_v15 }
 0x2ca   :  { %v4398_v8 = vadd.f32 %v4302_v50, %v4009_v31  ;;  %v4983_v56 = vmul.f32 %v8859_v10, %v8907_v38  ;;  %v4400_v62 = vadd.f32 %v4304_v45, %v4011_v19  ;;  %v4626_v40 = vrot.slane %v4484_v53, 1 }
 0x2cb   :  { %v4627_v57 = vrot.slane %v4485_v5, 1  ;;  %v4984_v46 = vmul.f32 %v8859_v10, %v4918_v0  ;;  %v4399_v35 = vadd.f32 %v4303_v22, %v4010_v26  ;;  %v5202_v20 = vrot.slane %v4982_v47, 2 }
 0x2cc   :  { %v5203_v44 = vrot.slane %v4983_v56, 2  ;;  %v493_v25 = vadd.f32 %v8935_v9, %v8657_v11  ;;  %v4818_v30 = vadd.f32 %v4626_v40, %v4398_v8  ;;  %v504_v36 = vadd.f32 %v8935_v9, %v8666_v29 }
 0x2cd   :  { %v4628_v51 = vsel %vm1741_vm6, %v4626_v40, %v4627_v57  ;;  %v4820_v41 = vadd.f32 %v4627_v57, %v4400_v62  ;;  %v5205_v49 = vrot.slane %v4984_v46, 2  ;;  %v496_v11 = vadd.f32 %v8935_v9, %v8668_v17 }
 0x2ce   :  { %v4819_v13 = vadd.f32 %v4628_v51, %v4399_v35  ;;  %v5204_v2 = vsel %vm2290_vm7, %v5202_v20, %v5203_v44  ;;  %v591_v27 = vmax.f32 %v493_v25, 0.0  ;;  %v5430_v4 = vadd.f32 %v5202_v20, %v4818_v30  ;;  %v2045_v35 = vld [vmem:[#allocation2 + $0x13c] sm:$0x1] }
 0x2cf   :  { %v5206_v22 = vsel %vm2290_vm7, %v5203_v44, %v5205_v49  ;;  %v1012_v52 = vsel %vm7711_vm5, 0, %v1011_v16  ;;  %v594_v7 = vmax.f32 %v504_v36, 0.0  ;;  %v592_v29 = vmax.f32 %v496_v11, 0.0  ;;  %v2688_v49 = vld [vmem:[#allocation2 + $0x144] sm:$0x8] }
 0x2d0   :  { %v5431_v61 = vadd.f32 %v5204_v2, %v4819_v13  ;;  %v5432_v48 = vadd.f32 %v5206_v22, %v4820_v41  ;;  %v655_v45 = vmin.f32 %v591_v27, 6.0  ;;  %1013 = vst [vmem:[#allocation2 + $0x158] sm:$0x8] %v1012_v52  ;;  %v5533_v31 = vadd.f32 %v8689_v55, %v5430_v4 }
 0x2d1   :  { %v1017_v50 = vsel %vm7705_vm2, 0, %v1016_v6  ;;  %v1362_v19 = vunpack.c.l.bf16 %v1266_v58  ;;  %v658_v0 = vmin.f32 %v594_v7, 6.0  ;;  %v656_v8 = vmin.f32 %v592_v29, 6.0 }
 0x2d2   :  { %v5534_v53 = vadd.f32 %v8689_v55, %v5431_v61  ;;  %v5535_v17 = vadd.f32 %v8689_v55, %v5432_v48  ;;  %v6775_v5 = vpack.c.bf16 %v655_v45, %v655_v45  ;;  %1018 = vst [vmem:[#allocation2 + $0x164] sm:$0x1] %v1017_v50  ;;  %v5629_v26 = vmax.f32 %v5533_v31, 0.0 }
 0x2d3   :  { %v1363_v47 = vunpack.c.l.bf16 %v1267_v32  ;;  %v1364_v56 = vunpack.c.h.bf16 %v1267_v32  ;;  %v6855_v57 = vpack.c.bf16 %v658_v0, %v8873_v18  ;;  %v1462_v46 = vmul.f32 %v7757_v34, %v1362_v19 }
 0x2d4   :  { %v5630_v62 = vmax.f32 %v5534_v53, 0.0  ;;  %v5631_v40 = vmax.f32 %v5535_v17, 0.0  ;;  %976 = vst [vmem:[#allocation2 + $0x24c] sm:$0xf] %v6775_v5  ;;  %v5725_v20 = vmin.f32 %v5629_v26, 6.0  ;;  %v6776_v44 = vpack.c.bf16 %v656_v8, %v656_v8 }
 0x2d5   :  { %v1463_v25 = vmul.f32 %v7757_v34, %v1363_v47  ;;  %v1464_v55 = vmul.f32 %v7757_v34, %v1364_v56  ;;  %7072 = vst [vmem:[#allocation2 + $0x260] sm:$0xff] %v6855_v57   ;;  %v1643_v30 = vmul.f32 %v7745_v24, %v1363_v47  ;;  %v1644_v41 = vmul.f32 %v7745_v24, %v1364_v56  ;;  %v3466_v53 = vld [vmem:[#allocation2 + $0x150] sm:$0x1] }
 0x2d6   :  { %v5726_v16 = vmin.f32 %v5630_v62, 6.0  ;;  %v5727_v51 = vmin.f32 %v5631_v40, 6.0  ;;  %v5946_v13 = vrot.slane %v5725_v20, 7  ;;  %977 = vst [vmem:[#allocation2 + $0x250] sm:$0xf] %v6776_v44  ;;  %v2077_v18 = vunpack.c.l.bf16 %v2045_v35  ;;  %v4110_v44 = vld [vmem:[#allocation2 + $0x15c] sm:$0xff]  }
 0x2d7   :  { %v2143_v2 = vmul.f32 %v7754_v33, %v1363_v47  ;;  %v2144_v27 = vmul.f32 %v7754_v33, %v1364_v56  ;;  %v1787_v58 = vrot.slane %v1643_v30, 1  ;;  %v1788_v22 = vrot.slane %v1644_v41, 1  ;;  %v4109_v40 = vld [vmem:[#allocation2 + $0x158] sm:$0x8] }
 0x2d8   :  { %v5947_v36 = vrot.slane %v5726_v16, 7  ;;  %v5949_v6 = vrot.slane %v5727_v51, 7  ;;  %v2145_v4 = vmul.f32 %v7754_v33, %v2077_v18  ;;  %v2784_v61 = vunpack.c.l.bf16 %v2688_v49 }
 0x2d9   :  { %v2366_v11 = vrot.slane %v2143_v2, 2  ;;  %v2367_v52 = vrot.slane %v2144_v27, 2  ;;  %v1789_v7 = vsel %vm1741_vm6, %v1787_v58, %v1788_v22  ;;  %v1979_v32 = vadd.f32 %v1787_v58, %v1462_v46 }
 0x2da   :  { %v5948_v48 = vsel %vm996_vm0, %v5946_v13, %v5947_v36  ;;  %v5950_v45 = vsel %vm996_vm0, %v5947_v36, %v5949_v6  ;;  %v1980_v29 = vadd.f32 %v1789_v7, %v1463_v25  ;;  %v1981_v50 = vadd.f32 %v1788_v22, %v1464_v55 }
 0x2db   :  { %v6114_v31 = vpack.c.bf16 %v5950_v45, %v5948_v48  ;;  %v2368_v19 = vsel %vm2290_vm7, %v2366_v11, %v2367_v52  ;;  %v2369_v17 = vrot.slane %v2145_v4, 2  ;;  %v2592_v5 = vadd.f32 %v2366_v11, %v1979_v32 }
 0x2dc   :  { %v2884_v0 = vmul.f32 %v7772_v60, %v2784_v61  ;;  %v2885_v26 = vmul.f32 %v8905_v15, %v7772_v60  ;;  %v2593_v8 = vadd.f32 %v2368_v19, %v1980_v29  ;;  %v2886_v47 = vmul.f32 %v8907_v38, %v7772_v60 }
 0x2dd   :  { %7327 = vmatprep.mubr.bf16.mxu1 %v6114_v31  ;;  %v3065_v56 = vmul.f32 %v8905_v15, %v7786_v12  ;;  %v3066_v62 = vmul.f32 %v8907_v38, %v7786_v12  ;;  %v2370_v57 = vsel %vm2290_vm7, %v2367_v52, %v2369_v17  ;;  %v3498_v35 = vunpack.c.l.bf16 %v3466_v53 }
 0x2de   :  { %v2980_v46 = vadd.f32 %v2884_v0, %v2592_v5  ;;  %v3564_v20 = vmul.f32 %v8905_v15, %v7778_v3  ;;  %v2594_v25 = vadd.f32 %v2370_v57, %v1981_v50  ;;  %v2981_v55 = vadd.f32 %v2885_v26, %v2593_v8  ;;  %v1002_v26 = vld [vmem:[#allocation2 + $0x16c] sm:$0x8] }
 0x2df   :  { %v3208_v16 = vrot.slane %v3065_v56, 1  ;;  %v3209_v51 = vrot.slane %v3066_v62, 1  ;;  %v3565_v30 = vmul.f32 %v8907_v38, %v7778_v3  ;;  %v3566_v41 = vmul.f32 %v7778_v3, %v3498_v35  ;;  %v4887_v38 = vld [vmem:[#allocation2 + $0x164] sm:$0x1] }
 0x2e0   :  { %v3786_v49 = vrot.slane %v3564_v20, 2  ;;  %v4205_v13 = vunpack.c.l.bf16 %v4109_v40  ;;  %v2982_v18 = vadd.f32 %v2886_v47, %v2594_v25  ;;  %v4206_v36 = vunpack.c.l.bf16 %v4110_v44  ;;  %v1007_v40 = vld [vmem:[#allocation2 + $0x178] sm:$0x1]  ;;  %v1078_v25 = vld [vmem:[#allocation2 + $0x194] sm:$0x8] }
 0x2e1   :  { %v3210_v2 = vsel %vm1741_vm6, %v3208_v16, %v3209_v51  ;;  %v3400_v27 = vadd.f32 %v3208_v16, %v2980_v46  ;;  %v3787_v58 = vrot.slane %v3565_v30, 2  ;;  %v3789_v15 = vrot.slane %v3566_v41, 2  ;;  %v1171_v41 = vld [vmem:[#allocation2 + $0x18c] sm:$0x1] }
 0x2e2   :  { %v3401_v6 = vadd.f32 %v3210_v2, %v2981_v55  ;;  %v4207_v22 = vunpack.c.h.bf16 %v4110_v44  ;;  %v3402_v4 = vadd.f32 %v3209_v51, %v2982_v18  ;;  %v4305_v52 = vmul.f32 %v7795_v21, %v4205_v13  ;;  %v1075_v44 = vld [vmem:[#allocation2 + $0x180] sm:$0x8]  ;;  %v1174_v2 = vld [vmem:[#allocation2 + $0x1a0] sm:$0x1] }
 0x2e3   :  { %v4012_v11 = vadd.f32 %v3786_v49, %v3400_v27  ;;  %v4306_v61 = vmul.f32 %v7795_v21, %v4206_v36  ;;  %v3788_v48 = vsel %vm2290_vm7, %v3786_v49, %v3787_v58  ;;  %v3790_v45 = vsel %vm2290_vm7, %v3787_v58, %v3789_v15  ;;  %v7083_v27 = vld [vmem:[#allocation2 + $0x170] sm:$0xff]  }
 0x2e4   :  { %v4307_v7 = vmul.f32 %v7795_v21, %v4207_v22  ;;  %v4486_v32 = vmul.f32 %v7798_v23, %v4206_v36  ;;  %v4013_v31 = vadd.f32 %v3788_v48, %v3401_v6  ;;  %v4014_v29 = vadd.f32 %v3790_v45, %v3402_v4 }
 0x2e5   :  { %v4401_v50 = vadd.f32 %v4305_v52, %v4012_v11  ;;  %v4487_v19 = vmul.f32 %v7798_v23, %v4207_v22  ;;  %v4919_v17 = vunpack.c.l.bf16 %v4887_v38  ;;  %v4985_v5 = vmul.f32 %v8859_v10, %v4206_v36  ;;  %v9010_v52 = vld [vmem:[%s10120_s4] ss:$0 sm:$0xff] }
 0x2e6   :  { %v4629_v53 = vrot.slane %v4486_v32, 1  ;;  %v4986_v0 = vmul.f32 %v8859_v10, %v4207_v22  ;;  %v4402_v8 = vadd.f32 %v4306_v61, %v4013_v31  ;;  %v4403_v47 = vadd.f32 %v4307_v7, %v4014_v29  ;;  %v2692_v22 = vld [vmem:[#allocation2 + $0x184] sm:$0xff]  }
 0x2e7   :  { %v4630_v56 = vrot.slane %v4487_v19, 1  ;;  %v517_v62 = vadd.f32 %v8935_v9, %v8732_v14  ;;  %v4987_v46 = vmul.f32 %v8859_v10, %v4919_v17  ;;  %v5207_v35 = vrot.slane %v4985_v5, 2 }
 0x2e8   :  { %v4821_v57 = vadd.f32 %v4629_v53, %v4401_v50  ;;  %v5208_v20 = vrot.slane %v4986_v0, 2  ;;  %v1003_v30 = vsel %vm7711_vm5, 0, %v1002_v26  ;;  %v1008_v6 = vsel %vm7705_vm2, 0, %v1007_v40 }
 0x2e9   :  { %v4631_v55 = vsel %vm1741_vm6, %v4629_v53, %v4630_v56  ;;  %v4823_v16 = vadd.f32 %v4630_v56, %v4403_v47  ;;  %v597_v51 = vmax.f32 %v517_v62, 0.0  ;;  %v5210_v14 = vrot.slane %v4987_v46, 2  ;;  %1004 = vst [vmem:[#allocation2 + $0x16c] sm:$0x8] %v1003_v30  ;;  %1009 = vst [vmem:[#allocation2 + $0x178] sm:$0x1] %v1008_v6 }
 0x2ea   :  { %v4822_v49 = vadd.f32 %v4631_v55, %v4402_v8  ;;  %v5209_v13 = vsel %vm2290_vm7, %v5207_v35, %v5208_v20  ;;  %v5433_v18 = vadd.f32 %v5207_v35, %v4821_v57  ;;  %v1076_v58 = vsel %vm7711_vm5, 0, %v1075_v44 }
 0x2eb   :  { %v8998_v36 = vmin.f32 %v597_v51, 6.0  ;;  %v1079_v15 = vsel %vm7711_vm5, 0, %v1078_v25  ;;  %v5211_v4 = vsel %vm2290_vm7, %v5208_v20, %v5210_v14  ;;  %1077 = vst [vmem:[#allocation2 + $0x180] sm:$0x8] %v1076_v58  ;;  %v1172_v38 = vsel %vm7705_vm2, 0, %v1171_v41 }
 0x2ec   :  { %v5434_v11 = vadd.f32 %v5209_v13, %v4822_v49  ;;  %v5536_v61 = vadd.f32 %v9010_v52, %v5433_v18  ;;  %1080 = vst [vmem:[#allocation2 + $0x194] sm:$0x8] %v1079_v15  ;;  %v5435_v48 = vadd.f32 %v5211_v4, %v4823_v16  ;;  %1173 = vst [vmem:[#allocation2 + $0x18c] sm:$0x1] %v1172_v38  ;;  %v1175_v45 = vsel %vm7705_vm2, 0, %v1174_v2 }
 0x2ed   :  { %v6901_v7 = vunpack.c.l.bf16 %v7083_v27  ;;  %v6902_v32 = vunpack.c.h.bf16 %v7083_v27  ;;  %1176 = vst [vmem:[#allocation2 + $0x1a0] sm:$0x1] %v1175_v45  ;;  %v2788_v50 = vunpack.c.l.bf16 %v2692_v22  ;;  %v2789_v19 = vunpack.c.h.bf16 %v2692_v22 }
 0x2ee   :  { %v5537_v31 = vadd.f32 %v9010_v52, %v5434_v11  ;;  %v5632_v29 = vmax.f32 %v5536_v61, 0.0  ;;  %v5538_v53 = vadd.f32 %v9010_v52, %v5435_v48 }
 0x2ef   :  { %v1466_v17 = vmul.f32 %v6901_v7, %v7757_v34  ;;  %v1467_v5 = vmul.f32 %v6902_v32, %v7757_v34  ;;  %v1645_v0 = vmul.f32 %v6901_v7, %v7745_v24  ;;  %v1646_v47 = vmul.f32 %v6902_v32, %v7745_v24 }
 0x2f0   :  { %v5633_v26 = vmax.f32 %v5537_v31, 0.0  ;;  %v5728_v8 = vmin.f32 %v5632_v29, 6.0  ;;  %v2146_v56 = vmul.f32 %v6901_v7, %v7754_v33  ;;  %v5634_v62 = vmax.f32 %v5538_v53, 0.0  ;;  %v1269_v40 = vld [vmem:[#allocation2 + $0x16c] sm:$0x8]  ;;  %v7115_v29 = vld [vmem:[#allocation2 + $0x198] sm:$0xff]  }
 0x2f1   :  { %v1790_v57 = vrot.slane %v1645_v0, 1  ;;  %v2147_v46 = vmul.f32 %v6902_v32, %v7754_v33  ;;  %v2888_v35 = vmul.f32 %v7772_v60, %v2788_v50  ;;  %v1365_v25 = vunpack.c.l.bf16 %v1269_v40  ;;  %v2046_v51 = vld [vmem:[#allocation2 + $0x178] sm:$0x1] }
 0x2f2   :  { %v5729_v20 = vmin.f32 %v5633_v26, 6.0  ;;  %v5951_v44 = vrot.slane %v5728_v8, 7  ;;  %v1791_v55 = vrot.slane %v1646_v47, 1  ;;  %v5730_v16 = vmin.f32 %v5634_v62, 6.0  ;;  %v2691_v27 = vld [vmem:[#allocation2 + $0x180] sm:$0x8] }
 0x2f3   :  { %v2371_v30 = vrot.slane %v2146_v56, 2  ;;  %v2372_v41 = vrot.slane %v2147_v46, 2  ;;  %v2889_v49 = vmul.f32 %v7772_v60, %v2789_v19  ;;  %v1465_v14 = vmul.f32 %v7757_v34, %v1365_v25  ;;  %v3467_v48 = vld [vmem:[#allocation2 + $0x18c] sm:$0x1]  ;;  %v4112_v46 = vld [vmem:[#allocation2 + $0x194] sm:$0x8] }
 0x2f4   :  { %v5952_v13 = vrot.slane %v5729_v20, 7  ;;  %v1792_v18 = vsel %vm1741_vm6, %v1790_v57, %v1791_v55  ;;  %v1984_v2 = vadd.f32 %v1791_v55, %v1467_v5  ;;  %v5954_v6 = vrot.slane %v5730_v16, 7 }
 0x2f5   :  { %v1983_v58 = vadd.f32 %v1792_v18, %v1466_v17  ;;  %v2078_v15 = vunpack.c.l.bf16 %v2046_v51  ;;  %v2373_v22 = vsel %vm2290_vm7, %v2371_v30, %v2372_v41  ;;  %v1982_v11 = vadd.f32 %v1790_v57, %v1465_v14 }
 0x2f6   :  { %v5953_v4 = vsel %vm996_vm0, %v5951_v44, %v5952_v13  ;;  %v2787_v61 = vunpack.c.l.bf16 %v2691_v27  ;;  %v3067_v38 = vmul.f32 %v7786_v12, %v2788_v50  ;;  %v5955_v45 = vsel %vm996_vm0, %v5952_v13, %v5954_v6  ;;  %v4888_v27 = vld [vmem:[#allocation2 + $0x1a0] sm:$0x1] }
 0x2f7   :  { %v2148_v7 = vmul.f32 %v7754_v33, %v2078_v15  ;;  %v2596_v32 = vadd.f32 %v2373_v22, %v1983_v58  ;;  %v3068_v31 = vmul.f32 %v7786_v12, %v2789_v19  ;;  %v6115_v53 = vpack.c.bf16 %v5955_v45, %v5953_v4 }
 0x2f8   :  { %v2595_v17 = vadd.f32 %v2371_v30, %v1982_v11  ;;  %v2887_v5 = vmul.f32 %v7772_v60, %v2787_v61  ;;  %v3211_v0 = vrot.slane %v3067_v38, 1  ;;  %v3499_v56 = vunpack.c.l.bf16 %v3467_v48 }
 0x2f9   :  { %v2374_v26 = vrot.slane %v2148_v7, 2  ;;  %v2984_v8 = vadd.f32 %v2888_v35, %v2596_v32  ;;  %v3212_v47 = vrot.slane %v3068_v31, 1  ;;  %7328 = vmatmul.mubr.bf16.gmra.mrb[28].mxu1 %v6115_v53  ;;  %v3567_v40 = vmul.f32 %v7778_v3, %v2788_v50 }
 0x2fa   :  { %v2983_v62 = vadd.f32 %v2887_v5, %v2595_v17  ;;  %v3568_v57 = vmul.f32 %v7778_v3, %v2789_v19  ;;  %v9038_v20 = vunpack.c.l.bf16 %v7115_v29  ;;  %v3569_v55 = vmul.f32 %v7778_v3, %v3499_v56 }
 0x2fb   :  { %v2375_v44 = vsel %vm2290_vm7, %v2372_v41, %v2374_v26  ;;  %v3213_v25 = vsel %vm1741_vm6, %v3211_v0, %v3212_v47  ;;  %v9043_v16 = vunpack.c.h.bf16 %v7115_v29  ;;  %v3791_v13 = vrot.slane %v3567_v40, 2 }
 0x2fc   :  { %v2597_v35 = vadd.f32 %v2375_v44, %v1984_v2  ;;  %v3403_v51 = vadd.f32 %v3211_v0, %v2983_v62  ;;  %v3404_v30 = vadd.f32 %v3213_v25, %v2984_v8  ;;  %v3792_v14 = vrot.slane %v3568_v57, 2 }
 0x2fd   :  { %v3794_v18 = vrot.slane %v3569_v55, 2  ;;  %v4208_v50 = vunpack.c.l.bf16 %v4112_v46  ;;  %v4309_v19 = vmul.f32 %v9038_v20, %v7795_v21  ;;  %v4310_v41 = vmul.f32 %v9043_v16, %v7795_v21  ;;  %v1081_v46 = vld [vmem:[#allocation2 + $0x1a8] sm:$0x8] }
 0x2fe   :  { %v2985_v6 = vadd.f32 %v2889_v49, %v2597_v35  ;;  %v4015_v58 = vadd.f32 %v3791_v13, %v3403_v51  ;;  %v4488_v15 = vmul.f32 %v9038_v20, %v7798_v23  ;;  %v3793_v2 = vsel %vm2290_vm7, %v3791_v13, %v3792_v14 }
 0x2ff   :  { %v3795_v22 = vsel %vm2290_vm7, %v3792_v14, %v3794_v18  ;;  %v4308_v4 = vmul.f32 %v7795_v21, %v4208_v50  ;;  %v4489_v11 = vmul.f32 %v9043_v16, %v7798_v23  ;;  %v4016_v38 = vadd.f32 %v3793_v2, %v3404_v30  ;;  %v1272_v18 = vld [vmem:[#allocation2 + $0x180] sm:$0x8] }
 0x300   :  { %v3405_v61 = vadd.f32 %v3212_v47, %v2985_v6  ;;  %v4632_v48 = vrot.slane %v4488_v15, 1  ;;  %v4920_v49 = vunpack.c.l.bf16 %v4888_v27  ;;  %v4988_v32 = vmul.f32 %v8859_v10, %v9038_v20 }
 0x301   :  { %v4404_v45 = vadd.f32 %v4308_v4, %v4015_v58  ;;  %v4633_v7 = vrot.slane %v4489_v11, 1  ;;  %v4989_v31 = vmul.f32 %v8859_v10, %v9043_v16  ;;  %v4405_v53 = vadd.f32 %v4309_v19, %v4016_v38  ;;  %v1273_v58 = vld [vmem:[#allocation2 + $0x184] sm:$0xff]  }
 0x302   :  { %v4017_v29 = vadd.f32 %v3795_v22, %v3405_v61  ;;  %v4990_v17 = vmul.f32 %v8859_v10, %v4920_v49  ;;  %v509_v5 = vadd.f32 %v8935_v9, %v8798_v54  ;;  %v5212_v8 = vrot.slane %v4988_v32, 2  ;;  %v1177_v54 = vld [vmem:[#allocation2 + $0x1b4] sm:$0x1] }
 0x303   :  { %v4634_v0 = vsel %vm1741_vm6, %v4632_v48, %v4633_v7  ;;  %v4824_v26 = vadd.f32 %v4632_v48, %v4404_v45  ;;  %v5213_v47 = vrot.slane %v4989_v31, 2  ;;  %v520_v55 = vadd.f32 %v8935_v9, %v8801_v42  ;;  %v2047_v45 = vld [vmem:[#allocation2 + $0x18c] sm:$0x1] }
 0x304   :  { %v4406_v56 = vadd.f32 %v4310_v41, %v4017_v29  ;;  %v4825_v62 = vadd.f32 %v4634_v0, %v4405_v53  ;;  %v5215_v40 = vrot.slane %v4990_v17, 2  ;;  %v595_v57 = vmax.f32 %v509_v5, 0.0 }
 0x305   :  { %v5214_v44 = vsel %vm2290_vm7, %v5212_v8, %v5213_v47  ;;  %v5436_v25 = vadd.f32 %v5212_v8, %v4824_v26  ;;  %v512_v35 = vadd.f32 %v8935_v9, %v8805_v43  ;;  %v598_v19 = vmax.f32 %v520_v55, 0.0  ;;  %v2694_v26 = vld [vmem:[#allocation2 + $0x194] sm:$0x8] }
 0x306   :  { %v4826_v51 = vadd.f32 %v4633_v7, %v4406_v56  ;;  %v5216_v30 = vsel %vm2290_vm7, %v5213_v47, %v5215_v40  ;;  %v5437_v13 = vadd.f32 %v5214_v44, %v4825_v62  ;;  %v659_v14 = vmin.f32 %v595_v57, 6.0 }
 0x307   :  { %v5539_v50 = vadd.f32 %v9010_v52, %v5436_v25  ;;  %v596_v27 = vmax.f32 %v512_v35, 0.0  ;;  %v1082_v6 = vsel %vm7711_vm5, 0, %v1081_v46  ;;  %v1178_v43 = vsel %vm7705_vm2, 0, %v1177_v54 }
 0x308   :  { %v5438_v41 = vadd.f32 %v5216_v30, %v4826_v51  ;;  %v5540_v42 = vadd.f32 %v9010_v52, %v5437_v13  ;;  %v6779_v15 = vpack.c.bf16 %v659_v14, %v659_v14  ;;  %1083 = vst [vmem:[#allocation2 + $0x1a8] sm:$0x8] %v1082_v6  ;;  %v662_v22 = vmin.f32 %v598_v19, 6.0  ;;  %1179 = vst [vmem:[#allocation2 + $0x1b4] sm:$0x1] %v1178_v43 }
 0x309   :  { %v5635_v2 = vmax.f32 %v5539_v50, 0.0  ;;  %v660_v4 = vmin.f32 %v596_v27, 6.0  ;;  %v1368_v11 = vunpack.c.l.bf16 %v1272_v18  ;;  %v1369_v48 = vunpack.c.l.bf16 %v1273_v58 }
 0x30a   :  { %v5541_v61 = vadd.f32 %v9010_v52, %v5438_v41  ;;  %v5636_v38 = vmax.f32 %v5540_v42, 0.0  ;;  %980 = vst [vmem:[#allocation2 + $0x274] sm:$0xf] %v6779_v15  ;;  %v1370_v49 = vunpack.c.h.bf16 %v1273_v58  ;;  %v6860_v32 = vpack.c.bf16 %v662_v22, %v8998_v36  ;;  %v3468_v42 = vld [vmem:[#allocation2 + $0x1a0] sm:$0x1] }
 0x30b   :  { %v5731_v7 = vmin.f32 %v5635_v2, 6.0  ;;  %v6780_v31 = vpack.c.bf16 %v660_v4, %v660_v4  ;;  %v1468_v29 = vmul.f32 %v7757_v34, %v1368_v11  ;;  %v1469_v5 = vmul.f32 %v7757_v34, %v1369_v48 }
 0x30c   :  { %v5637_v53 = vmax.f32 %v5541_v61, 0.0  ;;  %v5732_v17 = vmin.f32 %v5636_v38, 6.0  ;;  %v1470_v0 = vmul.f32 %v7757_v34, %v1370_v49  ;;  %7073 = vst [vmem:[#allocation2 + $0x288] sm:$0xff] %v6860_v32   ;;  %v1647_v47 = vmul.f32 %v7745_v24, %v1369_v48 }
 0x30d   :  { %v5956_v8 = vrot.slane %v5731_v7, 7  ;;  %981 = vst [vmem:[#allocation2 + $0x278] sm:$0xf] %v6780_v31  ;;  %v1648_v56 = vmul.f32 %v7745_v24, %v1370_v49  ;;  %v2079_v62 = vunpack.c.l.bf16 %v2047_v45  ;;  %v2149_v57 = vmul.f32 %v7754_v33, %v1369_v48  ;;  %v4116_v31 = vld [vmem:[#allocation2 + $0x1ac] sm:$0xff]  }
 0x30e   :  { %v5733_v40 = vmin.f32 %v5637_v53, 6.0  ;;  %v5957_v36 = vrot.slane %v5732_v17, 7  ;;  %v2150_v46 = vmul.f32 %v7754_v33, %v1370_v49  ;;  %v1793_v44 = vrot.slane %v1647_v47, 1 }
 0x30f   :  { %v1794_v25 = vrot.slane %v1648_v56, 1  ;;  %v2151_v55 = vmul.f32 %v7754_v33, %v2079_v62  ;;  %v2790_v35 = vunpack.c.l.bf16 %v2694_v26  ;;  %v2376_v30 = vrot.slane %v2149_v57, 2  ;;  %v4115_v48 = vld [vmem:[#allocation2 + $0x1a8] sm:$0x8] }
 0x310   :  { %v5958_v54 = vsel %vm996_vm0, %v5956_v8, %v5957_v36  ;;  %v5959_v51 = vrot.slane %v5733_v40, 7  ;;  %v2377_v13 = vrot.slane %v2150_v46, 2  ;;  %v1985_v18 = vadd.f32 %v1793_v44, %v1468_v29 }
 0x311   :  { %v1795_v14 = vsel %vm1741_vm6, %v1793_v44, %v1794_v25  ;;  %v1987_v50 = vadd.f32 %v1794_v25, %v1470_v0  ;;  %v2379_v19 = vrot.slane %v2151_v55, 2  ;;  %v2890_v41 = vmul.f32 %v7772_v60, %v2790_v35  ;;  %v4889_v55 = vld [vmem:[#allocation2 + $0x1b4] sm:$0x1] }
 0x312   :  { %v5960_v27 = vsel %vm996_vm0, %v5957_v36, %v5959_v51  ;;  %v1986_v6 = vadd.f32 %v1795_v14, %v1469_v5  ;;  %v2378_v58 = vsel %vm2290_vm7, %v2376_v30, %v2377_v13  ;;  %v2598_v2 = vadd.f32 %v2376_v30, %v1985_v18 }
 0x313   :  { %v6116_v15 = vpack.c.bf16 %v5960_v27, %v5958_v54  ;;  %v2380_v43 = vsel %vm2290_vm7, %v2377_v13, %v2379_v19  ;;  %v2891_v22 = vmul.f32 %v9038_v20, %v7772_v60  ;;  %v2892_v61 = vmul.f32 %v9043_v16, %v7772_v60 }
 0x314   :  { %v2599_v4 = vadd.f32 %v2378_v58, %v1986_v6  ;;  %v2600_v11 = vadd.f32 %v2380_v43, %v1987_v50  ;;  %v3069_v38 = vmul.f32 %v9038_v20, %v7786_v12  ;;  %v2986_v49 = vadd.f32 %v2890_v41, %v2598_v2 }
 0x315   :  { %7331 = vmatprep.mubr.bf16.mxu1 %v6116_v15  ;;  %v3070_v45 = vmul.f32 %v9043_v16, %v7786_v12  ;;  %v3500_v7 = vunpack.c.l.bf16 %v3468_v42  ;;  %v3570_v32 = vmul.f32 %v9038_v20, %v7778_v3  ;;  %v3571_v5 = vmul.f32 %v9043_v16, %v7778_v3 }
 0x316   :  { %v2987_v29 = vadd.f32 %v2891_v22, %v2599_v4  ;;  %v2988_v53 = vadd.f32 %v2892_v61, %v2600_v11  ;;  %v3214_v17 = vrot.slane %v3069_v38, 1  ;;  %v4211_v47 = vunpack.c.l.bf16 %v4115_v48  ;;  %v1084_v61 = vld [vmem:[#allocation2 + $0x1bc] sm:$0x8]  ;;  %v1180_v38 = vld [vmem:[#allocation2 + $0x1c8] sm:$0x1] }
 0x317   :  { %v3215_v0 = vrot.slane %v3070_v45, 1  ;;  %v3572_v26 = vmul.f32 %v7778_v3, %v3500_v7  ;;  %v3796_v8 = vrot.slane %v3570_v32, 2  ;;  %v3797_v62 = vrot.slane %v3571_v5, 2  ;;  %v1275_v32 = vld [vmem:[#allocation2 + $0x194] sm:$0x8] }
 0x318   :  { %v3406_v56 = vadd.f32 %v3214_v17, %v2986_v49  ;;  %v4212_v40 = vunpack.c.l.bf16 %v4116_v31  ;;  %v4213_v36 = vunpack.c.h.bf16 %v4116_v31  ;;  %v4311_v25 = vmul.f32 %v7795_v21, %v4211_v47 }
 0x319   :  { %v3216_v57 = vsel %vm1741_vm6, %v3214_v17, %v3215_v0  ;;  %v3408_v46 = vadd.f32 %v3215_v0, %v2988_v53  ;;  %v3799_v44 = vrot.slane %v3572_v26, 2  ;;  %v3798_v54 = vsel %vm2290_vm7, %v3796_v8, %v3797_v62 }
 0x31a   :  { %v3407_v35 = vadd.f32 %v3216_v57, %v2987_v29  ;;  %v4018_v51 = vadd.f32 %v3796_v8, %v3406_v56  ;;  %v4312_v30 = vmul.f32 %v7795_v21, %v4212_v40  ;;  %v4313_v14 = vmul.f32 %v7795_v21, %v4213_v36 }
 0x31b   :  { %v3800_v13 = vsel %vm2290_vm7, %v3797_v62, %v3799_v44  ;;  %v4490_v18 = vmul.f32 %v7798_v23, %v4212_v40  ;;  %v4491_v50 = vmul.f32 %v7798_v23, %v4213_v36  ;;  %v4921_v58 = vunpack.c.l.bf16 %v4889_v55  ;;  %v2048_v62 = vld [vmem:[#allocation2 + $0x1a0] sm:$0x1] }
 0x31c   :  { %v4019_v19 = vadd.f32 %v3798_v54, %v3407_v35  ;;  %v4020_v27 = vadd.f32 %v3800_v13, %v3408_v46  ;;  %v4407_v6 = vadd.f32 %v4311_v25, %v4018_v51  ;;  %v4991_v15 = vmul.f32 %v8859_v10, %v4212_v40 }
 0x31d   :  { %v4635_v41 = vrot.slane %v4490_v18, 1  ;;  %v4636_v42 = vrot.slane %v4491_v50, 1  ;;  %v4992_v43 = vmul.f32 %v8859_v10, %v4213_v36  ;;  %v4993_v4 = vmul.f32 %v8859_v10, %v4921_v58 }
 0x31e   :  { %v4408_v2 = vadd.f32 %v4312_v30, %v4019_v19  ;;  %v4409_v22 = vadd.f32 %v4313_v14, %v4020_v27  ;;  %v533_v11 = vadd.f32 %v8935_v9, %v8857_v28  ;;  %v5217_v45 = vrot.slane %v4991_v15, 2 }
 0x31f   :  { %v4637_v48 = vsel %vm1741_vm6, %v4635_v41, %v4636_v42  ;;  %v4827_v49 = vadd.f32 %v4635_v41, %v4407_v6  ;;  %v5218_v7 = vrot.slane %v4992_v43, 2  ;;  %v5220_v53 = vrot.slane %v4993_v4, 2  ;;  %v2698_v4 = vld [vmem:[#allocation2 + $0x1ac] sm:$0xff]  }
 0x320   :  { %v4828_v31 = vadd.f32 %v4637_v48, %v4408_v2  ;;  %v4829_v29 = vadd.f32 %v4636_v42, %v4409_v22  ;;  %v601_v17 = vmax.f32 %v533_v11, 0.0  ;;  %v1085_v10 = vsel %vm7711_vm5, 0, %v1084_v61  ;;  %v2697_v42 = vld [vmem:[#allocation2 + $0x1a8] sm:$0x8] }
 0x321   :  { %v5219_v5 = vsel %vm2290_vm7, %v5217_v45, %v5218_v7  ;;  %v5439_v0 = vadd.f32 %v5217_v45, %v4827_v49  ;;  %v1181_v28 = vsel %vm7705_vm2, 0, %v1180_v38  ;;  %v5221_v26 = vsel %vm2290_vm7, %v5218_v7, %v5220_v53  ;;  %1086 = vst [vmem:[#allocation2 + $0x1bc] sm:$0x8] %v1085_v10  ;;  %v3469_v10 = vld [vmem:[#allocation2 + $0x1b4] sm:$0x1] }
 0x322   :  { %v5440_v8 = vadd.f32 %v5219_v5, %v4828_v31  ;;  %v9125_v47 = vmin.f32 %v601_v17, 6.0  ;;  %1182 = vst [vmem:[#allocation2 + $0x1c8] sm:$0x1] %v1181_v28  ;;  %v1371_v56 = vunpack.c.l.bf16 %v1275_v32  ;;  %v5441_v40 = vadd.f32 %v5221_v26, %v4829_v29 }
 0x323   :  { %v5542_v36 = vadd.f32 %v9010_v52, %v5439_v0  ;;  %v1472_v57 = vmul.f32 %v9038_v20, %v7757_v34  ;;  %v1473_v46 = vmul.f32 %v9043_v16, %v7757_v34  ;;  %v1649_v55 = vmul.f32 %v9038_v20, %v7745_v24 }
 0x324   :  { %v5543_v44 = vadd.f32 %v9010_v52, %v5440_v8  ;;  %v1471_v25 = vmul.f32 %v7757_v34, %v1371_v56  ;;  %v1650_v35 = vmul.f32 %v9043_v16, %v7745_v24  ;;  %v5544_v54 = vadd.f32 %v9010_v52, %v5441_v40 }
 0x325   :  { %v5638_v51 = vmax.f32 %v5542_v36, 0.0  ;;  %v2080_v30 = vunpack.c.l.bf16 %v2048_v62  ;;  %v2152_v13 = vmul.f32 %v9038_v20, %v7754_v33  ;;  %v1796_v18 = vrot.slane %v1649_v55, 1  ;;  %v7116_v62 = vld [vmem:[#allocation2 + $0x1c0] sm:$0xff]  }
 0x326   :  { %v5639_v14 = vmax.f32 %v5543_v44, 0.0  ;;  %v1797_v50 = vrot.slane %v1650_v35, 1  ;;  %v2153_v19 = vmul.f32 %v9043_v16, %v7754_v33  ;;  %v5640_v27 = vmax.f32 %v5544_v54, 0.0 }
 0x327   :  { %v5734_v6 = vmin.f32 %v5638_v51, 6.0  ;;  %v2154_v58 = vmul.f32 %v7754_v33, %v2080_v30  ;;  %v2381_v41 = vrot.slane %v2152_v13, 2  ;;  %v1988_v2 = vadd.f32 %v1796_v18, %v1471_v25 }
 0x328   :  { %v5735_v15 = vmin.f32 %v5639_v14, 6.0  ;;  %v1798_v43 = vsel %vm1741_vm6, %v1796_v18, %v1797_v50  ;;  %v1990_v22 = vadd.f32 %v1797_v50, %v1473_v46  ;;  %v5736_v11 = vmin.f32 %v5640_v27, 6.0  ;;  %v4118_v44 = vld [vmem:[#allocation2 + $0x1bc] sm:$0x8] }
 0x329   :  { %v5961_v20 = vrot.slane %v5734_v6, 7  ;;  %v1989_v61 = vadd.f32 %v1798_v43, %v1472_v57  ;;  %v2382_v38 = vrot.slane %v2153_v19, 2  ;;  %v2384_v49 = vrot.slane %v2154_v58, 2 }
 0x32a   :  { %v5962_v48 = vrot.slane %v5735_v15, 7  ;;  %v2601_v45 = vadd.f32 %v2381_v41, %v1988_v2  ;;  %v2793_v16 = vunpack.c.l.bf16 %v2697_v42  ;;  %v5964_v7 = vrot.slane %v5736_v11, 7  ;;  %v4890_v15 = vld [vmem:[#allocation2 + $0x1c8] sm:$0x1] }
 0x32b   :  { %v2383_v32 = vsel %vm2290_vm7, %v2381_v41, %v2382_v38  ;;  %v2794_v31 = vunpack.c.l.bf16 %v2698_v4  ;;  %v2795_v29 = vunpack.c.h.bf16 %v2698_v4  ;;  %v2385_v17 = vsel %vm2290_vm7, %v2382_v38, %v2384_v49 }
 0x32c   :  { %v5963_v53 = vsel %vm996_vm0, %v5961_v20, %v5962_v48  ;;  %v2602_v5 = vadd.f32 %v2383_v32, %v1989_v61  ;;  %v2893_v0 = vmul.f32 %v7772_v60, %v2793_v16  ;;  %v5965_v28 = vsel %vm996_vm0, %v5962_v48, %v5964_v7 }
 0x32d   :  { %v2603_v26 = vadd.f32 %v2385_v17, %v1990_v22  ;;  %v2894_v8 = vmul.f32 %v7772_v60, %v2794_v31  ;;  %v2895_v56 = vmul.f32 %v7772_v60, %v2795_v29  ;;  %v6117_v40 = vpack.c.bf16 %v5965_v28, %v5963_v53 }
 0x32e   :  { %v2989_v36 = vadd.f32 %v2893_v0, %v2601_v45  ;;  %v3071_v57 = vmul.f32 %v7786_v12, %v2794_v31  ;;  %v3072_v46 = vmul.f32 %v7786_v12, %v2795_v29  ;;  %v3501_v35 = vunpack.c.l.bf16 %v3469_v10 }
 0x32f   :  { %v2990_v25 = vadd.f32 %v2894_v8, %v2602_v5  ;;  %v2991_v55 = vadd.f32 %v2895_v56, %v2603_v26  ;;  %v3573_v54 = vmul.f32 %v7778_v3, %v2794_v31  ;;  %7332 = vmatmul.mubr.bf16.gmra.mrb[32].mxu1 %v6117_v40  ;;  %v3574_v13 = vmul.f32 %v7778_v3, %v2795_v29  ;;  %v9173_v29 = vld [vmem:[#allocation8 + $0x8] ss:$0 sm:$0xff] }
 0x330   :  { %v3217_v51 = vrot.slane %v3071_v57, 1  ;;  %v3218_v30 = vrot.slane %v3072_v46, 1  ;;  %v9156_v14 = vunpack.c.l.bf16 %v7116_v62  ;;  %v3575_v18 = vmul.f32 %v7778_v3, %v3501_v35  ;;  %v1087_v35 = vld [vmem:[#allocation2 + $0x1d0] sm:$0x8] }
 0x331   :  { %v3801_v50 = vrot.slane %v3573_v54, 2  ;;  %v9159_v19 = vunpack.c.h.bf16 %v7116_v62  ;;  %v4214_v27 = vunpack.c.l.bf16 %v4118_v44  ;;  %v3802_v42 = vrot.slane %v3574_v13, 2  ;;  %v1183_v54 = vld [vmem:[#allocation2 + $0x1dc] sm:$0x1] }
 0x332   :  { %v3219_v6 = vsel %vm1741_vm6, %v3217_v51, %v3218_v30  ;;  %v3409_v58 = vadd.f32 %v3217_v51, %v2989_v36  ;;  %v3411_v41 = vadd.f32 %v3218_v30, %v2991_v55  ;;  %v3804_v2 = vrot.slane %v3575_v18, 2 }
 0x333   :  { %v3410_v43 = vadd.f32 %v3219_v6, %v2990_v25  ;;  %v4314_v22 = vmul.f32 %v7795_v21, %v4214_v27  ;;  %v4315_v4 = vmul.f32 %v9156_v14, %v7795_v21  ;;  %v3803_v11 = vsel %vm2290_vm7, %v3801_v50, %v3802_v42  ;;  %v1278_v6 = vld [vmem:[#allocation2 + $0x1a8] sm:$0x8] }
 0x334   :  { %v4021_v20 = vadd.f32 %v3801_v50, %v3409_v58  ;;  %v4316_v61 = vmul.f32 %v9159_v19, %v7795_v21  ;;  %v4492_v38 = vmul.f32 %v9156_v14, %v7798_v23  ;;  %v3805_v48 = vsel %vm2290_vm7, %v3802_v42, %v3804_v2  ;;  %v1279_v58 = vld [vmem:[#allocation2 + $0x1ac] sm:$0xff]  }
 0x335   :  { %v4022_v49 = vadd.f32 %v3803_v11, %v3410_v43  ;;  %v4493_v45 = vmul.f32 %v9159_v19, %v7798_v23  ;;  %v4922_v16 = vunpack.c.l.bf16 %v4890_v15  ;;  %v4023_v7 = vadd.f32 %v3805_v48, %v3411_v41 }
 0x336   :  { %v4410_v32 = vadd.f32 %v4314_v22, %v4021_v20  ;;  %v4638_v31 = vrot.slane %v4492_v38, 1  ;;  %v4994_v53 = vmul.f32 %v9173_v29, %v9156_v14  ;;  %v4995_v0 = vmul.f32 %v9173_v29, %v9159_v19 }
 0x337   :  { %v4411_v17 = vadd.f32 %v4315_v4, %v4022_v49  ;;  %v4639_v5 = vrot.slane %v4493_v45, 1  ;;  %v4996_v10 = vmul.f32 %v9173_v29, %v4922_v16  ;;  %v4412_v28 = vadd.f32 %v4316_v61, %v4023_v7  ;;  %v2049_v7 = vld [vmem:[#allocation2 + $0x1b4] sm:$0x1] }
 0x338   :  { %v4830_v26 = vadd.f32 %v4638_v31, %v4410_v32  ;;  %v5222_v8 = vrot.slane %v4994_v53, 2  ;;  %v525_v56 = vadd.f32 %v8935_v9, %v8921_v39  ;;  %v5223_v40 = vrot.slane %v4995_v0, 2  ;;  %v7399_v39 = vld [vmem:[%s10118_s2] ss:$0 sm:$0xff] }
 0x339   :  { %v4640_v62 = vsel %vm1741_vm6, %v4638_v31, %v4639_v5  ;;  %v5225_v36 = vrot.slane %v4996_v10, 2  ;;  %v536_v57 = vadd.f32 %v8935_v9, %v8927_v63  ;;  %v4832_v44 = vadd.f32 %v4639_v5, %v4412_v28  ;;  %v2700_v5 = vld [vmem:[#allocation2 + $0x1bc] sm:$0x8] }
 0x33a   :  { %v4831_v46 = vadd.f32 %v4640_v62, %v4411_v17  ;;  %v5442_v25 = vadd.f32 %v5222_v8, %v4830_v26  ;;  %v599_v55 = vmax.f32 %v525_v56, 0.0  ;;  %v5224_v51 = vsel %vm2290_vm7, %v5222_v8, %v5223_v40 }
 0x33b   :  { %v5226_v30 = vsel %vm2290_vm7, %v5223_v40, %v5225_v36  ;;  %v602_v13 = vmax.f32 %v536_v57, 0.0  ;;  %v528_v18 = vadd.f32 %v7399_v39, %v8930_v37  ;;  %v1088_v15 = vsel %vm7711_vm5, 0, %v1087_v35 }
 0x33c   :  { %v5443_v50 = vadd.f32 %v5224_v51, %v4831_v46  ;;  %v5444_v27 = vadd.f32 %v5226_v30, %v4832_v44  ;;  %v5545_v63 = vadd.f32 %v9010_v52, %v5442_v25  ;;  %v663_v9 = vmin.f32 %v599_v55, 6.0  ;;  %1089 = vst [vmem:[#allocation2 + $0x1d0] sm:$0x8] %v1088_v15 }
 0x33d   :  { %v666_v41 = vmin.f32 %v602_v13, 6.0  ;;  %v600_v42 = vmax.f32 %v528_v18, 0.0  ;;  %v1184_v43 = vsel %vm7705_vm2, 0, %v1183_v54  ;;  %v1374_v61 = vunpack.c.l.bf16 %v1278_v6 }
 0x33e   :  { %v5546_v2 = vadd.f32 %v9010_v52, %v5443_v50  ;;  %v5547_v22 = vadd.f32 %v9010_v52, %v5444_v27  ;;  %v5641_v37 = vmax.f32 %v5545_v63, 0.0  ;;  %v6783_v4 = vpack.c.bf16 %v663_v9, %v663_v9  ;;  %1185 = vst [vmem:[#allocation2 + $0x1dc] sm:$0x1] %v1184_v43  ;;  %v3470_v63 = vld [vmem:[#allocation2 + $0x1c8] sm:$0x1] }
 0x33f   :  { %v6865_v11 = vpack.c.bf16 %v666_v41, %v9125_v47  ;;  %v664_v20 = vmin.f32 %v600_v42, 6.0  ;;  %v1375_v38 = vunpack.c.l.bf16 %v1279_v58  ;;  %v1376_v16 = vunpack.c.h.bf16 %v1279_v58 }
 0x340   :  { %v5642_v48 = vmax.f32 %v5546_v2, 0.0  ;;  %v5643_v49 = vmax.f32 %v5547_v22, 0.0  ;;  %v5737_v45 = vmin.f32 %v5641_v37, 6.0  ;;  %984 = vst [vmem:[#allocation2 + $0x29c] sm:$0xf] %v6783_v4  ;;  %v1474_v31 = vmul.f32 %v7757_v34, %v1374_v61 }
 0x341   :  { %7074 = vst [vmem:[#allocation2 + $0x2b0] sm:$0xff] %v6865_v11   ;;  %v6784_v32 = vpack.c.bf16 %v664_v20, %v664_v20  ;;  %v1475_v53 = vmul.f32 %v7757_v34, %v1375_v38  ;;  %v1651_v17 = vmul.f32 %v7745_v24, %v1375_v38  ;;  %v1476_v28 = vmul.f32 %v7757_v34, %v1376_v16 }
 0x342   :  { %v5738_v0 = vmin.f32 %v5642_v48, 6.0  ;;  %v5739_v47 = vmin.f32 %v5643_v49, 6.0  ;;  %v5966_v10 = vrot.slane %v5737_v45, 7  ;;  %v1652_v26 = vmul.f32 %v7745_v24, %v1376_v16  ;;  %v4122_v45 = vld [vmem:[#allocation2 + $0x1d4] sm:$0xff]  }
 0x343   :  { %985 = vst [vmem:[#allocation2 + $0x2a0] sm:$0xf] %v6784_v32  ;;  %v1799_v8 = vrot.slane %v1651_v17, 1  ;;  %v2081_v56 = vunpack.c.l.bf16 %v2049_v7  ;;  %v2155_v62 = vmul.f32 %v7754_v33, %v1375_v38  ;;  %v2156_v57 = vmul.f32 %v7754_v33, %v1376_v16  ;;  %v4121_v22 = vld [vmem:[#allocation2 + $0x1d0] sm:$0x8] }
 0x344   :  { %v5967_v40 = vrot.slane %v5738_v0, 7  ;;  %v5969_v36 = vrot.slane %v5739_v47, 7  ;;  %v2796_v46 = vunpack.c.l.bf16 %v2700_v5  ;;  %v1800_v44 = vrot.slane %v1652_v26, 1 }
 0x345   :  { %v1991_v25 = vadd.f32 %v1799_v8, %v1474_v31  ;;  %v2157_v55 = vmul.f32 %v7754_v33, %v2081_v56  ;;  %v2386_v35 = vrot.slane %v2155_v62, 2  ;;  %v2387_v30 = vrot.slane %v2156_v57, 2 }
 0x346   :  { %v5968_v54 = vsel %vm996_vm0, %v5966_v10, %v5967_v40  ;;  %v5970_v51 = vsel %vm996_vm0, %v5967_v40, %v5969_v36  ;;  %v2896_v13 = vmul.f32 %v7772_v60, %v2796_v46  ;;  %v1801_v18 = vsel %vm1741_vm6, %v1799_v8, %v1800_v44  ;;  %v4891_v36 = vld [vmem:[#allocation2 + $0x1dc] sm:$0x1] }
 0x347   :  { %v6118_v39 = vpack.c.bf16 %v5970_v51, %v5968_v54  ;;  %v1993_v50 = vadd.f32 %v1800_v44, %v1476_v28  ;;  %v2389_v27 = vrot.slane %v2157_v55, 2  ;;  %v1992_v9 = vadd.f32 %v1801_v18, %v1475_v53  ;;  %v1090_v55 = vld [vmem:[#allocation2 + $0x1e4] sm:$0x8] }
 0x348   :  { %v2388_v6 = vsel %vm2290_vm7, %v2386_v35, %v2387_v30  ;;  %v2604_v58 = vadd.f32 %v2386_v35, %v1991_v25  ;;  %v2897_v41 = vmul.f32 %v9156_v14, %v7772_v60  ;;  %v2898_v15 = vmul.f32 %v9159_v19, %v7772_v60 }
 0x349   :  { %7335 = vmatprep.mubr.bf16.mxu1 %v6118_v39  ;;  %v2390_v42 = vsel %vm2290_vm7, %v2387_v30, %v2389_v27  ;;  %v3073_v43 = vmul.f32 %v9156_v14, %v7786_v12  ;;  %v3074_v2 = vmul.f32 %v9159_v19, %v7786_v12  ;;  %v2605_v37 = vadd.f32 %v2388_v6, %v1992_v9 }
 0x34a   :  { %v2606_v4 = vadd.f32 %v2390_v42, %v1993_v50  ;;  %v2992_v11 = vadd.f32 %v2896_v13, %v2604_v58  ;;  %v3502_v20 = vunpack.c.l.bf16 %v3470_v63  ;;  %v3576_v48 = vmul.f32 %v9156_v14, %v7778_v3  ;;  %v1186_v13 = vld [vmem:[#allocation2 + $0x1f0] sm:$0x1]  ;;  %v1281_v63 = vld [vmem:[#allocation2 + $0x1bc] sm:$0x8] }
 0x34b   :  { %v3220_v61 = vrot.slane %v3073_v43, 1  ;;  %v3221_v38 = vrot.slane %v3074_v2, 1  ;;  %v3577_v49 = vmul.f32 %v9159_v19, %v7778_v3  ;;  %v2993_v16 = vadd.f32 %v2897_v41, %v2605_v37 }
 0x34c   :  { %v2994_v7 = vadd.f32 %v2898_v15, %v2606_v4  ;;  %v3578_v32 = vmul.f32 %v7778_v3, %v3502_v20  ;;  %v4217_v31 = vunpack.c.l.bf16 %v4121_v22  ;;  %v3806_v5 = vrot.slane %v3576_v48, 2 }
 0x34d   :  { %v3222_v53 = vsel %vm1741_vm6, %v3220_v61, %v3221_v38  ;;  %v3412_v17 = vadd.f32 %v3220_v61, %v2992_v11  ;;  %v3807_v0 = vrot.slane %v3577_v49, 2  ;;  %v4218_v26 = vunpack.c.l.bf16 %v4122_v45  ;;  %v2050_v49 = vld [vmem:[#allocation2 + $0x1c8] sm:$0x1] }
 0x34e   :  { %v3413_v47 = vadd.f32 %v3222_v53, %v2993_v16  ;;  %v3414_v10 = vadd.f32 %v3221_v38, %v2994_v7  ;;  %v3809_v28 = vrot.slane %v3578_v32, 2  ;;  %v4219_v62 = vunpack.c.h.bf16 %v4122_v45 }
 0x34f   :  { %v3808_v8 = vsel %vm2290_vm7, %v3806_v5, %v3807_v0  ;;  %v4024_v56 = vadd.f32 %v3806_v5, %v3412_v17  ;;  %v4317_v40 = vmul.f32 %v7795_v21, %v4217_v31  ;;  %v4318_v44 = vmul.f32 %v7795_v21, %v4218_v26 }
 0x350   :  { %v3810_v57 = vsel %vm2290_vm7, %v3807_v0, %v3809_v28  ;;  %v4025_v46 = vadd.f32 %v3808_v8, %v3413_v47  ;;  %v4494_v25 = vmul.f32 %v7798_v23, %v4218_v26  ;;  %v4319_v54 = vmul.f32 %v7795_v21, %v4219_v62 }
 0x351   :  { %v4026_v35 = vadd.f32 %v3810_v57, %v3414_v10  ;;  %v4413_v51 = vadd.f32 %v4317_v40, %v4024_v56  ;;  %v4495_v30 = vmul.f32 %v7798_v23, %v4219_v62  ;;  %v4923_v50 = vunpack.c.l.bf16 %v4891_v36 }
 0x352   :  { %v4414_v39 = vadd.f32 %v4318_v44, %v4025_v46  ;;  %v4641_v18 = vrot.slane %v4494_v25, 1  ;;  %v4997_v27 = vmul.f32 %v9173_v29, %v4218_v26  ;;  %v4998_v58 = vmul.f32 %v9173_v29, %v4219_v62  ;;  %v2703_v44 = vld [vmem:[#allocation2 + $0x1d0] sm:$0x8] }
 0x353   :  { %v4415_v9 = vadd.f32 %v4319_v54, %v4026_v35  ;;  %v4642_v6 = vrot.slane %v4495_v30, 1  ;;  %v1091_v41 = vsel %vm7711_vm5, 0, %v1090_v55  ;;  %v4999_v15 = vmul.f32 %v9173_v29, %v4923_v50 }
 0x354   :  { %v4833_v42 = vadd.f32 %v4641_v18, %v4413_v51  ;;  %v5227_v43 = vrot.slane %v4997_v27, 2  ;;  %1092 = vst [vmem:[#allocation2 + $0x1e4] sm:$0x8] %v1091_v41  ;;  %v1187_v2 = vsel %vm7705_vm2, 0, %v1186_v13  ;;  %v5228_v4 = vrot.slane %v4998_v58, 2 }
 0x355   :  { %v4643_v22 = vsel %vm1741_vm6, %v4641_v18, %v4642_v6  ;;  %v4835_v37 = vadd.f32 %v4642_v6, %v4415_v9  ;;  %1188 = vst [vmem:[#allocation2 + $0x1f0] sm:$0x1] %v1187_v2  ;;  %v1377_v11 = vunpack.c.l.bf16 %v1281_v63  ;;  %v5230_v61 = vrot.slane %v4999_v15, 2  ;;  %v3471_v58 = vld [vmem:[#allocation2 + $0x1dc] sm:$0x1] }
 0x356   :  { %v4834_v20 = vadd.f32 %v4643_v22, %v4414_v39  ;;  %v5445_v38 = vadd.f32 %v5227_v43, %v4833_v42  ;;  %v1478_v48 = vmul.f32 %v9156_v14, %v7757_v34  ;;  %v5229_v45 = vsel %vm2290_vm7, %v5227_v43, %v5228_v4 }
 0x357   :  { %v1477_v16 = vmul.f32 %v7757_v34, %v1377_v11  ;;  %v1479_v7 = vmul.f32 %v9159_v19, %v7757_v34  ;;  %v1653_v32 = vmul.f32 %v9156_v14, %v7745_v24  ;;  %v5231_v31 = vsel %vm2290_vm7, %v5228_v4, %v5230_v61 }
 0x358   :  { %v5446_v53 = vadd.f32 %v5229_v45, %v4834_v20  ;;  %v5548_v17 = vadd.f32 %v9010_v52, %v5445_v38  ;;  %v1654_v5 = vmul.f32 %v9159_v19, %v7745_v24  ;;  %v5447_v0 = vadd.f32 %v5231_v31, %v4835_v37 }
 0x359   :  { %v1802_v47 = vrot.slane %v1653_v32, 1  ;;  %v2082_v10 = vunpack.c.l.bf16 %v2050_v49  ;;  %v2158_v28 = vmul.f32 %v9156_v14, %v7754_v33  ;;  %v2159_v62 = vmul.f32 %v9159_v19, %v7754_v33  ;;  %v2704_v14 = vld [vmem:[#allocation2 + $0x1d4] sm:$0xff]  }
 0x35a   :  { %v5549_v26 = vadd.f32 %v9010_v52, %v5446_v53  ;;  %v5644_v8 = vmax.f32 %v5548_v17, 0.0  ;;  %v1803_v56 = vrot.slane %v1654_v5, 1  ;;  %v5550_v40 = vadd.f32 %v9010_v52, %v5447_v0 }
 0x35b   :  { %v1994_v36 = vadd.f32 %v1802_v47, %v1477_v16  ;;  %v2160_v57 = vmul.f32 %v7754_v33, %v2082_v10  ;;  %v2391_v46 = vrot.slane %v2158_v28, 2  ;;  %v2392_v13 = vrot.slane %v2159_v62, 2  ;;  %v4124_v5 = vld [vmem:[#allocation2 + $0x1e4] sm:$0x8] }
 0x35c   :  { %v5645_v25 = vmax.f32 %v5549_v26, 0.0  ;;  %v5740_v55 = vmin.f32 %v5644_v8, 6.0  ;;  %v1804_v35 = vsel %vm1741_vm6, %v1802_v47, %v1803_v56  ;;  %v1996_v54 = vadd.f32 %v1803_v56, %v1479_v7 }
 0x35d   :  { %v5646_v51 = vmax.f32 %v5550_v40, 0.0  ;;  %v1995_v30 = vadd.f32 %v1804_v35, %v1478_v48  ;;  %v2394_v39 = vrot.slane %v2160_v57, 2  ;;  %v2607_v19 = vadd.f32 %v2391_v46, %v1994_v36  ;;  %v7117_v48 = vld [vmem:[#allocation2 + $0x1e8] sm:$0xff]  }
 0x35e   :  { %v5741_v18 = vmin.f32 %v5645_v25, 6.0  ;;  %v5971_v50 = vrot.slane %v5740_v55, 7  ;;  %v2799_v27 = vunpack.c.l.bf16 %v2703_v44  ;;  %v2393_v63 = vsel %vm2290_vm7, %v2391_v46, %v2392_v13  ;;  %v4892_v44 = vld [vmem:[#allocation2 + $0x1f0] sm:$0x1] }
 0x35f   :  { %v5742_v52 = vmin.f32 %v5646_v51, 6.0  ;;  %v2395_v9 = vsel %vm2290_vm7, %v2392_v13, %v2394_v39  ;;  %v2800_v6 = vunpack.c.l.bf16 %v2704_v14  ;;  %v2608_v42 = vadd.f32 %v2393_v63, %v1995_v30  ;;  %v1093_v39 = vld [vmem:[#allocation2 + $0x1f8] sm:$0x8] }
 0x360   :  { %v5972_v41 = vrot.slane %v5741_v18, 7  ;;  %v2609_v15 = vadd.f32 %v2395_v9, %v1996_v54  ;;  %v2801_v43 = vunpack.c.h.bf16 %v2704_v14  ;;  %v2899_v22 = vmul.f32 %v7772_v60, %v2799_v27 }
 0x361   :  { %v5974_v2 = vrot.slane %v5742_v52, 7  ;;  %v2900_v37 = vmul.f32 %v7772_v60, %v2800_v6  ;;  %v3075_v4 = vmul.f32 %v7786_v12, %v2800_v6  ;;  %v3503_v38 = vunpack.c.l.bf16 %v3471_v58  ;;  %v1189_v58 = vld [vmem:[#allocation2 + $0x204] sm:$0x1] }
 0x362   :  { %v5973_v11 = vsel %vm996_vm0, %v5971_v50, %v5972_v41  ;;  %v2901_v20 = vmul.f32 %v7772_v60, %v2801_v43  ;;  %v3076_v61 = vmul.f32 %v7786_v12, %v2801_v43  ;;  %v2995_v45 = vadd.f32 %v2899_v22, %v2607_v19  ;;  %v1285_v22 = vld [vmem:[#allocation2 + $0x1d4] sm:$0xff]  }
 0x363   :  { %v5975_v49 = vsel %vm996_vm0, %v5972_v41, %v5974_v2  ;;  %v2996_v16 = vadd.f32 %v2900_v37, %v2608_v42  ;;  %v3223_v7 = vrot.slane %v3075_v4, 1  ;;  %v3579_v17 = vmul.f32 %v7778_v3, %v2800_v6  ;;  %v1284_v2 = vld [vmem:[#allocation2 + $0x1d0] sm:$0x8] }
 0x364   :  { %v6119_v32 = vpack.c.bf16 %v5975_v49, %v5973_v11  ;;  %v2997_v31 = vadd.f32 %v2901_v20, %v2609_v15  ;;  %v3224_v53 = vrot.slane %v3076_v61, 1  ;;  %v3580_v47 = vmul.f32 %v7778_v3, %v2801_v43  ;;  %v2051_v61 = vld [vmem:[#allocation2 + $0x1dc] sm:$0x1] }
 0x365   :  { %v3415_v0 = vadd.f32 %v3223_v7, %v2995_v45  ;;  %v3581_v10 = vmul.f32 %v7778_v3, %v3503_v38  ;;  %v9274_v28 = vunpack.c.l.bf16 %v7117_v48  ;;  %v3811_v56 = vrot.slane %v3579_v17, 2 }
 0x366   :  { %7336 = vmatmul.mubr.bf16.gmra.mrb[36].mxu1 %v6119_v32  ;;  %v3225_v26 = vsel %vm1741_vm6, %v3223_v7, %v3224_v53  ;;  %v3417_v8 = vadd.f32 %v3224_v53, %v2997_v31  ;;  %v9277_v62 = vunpack.c.h.bf16 %v7117_v48  ;;  %v3812_v36 = vrot.slane %v3580_v47, 2 }
 0x367   :  { %v3416_v40 = vadd.f32 %v3225_v26, %v2996_v16  ;;  %v3814_v57 = vrot.slane %v3581_v10, 2  ;;  %v4220_v46 = vunpack.c.l.bf16 %v4124_v5  ;;  %v4027_v25 = vadd.f32 %v3811_v56, %v3415_v0  ;;  %v9305_v10 = vld [vmem:[%s10120_s4] ss:$0 sm:$0xff] }
 0x368   :  { %v4321_v55 = vmul.f32 %v9274_v28, %v7795_v21  ;;  %v4322_v35 = vmul.f32 %v9277_v62, %v7795_v21  ;;  %v4496_v54 = vmul.f32 %v9274_v28, %v7798_v23  ;;  %v3813_v14 = vsel %vm2290_vm7, %v3811_v56, %v3812_v36 }
 0x369   :  { %v3815_v51 = vsel %vm2290_vm7, %v3812_v36, %v3814_v57  ;;  %v4320_v30 = vmul.f32 %v7795_v21, %v4220_v46  ;;  %v4497_v13 = vmul.f32 %v9277_v62, %v7798_v23  ;;  %v4028_v18 = vadd.f32 %v3813_v14, %v3416_v40 }
 0x36a   :  { %v4029_v50 = vadd.f32 %v3815_v51, %v3417_v8  ;;  %v4644_v19 = vrot.slane %v4496_v54, 1  ;;  %v4924_v27 = vunpack.c.l.bf16 %v4892_v44  ;;  %v5000_v9 = vmul.f32 %v9173_v29, %v9274_v28 }
 0x36b   :  { %v4416_v52 = vadd.f32 %v4320_v30, %v4027_v25  ;;  %v4645_v63 = vrot.slane %v4497_v13, 1  ;;  %v5001_v6 = vmul.f32 %v9173_v29, %v9277_v62  ;;  %v4417_v41 = vadd.f32 %v4321_v55, %v4028_v18 }
 0x36c   :  { %v4418_v42 = vadd.f32 %v4322_v35, %v4029_v50  ;;  %v5002_v15 = vmul.f32 %v9173_v29, %v4924_v27  ;;  %v1094_v43 = vsel %vm7711_vm5, 0, %v1093_v39  ;;  %v5232_v11 = vrot.slane %v5000_v9, 2 }
 0x36d   :  { %v4646_v37 = vsel %vm1741_vm6, %v4644_v19, %v4645_v63  ;;  %v4836_v4 = vadd.f32 %v4644_v19, %v4416_v52  ;;  %v5233_v20 = vrot.slane %v5001_v6, 2  ;;  %1095 = vst [vmem:[#allocation2 + $0x1f8] sm:$0x8] %v1094_v43  ;;  %v1190_v45 = vsel %vm7705_vm2, 0, %v1189_v58  ;;  %v2706_v19 = vld [vmem:[#allocation2 + $0x1e4] sm:$0x8] }
 0x36e   :  { %v4837_v38 = vadd.f32 %v4646_v37, %v4417_v41  ;;  %v4838_v48 = vadd.f32 %v4645_v63, %v4418_v42  ;;  %v5235_v49 = vrot.slane %v5002_v15, 2  ;;  %1191 = vst [vmem:[#allocation2 + $0x204] sm:$0x1] %v1190_v45  ;;  %v1380_v32 = vunpack.c.l.bf16 %v1284_v2 }
 0x36f   :  { %v5234_v16 = vsel %vm2290_vm7, %v5232_v11, %v5233_v20  ;;  %v5448_v7 = vadd.f32 %v5232_v11, %v4836_v4  ;;  %v1381_v31 = vunpack.c.l.bf16 %v1285_v22  ;;  %v1382_v5 = vunpack.c.h.bf16 %v1285_v22 }
 0x370   :  { %v5236_v53 = vsel %vm2290_vm7, %v5233_v20, %v5235_v49  ;;  %v5449_v17 = vadd.f32 %v5234_v16, %v4837_v38  ;;  %v2083_v0 = vunpack.c.l.bf16 %v2051_v61  ;;  %v1480_v8 = vmul.f32 %v7757_v34, %v1380_v32  ;;  %v3472_v61 = vld [vmem:[#allocation2 + $0x1f0] sm:$0x1] }
 0x371   :  { %v5450_v47 = vadd.f32 %v5236_v53, %v4838_v48  ;;  %v5551_v26 = vadd.f32 %v9305_v10, %v5448_v7  ;;  %v1481_v56 = vmul.f32 %v7757_v34, %v1381_v31  ;;  %v1482_v36 = vmul.f32 %v7757_v34, %v1382_v5 }
 0x372   :  { %v5552_v40 = vadd.f32 %v9305_v10, %v5449_v17  ;;  %v1655_v57 = vmul.f32 %v7745_v24, %v1381_v31  ;;  %v1656_v46 = vmul.f32 %v7745_v24, %v1382_v5  ;;  %v2161_v55 = vmul.f32 %v7754_v33, %v1381_v31  ;;  %v4128_v17 = vld [vmem:[#allocation2 + $0x1fc] sm:$0xff]  }
 0x373   :  { %v5553_v44 = vadd.f32 %v9305_v10, %v5450_v47  ;;  %v5647_v25 = vmax.f32 %v5551_v26, 0.0  ;;  %v2162_v35 = vmul.f32 %v7754_v33, %v1382_v5  ;;  %v2163_v30 = vmul.f32 %v7754_v33, %v2083_v0 }
 0x374   :  { %v5648_v54 = vmax.f32 %v5552_v40, 0.0  ;;  %v1805_v14 = vrot.slane %v1655_v57, 1  ;;  %v1806_v51 = vrot.slane %v1656_v46, 1  ;;  %v2396_v18 = vrot.slane %v2161_v55, 2  ;;  %v4127_v53 = vld [vmem:[#allocation2 + $0x1f8] sm:$0x8] }
 0x375   :  { %v5649_v13 = vmax.f32 %v5553_v44, 0.0  ;;  %v5743_v39 = vmin.f32 %v5647_v25, 6.0  ;;  %v2397_v50 = vrot.slane %v2162_v35, 2  ;;  %v2399_v43 = vrot.slane %v2163_v30, 2 }
 0x376   :  { %v5744_v27 = vmin.f32 %v5648_v54, 6.0  ;;  %v1807_v52 = vsel %vm1741_vm6, %v1805_v14, %v1806_v51  ;;  %v1997_v63 = vadd.f32 %v1805_v14, %v1480_v8  ;;  %v1999_v9 = vadd.f32 %v1806_v51, %v1482_v36 }
 0x377   :  { %v5745_v6 = vmin.f32 %v5649_v13, 6.0  ;;  %v5976_v58 = vrot.slane %v5743_v39, 7  ;;  %v1998_v41 = vadd.f32 %v1807_v52, %v1481_v56  ;;  %v2398_v42 = vsel %vm2290_vm7, %v2396_v18, %v2397_v50 }
 0x378   :  { %v5977_v15 = vrot.slane %v5744_v27, 7  ;;  %v2610_v2 = vadd.f32 %v2396_v18, %v1997_v63  ;;  %v2802_v22 = vunpack.c.l.bf16 %v2706_v19  ;;  %v2903_v11 = vmul.f32 %v9274_v28, %v7772_v60  ;;  %v4893_v18 = vld [vmem:[#allocation2 + $0x204] sm:$0x1] }
 0x379   :  { %v5979_v37 = vrot.slane %v5745_v6, 7  ;;  %v2611_v4 = vadd.f32 %v2398_v42, %v1998_v41  ;;  %v2904_v20 = vmul.f32 %v9277_v62, %v7772_v60  ;;  %v2400_v48 = vsel %vm2290_vm7, %v2397_v50, %v2399_v43  ;;  %v1096_v41 = vld [vmem:[#allocation2 + $0x20c] sm:$0x8] }
 0x37a   :  { %v5978_v38 = vsel %vm996_vm0, %v5976_v58, %v5977_v15  ;;  %v2902_v49 = vmul.f32 %v7772_v60, %v2802_v22  ;;  %v3077_v45 = vmul.f32 %v9274_v28, %v7786_v12  ;;  %v2612_v7 = vadd.f32 %v2400_v48, %v1999_v9  ;;  %v1192_v22 = vld [vmem:[#allocation2 + $0x218] sm:$0x1] }
 0x37b   :  { %v5980_v16 = vsel %vm996_vm0, %v5977_v15, %v5979_v37  ;;  %v2999_v32 = vadd.f32 %v2903_v11, %v2611_v4  ;;  %v3078_v31 = vmul.f32 %v9277_v62, %v7786_v12  ;;  %v3504_v26 = vunpack.c.l.bf16 %v3472_v61  ;;  %v1287_v61 = vld [vmem:[#allocation2 + $0x1e4] sm:$0x8] }
 0x37c   :  { %v6120_v5 = vpack.c.bf16 %v5980_v16, %v5978_v38  ;;  %v2998_v0 = vadd.f32 %v2902_v49, %v2610_v2  ;;  %v3226_v47 = vrot.slane %v3077_v45, 1  ;;  %v3000_v8 = vadd.f32 %v2904_v20, %v2612_v7 }
 0x37d   :  { %v3227_v56 = vrot.slane %v3078_v31, 1  ;;  %v3582_v40 = vmul.f32 %v9274_v28, %v7778_v3  ;;  %v3583_v36 = vmul.f32 %v9277_v62, %v7778_v3  ;;  %v3584_v46 = vmul.f32 %v7778_v3, %v3504_v26 }
 0x37e   :  { %7339 = vmatprep.mubr.bf16.mxu1 %v6120_v5  ;;  %v3418_v57 = vadd.f32 %v3226_v47, %v2998_v0  ;;  %v4223_v44 = vunpack.c.l.bf16 %v4127_v53  ;;  %v4224_v25 = vunpack.c.l.bf16 %v4128_v17  ;;  %v4225_v13 = vunpack.c.h.bf16 %v4128_v17 }
 0x37f   :  { %v3228_v55 = vsel %vm1741_vm6, %v3226_v47, %v3227_v56  ;;  %v3420_v35 = vadd.f32 %v3227_v56, %v3000_v8  ;;  %v3816_v54 = vrot.slane %v3582_v40, 2  ;;  %v3817_v14 = vrot.slane %v3583_v36, 2  ;;  %v2052_v47 = vld [vmem:[#allocation2 + $0x1f0] sm:$0x1] }
 0x380   :  { %v3419_v51 = vadd.f32 %v3228_v55, %v2999_v32  ;;  %v3819_v30 = vrot.slane %v3584_v46, 2  ;;  %v4323_v39 = vmul.f32 %v7795_v21, %v4223_v44  ;;  %v4324_v27 = vmul.f32 %v7795_v21, %v4224_v25 }
 0x381   :  { %v3818_v50 = vsel %vm2290_vm7, %v3816_v54, %v3817_v14  ;;  %v4030_v19 = vadd.f32 %v3816_v54, %v3418_v57  ;;  %v4498_v52 = vmul.f32 %v7798_v23, %v4224_v25  ;;  %v4325_v6 = vmul.f32 %v7795_v21, %v4225_v13 }
 0x382   :  { %v3820_v63 = vsel %vm2290_vm7, %v3817_v14, %v3819_v30  ;;  %v4031_v9 = vadd.f32 %v3818_v50, %v3419_v51  ;;  %v4499_v58 = vmul.f32 %v7798_v23, %v4225_v13  ;;  %v4925_v2 = vunpack.c.l.bf16 %v4893_v18 }
 0x383   :  { %v4032_v42 = vadd.f32 %v3820_v63, %v3420_v35  ;;  %v4419_v15 = vadd.f32 %v4323_v39, %v4030_v19  ;;  %v4647_v43 = vrot.slane %v4498_v52, 1  ;;  %v5003_v11 = vmul.f32 %v9173_v29, %v4224_v25 }
 0x384   :  { %v4420_v37 = vadd.f32 %v4324_v27, %v4031_v9  ;;  %v4648_v4 = vrot.slane %v4499_v58, 1  ;;  %v5004_v20 = vmul.f32 %v9173_v29, %v4225_v13  ;;  %v5005_v49 = vmul.f32 %v9173_v29, %v4925_v2 }
 0x385   :  { %v4421_v38 = vadd.f32 %v4325_v6, %v4032_v42  ;;  %v4839_v48 = vadd.f32 %v4647_v43, %v4419_v15  ;;  %v1097_v45 = vsel %vm7711_vm5, 0, %v1096_v41  ;;  %v5237_v7 = vrot.slane %v5003_v11, 2  ;;  %v2709_v6 = vld [vmem:[#allocation2 + $0x1f8] sm:$0x8] }
 0x386   :  { %v4649_v16 = vsel %vm1741_vm6, %v4647_v43, %v4648_v4  ;;  %v5238_v32 = vrot.slane %v5004_v20, 2  ;;  %1098 = vst [vmem:[#allocation2 + $0x20c] sm:$0x8] %v1097_v45  ;;  %v1193_v31 = vsel %vm7705_vm2, 0, %v1192_v22  ;;  %v5240_v5 = vrot.slane %v5005_v49, 2 }
 0x387   :  { %v4840_v53 = vadd.f32 %v4649_v16, %v4420_v37  ;;  %v4841_v17 = vadd.f32 %v4648_v4, %v4421_v38  ;;  %1194 = vst [vmem:[#allocation2 + $0x218] sm:$0x1] %v1193_v31  ;;  %v1383_v0 = vunpack.c.l.bf16 %v1287_v61  ;;  %v5451_v8 = vadd.f32 %v5237_v7, %v4839_v48  ;;  %v3473_v61 = vld [vmem:[#allocation2 + $0x204] sm:$0x1] }
 0x388   :  { %v5239_v26 = vsel %vm2290_vm7, %v5237_v7, %v5238_v32  ;;  %v1484_v56 = vmul.f32 %v9274_v28, %v7757_v34  ;;  %v1485_v40 = vmul.f32 %v9277_v62, %v7757_v34  ;;  %v5241_v36 = vsel %vm2290_vm7, %v5238_v32, %v5240_v5 }
 0x389   :  { %v5452_v57 = vadd.f32 %v5239_v26, %v4840_v53  ;;  %v1483_v46 = vmul.f32 %v7757_v34, %v1383_v0  ;;  %v1657_v44 = vmul.f32 %v9274_v28, %v7745_v24  ;;  %v5453_v25 = vadd.f32 %v5241_v36, %v4841_v17 }
 0x38a   :  { %v5554_v55 = vadd.f32 %v9305_v10, %v5451_v8  ;;  %v1658_v35 = vmul.f32 %v9277_v62, %v7745_v24  ;;  %v2084_v54 = vunpack.c.l.bf16 %v2052_v47  ;;  %v2164_v30 = vmul.f32 %v9274_v28, %v7754_v33  ;;  %v2710_v28 = vld [vmem:[#allocation2 + $0x1fc] sm:$0xff]  }
 0x38b   :  { %v5555_v14 = vadd.f32 %v9305_v10, %v5452_v57  ;;  %v1808_v51 = vrot.slane %v1657_v44, 1  ;;  %v2165_v13 = vmul.f32 %v9277_v62, %v7754_v33  ;;  %v5556_v39 = vadd.f32 %v9305_v10, %v5453_v25 }
 0x38c   :  { %v5650_v18 = vmax.f32 %v5554_v55, 0.0  ;;  %v1809_v50 = vrot.slane %v1658_v35, 1  ;;  %v2166_v19 = vmul.f32 %v7754_v33, %v2084_v54  ;;  %v2401_v63 = vrot.slane %v2164_v30, 2 }
 0x38d   :  { %v5651_v27 = vmax.f32 %v5555_v14, 0.0  ;;  %v2000_v52 = vadd.f32 %v1808_v51, %v1483_v46  ;;  %v2402_v9 = vrot.slane %v2165_v13, 2  ;;  %v5652_v58 = vmax.f32 %v5556_v39, 0.0  ;;  %v4130_v14 = vld [vmem:[#allocation2 + $0x20c] sm:$0x8] }
 0x38e   :  { %v5746_v41 = vmin.f32 %v5650_v18, 6.0  ;;  %v1810_v42 = vsel %vm1741_vm6, %v1808_v51, %v1809_v50  ;;  %v2002_v15 = vadd.f32 %v1809_v50, %v1485_v40  ;;  %v2404_v22 = vrot.slane %v2166_v19, 2  ;;  %v7118_v40 = vld [vmem:[#allocation2 + $0x210] sm:$0xff]  }
 0x38f   :  { %v5747_v43 = vmin.f32 %v5651_v27, 6.0  ;;  %v2001_v2 = vadd.f32 %v1810_v42, %v1484_v56  ;;  %v2403_v62 = vsel %vm2290_vm7, %v2401_v63, %v2402_v9  ;;  %v5748_v37 = vmin.f32 %v5652_v58, 6.0  ;;  %v4894_v58 = vld [vmem:[#allocation2 + $0x218] sm:$0x1] }
 0x390   :  { %v5981_v4 = vrot.slane %v5746_v41, 7  ;;  %v2613_v11 = vadd.f32 %v2401_v63, %v2000_v52  ;;  %v2805_v20 = vunpack.c.l.bf16 %v2709_v6  ;;  %v2405_v48 = vsel %vm2290_vm7, %v2402_v9, %v2404_v22 }
 0x391   :  { %v5982_v38 = vrot.slane %v5747_v43, 7  ;;  %v2614_v49 = vadd.f32 %v2403_v62, %v2001_v2  ;;  %v2806_v45 = vunpack.c.l.bf16 %v2710_v28  ;;  %v5984_v16 = vrot.slane %v5748_v37, 7  ;;  %v1099_v37 = vld [vmem:[#allocation2 + $0x220] sm:$0x8] }
 0x392   :  { %v2615_v7 = vadd.f32 %v2405_v48, %v2002_v15  ;;  %v2807_v32 = vunpack.c.h.bf16 %v2710_v28  ;;  %v2905_v31 = vmul.f32 %v7772_v60, %v2805_v20  ;;  %v3505_v0 = vunpack.c.l.bf16 %v3473_v61 }
 0x393   :  { %v5983_v53 = vsel %vm996_vm0, %v5981_v4, %v5982_v38  ;;  %v2906_v17 = vmul.f32 %v7772_v60, %v2806_v45  ;;  %v3079_v5 = vmul.f32 %v7786_v12, %v2806_v45  ;;  %v5985_v47 = vsel %vm996_vm0, %v5982_v38, %v5984_v16  ;;  %v1195_v38 = vld [vmem:[#allocation2 + $0x22c] sm:$0x1] }
 0x394   :  { %v2907_v26 = vmul.f32 %v7772_v60, %v2807_v32  ;;  %v3001_v8 = vadd.f32 %v2905_v31, %v2613_v11  ;;  %v3080_v56 = vmul.f32 %v7786_v12, %v2807_v32  ;;  %v6121_v36 = vpack.c.bf16 %v5985_v47, %v5983_v53 }
 0x395   :  { %v3002_v57 = vadd.f32 %v2906_v17, %v2614_v49  ;;  %v3229_v46 = vrot.slane %v3079_v5, 1  ;;  %v3585_v44 = vmul.f32 %v7778_v3, %v2806_v45  ;;  %v3586_v35 = vmul.f32 %v7778_v3, %v2807_v32  ;;  %v1291_v5 = vld [vmem:[#allocation2 + $0x1fc] sm:$0xff]  }
 0x396   :  { %v3003_v25 = vadd.f32 %v2907_v26, %v2615_v7  ;;  %v3230_v55 = vrot.slane %v3080_v56, 1  ;;  %v3587_v54 = vmul.f32 %v7778_v3, %v3505_v0  ;;  %7340 = vmatmul.mubr.bf16.gmra.mrb[40].mxu1 %v6121_v36  ;;  %v9385_v13 = vunpack.c.l.bf16 %v7118_v40  ;;  %v1290_v7 = vld [vmem:[#allocation2 + $0x1f8] sm:$0x8]  ;;  %v2053_v0 = vld [vmem:[#allocation2 + $0x204] sm:$0x1] }
 0x397   :  { %v3421_v51 = vadd.f32 %v3229_v46, %v3001_v8  ;;  %v3821_v30 = vrot.slane %v3585_v44, 2  ;;  %v9387_v39 = vunpack.c.h.bf16 %v7118_v40  ;;  %v3822_v19 = vrot.slane %v3586_v35, 2  ;;  %v2712_v40 = vld [vmem:[#allocation2 + $0x20c] sm:$0x8] }
 0x398   :  { %v3231_v18 = vsel %vm1741_vm6, %v3229_v46, %v3230_v55  ;;  %v3423_v50 = vadd.f32 %v3230_v55, %v3003_v25  ;;  %v3824_v27 = vrot.slane %v3587_v54, 2  ;;  %v4226_v9 = vunpack.c.l.bf16 %v4130_v14 }
 0x399   :  { %v3422_v52 = vadd.f32 %v3231_v18, %v3002_v57  ;;  %v4033_v63 = vadd.f32 %v3821_v30, %v3421_v51  ;;  %v4327_v6 = vmul.f32 %v9385_v13, %v7795_v21  ;;  %v3823_v41 = vsel %vm2290_vm7, %v3821_v30, %v3822_v19 }
 0x39a   :  { %v3825_v42 = vsel %vm2290_vm7, %v3822_v19, %v3824_v27  ;;  %v4328_v15 = vmul.f32 %v9387_v39, %v7795_v21  ;;  %v4500_v28 = vmul.f32 %v9385_v13, %v7798_v23  ;;  %v4326_v62 = vmul.f32 %v7795_v21, %v4226_v9 }
 0x39b   :  { %v4034_v43 = vadd.f32 %v3823_v41, %v3422_v52  ;;  %v4035_v2 = vadd.f32 %v3825_v42, %v3423_v50  ;;  %v4501_v22 = vmul.f32 %v9387_v39, %v7798_v23  ;;  %v4926_v11 = vunpack.c.l.bf16 %v4894_v58 }
 0x39c   :  { %v4650_v4 = vrot.slane %v4500_v28, 1  ;;  %v5006_v20 = vmul.f32 %v9173_v29, %v9385_v13  ;;  %v5007_v61 = vmul.f32 %v9173_v29, %v9387_v39  ;;  %v4422_v48 = vadd.f32 %v4326_v62, %v4033_v63 }
 0x39d   :  { %v4423_v49 = vadd.f32 %v4327_v6, %v4034_v43  ;;  %v4424_v45 = vadd.f32 %v4328_v15, %v4035_v2  ;;  %v4651_v16 = vrot.slane %v4501_v22, 1  ;;  %v5008_v32 = vmul.f32 %v9173_v29, %v4926_v11 }
 0x39e   :  { %v5242_v31 = vrot.slane %v5006_v20, 2  ;;  %v5243_v53 = vrot.slane %v5007_v61, 2  ;;  %v1100_v17 = vsel %vm7711_vm5, 0, %v1099_v37  ;;  %v4842_v26 = vadd.f32 %v4650_v4, %v4422_v48 }
 0x39f   :  { %v4652_v47 = vsel %vm1741_vm6, %v4650_v4, %v4651_v16  ;;  %v4844_v8 = vadd.f32 %v4651_v16, %v4424_v45  ;;  %1101 = vst [vmem:[#allocation2 + $0x220] sm:$0x8] %v1100_v17  ;;  %v1196_v56 = vsel %vm7705_vm2, 0, %v1195_v38  ;;  %v5245_v29 = vrot.slane %v5008_v32, 2 }
 0x3a0   :  { %v4843_v36 = vadd.f32 %v4652_v47, %v4423_v49  ;;  %v5244_v57 = vsel %vm2290_vm7, %v5242_v31, %v5243_v53  ;;  %1197 = vst [vmem:[#allocation2 + $0x22c] sm:$0x1] %v1196_v56  ;;  %v1386_v46 = vunpack.c.l.bf16 %v1290_v7  ;;  %v5454_v44 = vadd.f32 %v5242_v31, %v4842_v26 }
 0x3a1   :  { %v1387_v25 = vunpack.c.l.bf16 %v1291_v5  ;;  %v1388_v55 = vunpack.c.h.bf16 %v1291_v5  ;;  %v2085_v35 = vunpack.c.l.bf16 %v2053_v0  ;;  %v5246_v54 = vsel %vm2290_vm7, %v5243_v53, %v5245_v29  ;;  %v3474_v5 = vld [vmem:[#allocation2 + $0x218] sm:$0x1] }
 0x3a2   :  { %v5455_v14 = vadd.f32 %v5244_v57, %v4843_v36  ;;  %v1486_v51 = vmul.f32 %v7757_v34, %v1386_v46  ;;  %v2808_v30 = vunpack.c.l.bf16 %v2712_v40  ;;  %v5456_v18 = vadd.f32 %v5246_v54, %v4844_v8 }
 0x3a3   :  { %v5557_v50 = vadd.f32 %v9305_v10, %v5454_v44  ;;  %v1487_v19 = vmul.f32 %v7757_v34, %v1387_v25  ;;  %v1488_v27 = vmul.f32 %v7757_v34, %v1388_v55  ;;  %v1659_v63 = vmul.f32 %v7745_v24, %v1387_v25 }
 0x3a4   :  { %v5558_v52 = vadd.f32 %v9305_v10, %v5455_v14  ;;  %v1660_v9 = vmul.f32 %v7745_v24, %v1388_v55  ;;  %v2167_v6 = vmul.f32 %v7754_v33, %v1387_v25  ;;  %v5559_v58 = vadd.f32 %v9305_v10, %v5456_v18 }
 0x3a5   :  { %v5653_v41 = vmax.f32 %v5557_v50, 0.0  ;;  %v2168_v42 = vmul.f32 %v7754_v33, %v1388_v55  ;;  %v2169_v15 = vmul.f32 %v7754_v33, %v2085_v35  ;;  %v1811_v43 = vrot.slane %v1659_v63, 1  ;;  %v4134_v35 = vld [vmem:[#allocation2 + $0x224] sm:$0xff]  }
 0x3a6   :  { %v5654_v28 = vmax.f32 %v5558_v52, 0.0  ;;  %v1812_v2 = vrot.slane %v1660_v9, 1  ;;  %v2406_v62 = vrot.slane %v2167_v6, 2  ;;  %v5655_v22 = vmax.f32 %v5559_v58, 0.0  ;;  %v4133_v29 = vld [vmem:[#allocation2 + $0x220] sm:$0x8] }
 0x3a7   :  { %v5749_v37 = vmin.f32 %v5653_v41, 6.0  ;;  %v2407_v4 = vrot.slane %v2168_v42, 2  ;;  %v2409_v11 = vrot.slane %v2169_v15, 2  ;;  %v2003_v38 = vadd.f32 %v1811_v43, %v1486_v51 }
 0x3a8   :  { %v5750_v20 = vmin.f32 %v5654_v28, 6.0  ;;  %v1813_v61 = vsel %vm1741_vm6, %v1811_v43, %v1812_v2  ;;  %v2005_v48 = vadd.f32 %v1812_v2, %v1488_v27  ;;  %v5751_v49 = vmin.f32 %v5655_v22, 6.0  ;;  %v4895_v22 = vld [vmem:[#allocation2 + $0x22c] sm:$0x1] }
 0x3a9   :  { %v5986_v45 = vrot.slane %v5749_v37, 7  ;;  %v2004_v16 = vadd.f32 %v1813_v61, %v1487_v19  ;;  %v2408_v7 = vsel %vm2290_vm7, %v2406_v62, %v2407_v4  ;;  %v2410_v31 = vsel %vm2290_vm7, %v2407_v4, %v2409_v11  ;;  %v1102_v61 = vld [vmem:[#allocation2 + $0x234] sm:$0x8] }
 0x3aa   :  { %v5987_v32 = vrot.slane %v5750_v20, 7  ;;  %v2616_v53 = vadd.f32 %v2406_v62, %v2003_v38  ;;  %v2908_v17 = vmul.f32 %v7772_v60, %v2808_v30  ;;  %v5989_v0 = vrot.slane %v5751_v49, 7 }
 0x3ab   :  { %v2617_v47 = vadd.f32 %v2408_v7, %v2004_v16  ;;  %v2618_v26 = vadd.f32 %v2410_v31, %v2005_v48  ;;  %v2909_v8 = vmul.f32 %v9385_v13, %v7772_v60  ;;  %v2910_v40 = vmul.f32 %v9387_v39, %v7772_v60 }
 0x3ac   :  { %v5988_v56 = vsel %vm996_vm0, %v5986_v45, %v5987_v32  ;;  %v3004_v36 = vadd.f32 %v2908_v17, %v2616_v53  ;;  %v3081_v57 = vmul.f32 %v9385_v13, %v7786_v12  ;;  %v5990_v46 = vsel %vm996_vm0, %v5987_v32, %v5989_v0  ;;  %v9451_v32 = vld [vmem:[#allocation8 + $0x8] ss:$0 sm:$0xff]  ;;  %v1198_v17 = vld [vmem:[#allocation2 + $0x240] sm:$0x1] }
 0x3ad   :  { %v3005_v44 = vadd.f32 %v2909_v8, %v2617_v47  ;;  %v3082_v25 = vmul.f32 %v9387_v39, %v7786_v12  ;;  %v3506_v55 = vunpack.c.l.bf16 %v3474_v5  ;;  %v6122_v54 = vpack.c.bf16 %v5990_v46, %v5988_v56  ;;  %v1293_v5 = vld [vmem:[#allocation2 + $0x20c] sm:$0x8] }
 0x3ae   :  { %v3006_v14 = vadd.f32 %v2910_v40, %v2618_v26  ;;  %v3232_v51 = vrot.slane %v3081_v57, 1  ;;  %v3588_v30 = vmul.f32 %v9385_v13, %v7778_v3  ;;  %v3589_v50 = vmul.f32 %v9387_v39, %v7778_v3 }
 0x3af   :  { %v3233_v18 = vrot.slane %v3082_v25, 1  ;;  %v3590_v19 = vmul.f32 %v7778_v3, %v3506_v55  ;;  %v4229_v27 = vunpack.c.l.bf16 %v4133_v29  ;;  %7343 = vmatprep.mubr.bf16.mxu1 %v6122_v54  ;;  %v4230_v9 = vunpack.c.l.bf16 %v4134_v35 }
 0x3b0   :  { %v3424_v52 = vadd.f32 %v3232_v51, %v3004_v36  ;;  %v3826_v63 = vrot.slane %v3588_v30, 2  ;;  %v4231_v6 = vunpack.c.h.bf16 %v4134_v35  ;;  %v3827_v42 = vrot.slane %v3589_v50, 2 }
 0x3b1   :  { %v3234_v58 = vsel %vm1741_vm6, %v3232_v51, %v3233_v18  ;;  %v3426_v41 = vadd.f32 %v3233_v18, %v3006_v14  ;;  %v3829_v15 = vrot.slane %v3590_v19, 2  ;;  %v4329_v2 = vmul.f32 %v7795_v21, %v4229_v27  ;;  %v2054_v51 = vld [vmem:[#allocation2 + $0x218] sm:$0x1] }
 0x3b2   :  { %v3425_v28 = vadd.f32 %v3234_v58, %v3005_v44  ;;  %v4036_v43 = vadd.f32 %v3826_v63, %v3424_v52  ;;  %v4330_v62 = vmul.f32 %v7795_v21, %v4230_v9  ;;  %v3828_v37 = vsel %vm2290_vm7, %v3826_v63, %v3827_v42 }
 0x3b3   :  { %v3830_v4 = vsel %vm2290_vm7, %v3827_v42, %v3829_v15  ;;  %v4331_v11 = vmul.f32 %v7795_v21, %v4231_v6  ;;  %v4502_v20 = vmul.f32 %v7798_v23, %v4230_v9  ;;  %v4503_v45 = vmul.f32 %v7798_v23, %v4231_v6 }
 0x3b4   :  { %v4037_v38 = vadd.f32 %v3828_v37, %v3425_v28  ;;  %v4038_v48 = vadd.f32 %v3830_v4, %v3426_v41  ;;  %v4425_v49 = vadd.f32 %v4329_v2, %v4036_v43  ;;  %v4927_v7 = vunpack.c.l.bf16 %v4895_v22 }
 0x3b5   :  { %v4653_v16 = vrot.slane %v4502_v20, 1  ;;  %v5009_v31 = vmul.f32 %v9451_v32, %v4230_v9  ;;  %v5010_v53 = vmul.f32 %v9451_v32, %v4231_v6  ;;  %v4654_v26 = vrot.slane %v4503_v45, 1 }
 0x3b6   :  { %v4426_v0 = vadd.f32 %v4330_v62, %v4037_v38  ;;  %v4427_v47 = vadd.f32 %v4331_v11, %v4038_v48  ;;  %v1103_v8 = vsel %vm7711_vm5, 0, %v1102_v61  ;;  %v5011_v40 = vmul.f32 %v9451_v32, %v4927_v7  ;;  %v2715_v11 = vld [vmem:[#allocation2 + $0x220] sm:$0x8] }
 0x3b7   :  { %v4845_v56 = vadd.f32 %v4653_v16, %v4425_v49  ;;  %v5247_v36 = vrot.slane %v5009_v31, 2  ;;  %v5248_v57 = vrot.slane %v5010_v53, 2  ;;  %1104 = vst [vmem:[#allocation2 + $0x234] sm:$0x8] %v1103_v8  ;;  %v4655_v29 = vsel %vm1741_vm6, %v4653_v16, %v4654_v26  ;;  %v3475_v8 = vld [vmem:[#allocation2 + $0x22c] sm:$0x1] }
 0x3b8   :  { %v4847_v46 = vadd.f32 %v4654_v26, %v4427_v47  ;;  %v1199_v44 = vsel %vm7705_vm2, 0, %v1198_v17  ;;  %v1389_v25 = vunpack.c.l.bf16 %v1293_v5  ;;  %v4846_v55 = vadd.f32 %v4655_v29, %v4426_v0 }
 0x3b9   :  { %v5249_v35 = vsel %vm2290_vm7, %v5247_v36, %v5248_v57  ;;  %v5250_v54 = vrot.slane %v5011_v40, 2  ;;  %v5457_v14 = vadd.f32 %v5247_v36, %v4845_v56  ;;  %1200 = vst [vmem:[#allocation2 + $0x240] sm:$0x1] %v1199_v44  ;;  %v1490_v18 = vmul.f32 %v9385_v13, %v7757_v34 }
 0x3ba   :  { %v1489_v30 = vmul.f32 %v7757_v34, %v1389_v25  ;;  %v1491_v50 = vmul.f32 %v9387_v39, %v7757_v34  ;;  %v1661_v19 = vmul.f32 %v9385_v13, %v7745_v24  ;;  %v5458_v52 = vadd.f32 %v5249_v35, %v4846_v55 }
 0x3bb   :  { %v5251_v27 = vsel %vm2290_vm7, %v5248_v57, %v5250_v54  ;;  %v5560_v63 = vadd.f32 %v9305_v10, %v5457_v14  ;;  %v1662_v9 = vmul.f32 %v9387_v39, %v7745_v24  ;;  %v2086_v41 = vunpack.c.l.bf16 %v2054_v51  ;;  %v7119_v51 = vld [vmem:[#allocation2 + $0x238] sm:$0xff]  }
 0x3bc   :  { %v5459_v6 = vadd.f32 %v5251_v27, %v4847_v46  ;;  %v1814_v58 = vrot.slane %v1661_v19, 1  ;;  %v2170_v42 = vmul.f32 %v9385_v13, %v7754_v33  ;;  %v5561_v15 = vadd.f32 %v9305_v10, %v5458_v52  ;;  %v2716_v13 = vld [vmem:[#allocation2 + $0x224] sm:$0xff]  }
 0x3bd   :  { %v5656_v28 = vmax.f32 %v5560_v63, 0.0  ;;  %v1815_v43 = vrot.slane %v1662_v9, 1  ;;  %v2171_v2 = vmul.f32 %v9387_v39, %v7754_v33  ;;  %v2172_v37 = vmul.f32 %v7754_v33, %v2086_v41 }
 0x3be   :  { %v5562_v62 = vadd.f32 %v9305_v10, %v5459_v6  ;;  %v2006_v22 = vadd.f32 %v1814_v58, %v1489_v30  ;;  %v2411_v4 = vrot.slane %v2170_v42, 2  ;;  %v5657_v20 = vmax.f32 %v5561_v15, 0.0  ;;  %v4136_v6 = vld [vmem:[#allocation2 + $0x234] sm:$0x8] }
 0x3bf   :  { %v5752_v61 = vmin.f32 %v5656_v28, 6.0  ;;  %v1816_v38 = vsel %vm1741_vm6, %v1814_v58, %v1815_v43  ;;  %v2008_v48 = vadd.f32 %v1815_v43, %v1491_v50  ;;  %v2412_v16 = vrot.slane %v2171_v2, 2 }
 0x3c0   :  { %v5658_v49 = vmax.f32 %v5562_v62, 0.0  ;;  %v2007_v45 = vadd.f32 %v1816_v38, %v1490_v18  ;;  %v2414_v7 = vrot.slane %v2172_v37, 2  ;;  %v5753_v31 = vmin.f32 %v5657_v20, 6.0  ;;  %v4896_v20 = vld [vmem:[#allocation2 + $0x240] sm:$0x1] }
 0x3c1   :  { %v5991_v53 = vrot.slane %v5752_v61, 7  ;;  %v2619_v39 = vadd.f32 %v2411_v4, %v2006_v22  ;;  %v2811_v17 = vunpack.c.l.bf16 %v2715_v11  ;;  %v2413_v0 = vsel %vm2290_vm7, %v2411_v4, %v2412_v16 }
 0x3c2   :  { %v5754_v5 = vmin.f32 %v5658_v49, 6.0  ;;  %v2415_v47 = vsel %vm2290_vm7, %v2412_v16, %v2414_v7  ;;  %v2812_v26 = vunpack.c.l.bf16 %v2716_v13  ;;  %v5992_v56 = vrot.slane %v5753_v31, 7  ;;  %v1105_v31 = vld [vmem:[#allocation2 + $0x248] sm:$0x8] }
 0x3c3   :  { %v2620_v40 = vadd.f32 %v2413_v0, %v2007_v45  ;;  %v2621_v36 = vadd.f32 %v2415_v47, %v2008_v48  ;;  %v2813_v57 = vunpack.c.h.bf16 %v2716_v13  ;;  %v2911_v46 = vmul.f32 %v7772_v60, %v2811_v17 }
 0x3c4   :  { %v5994_v29 = vrot.slane %v5754_v5, 7  ;;  %v2912_v44 = vmul.f32 %v7772_v60, %v2812_v26  ;;  %v3083_v25 = vmul.f32 %v7786_v12, %v2812_v26  ;;  %v5993_v55 = vsel %vm996_vm0, %v5991_v53, %v5992_v56 }
 0x3c5   :  { %v2913_v35 = vmul.f32 %v7772_v60, %v2813_v57  ;;  %v3084_v54 = vmul.f32 %v7786_v12, %v2813_v57  ;;  %v3507_v14 = vunpack.c.l.bf16 %v3475_v8  ;;  %v3007_v18 = vadd.f32 %v2911_v46, %v2619_v39  ;;  %v1296_v46 = vld [vmem:[#allocation2 + $0x220] sm:$0x8] }
 0x3c6   :  { %v5995_v30 = vsel %vm996_vm0, %v5992_v56, %v5994_v29  ;;  %v3008_v50 = vadd.f32 %v2912_v44, %v2620_v40  ;;  %v3235_v19 = vrot.slane %v3083_v25, 1  ;;  %v3591_v9 = vmul.f32 %v7778_v3, %v2812_v26  ;;  %v1201_v56 = vld [vmem:[#allocation2 + $0x254] sm:$0x1]  ;;  %v1297_v44 = vld [vmem:[#allocation2 + $0x224] sm:$0xff]  }
 0x3c7   :  { %v6123_v27 = vpack.c.bf16 %v5995_v30, %v5993_v55  ;;  %v3009_v52 = vadd.f32 %v2913_v35, %v2621_v36  ;;  %v3236_v63 = vrot.slane %v3084_v54, 1  ;;  %v3592_v41 = vmul.f32 %v7778_v3, %v2813_v57 }
 0x3c8   :  { %v3427_v58 = vadd.f32 %v3235_v19, %v3007_v18  ;;  %v3593_v42 = vmul.f32 %v7778_v3, %v3507_v14  ;;  %v9493_v15 = vunpack.c.l.bf16 %v7119_v51  ;;  %v3831_v2 = vrot.slane %v3591_v9, 2  ;;  %v2055_v14 = vld [vmem:[#allocation2 + $0x22c] sm:$0x1] }
 0x3c9   :  { %7344 = vmatmul.mubr.bf16.gmra.mrb[44].mxu1 %v6123_v27  ;;  %v3237_v28 = vsel %vm1741_vm6, %v3235_v19, %v3236_v63  ;;  %v3429_v43 = vadd.f32 %v3236_v63, %v3009_v52  ;;  %v9496_v62 = vunpack.c.h.bf16 %v7119_v51  ;;  %v3832_v37 = vrot.slane %v3592_v41, 2 }
 0x3ca   :  { %v3428_v22 = vadd.f32 %v3237_v28, %v3008_v50  ;;  %v3834_v4 = vrot.slane %v3593_v42, 2  ;;  %v4232_v11 = vunpack.c.l.bf16 %v4136_v6  ;;  %v4039_v61 = vadd.f32 %v3831_v2, %v3427_v58 }
 0x3cb   :  { %v4333_v38 = vmul.f32 %v9493_v15, %v7795_v21  ;;  %v4334_v48 = vmul.f32 %v9496_v62, %v7795_v21  ;;  %v4504_v13 = vmul.f32 %v9493_v15, %v7798_v23  ;;  %v3833_v49 = vsel %vm2290_vm7, %v3831_v2, %v3832_v37 }
 0x3cc   :  { %v3835_v45 = vsel %vm2290_vm7, %v3832_v37, %v3834_v4  ;;  %v4332_v16 = vmul.f32 %v7795_v21, %v4232_v11  ;;  %v4505_v7 = vmul.f32 %v9496_v62, %v7798_v23  ;;  %v4040_v53 = vadd.f32 %v3833_v49, %v3428_v22 }
 0x3cd   :  { %v4041_v39 = vadd.f32 %v3835_v45, %v3429_v43  ;;  %v4656_v17 = vrot.slane %v4504_v13, 1  ;;  %v4928_v5 = vunpack.c.l.bf16 %v4896_v20  ;;  %v5012_v26 = vmul.f32 %v9451_v32, %v9493_v15 }
 0x3ce   :  { %v4428_v0 = vadd.f32 %v4332_v16, %v4039_v61  ;;  %v4657_v47 = vrot.slane %v4505_v7, 1  ;;  %v5013_v8 = vmul.f32 %v9451_v32, %v9496_v62  ;;  %v4429_v40 = vadd.f32 %v4333_v38, %v4040_v53 }
 0x3cf   :  { %v4430_v36 = vadd.f32 %v4334_v48, %v4041_v39  ;;  %v5014_v57 = vmul.f32 %v9451_v32, %v4928_v5  ;;  %v1106_v29 = vsel %vm7711_vm5, 0, %v1105_v31  ;;  %v5252_v35 = vrot.slane %v5012_v26, 2 }
 0x3d0   :  { %v4658_v25 = vsel %vm1741_vm6, %v4656_v17, %v4657_v47  ;;  %v4848_v55 = vadd.f32 %v4656_v17, %v4428_v0  ;;  %v5253_v54 = vrot.slane %v5013_v8, 2  ;;  %1107 = vst [vmem:[#allocation2 + $0x248] sm:$0x8] %v1106_v29  ;;  %v1202_v50 = vsel %vm7705_vm2, 0, %v1201_v56  ;;  %v2718_v17 = vld [vmem:[#allocation2 + $0x234] sm:$0x8] }
 0x3d1   :  { %v4849_v51 = vadd.f32 %v4658_v25, %v4429_v40  ;;  %v4850_v30 = vadd.f32 %v4657_v47, %v4430_v36  ;;  %v5255_v18 = vrot.slane %v5014_v57, 2  ;;  %1203 = vst [vmem:[#allocation2 + $0x254] sm:$0x1] %v1202_v50  ;;  %v1392_v52 = vunpack.c.l.bf16 %v1296_v46 }
 0x3d2   :  { %v5254_v19 = vsel %vm2290_vm7, %v5252_v35, %v5253_v54  ;;  %v5460_v27 = vadd.f32 %v5252_v35, %v4848_v55  ;;  %v1393_v63 = vunpack.c.l.bf16 %v1297_v44  ;;  %v1394_v58 = vunpack.c.h.bf16 %v1297_v44 }
 0x3d3   :  { %v5256_v9 = vsel %vm2290_vm7, %v5253_v54, %v5255_v18  ;;  %v5461_v6 = vadd.f32 %v5254_v19, %v4849_v51  ;;  %v2087_v41 = vunpack.c.l.bf16 %v2055_v14  ;;  %v1492_v43 = vmul.f32 %v7757_v34, %v1392_v52  ;;  %v3476_v54 = vld [vmem:[#allocation2 + $0x240] sm:$0x1] }
 0x3d4   :  { %v5462_v42 = vadd.f32 %v5256_v9, %v4850_v30  ;;  %v5563_v28 = vadd.f32 %v9305_v10, %v5460_v27  ;;  %v1493_v2 = vmul.f32 %v7757_v34, %v1393_v63  ;;  %v1494_v37 = vmul.f32 %v7757_v34, %v1394_v58  ;;  %v4140_v9 = vld [vmem:[#allocation2 + $0x24c] sm:$0xff]  }
 0x3d5   :  { %v5564_v22 = vadd.f32 %v9305_v10, %v5461_v6  ;;  %v1663_v4 = vmul.f32 %v7745_v24, %v1393_v63  ;;  %v1664_v11 = vmul.f32 %v7745_v24, %v1394_v58  ;;  %v2173_v38 = vmul.f32 %v7754_v33, %v1393_v63 }
 0x3d6   :  { %v5565_v20 = vadd.f32 %v9305_v10, %v5462_v42  ;;  %v5659_v61 = vmax.f32 %v5563_v28, 0.0  ;;  %v2174_v48 = vmul.f32 %v7754_v33, %v1394_v58  ;;  %v2175_v16 = vmul.f32 %v7754_v33, %v2087_v41 }
 0x3d7   :  { %v5660_v13 = vmax.f32 %v5564_v22, 0.0  ;;  %v1817_v49 = vrot.slane %v1663_v4, 1  ;;  %v1818_v45 = vrot.slane %v1664_v11, 1  ;;  %v2416_v53 = vrot.slane %v2173_v38, 2  ;;  %v4139_v63 = vld [vmem:[#allocation2 + $0x248] sm:$0x8] }
 0x3d8   :  { %v5661_v7 = vmax.f32 %v5565_v20, 0.0  ;;  %v5755_v31 = vmin.f32 %v5659_v61, 6.0  ;;  %v2417_v39 = vrot.slane %v2174_v48, 2  ;;  %v2419_v57 = vrot.slane %v2175_v16, 2 }
 0x3d9   :  { %v5756_v5 = vmin.f32 %v5660_v13, 6.0  ;;  %v1819_v0 = vsel %vm1741_vm6, %v1817_v49, %v1818_v45  ;;  %v2009_v47 = vadd.f32 %v1817_v49, %v1492_v43  ;;  %v2011_v10 = vadd.f32 %v1818_v45, %v1494_v37 }
 0x3da   :  { %v5757_v26 = vmin.f32 %v5661_v7, 6.0  ;;  %v5996_v8 = vrot.slane %v5755_v31, 7  ;;  %v2010_v56 = vadd.f32 %v1819_v0, %v1493_v2  ;;  %v2418_v40 = vsel %vm2290_vm7, %v2416_v53, %v2417_v39  ;;  %v4897_v31 = vld [vmem:[#allocation2 + $0x254] sm:$0x1] }
 0x3db   :  { %v5997_v36 = vrot.slane %v5756_v5, 7  ;;  %v2622_v29 = vadd.f32 %v2416_v53, %v2009_v47  ;;  %v2814_v46 = vunpack.c.l.bf16 %v2718_v17  ;;  %v2915_v55 = vmul.f32 %v9493_v15, %v7772_v60 }
 0x3dc   :  { %v5999_v44 = vrot.slane %v5757_v26, 7  ;;  %v2623_v25 = vadd.f32 %v2418_v40, %v2010_v56  ;;  %v2916_v35 = vmul.f32 %v9496_v62, %v7772_v60  ;;  %v2420_v51 = vsel %vm2290_vm7, %v2417_v39, %v2419_v57 }
 0x3dd   :  { %v5998_v14 = vsel %vm996_vm0, %v5996_v8, %v5997_v36  ;;  %v2914_v30 = vmul.f32 %v7772_v60, %v2814_v46  ;;  %v3085_v18 = vmul.f32 %v9493_v15, %v7786_v12  ;;  %v2624_v19 = vadd.f32 %v2420_v51, %v2011_v10  ;;  %v1108_v8 = vld [vmem:[#allocation2 + $0x25c] sm:$0x8] }
 0x3de   :  { %v6000_v50 = vsel %vm996_vm0, %v5997_v36, %v5999_v44  ;;  %v3011_v27 = vadd.f32 %v2915_v55, %v2623_v25  ;;  %v3086_v52 = vmul.f32 %v9496_v62, %v7786_v12  ;;  %v3508_v42 = vunpack.c.l.bf16 %v3476_v54 }
 0x3df   :  { %v6124_v6 = vpack.c.bf16 %v6000_v50, %v5998_v14  ;;  %v3010_v58 = vadd.f32 %v2914_v30, %v2622_v29  ;;  %v3238_v41 = vrot.slane %v3085_v18, 1  ;;  %v3012_v28 = vadd.f32 %v2916_v35, %v2624_v19  ;;  %v1204_v29 = vld [vmem:[#allocation2 + $0x268] sm:$0x1]  ;;  %v1299_v35 = vld [vmem:[#allocation2 + $0x234] sm:$0x8] }
 0x3e0   :  { %v3239_v43 = vrot.slane %v3086_v52, 1  ;;  %v3594_v2 = vmul.f32 %v9493_v15, %v7778_v3  ;;  %v3595_v22 = vmul.f32 %v9496_v62, %v7778_v3  ;;  %v3596_v4 = vmul.f32 %v7778_v3, %v3508_v42 }
 0x3e1   :  { %7347 = vmatprep.mubr.bf16.mxu1 %v6124_v6  ;;  %v3430_v37 = vadd.f32 %v3238_v41, %v3010_v58  ;;  %v4235_v11 = vunpack.c.l.bf16 %v4139_v63  ;;  %v4236_v20 = vunpack.c.l.bf16 %v4140_v9  ;;  %v4237_v16 = vunpack.c.h.bf16 %v4140_v9  ;;  %v2056_v58 = vld [vmem:[#allocation2 + $0x240] sm:$0x1] }
 0x3e2   :  { %v3240_v61 = vsel %vm1741_vm6, %v3238_v41, %v3239_v43  ;;  %v3432_v38 = vadd.f32 %v3239_v43, %v3012_v28  ;;  %v3836_v48 = vrot.slane %v3594_v2, 2  ;;  %v3837_v13 = vrot.slane %v3595_v22, 2 }
 0x3e3   :  { %v3431_v49 = vadd.f32 %v3240_v61, %v3011_v27  ;;  %v3839_v45 = vrot.slane %v3596_v4, 2  ;;  %v4335_v7 = vmul.f32 %v7795_v21, %v4235_v11  ;;  %v4336_v17 = vmul.f32 %v7795_v21, %v4236_v20 }
 0x3e4   :  { %v3838_v53 = vsel %vm2290_vm7, %v3836_v48, %v3837_v13  ;;  %v4042_v39 = vadd.f32 %v3836_v48, %v3430_v37  ;;  %v4506_v5 = vmul.f32 %v7798_v23, %v4236_v20  ;;  %v4337_v10 = vmul.f32 %v7795_v21, %v4237_v16 }
 0x3e5   :  { %v3840_v0 = vsel %vm2290_vm7, %v3837_v13, %v3839_v45  ;;  %v4043_v47 = vadd.f32 %v3838_v53, %v3431_v49  ;;  %v4507_v26 = vmul.f32 %v7798_v23, %v4237_v16  ;;  %v4929_v57 = vunpack.c.l.bf16 %v4897_v31 }
 0x3e6   :  { %v4044_v56 = vadd.f32 %v3840_v0, %v3432_v38  ;;  %v4431_v40 = vadd.f32 %v4335_v7, %v4042_v39  ;;  %v4659_v36 = vrot.slane %v4506_v5, 1  ;;  %v5015_v25 = vmul.f32 %v9451_v32, %v4236_v20  ;;  %v9579_v20 = vld [vmem:[%s10120_s4] ss:$0 sm:$0xff] }
 0x3e7   :  { %v4432_v46 = vadd.f32 %v4336_v17, %v4043_v47  ;;  %v4660_v44 = vrot.slane %v4507_v26, 1  ;;  %v5016_v55 = vmul.f32 %v9451_v32, %v4237_v16  ;;  %v5017_v51 = vmul.f32 %v9451_v32, %v4929_v57 }
 0x3e8   :  { %v4433_v54 = vadd.f32 %v4337_v10, %v4044_v56  ;;  %v4851_v14 = vadd.f32 %v4659_v36, %v4431_v40  ;;  %v1109_v30 = vsel %vm7711_vm5, 0, %v1108_v8  ;;  %v5257_v50 = vrot.slane %v5015_v25, 2  ;;  %v2721_v10 = vld [vmem:[#allocation2 + $0x248] sm:$0x8] }
 0x3e9   :  { %v4661_v18 = vsel %vm1741_vm6, %v4659_v36, %v4660_v44  ;;  %v5258_v19 = vrot.slane %v5016_v55, 2  ;;  %1110 = vst [vmem:[#allocation2 + $0x25c] sm:$0x8] %v1109_v30  ;;  %v1205_v27 = vsel %vm7705_vm2, 0, %v1204_v29  ;;  %v5260_v9 = vrot.slane %v5017_v51, 2 }
 0x3ea   :  { %v4852_v52 = vadd.f32 %v4661_v18, %v4432_v46  ;;  %v4853_v63 = vadd.f32 %v4660_v44, %v4433_v54  ;;  %1206 = vst [vmem:[#allocation2 + $0x268] sm:$0x1] %v1205_v27  ;;  %v1395_v6 = vunpack.c.l.bf16 %v1299_v35  ;;  %v5463_v42 = vadd.f32 %v5257_v50, %v4851_v14  ;;  %v3477_v35 = vld [vmem:[#allocation2 + $0x254] sm:$0x1] }
 0x3eb   :  { %v5259_v41 = vsel %vm2290_vm7, %v5257_v50, %v5258_v19  ;;  %v1496_v28 = vmul.f32 %v9493_v15, %v7757_v34  ;;  %v1497_v43 = vmul.f32 %v9496_v62, %v7757_v34  ;;  %v5261_v2 = vsel %vm2290_vm7, %v5258_v19, %v5260_v9 }
 0x3ec   :  { %v5464_v22 = vadd.f32 %v5259_v41, %v4852_v52  ;;  %v1495_v37 = vmul.f32 %v7757_v34, %v1395_v6  ;;  %v1665_v4 = vmul.f32 %v9493_v15, %v7745_v24  ;;  %v5465_v11 = vadd.f32 %v5261_v2, %v4853_v63 }
 0x3ed   :  { %v5566_v61 = vadd.f32 %v9579_v20, %v5463_v42  ;;  %v1666_v38 = vmul.f32 %v9496_v62, %v7745_v24  ;;  %v2088_v48 = vunpack.c.l.bf16 %v2056_v58  ;;  %v2176_v45 = vmul.f32 %v9493_v15, %v7754_v33  ;;  %v2722_v15 = vld [vmem:[#allocation2 + $0x24c] sm:$0xff]  }
 0x3ee   :  { %v5567_v13 = vadd.f32 %v9579_v20, %v5464_v22  ;;  %v1820_v49 = vrot.slane %v1665_v4, 1  ;;  %v2177_v16 = vmul.f32 %v9496_v62, %v7754_v33  ;;  %v5568_v7 = vadd.f32 %v9579_v20, %v5465_v11 }
 0x3ef   :  { %v5662_v31 = vmax.f32 %v5566_v61, 0.0  ;;  %v1821_v53 = vrot.slane %v1666_v38, 1  ;;  %v2178_v39 = vmul.f32 %v7754_v33, %v2088_v48  ;;  %v2421_v0 = vrot.slane %v2176_v45, 2 }
 0x3f0   :  { %v5663_v17 = vmax.f32 %v5567_v13, 0.0  ;;  %v2012_v5 = vadd.f32 %v1820_v49, %v1495_v37  ;;  %v2422_v47 = vrot.slane %v2177_v16, 2  ;;  %v5664_v26 = vmax.f32 %v5568_v7, 0.0  ;;  %v4142_v13 = vld [vmem:[#allocation2 + $0x25c] sm:$0x8] }
 0x3f1   :  { %v5758_v8 = vmin.f32 %v5662_v31, 6.0  ;;  %v1822_v56 = vsel %vm1741_vm6, %v1820_v49, %v1821_v53  ;;  %v2014_v40 = vadd.f32 %v1821_v53, %v1497_v43  ;;  %v2424_v29 = vrot.slane %v2178_v39, 2  ;;  %v7120_v43 = vld [vmem:[#allocation2 + $0x260] sm:$0xff]  }
 0x3f2   :  { %v5759_v36 = vmin.f32 %v5663_v17, 6.0  ;;  %v2013_v57 = vadd.f32 %v1822_v56, %v1496_v28  ;;  %v2423_v62 = vsel %vm2290_vm7, %v2421_v0, %v2422_v47  ;;  %v5760_v46 = vmin.f32 %v5664_v26, 6.0  ;;  %v4898_v26 = vld [vmem:[#allocation2 + $0x268] sm:$0x1] }
 0x3f3   :  { %v6001_v44 = vrot.slane %v5758_v8, 7  ;;  %v2625_v25 = vadd.f32 %v2421_v0, %v2012_v5  ;;  %v2817_v55 = vunpack.c.l.bf16 %v2721_v10  ;;  %v2425_v14 = vsel %vm2290_vm7, %v2422_v47, %v2424_v29 }
 0x3f4   :  { %v6002_v54 = vrot.slane %v5759_v36, 7  ;;  %v2626_v51 = vadd.f32 %v2423_v62, %v2013_v57  ;;  %v2818_v30 = vunpack.c.l.bf16 %v2722_v15  ;;  %v6004_v18 = vrot.slane %v5760_v46, 7  ;;  %v1111_v46 = vld [vmem:[#allocation2 + $0x270] sm:$0x8] }
 0x3f5   :  { %v2627_v50 = vadd.f32 %v2425_v14, %v2014_v40  ;;  %v2819_v19 = vunpack.c.h.bf16 %v2722_v15  ;;  %v2917_v27 = vmul.f32 %v7772_v60, %v2817_v55  ;;  %v3509_v6 = vunpack.c.l.bf16 %v3477_v35 }
 0x3f6   :  { %v6003_v52 = vsel %vm996_vm0, %v6001_v44, %v6002_v54  ;;  %v2918_v63 = vmul.f32 %v7772_v60, %v2818_v30  ;;  %v3087_v9 = vmul.f32 %v7786_v12, %v2818_v30  ;;  %v6005_v58 = vsel %vm996_vm0, %v6002_v54, %v6004_v18  ;;  %v1207_v54 = vld [vmem:[#allocation2 + $0x27c] sm:$0x1] }
 0x3f7   :  { %v2919_v41 = vmul.f32 %v7772_v60, %v2819_v19  ;;  %v3013_v42 = vadd.f32 %v2917_v27, %v2625_v25  ;;  %v3088_v28 = vmul.f32 %v7786_v12, %v2819_v19  ;;  %v6125_v2 = vpack.c.bf16 %v6005_v58, %v6003_v52 }
 0x3f8   :  { %v3014_v22 = vadd.f32 %v2918_v63, %v2626_v51  ;;  %v3241_v37 = vrot.slane %v3087_v9, 1  ;;  %v3597_v4 = vmul.f32 %v7778_v3, %v2818_v30  ;;  %v3598_v38 = vmul.f32 %v7778_v3, %v2819_v19  ;;  %v1303_v9 = vld [vmem:[#allocation2 + $0x24c] sm:$0xff]  }
 0x3f9   :  { %v3015_v11 = vadd.f32 %v2919_v41, %v2627_v50  ;;  %v3242_v61 = vrot.slane %v3088_v28, 1  ;;  %v3599_v48 = vmul.f32 %v7778_v3, %v3509_v6  ;;  %7348 = vmatmul.mubr.bf16.gmra.mrb[48].mxu1 %v6125_v2  ;;  %v9604_v16 = vunpack.c.l.bf16 %v7120_v43  ;;  %v1302_v50 = vld [vmem:[#allocation2 + $0x248] sm:$0x8]  ;;  %v2057_v6 = vld [vmem:[#allocation2 + $0x254] sm:$0x1] }
 0x3fa   :  { %v3433_v49 = vadd.f32 %v3241_v37, %v3013_v42  ;;  %v3841_v45 = vrot.slane %v3597_v4, 2  ;;  %v9606_v7 = vunpack.c.h.bf16 %v7120_v43  ;;  %v3842_v39 = vrot.slane %v3598_v38, 2  ;;  %v2724_v43 = vld [vmem:[#allocation2 + $0x25c] sm:$0x8] }
 0x3fb   :  { %v3243_v31 = vsel %vm1741_vm6, %v3241_v37, %v3242_v61  ;;  %v3435_v53 = vadd.f32 %v3242_v61, %v3015_v11  ;;  %v3844_v17 = vrot.slane %v3599_v48, 2  ;;  %v4238_v47 = vunpack.c.l.bf16 %v4142_v13 }
 0x3fc   :  { %v3434_v5 = vadd.f32 %v3243_v31, %v3014_v22  ;;  %v4045_v0 = vadd.f32 %v3841_v45, %v3433_v49  ;;  %v4339_v10 = vmul.f32 %v9604_v16, %v7795_v21  ;;  %v3843_v8 = vsel %vm2290_vm7, %v3841_v45, %v3842_v39 }
 0x3fd   :  { %v3845_v56 = vsel %vm2290_vm7, %v3842_v39, %v3844_v17  ;;  %v4340_v40 = vmul.f32 %v9606_v7, %v7795_v21  ;;  %v4508_v15 = vmul.f32 %v9604_v16, %v7798_v23  ;;  %v4338_v62 = vmul.f32 %v7795_v21, %v4238_v47 }
 0x3fe   :  { %v4046_v36 = vadd.f32 %v3843_v8, %v3434_v5  ;;  %v4047_v57 = vadd.f32 %v3845_v56, %v3435_v53  ;;  %v4509_v29 = vmul.f32 %v9606_v7, %v7798_v23  ;;  %v4930_v25 = vunpack.c.l.bf16 %v4898_v26 }
 0x3ff   :  { %v4662_v44 = vrot.slane %v4508_v15, 1  ;;  %v5018_v55 = vmul.f32 %v9451_v32, %v9604_v16  ;;  %v5019_v35 = vmul.f32 %v9451_v32, %v9606_v7  ;;  %v4434_v14 = vadd.f32 %v4338_v62, %v4045_v0 }
 0x400   :  { %v4435_v51 = vadd.f32 %v4339_v10, %v4046_v36  ;;  %v4436_v30 = vadd.f32 %v4340_v40, %v4047_v57  ;;  %v4663_v18 = vrot.slane %v4509_v29, 1  ;;  %v5020_v19 = vmul.f32 %v9451_v32, %v4930_v25 }
 0x401   :  { %v5262_v27 = vrot.slane %v5018_v55, 2  ;;  %v5263_v52 = vrot.slane %v5019_v35, 2  ;;  %v1112_v63 = vsel %vm7711_vm5, 0, %v1111_v46  ;;  %v4854_v41 = vadd.f32 %v4662_v44, %v4434_v14 }
 0x402   :  { %v4664_v58 = vsel %vm1741_vm6, %v4662_v44, %v4663_v18  ;;  %v4856_v42 = vadd.f32 %v4663_v18, %v4436_v30  ;;  %1113 = vst [vmem:[#allocation2 + $0x270] sm:$0x8] %v1112_v63  ;;  %v1208_v28 = vsel %vm7705_vm2, 0, %v1207_v54  ;;  %v5265_v37 = vrot.slane %v5020_v19, 2 }
 0x403   :  { %v4855_v2 = vadd.f32 %v4664_v58, %v4435_v51  ;;  %v5264_v22 = vsel %vm2290_vm7, %v5262_v27, %v5263_v52  ;;  %1209 = vst [vmem:[#allocation2 + $0x27c] sm:$0x1] %v1208_v28  ;;  %v1398_v4 = vunpack.c.l.bf16 %v1302_v50  ;;  %v5466_v11 = vadd.f32 %v5262_v27, %v4854_v41 }
 0x404   :  { %v1399_v61 = vunpack.c.l.bf16 %v1303_v9  ;;  %v1400_v38 = vunpack.c.h.bf16 %v1303_v9  ;;  %v2089_v48 = vunpack.c.l.bf16 %v2057_v6  ;;  %v5266_v13 = vsel %vm2290_vm7, %v5263_v52, %v5265_v37  ;;  %v3478_v6 = vld [vmem:[#allocation2 + $0x268] sm:$0x1] }
 0x405   :  { %v5467_v49 = vadd.f32 %v5264_v22, %v4855_v2  ;;  %v1498_v45 = vmul.f32 %v7757_v34, %v1398_v4  ;;  %v2820_v31 = vunpack.c.l.bf16 %v2724_v43  ;;  %v5468_v53 = vadd.f32 %v5266_v13, %v4856_v42 }
 0x406   :  { %v5569_v39 = vadd.f32 %v9579_v20, %v5466_v11  ;;  %v1499_v17 = vmul.f32 %v7757_v34, %v1399_v61  ;;  %v1500_v5 = vmul.f32 %v7757_v34, %v1400_v38  ;;  %v1667_v47 = vmul.f32 %v7745_v24, %v1399_v61  ;;  %v9654_v11 = vpop.f32.mrb[0].mxu1 }
 0x407   :  { %v5570_v0 = vadd.f32 %v9579_v20, %v5467_v49  ;;  %v1668_v10 = vmul.f32 %v7745_v24, %v1400_v38  ;;  %v2179_v26 = vmul.f32 %v7754_v33, %v1399_v61  ;;  %v5571_v8 = vadd.f32 %v9579_v20, %v5468_v53  ;;  %v4146_v49 = vld [vmem:[#allocation2 + $0x274] sm:$0xff]  }
 0x408   :  { %v5665_v56 = vmax.f32 %v5569_v39, 0.0  ;;  %v2180_v40 = vmul.f32 %v7754_v33, %v1400_v38  ;;  %v2181_v15 = vmul.f32 %v7754_v33, %v2089_v48  ;;  %v1823_v57 = vrot.slane %v1667_v47, 1 }
 0x409   :  { %v5666_v36 = vmax.f32 %v5570_v0, 0.0  ;;  %v1824_v62 = vrot.slane %v1668_v10, 1  ;;  %v2426_v29 = vrot.slane %v2179_v26, 2  ;;  %v5667_v46 = vmax.f32 %v5571_v8, 0.0  ;;  %v4145_v4 = vld [vmem:[#allocation2 + $0x270] sm:$0x8] }
 0x40a   :  { %v5761_v44 = vmin.f32 %v5665_v56, 6.0  ;;  %v2427_v25 = vrot.slane %v2180_v40, 2  ;;  %v2429_v55 = vrot.slane %v2181_v15, 2  ;;  %v2015_v14 = vadd.f32 %v1823_v57, %v1498_v45  ;;  %v9659_v45 = vpop.f32.mrb[1].mxu1 }
 0x40b   :  { %v5762_v35 = vmin.f32 %v5666_v36, 6.0  ;;  %v1825_v54 = vsel %vm1741_vm6, %v1823_v57, %v1824_v62  ;;  %v2017_v51 = vadd.f32 %v1824_v62, %v1500_v5  ;;  %v5763_v30 = vmin.f32 %v5667_v46, 6.0  ;;  %v9663_v5 = vpop.f32.mrb[2].mxu1 }
 0x40c   :  { %v6006_v18 = vrot.slane %v5761_v44, 7  ;;  %v2016_v50 = vadd.f32 %v1825_v54, %v1499_v17  ;;  %v2428_v19 = vsel %vm2290_vm7, %v2426_v29, %v2427_v25  ;;  %v2430_v52 = vsel %vm2290_vm7, %v2427_v25, %v2429_v55  ;;  %v9668_v8 = vpop.f32.mrb[3].mxu1 }
 0x40d   :  { %v6007_v27 = vrot.slane %v5762_v35, 7  ;;  %v2628_v63 = vadd.f32 %v2426_v29, %v2015_v14  ;;  %v2920_v9 = vmul.f32 %v7772_v60, %v2820_v31  ;;  %v6009_v58 = vrot.slane %v5763_v30, 7  ;;  %v9670_v57 = vpop.f32.mrb[4].mxu1 }
 0x40e   :  { %v2629_v41 = vadd.f32 %v2428_v19, %v2016_v50  ;;  %v2630_v42 = vadd.f32 %v2430_v52, %v2017_v51  ;;  %v2921_v28 = vmul.f32 %v9604_v16, %v7772_v60  ;;  %v2922_v2 = vmul.f32 %v9606_v7, %v7772_v60  ;;  %v9673_v25 = vpop.f32.mrb[5].mxu1  ;;  %v4899_v51 = vld [vmem:[#allocation2 + $0x27c] sm:$0x1]  ;;  %v1114_v52 = vld [vmem:[#allocation2 + $0x284] sm:$0x8] }
 0x40f   :  { %v6008_v43 = vsel %vm996_vm0, %v6006_v18, %v6007_v27  ;;  %v3016_v22 = vadd.f32 %v2920_v9, %v2628_v63  ;;  %v3089_v37 = vmul.f32 %v9604_v16, %v7786_v12  ;;  %v6010_v61 = vsel %vm996_vm0, %v6007_v27, %v6009_v58  ;;  %v9677_v30 = vpop.f32.mrb[6].mxu1 }
 0x410   :  { %v3017_v38 = vadd.f32 %v2921_v28, %v2629_v41  ;;  %v3090_v48 = vmul.f32 %v9606_v7, %v7786_v12  ;;  %v3510_v13 = vunpack.c.l.bf16 %v3478_v6  ;;  %v6126_v31 = vpack.c.bf16 %v6010_v61, %v6008_v43  ;;  %v9683_v63 = vpop.f32.mrb[7].mxu1 }
 0x411   :  { %v3018_v53 = vadd.f32 %v2922_v2, %v2630_v42  ;;  %v3244_v39 = vrot.slane %v3089_v37, 1  ;;  %v3600_v17 = vmul.f32 %v9604_v16, %v7778_v3  ;;  %v3601_v47 = vmul.f32 %v9606_v7, %v7778_v3  ;;  %v9686_v42 = vpop.f32.mrb[8].mxu1  ;;  %v1210_v37 = vld [vmem:[#allocation2 + $0x290] sm:$0x1] }
 0x412   :  { %v3245_v0 = vrot.slane %v3090_v48, 1  ;;  %v3602_v10 = vmul.f32 %v7778_v3, %v3510_v13  ;;  %v4241_v26 = vunpack.c.l.bf16 %v4145_v4  ;;  %7351 = vmatprep.mubr.bf16.mxu1 %v6126_v31  ;;  %v4242_v15 = vunpack.c.l.bf16 %v4146_v49  ;;  %v1305_v4 = vld [vmem:[#allocation2 + $0x25c] sm:$0x8]  ;;  %v9690_v61 = vpop.f32.mrb[9].mxu1 }
 0x413   :  { %v3436_v56 = vadd.f32 %v3244_v39, %v3016_v22  ;;  %v3846_v40 = vrot.slane %v3600_v17, 2  ;;  %v4243_v36 = vunpack.c.h.bf16 %v4146_v49  ;;  %v3847_v46 = vrot.slane %v3601_v47, 2  ;;  %v9694_v31 = vpop.f32.mrb[10].mxu1 }
 0x414   :  { %v3246_v62 = vsel %vm1741_vm6, %v3244_v39, %v3245_v0  ;;  %v3438_v29 = vadd.f32 %v3245_v0, %v3018_v53  ;;  %v3849_v44 = vrot.slane %v3602_v10, 2  ;;  %v4341_v54 = vmul.f32 %v7795_v21, %v4241_v26  ;;  %v9697_v47 = vpop.f32.mrb[11].mxu1 }
 0x415   :  { %v3437_v55 = vadd.f32 %v3246_v62, %v3017_v38  ;;  %v4048_v35 = vadd.f32 %v3846_v40, %v3436_v56  ;;  %v4342_v14 = vmul.f32 %v7795_v21, %v4242_v15  ;;  %v3848_v18 = vsel %vm2290_vm7, %v3846_v40, %v3847_v46 }
 0x416   :  { %v3850_v50 = vsel %vm2290_vm7, %v3847_v46, %v3849_v44  ;;  %v4343_v19 = vmul.f32 %v7795_v21, %v4243_v36  ;;  %v4510_v27 = vmul.f32 %v7798_v23, %v4242_v15  ;;  %v4511_v41 = vmul.f32 %v7798_v23, %v4243_v36 }
 0x417   :  { %v4049_v9 = vadd.f32 %v3848_v18, %v3437_v55  ;;  %v4050_v6 = vadd.f32 %v3850_v50, %v3438_v29  ;;  %v4437_v58 = vadd.f32 %v4341_v54, %v4048_v35  ;;  %v4931_v43 = vunpack.c.l.bf16 %v4899_v51 }
 0x418   :  { %v4665_v28 = vrot.slane %v4510_v27, 1  ;;  %v5021_v2 = vmul.f32 %v9451_v32, %v4242_v15  ;;  %v5022_v22 = vmul.f32 %v9451_v32, %v4243_v36  ;;  %v4666_v13 = vrot.slane %v4511_v41, 1  ;;  %v9702_v15 = vpop.f32.mrb[12].mxu1 }
 0x419   :  { %v4438_v38 = vadd.f32 %v4342_v14, %v4049_v9  ;;  %v4439_v48 = vadd.f32 %v4343_v19, %v4050_v6  ;;  %v1115_v49 = vsel %vm7711_vm5, 0, %v1114_v52  ;;  %v5023_v39 = vmul.f32 %v9451_v32, %v4931_v43  ;;  %v2058_v32 = vld [vmem:[#allocation2 + $0x268] sm:$0x1]  ;;  %v9705_v44 = vpop.f32.mrb[13].mxu1 }
 0x41a   :  { %v4857_v53 = vadd.f32 %v4665_v28, %v4437_v58  ;;  %v5267_v17 = vrot.slane %v5021_v2, 2  ;;  %v5268_v0 = vrot.slane %v5022_v22, 2  ;;  %1116 = vst [vmem:[#allocation2 + $0x284] sm:$0x8] %v1115_v49  ;;  %v4667_v10 = vsel %vm1741_vm6, %v4665_v28, %v4666_v13  ;;  %v9714_v51 = vpop.f32.mrb[14].mxu1 }
 0x41b   :  { %v4859_v26 = vadd.f32 %v4666_v13, %v4439_v48  ;;  %v1211_v56 = vsel %vm7705_vm2, 0, %v1210_v37  ;;  %v1401_v40 = vunpack.c.l.bf16 %v1305_v4  ;;  %v4858_v36 = vadd.f32 %v4667_v10, %v4438_v38  ;;  %v9720_v52 = vpop.f32.mrb[15].mxu1 }
 0x41c   :  { %v5269_v62 = vsel %vm2290_vm7, %v5267_v17, %v5268_v0  ;;  %v5270_v29 = vrot.slane %v5023_v39, 2  ;;  %v5469_v46 = vadd.f32 %v5267_v17, %v4857_v53  ;;  %1212 = vst [vmem:[#allocation2 + $0x290] sm:$0x1] %v1211_v56  ;;  %v1502_v35 = vmul.f32 %v9604_v16, %v7757_v34  ;;  %v9724_v28 = vpop.f32.mrb[16].mxu1  ;;  %v2727_v53 = vld [vmem:[#allocation2 + $0x270] sm:$0x8] }
 0x41d   :  { %v1501_v55 = vmul.f32 %v7757_v34, %v1401_v40  ;;  %v1503_v54 = vmul.f32 %v9606_v7, %v7757_v34  ;;  %v1669_v14 = vmul.f32 %v9604_v16, %v7745_v24  ;;  %v5470_v50 = vadd.f32 %v5269_v62, %v4858_v36  ;;  %v9729_v4 = vpop.f32.mrb[17].mxu1 }
 0x41e   :  { %v5271_v18 = vsel %vm2290_vm7, %v5268_v0, %v5270_v29  ;;  %v5572_v19 = vadd.f32 %v9579_v20, %v5469_v46  ;;  %v1670_v27 = vmul.f32 %v9606_v7, %v7745_v24  ;;  %v2090_v58 = vunpack.c.l.bf16 %v2058_v32  ;;  %v9733_v39 = vpop.f32.mrb[18].mxu1 }
 0x41f   :  { %v5471_v9 = vadd.f32 %v5271_v18, %v4859_v26  ;;  %v1826_v6 = vrot.slane %v1669_v14, 1  ;;  %v2182_v41 = vmul.f32 %v9604_v16, %v7754_v33  ;;  %v5573_v43 = vadd.f32 %v9579_v20, %v5470_v50  ;;  %v2728_v26 = vld [vmem:[#allocation2 + $0x274] sm:$0xff]   ;;  %v9736_v56 = vpop.f32.mrb[19].mxu1 }
 0x420   :  { %v5668_v2 = vmax.f32 %v5572_v19, 0.0  ;;  %v1827_v22 = vrot.slane %v1670_v27, 1  ;;  %v2183_v37 = vmul.f32 %v9606_v7, %v7754_v33  ;;  %v2184_v13 = vmul.f32 %v7754_v33, %v2090_v58  ;;  %v9738_v29 = vpop.f32.mrb[20].mxu1 }
 0x421   :  { %v5574_v38 = vadd.f32 %v9579_v20, %v5471_v9  ;;  %v2018_v48 = vadd.f32 %v1826_v6, %v1501_v55  ;;  %v2431_v49 = vrot.slane %v2182_v41, 2  ;;  %v5669_v16 = vmax.f32 %v5573_v43, 0.0  ;;  %v9742_v9 = vpop.f32.mrb[21].mxu1 }
 0x422   :  { %v5764_v17 = vmin.f32 %v5668_v2, 6.0  ;;  %v1828_v0 = vsel %vm1741_vm6, %v1826_v6, %v1827_v22  ;;  %v2020_v10 = vadd.f32 %v1827_v22, %v1503_v54  ;;  %v2432_v36 = vrot.slane %v2183_v37, 2  ;;  %v3479_v54 = vld [vmem:[#allocation2 + $0x27c] sm:$0x1]  ;;  %v9744_v43 = vpop.f32.mrb[22].mxu1 }
 0x423   :  { %v5670_v7 = vmax.f32 %v5574_v38, 0.0  ;;  %v2019_v40 = vadd.f32 %v1828_v0, %v1502_v35  ;;  %v2434_v62 = vrot.slane %v2184_v13, 2  ;;  %v5765_v46 = vmin.f32 %v5669_v16, 6.0  ;;  %10195 = vst [vmem:[#allocation18_spill] sm:$0xff] %v9744_v43 }
 0x424   :  { %v6011_v32 = vrot.slane %v5764_v17, 7  ;;  %v2631_v55 = vadd.f32 %v2431_v49, %v2018_v48  ;;  %v2823_v14 = vunpack.c.l.bf16 %v2727_v53  ;;  %v2433_v50 = vsel %vm2290_vm7, %v2431_v49, %v2432_v36  ;;  %v9749_v48 = vpop.f32.mrb[23].mxu1  ;;  %v7121_v17 = vld [vmem:[#allocation2 + $0x288] sm:$0xff]  }
 0x425   :  { %v5766_v18 = vmin.f32 %v5670_v7, 6.0  ;;  %v2435_v19 = vsel %vm2290_vm7, %v2432_v36, %v2434_v62  ;;  %v2824_v27 = vunpack.c.l.bf16 %v2728_v26  ;;  %v6012_v6 = vrot.slane %v5765_v46, 7  ;;  %10196 = vst [vmem:[#allocation21_spill] sm:$0xff] %v9749_v48  ;;  %v9754_v0 = vpop.f32.mrb[24].mxu1 }
 0x426   :  { %v2632_v58 = vadd.f32 %v2433_v50, %v2019_v40  ;;  %v2633_v35 = vadd.f32 %v2435_v19, %v2020_v10  ;;  %v2825_v41 = vunpack.c.h.bf16 %v2728_v26  ;;  %v2923_v22 = vmul.f32 %v7772_v60, %v2823_v14  ;;  %10197 = vst [vmem:[#allocation19_spill] sm:$0xff] %v9754_v0  ;;  %v9757_v36 = vpop.f32.mrb[25].mxu1 }
 0x427   :  { %v6014_v2 = vrot.slane %v5766_v18, 7  ;;  %v2924_v37 = vmul.f32 %v7772_v60, %v2824_v27  ;;  %v3091_v38 = vmul.f32 %v7786_v12, %v2824_v27  ;;  %v6013_v13 = vsel %vm996_vm0, %v6011_v32, %v6012_v6  ;;  %10198 = vst [vmem:[#allocation23_spill] sm:$0xff] %v9757_v36  ;;  %v4148_v18 = vld [vmem:[#allocation2 + $0x284] sm:$0x8]  ;;  %v9760_v50 = vpop.f32.mrb[26].mxu1 }
 0x428   :  { %v2925_v49 = vmul.f32 %v7772_v60, %v2825_v41  ;;  %v3092_v53 = vmul.f32 %v7786_v12, %v2825_v41  ;;  %v3511_v16 = vunpack.c.l.bf16 %v3479_v54  ;;  %v3019_v26 = vadd.f32 %v2923_v22, %v2631_v55  ;;  %10199 = vst [vmem:[#allocation20_spill] sm:$0xff] %v9760_v50  ;;  %v9766_v55 = vpop.f32.mrb[27].mxu1 }
 0x429   :  { %v6015_v10 = vsel %vm996_vm0, %v6012_v6, %v6014_v2  ;;  %v3020_v7 = vadd.f32 %v2924_v37, %v2632_v58  ;;  %v3247_v40 = vrot.slane %v3091_v38, 1  ;;  %v3603_v32 = vmul.f32 %v7778_v3, %v2824_v27  ;;  %10200 = vst [vmem:[#allocation26_spill] sm:$0xff] %v9766_v55  ;;  %v9771_v27 = vpop.f32.mrb[28].mxu1  ;;  %v2059_v55 = vld [vmem:[#allocation2 + $0x27c] sm:$0x1] }
 0x42a   :  { %v6127_v62 = vpack.c.bf16 %v6015_v10, %v6013_v13  ;;  %v3021_v46 = vadd.f32 %v2925_v49, %v2633_v35  ;;  %v3248_v14 = vrot.slane %v3092_v53, 1  ;;  %v3604_v54 = vmul.f32 %v7778_v3, %v2825_v41  ;;  %10201 = vst [vmem:[#allocation22_spill] sm:$0xff] %v9771_v27  ;;  %v4900_v41 = vld [vmem:[#allocation2 + $0x290] sm:$0x1]  ;;  %v9773_v49 = vpop.f32.mrb[29].mxu1 }
 0x42b   :  { %v3439_v19 = vadd.f32 %v3247_v40, %v3019_v26  ;;  %v3605_v0 = vmul.f32 %v7778_v3, %v3511_v16  ;;  %v9764_v48 = vunpack.c.l.bf16 %v7121_v17  ;;  %v3851_v35 = vrot.slane %v3603_v32, 2  ;;  %10202 = vst [vmem:[#allocation25_spill] sm:$0xff] %v9773_v49  ;;  %v9781_v26 = vpop.f32.mrb[30].mxu1  ;;  %v9792_v27 = vld [vmem:[#allocation8 + $0x8] ss:$0 sm:$0xff] }
 0x42c   :  { %7352 = vmatmul.mubr.bf16.gmra.mrb[52].mxu1 %v6127_v62  ;;  %v3249_v6 = vsel %vm1741_vm6, %v3247_v40, %v3248_v14  ;;  %v3441_v58 = vadd.f32 %v3248_v14, %v3021_v46  ;;  %v9769_v2 = vunpack.c.h.bf16 %v7121_v17  ;;  %v3852_v37 = vrot.slane %v3604_v54, 2  ;;  %10203 = vst [vmem:[#allocation24_spill] sm:$0xff] %v9781_v26  ;;  %v1117_v46 = vld [vmem:[#allocation2 + $0x298] sm:$0x8]  ;;  %v9788_v14 = vpop.f32.mrb[31].mxu1 }
 0x42d   :  { %v3440_v22 = vadd.f32 %v3249_v6, %v3020_v7  ;;  %v3854_v38 = vrot.slane %v3605_v0, 2  ;;  %v4244_v13 = vunpack.c.l.bf16 %v4148_v18  ;;  %v4051_v53 = vadd.f32 %v3851_v35, %v3439_v19  ;;  %10204 = vst [vmem:[#allocation29_spill] sm:$0xff] %v9788_v14  ;;  %v9790_v6 = vpop.f32.mrb[32].mxu1 }
 0x42e   :  { %v4345_v16 = vmul.f32 %v9764_v48, %v7795_v21  ;;  %v4346_v10 = vmul.f32 %v9769_v2, %v7795_v21  ;;  %v4512_v17 = vmul.f32 %v9764_v48, %v7798_v23  ;;  %v3853_v7 = vsel %vm2290_vm7, %v3851_v35, %v3852_v37  ;;  %10205 = vst [vmem:[#allocation27_spill] sm:$0xff] %v9790_v6 }
 0x42f   :  { %v3855_v0 = vsel %vm2290_vm7, %v3852_v37, %v3854_v38  ;;  %v4344_v40 = vmul.f32 %v7795_v21, %v4244_v13  ;;  %v4513_v62 = vmul.f32 %v9769_v2, %v7798_v23  ;;  %v4052_v32 = vadd.f32 %v3853_v7, %v3440_v22  ;;  %v1213_v38 = vld [vmem:[#allocation2 + $0x2a4] sm:$0x1]  ;;  %v9798_v13 = vpop.f32.mrb[33].mxu1 }
 0x430   :  { %v4053_v18 = vadd.f32 %v3855_v0, %v3441_v58  ;;  %v4668_v19 = vrot.slane %v4512_v17, 1  ;;  %v4932_v54 = vunpack.c.l.bf16 %v4900_v41  ;;  %v5024_v35 = vmul.f32 %v9792_v27, %v9764_v48  ;;  %10206 = vst [vmem:[#allocation31_spill] sm:$0xff] %v9798_v13  ;;  %v1309_v17 = vld [vmem:[#allocation2 + $0x274] sm:$0xff]   ;;  %v9803_v7 = vpop.f32.mrb[34].mxu1 }
 0x431   :  { %v4440_v49 = vadd.f32 %v4344_v40, %v4051_v53  ;;  %v4669_v26 = vrot.slane %v4513_v62, 1  ;;  %v5025_v37 = vmul.f32 %v9792_v27, %v9769_v2  ;;  %v4441_v14 = vadd.f32 %v4345_v16, %v4052_v32  ;;  %v1308_v53 = vld [vmem:[#allocation2 + $0x270] sm:$0x8]  ;;  %10207 = vst [vmem:[#allocation28_spill] sm:$0xff] %v9803_v7  ;;  %v9806_v50 = vpop.f32.mrb[35].mxu1 }
 0x432   :  { %v4442_v22 = vadd.f32 %v4346_v10, %v4053_v18  ;;  %v5026_v58 = vmul.f32 %v9792_v27, %v4932_v54  ;;  %v1118_v41 = vsel %vm7711_vm5, 0, %v1117_v46  ;;  %v5272_v62 = vrot.slane %v5024_v35, 2  ;;  %10208 = vst [vmem:[#allocation32_spill] sm:$0xff] %v9806_v50 }
 0x433   :  { %v4670_v0 = vsel %vm1741_vm6, %v4668_v19, %v4669_v26  ;;  %v4860_v40 = vadd.f32 %v4668_v19, %v4440_v49  ;;  %v5273_v6 = vrot.slane %v5025_v37, 2  ;;  %1119 = vst [vmem:[#allocation2 + $0x298] sm:$0x8] %v1118_v41  ;;  %v1214_v18 = vsel %vm7705_vm2, 0, %v1213_v38 }
 0x434   :  { %v4861_v16 = vadd.f32 %v4670_v0, %v4441_v14  ;;  %v4862_v10 = vadd.f32 %v4669_v26, %v4442_v22  ;;  %v5275_v32 = vrot.slane %v5026_v58, 2  ;;  %1215 = vst [vmem:[#allocation2 + $0x2a4] sm:$0x1] %v1214_v18  ;;  %v1404_v7 = vunpack.c.l.bf16 %v1308_v53 }
 0x435   :  { %v5274_v46 = vsel %vm2290_vm7, %v5272_v62, %v5273_v6  ;;  %v5472_v54 = vadd.f32 %v5272_v62, %v4860_v40  ;;  %v1405_v13 = vunpack.c.l.bf16 %v1309_v17  ;;  %v1406_v35 = vunpack.c.h.bf16 %v1309_v17 }
 0x436   :  { %v5276_v49 = vsel %vm2290_vm7, %v5273_v6, %v5275_v32  ;;  %v5473_v19 = vadd.f32 %v5274_v46, %v4861_v16  ;;  %v2091_v37 = vunpack.c.l.bf16 %v2059_v55  ;;  %v1504_v26 = vmul.f32 %v7757_v34, %v1404_v7 }
 0x437   :  { %v5474_v41 = vadd.f32 %v5276_v49, %v4862_v10  ;;  %v5575_v50 = vadd.f32 %v9579_v20, %v5472_v54  ;;  %v1505_v14 = vmul.f32 %v7757_v34, %v1405_v13  ;;  %v1506_v22 = vmul.f32 %v7757_v34, %v1406_v35 }
 0x438   :  { %v5576_v38 = vadd.f32 %v9579_v20, %v5473_v19  ;;  %v1671_v58 = vmul.f32 %v7745_v24, %v1405_v13  ;;  %v1672_v53 = vmul.f32 %v7745_v24, %v1406_v35  ;;  %v2185_v55 = vmul.f32 %v7754_v33, %v1405_v13  ;;  %v2730_v19 = vld [vmem:[#allocation2 + $0x284] sm:$0x8] }
 0x439   :  { %v5577_v6 = vadd.f32 %v9579_v20, %v5474_v41  ;;  %v5671_v0 = vmax.f32 %v5575_v50, 0.0  ;;  %v2186_v17 = vmul.f32 %v7754_v33, %v1406_v35  ;;  %v9822_v40 = vpop.f32.mrb[36].mxu1  ;;  %v2187_v10 = vmul.f32 %v7754_v33, %v2091_v37 }
 0x43a   :  { %10209 = vst [vmem:[#allocation30_spill] sm:$0xff] %v9822_v40  ;;  %v5672_v7 = vmax.f32 %v5576_v38, 0.0  ;;  %v1829_v62 = vrot.slane %v1671_v58, 1  ;;  %v1830_v16 = vrot.slane %v1672_v53, 1  ;;  %v9825_v32 = vpop.f32.mrb[37].mxu1  ;;  %v2436_v54 = vrot.slane %v2185_v55, 2 }
 0x43b   :  { %10210 = vst [vmem:[#allocation17_spill] sm:$0xff] %v9825_v32  ;;  %v5673_v18 = vmax.f32 %v5577_v6, 0.0  ;;  %v5767_v46 = vmin.f32 %v5671_v0, 6.0  ;;  %v2437_v49 = vrot.slane %v2186_v17, 2  ;;  %v9828_v35 = vpop.f32.mrb[38].mxu1  ;;  %v2439_v43 = vrot.slane %v2187_v10, 2 }
 0x43c   :  { %v5768_v41 = vmin.f32 %v5672_v7, 6.0  ;;  %v1831_v50 = vsel %vm1741_vm6, %v1829_v62, %v1830_v16  ;;  %v2021_v13 = vadd.f32 %v1829_v62, %v1504_v26  ;;  %v2023_v36 = vadd.f32 %v1830_v16, %v1506_v22  ;;  %10211 = vst [vmem:[#allocation16_spill] sm:$0xff] %v9828_v35  ;;  %v9831_v0 = vpop.f32.mrb[39].mxu1  ;;  %v3480_v22 = vld [vmem:[#allocation2 + $0x290] sm:$0x1] }
 0x43d   :  { %v5769_v40 = vmin.f32 %v5673_v18, 6.0  ;;  %v6016_v38 = vrot.slane %v5767_v46, 7  ;;  %v2022_v58 = vadd.f32 %v1831_v50, %v1505_v14  ;;  %v2438_v53 = vsel %vm2290_vm7, %v2436_v54, %v2437_v49  ;;  %10212 = vst [vmem:[#allocation33_spill] sm:$0xff] %v9831_v0  ;;  %v1311_v0 = vld [vmem:[#allocation2 + $0x284] sm:$0x8] }
 0x43e   :  { %v6017_v37 = vrot.slane %v5768_v41, 7  ;;  %v2634_v32 = vadd.f32 %v2436_v54, %v2021_v13  ;;  %v2826_v6 = vunpack.c.l.bf16 %v2730_v19  ;;  %v2927_v7 = vmul.f32 %v9764_v48, %v7772_v60  ;;  %v4151_v19 = vld [vmem:[#allocation2 + $0x298] sm:$0x8]  ;;  %v4152_v41 = vld [vmem:[#allocation2 + $0x29c] sm:$0xff]  }
 0x43f   :  { %v6019_v55 = vrot.slane %v5769_v40, 7  ;;  %v2635_v17 = vadd.f32 %v2438_v53, %v2022_v58  ;;  %v2928_v26 = vmul.f32 %v9769_v2, %v7772_v60  ;;  %v2440_v14 = vsel %vm2290_vm7, %v2437_v49, %v2439_v43 }
 0x440   :  { %v6018_v62 = vsel %vm996_vm0, %v6016_v38, %v6017_v37  ;;  %v2926_v16 = vmul.f32 %v7772_v60, %v2826_v6  ;;  %v3093_v10 = vmul.f32 %v9764_v48, %v7786_v12  ;;  %v2636_v40 = vadd.f32 %v2440_v14, %v2023_v36 }
 0x441   :  { %v6020_v18 = vsel %vm996_vm0, %v6017_v37, %v6019_v55  ;;  %v3023_v46 = vadd.f32 %v2927_v7, %v2635_v17  ;;  %v3094_v54 = vmul.f32 %v9769_v2, %v7786_v12  ;;  %v3512_v38 = vunpack.c.l.bf16 %v3480_v22 }
 0x442   :  { %v6128_v50 = vpack.c.bf16 %v6020_v18, %v6018_v62  ;;  %v3022_v13 = vadd.f32 %v2926_v16, %v2634_v32  ;;  %v3250_v58 = vrot.slane %v3093_v10, 1  ;;  %v3024_v53 = vadd.f32 %v2928_v26, %v2636_v40  ;;  %v4901_v18 = vld [vmem:[#allocation2 + $0x2a4] sm:$0x1] }
 0x443   :  { %v3251_v43 = vrot.slane %v3094_v54, 1  ;;  %v3606_v49 = vmul.f32 %v9764_v48, %v7778_v3  ;;  %v3607_v6 = vmul.f32 %v9769_v2, %v7778_v3  ;;  %v3608_v37 = vmul.f32 %v7778_v3, %v3512_v38 }
 0x444   :  { %7355 = vmatprep.mubr.bf16.mxu1 %v6128_v50  ;;  %v3442_v36 = vadd.f32 %v3250_v58, %v3022_v13  ;;  %v4247_v55 = vunpack.c.l.bf16 %v4151_v19  ;;  %v4248_v17 = vunpack.c.l.bf16 %v4152_v41  ;;  %v4249_v16 = vunpack.c.h.bf16 %v4152_v41 }
 0x445   :  { %v3252_v7 = vsel %vm1741_vm6, %v3250_v58, %v3251_v43  ;;  %v3444_v62 = vadd.f32 %v3251_v43, %v3024_v53  ;;  %v3856_v32 = vrot.slane %v3606_v49, 2  ;;  %v3857_v14 = vrot.slane %v3607_v6, 2 }
 0x446   :  { %v3443_v22 = vadd.f32 %v3252_v7, %v3023_v46  ;;  %v3859_v26 = vrot.slane %v3608_v37, 2  ;;  %v4347_v10 = vmul.f32 %v7795_v21, %v4247_v55  ;;  %v4348_v50 = vmul.f32 %v7795_v21, %v4248_v17  ;;  %v1120_v46 = vld [vmem:[#allocation2 + $0x2ac] sm:$0x8]  ;;  %v1216_v37 = vld [vmem:[#allocation2 + $0x2b8] sm:$0x1] }
 0x447   :  { %v3858_v40 = vsel %vm2290_vm7, %v3856_v32, %v3857_v14  ;;  %v4054_v54 = vadd.f32 %v3856_v32, %v3442_v36  ;;  %v4514_v13 = vmul.f32 %v7798_v23, %v4248_v17  ;;  %v4349_v58 = vmul.f32 %v7795_v21, %v4249_v16 }
 0x448   :  { %v3860_v19 = vsel %vm2290_vm7, %v3857_v14, %v3859_v26  ;;  %v4055_v38 = vadd.f32 %v3858_v40, %v3443_v22  ;;  %v4515_v53 = vmul.f32 %v7798_v23, %v4249_v16  ;;  %v4933_v6 = vunpack.c.l.bf16 %v4901_v18 }
 0x449   :  { %v4056_v43 = vadd.f32 %v3860_v19, %v3444_v62  ;;  %v4443_v41 = vadd.f32 %v4347_v10, %v4054_v54  ;;  %v4671_v49 = vrot.slane %v4514_v13, 1  ;;  %v5027_v36 = vmul.f32 %v9792_v27, %v4248_v17  ;;  %v2060_v13 = vld [vmem:[#allocation2 + $0x290] sm:$0x1] }
 0x44a   :  { %v4444_v55 = vadd.f32 %v4348_v50, %v4055_v38  ;;  %v4672_v7 = vrot.slane %v4515_v53, 1  ;;  %v5028_v32 = vmul.f32 %v9792_v27, %v4249_v16  ;;  %v5029_v22 = vmul.f32 %v9792_v27, %v4933_v6 }
 0x44b   :  { %v4445_v35 = vadd.f32 %v4349_v58, %v4056_v43  ;;  %v4863_v14 = vadd.f32 %v4671_v49, %v4443_v41  ;;  %v1121_v26 = vsel %vm7711_vm5, 0, %v1120_v46  ;;  %v5277_v10 = vrot.slane %v5027_v36, 2 }
 0x44c   :  { %v4673_v62 = vsel %vm1741_vm6, %v4671_v49, %v4672_v7  ;;  %v5278_v40 = vrot.slane %v5028_v32, 2  ;;  %1122 = vst [vmem:[#allocation2 + $0x2ac] sm:$0x8] %v1121_v26  ;;  %v1217_v18 = vsel %vm7705_vm2, 0, %v1216_v37  ;;  %v5280_v50 = vrot.slane %v5029_v22, 2 }
 0x44d   :  { %v4864_v54 = vadd.f32 %v4673_v62, %v4444_v55  ;;  %v4865_v17 = vadd.f32 %v4672_v7, %v4445_v35  ;;  %1218 = vst [vmem:[#allocation2 + $0x2b8] sm:$0x1] %v1217_v18  ;;  %v1407_v16 = vunpack.c.l.bf16 %v1311_v0  ;;  %v5475_v38 = vadd.f32 %v5277_v10, %v4863_v14 }
 0x44e   :  { %v5279_v19 = vsel %vm2290_vm7, %v5277_v10, %v5278_v40  ;;  %v1508_v58 = vmul.f32 %v9764_v48, %v7757_v34  ;;  %v1509_v53 = vmul.f32 %v9769_v2, %v7757_v34  ;;  %v5281_v46 = vsel %vm2290_vm7, %v5278_v40, %v5280_v50 }
 0x44f   :  { %v5476_v43 = vadd.f32 %v5279_v19, %v4864_v54  ;;  %v1507_v41 = vmul.f32 %v7757_v34, %v1407_v16  ;;  %v1673_v35 = vmul.f32 %v9764_v48, %v7745_v24  ;;  %v5477_v49 = vadd.f32 %v5281_v46, %v4865_v17  ;;  %v2733_v17 = vld [vmem:[#allocation2 + $0x298] sm:$0x8] }
 0x450   :  { %v5578_v0 = vadd.f32 %v9579_v20, %v5475_v38  ;;  %v1674_v6 = vmul.f32 %v9769_v2, %v7745_v24  ;;  %v2092_v37 = vunpack.c.l.bf16 %v2060_v13  ;;  %v2188_v36 = vmul.f32 %v9764_v48, %v7754_v33  ;;  %v2734_v48 = vld [vmem:[#allocation2 + $0x29c] sm:$0xff]  }
 0x451   :  { %v5579_v55 = vadd.f32 %v9579_v20, %v5476_v43  ;;  %v1832_v7 = vrot.slane %v1673_v35, 1  ;;  %v2189_v32 = vmul.f32 %v9769_v2, %v7754_v33  ;;  %v5580_v14 = vadd.f32 %v9579_v20, %v5477_v49 }
 0x452   :  { %v5674_v22 = vmax.f32 %v5578_v0, 0.0  ;;  %v1833_v26 = vrot.slane %v1674_v6, 1  ;;  %v2190_v62 = vmul.f32 %v7754_v33, %v2092_v37  ;;  %v2441_v18 = vrot.slane %v2188_v36, 2  ;;  %v3481_v6 = vld [vmem:[#allocation2 + $0x2a4] sm:$0x1] }
 0x453   :  { %v5675_v10 = vmax.f32 %v5579_v55, 0.0  ;;  %v2024_v40 = vadd.f32 %v1832_v7, %v1507_v41  ;;  %v2442_v54 = vrot.slane %v2189_v32, 2  ;;  %v5676_v50 = vmax.f32 %v5580_v14, 0.0 }
 0x454   :  { %v5770_v16 = vmin.f32 %v5674_v22, 6.0  ;;  %v1834_v13 = vsel %vm1741_vm6, %v1832_v7, %v1833_v26  ;;  %v2026_v19 = vadd.f32 %v1833_v26, %v1509_v53  ;;  %v2444_v20 = vrot.slane %v2190_v62, 2 }
 0x455   :  { %v5771_v38 = vmin.f32 %v5675_v10, 6.0  ;;  %v2025_v46 = vadd.f32 %v1834_v13, %v1508_v58  ;;  %v2443_v2 = vsel %vm2290_vm7, %v2441_v18, %v2442_v54  ;;  %v5772_v43 = vmin.f32 %v5676_v50, 6.0 }
 0x456   :  { %v6021_v35 = vrot.slane %v5770_v16, 7  ;;  %v2637_v49 = vadd.f32 %v2441_v18, %v2024_v40  ;;  %v2829_v0 = vunpack.c.l.bf16 %v2733_v17  ;;  %v2445_v37 = vsel %vm2290_vm7, %v2442_v54, %v2444_v20  ;;  %v7122_v17 = vld [vmem:[#allocation2 + $0x2b0] sm:$0xff]   ;;  %v4154_v20 = vld [vmem:[#allocation2 + $0x2ac] sm:$0x8] }
 0x457   :  { %v6022_v41 = vrot.slane %v5771_v38, 7  ;;  %v2638_v55 = vadd.f32 %v2443_v2, %v2025_v46  ;;  %v2830_v36 = vunpack.c.l.bf16 %v2734_v48  ;;  %v6024_v32 = vrot.slane %v5772_v43, 7 }
 0x458   :  { %v2639_v14 = vadd.f32 %v2445_v37, %v2026_v19  ;;  %v2831_v7 = vunpack.c.h.bf16 %v2734_v48  ;;  %v2929_v53 = vmul.f32 %v7772_v60, %v2829_v0  ;;  %v3513_v62 = vunpack.c.l.bf16 %v3481_v6 }
 0x459   :  { %v6023_v58 = vsel %vm996_vm0, %v6021_v35, %v6022_v41  ;;  %v2930_v22 = vmul.f32 %v7772_v60, %v2830_v36  ;;  %v3095_v26 = vmul.f32 %v7786_v12, %v2830_v36  ;;  %v6025_v10 = vsel %vm996_vm0, %v6022_v41, %v6024_v32 }
 0x45a   :  { %v2931_v40 = vmul.f32 %v7772_v60, %v2831_v7  ;;  %v3025_v18 = vadd.f32 %v2929_v53, %v2637_v49  ;;  %v3096_v54 = vmul.f32 %v7786_v12, %v2831_v7  ;;  %v6129_v50 = vpack.c.bf16 %v6025_v10, %v6023_v58  ;;  %v4902_v53 = vld [vmem:[#allocation2 + $0x2b8] sm:$0x1] }
 0x45b   :  { %v3026_v16 = vadd.f32 %v2930_v22, %v2638_v55  ;;  %v3253_v13 = vrot.slane %v3095_v26, 1  ;;  %v3609_v19 = vmul.f32 %v7778_v3, %v2830_v36  ;;  %v3610_v46 = vmul.f32 %v7778_v3, %v2831_v7 }
 0x45c   :  { %v3027_v48 = vadd.f32 %v2931_v40, %v2639_v14  ;;  %v3254_v38 = vrot.slane %v3096_v54, 1  ;;  %v3611_v2 = vmul.f32 %v7778_v3, %v3513_v62  ;;  %7356 = vmatmul.mubr.bf16.gmra.mrb[56].mxu1 %v6129_v50  ;;  %v9898_v0 = vunpack.c.l.bf16 %v7122_v17 }
 0x45d   :  { %v3445_v43 = vadd.f32 %v3253_v13, %v3025_v18  ;;  %v3861_v35 = vrot.slane %v3609_v19, 2  ;;  %v9900_v49 = vunpack.c.h.bf16 %v7122_v17  ;;  %v3862_v37 = vrot.slane %v3610_v46, 2  ;;  %v1019_v17 = vld [vmem:[#allocation2 + $0x2c0] sm:$0x8] }
 0x45e   :  { %v3255_v6 = vsel %vm1741_vm6, %v3253_v13, %v3254_v38  ;;  %v3447_v41 = vadd.f32 %v3254_v38, %v3027_v48  ;;  %v3864_v55 = vrot.slane %v3611_v2, 2  ;;  %v4250_v14 = vunpack.c.l.bf16 %v4154_v20  ;;  %v1024_v48 = vld [vmem:[#allocation2 + $0x2cc] sm:$0x1] }
 0x45f   :  { %v3446_v36 = vadd.f32 %v3255_v6, %v3026_v16  ;;  %v4057_v32 = vadd.f32 %v3861_v35, %v3445_v43  ;;  %v4351_v7 = vmul.f32 %v9898_v0, %v7795_v21  ;;  %v3863_v58 = vsel %vm2290_vm7, %v3861_v35, %v3862_v37  ;;  %v1314_v43 = vld [vmem:[#allocation2 + $0x298] sm:$0x8] }
 0x460   :  { %v3865_v22 = vsel %vm2290_vm7, %v3862_v37, %v3864_v55  ;;  %v4352_v26 = vmul.f32 %v9900_v49, %v7795_v21  ;;  %v4516_v62 = vmul.f32 %v9898_v0, %v7798_v23  ;;  %v4350_v18 = vmul.f32 %v7795_v21, %v4250_v14  ;;  %v1315_v55 = vld [vmem:[#allocation2 + $0x29c] sm:$0xff]  }
 0x461   :  { %v4058_v10 = vadd.f32 %v3863_v58, %v3446_v36  ;;  %v4059_v40 = vadd.f32 %v3865_v22, %v3447_v41  ;;  %v4517_v54 = vmul.f32 %v9900_v49, %v7798_v23  ;;  %v4934_v16 = vunpack.c.l.bf16 %v4902_v53  ;;  %v2061_v36 = vld [vmem:[#allocation2 + $0x2a4] sm:$0x1] }
 0x462   :  { %v4674_v50 = vrot.slane %v4516_v62, 1  ;;  %v5030_v13 = vmul.f32 %v9792_v27, %v9898_v0  ;;  %v5031_v19 = vmul.f32 %v9792_v27, %v9900_v49  ;;  %v4446_v38 = vadd.f32 %v4350_v18, %v4057_v32 }
 0x463   :  { %v4447_v46 = vadd.f32 %v4351_v7, %v4058_v10  ;;  %v4448_v2 = vadd.f32 %v4352_v26, %v4059_v40  ;;  %v4675_v20 = vrot.slane %v4517_v54, 1  ;;  %v5032_v35 = vmul.f32 %v9792_v27, %v4934_v16  ;;  %v2736_v7 = vld [vmem:[#allocation2 + $0x2ac] sm:$0x8] }
 0x464   :  { %v5282_v6 = vrot.slane %v5030_v13, 2  ;;  %v5283_v41 = vrot.slane %v5031_v19, 2  ;;  %v1020_v37 = vsel %vm7711_vm5, 0, %v1019_v17  ;;  %v4866_v53 = vadd.f32 %v4674_v50, %v4446_v38 }
 0x465   :  { %v4676_v14 = vsel %vm1741_vm6, %v4674_v50, %v4675_v20  ;;  %v4868_v58 = vadd.f32 %v4675_v20, %v4448_v2  ;;  %1021 = vst [vmem:[#allocation2 + $0x2c0] sm:$0x8] %v1020_v37  ;;  %v1025_v32 = vsel %vm7705_vm2, 0, %v1024_v48  ;;  %v5285_v62 = vrot.slane %v5032_v35, 2 }
 0x466   :  { %v4867_v22 = vadd.f32 %v4676_v14, %v4447_v46  ;;  %v5284_v26 = vsel %vm2290_vm7, %v5282_v6, %v5283_v41  ;;  %1026 = vst [vmem:[#allocation2 + $0x2cc] sm:$0x1] %v1025_v32  ;;  %v1410_v10 = vunpack.c.l.bf16 %v1314_v43  ;;  %v5478_v40 = vadd.f32 %v5282_v6, %v4866_v53 }
 0x467   :  { %v1411_v59 = vunpack.c.l.bf16 %v1315_v55  ;;  %v1412_v18 = vunpack.c.h.bf16 %v1315_v55  ;;  %v2093_v54 = vunpack.c.l.bf16 %v2061_v36  ;;  %v5286_v17 = vsel %vm2290_vm7, %v5283_v41, %v5285_v62 }
 0x468   :  { %v5479_v16 = vadd.f32 %v5284_v26, %v4867_v22  ;;  %v1510_v50 = vmul.f32 %v7757_v34, %v1410_v10  ;;  %v2832_v13 = vunpack.c.l.bf16 %v2736_v7  ;;  %v5480_v19 = vadd.f32 %v5286_v17, %v4868_v58 }
 0x469   :  { %v5581_v48 = vadd.f32 %v9930_v1, %v5478_v40  ;;  %v1511_v38 = vmul.f32 %v7757_v34, %v1411_v59  ;;  %v1512_v46 = vmul.f32 %v7757_v34, %v1412_v18  ;;  %v1675_v20 = vmul.f32 %v7745_v24, %v1411_v59  ;;  %v9939_v6 = vpop.f32.mrb[40].mxu1 }
 0x46a   :  { %v5582_v2 = vadd.f32 %v9930_v1, %v5479_v16  ;;  %v1676_v43 = vmul.f32 %v7745_v24, %v1412_v18  ;;  %v2191_v35 = vmul.f32 %v7754_v33, %v1411_v59  ;;  %v5583_v41 = vadd.f32 %v9930_v1, %v5480_v19  ;;  %v9944_v14 = vpop.f32.mrb[41].mxu1 }
 0x46b   :  { %v5677_v37 = vmax.f32 %v5581_v48, 0.0  ;;  %v2192_v55 = vmul.f32 %v7754_v33, %v1412_v18  ;;  %v2193_v36 = vmul.f32 %v7754_v33, %v2093_v54  ;;  %v1835_v53 = vrot.slane %v1675_v20, 1  ;;  %v9947_v17 = vpop.f32.mrb[42].mxu1 }
 0x46c   :  { %v5678_v34 = vmax.f32 %v5582_v2, 0.0  ;;  %v1836_v58 = vrot.slane %v1676_v43, 1  ;;  %v2446_v32 = vrot.slane %v2191_v35, 2  ;;  %v5679_v7 = vmax.f32 %v5583_v41, 0.0  ;;  %v9950_v19 = vpop.f32.mrb[43].mxu1 }
 0x46d   :  { %v5773_v22 = vmin.f32 %v5677_v37, 6.0  ;;  %v2447_v24 = vrot.slane %v2192_v55, 2  ;;  %v2449_v26 = vrot.slane %v2193_v36, 2  ;;  %v2027_v40 = vadd.f32 %v1835_v53, %v1510_v50  ;;  %v3482_v35 = vld [vmem:[#allocation2 + $0x2b8] sm:$0x1] }
 0x46e   :  { %v5774_v62 = vmin.f32 %v5678_v34, 6.0  ;;  %v1837_v10 = vsel %vm1741_vm6, %v1835_v53, %v1836_v58  ;;  %v2029_v59 = vadd.f32 %v1836_v58, %v1512_v46  ;;  %v5775_v18 = vmin.f32 %v5679_v7, 6.0  ;;  %v4157_v53 = vld [vmem:[#allocation2 + $0x2c0] sm:$0x8] }
 0x46f   :  { %v6026_v16 = vrot.slane %v5773_v22, 7  ;;  %v2028_v33 = vadd.f32 %v1837_v10, %v1511_v38  ;;  %v2448_v54 = vsel %vm2290_vm7, %v2446_v32, %v2447_v24  ;;  %v2450_v2 = vsel %vm2290_vm7, %v2447_v24, %v2449_v26  ;;  %v4158_v22 = vld [vmem:[#allocation2 + $0x2c4] sm:$0xff]  }
 0x470   :  { %v6027_v48 = vrot.slane %v5774_v62, 7  ;;  %v2640_v20 = vadd.f32 %v2446_v32, %v2027_v40  ;;  %v2932_v43 = vmul.f32 %v7772_v60, %v2832_v13  ;;  %v6029_v41 = vrot.slane %v5775_v18, 7 }
 0x471   :  { %v2641_v37 = vadd.f32 %v2448_v54, %v2028_v33  ;;  %v2642_v50 = vadd.f32 %v2450_v2, %v2029_v59  ;;  %v2933_v46 = vmul.f32 %v9898_v0, %v7772_v60  ;;  %v2934_v38 = vmul.f32 %v9900_v49, %v7772_v60 }
 0x472   :  { %v6028_v55 = vsel %vm996_vm0, %v6026_v16, %v6027_v48  ;;  %v3028_v36 = vadd.f32 %v2932_v43, %v2640_v20  ;;  %v3097_v34 = vmul.f32 %v9898_v0, %v7786_v12  ;;  %v6030_v58 = vsel %vm996_vm0, %v6027_v48, %v6029_v41 }
 0x473   :  { %v3029_v13 = vadd.f32 %v2933_v46, %v2641_v37  ;;  %v3098_v32 = vmul.f32 %v9900_v49, %v7786_v12  ;;  %v3514_v7 = vunpack.c.l.bf16 %v3482_v35  ;;  %v6130_v24 = vpack.c.bf16 %v6030_v58, %v6028_v55 }
 0x474   :  { %v3030_v26 = vadd.f32 %v2934_v38, %v2642_v50  ;;  %v3256_v62 = vrot.slane %v3097_v34, 1  ;;  %v3612_v10 = vmul.f32 %v9898_v0, %v7778_v3  ;;  %v3613_v40 = vmul.f32 %v9900_v49, %v7778_v3  ;;  %v4903_v49 = vld [vmem:[#allocation2 + $0x2cc] sm:$0x1]  ;;  %v9979_v38 = vld [vmem:[%s10122_s6] ss:$0 sm:$0xff]  ;;  %s7596_s6 = smov [#allocation11]  }
 0x475   :  { %v3257_v60 = vrot.slane %v3098_v32, 1  ;;  %v3614_v59 = vmul.f32 %v7778_v3, %v3514_v7  ;;  %v4253_v18 = vunpack.c.l.bf16 %v4157_v53  ;;  %7359 = vmatprep.mubr.bf16.mxu1 %v6130_v24  ;;  %v4254_v54 = vunpack.c.l.bf16 %v4158_v22  ;;  %s6625_s29 = sshll.u32 %s7596_s6, 4  ;;  %s6626_s29 = int_to_ptr.vmem [resolvable:$true] %s6625_s29 }
 0x476   :  { %v3448_v16 = vadd.f32 %v3256_v62, %v3028_v36  ;;  %v3866_v33 = vrot.slane %v3612_v10, 2  ;;  %v4255_v12 = vunpack.c.h.bf16 %v4158_v22  ;;  %v3867_v20 = vrot.slane %v3613_v40, 2  ;;  %s7557_s5 = scalar_lea.vmem %s6626_s29, 8192  ;;  %p7562_p5 = scmp.lt.s32.totalorder %s6626_s29, %s6626_s29 }
 0x477   :  { %v3258_v48 = vsel %vm1741_vm6, %v3256_v62, %v3257_v60  ;;  %v3450_v2 = vadd.f32 %v3257_v60, %v3030_v26  ;;  %v3869_v43 = vrot.slane %v3614_v59, 2  ;;  %v4353_v0 = vmul.f32 %v7795_v21, %v4253_v18  ;;  %p7558_p4 = scmp.ne.s32.totalorder %s6626_s29, %s7557_s5  ;;  %p7563_p6 = scmp.lt.s32.totalorder %s7557_s5, %s7557_s5 }
 0x478   :  { %v3449_v35 = vadd.f32 %v3258_v48, %v3029_v13  ;;  %v4060_v41 = vadd.f32 %v3866_v33, %v3448_v16  ;;  %v4354_v37 = vmul.f32 %v7795_v21, %v4254_v54  ;;  %v3868_v3 = vsel %vm2290_vm7, %v3866_v33, %v3867_v20  ;;  %v7405_v16 = vld [vmem:[#allocation3 + $0x10] sm:$0xff] }
 0x479   :  { %v3870_v50 = vsel %vm2290_vm7, %v3867_v20, %v3869_v43  ;;  %v4355_v46 = vmul.f32 %v7795_v21, %v4255_v12  ;;  %v4518_v55 = vmul.f32 %v7798_v23, %v4254_v54  ;;  %v4519_v58 = vmul.f32 %v7798_v23, %v4255_v12  ;;  %p7564_p7 = por %p7563_p6, %p7562_p5 }
 0x47a   :  { %v4061_v36 = vadd.f32 %v3868_v3, %v3449_v35  ;;  %v4062_v34 = vadd.f32 %v3870_v50, %v3450_v2  ;;  %v4449_v53 = vadd.f32 %v4353_v0, %v4060_v41  ;;  %v4935_v32 = vunpack.c.l.bf16 %v4903_v49  ;;  %v7407_v50 = vld [vmem:[#allocation3 + $0x18] sm:$0xff] }
 0x47b   :  { %v4677_v13 = vrot.slane %v4518_v55, 1  ;;  %v5033_v7 = vmul.f32 %v9792_v27, %v4254_v54  ;;  %v5034_v22 = vmul.f32 %v9792_v27, %v4255_v12  ;;  %v4678_v26 = vrot.slane %v4519_v58, 1  ;;  %v7408_v55 = vld [vmem:[#allocation3 + $0x8] sm:$0xff]  ;;  %p7565_p8 = pnand %p7564_p7, %p7558_p4 }
 0x47c   :  { %v4450_v24 = vadd.f32 %v4354_v37, %v4061_v36  ;;  %v4451_v21 = vadd.f32 %v4355_v46, %v4062_v34  ;;  %v6246_v62 = vadd.f32 %v9654_v11, %v9979_v38  ;;  %v5035_v60 = vmul.f32 %v9792_v27, %v4935_v32  ;;  %v7406_v11 = vld [vmem:[#allocation3] sm:$0xff]  ;;  %v7409_v36 = vld [vmem:[#allocation3 + $0x30] sm:$0xff] }
 0x47d   :  { %v4869_v10 = vadd.f32 %v4677_v13, %v4449_v53  ;;  %v5287_v40 = vrot.slane %v5033_v7, 2  ;;  %v5288_v59 = vrot.slane %v5034_v22, 2  ;;  %v4679_v18 = vsel %vm1741_vm6, %v4677_v13, %v4678_v26 }
 0x47e   :  { %v4871_v23 = vadd.f32 %v4678_v26, %v4451_v21  ;;  %v6494_v33 = vadd.f32 %v7405_v16, %v6246_v62  ;;  %v6238_v54 = vadd.f32 %v9979_v38, %v9659_v45  ;;  %v4870_v12 = vadd.f32 %v4679_v18, %v4450_v24  ;;  %v7411_v26 = vld [vmem:[#allocation3 + $0x38] sm:$0xff] }
 0x47f   :  { %v5289_v48 = vsel %vm2290_vm7, %v5287_v40, %v5288_v59  ;;  %v5290_v2 = vrot.slane %v5035_v60, 2  ;;  %v5481_v20 = vadd.f32 %v5287_v40, %v4869_v10  ;;  %v6249_v27 = vadd.f32 %v9663_v5, %v9979_v38  ;;  %v7412_v10 = vld [vmem:[#allocation3 + $0x28] sm:$0xff]  ;;  %v7413_v40 = vld [vmem:[#allocation3 + $0x50] sm:$0xff]  ;;  %v7415_v16 = vld [vmem:[#allocation3 + $0x58] sm:$0xff] }
 0x480   :  { %6558 = vst [vmem:[#allocation11 + $0x10] sm:$0xff] %v6494_v33  ;;  %v6492_v43 = vadd.f32 %v7406_v11, %v6238_v54  ;;  %v6241_v35 = vadd.f32 %v9979_v38, %v9668_v8  ;;  %v6262_v41 = vadd.f32 %v9670_v57, %v9979_v38  ;;  %v5482_v45 = vadd.f32 %v5289_v48, %v4870_v12  ;;  %v7410_v57 = vld [vmem:[#allocation3 + $0x20] sm:$0xff] }
 0x481   :  { %v5291_v0 = vsel %vm2290_vm7, %v5288_v59, %v5290_v2  ;;  %v5584_v37 = vadd.f32 %v9930_v1, %v5481_v20  ;;  %v6254_v49 = vadd.f32 %v9979_v38, %v9673_v25  ;;  %v6495_v46 = vadd.f32 %v7407_v50, %v6249_v27  ;;  %v7416_v20 = vld [vmem:[#allocation3 + $0x48] sm:$0xff] }
 0x482   :  { %v5483_v3 = vadd.f32 %v5291_v0, %v4871_v23  ;;  %6556 = vst [vmem:[#allocation11] sm:$0xff] %v6492_v43  ;;  %v6493_v5 = vadd.f32 %v7408_v55, %v6241_v35  ;;  %v6498_v34 = vadd.f32 %v7409_v36, %v6262_v41  ;;  %v5585_v8 = vadd.f32 %v9930_v1, %v5482_v45  ;;  %v7417_v35 = vld [vmem:[#allocation3 + $0x70] sm:$0xff]  ;;  %v7419_v45 = vld [vmem:[#allocation3 + $0x78] sm:$0xff] }
 0x483   :  { %v5680_v53 = vmax.f32 %v5584_v37, 0.0  ;;  %v6496_v58 = vadd.f32 %v7410_v57, %v6254_v49  ;;  %v6265_v13 = vadd.f32 %v9677_v30, %v9979_v38  ;;  %6559 = vst [vmem:[#allocation11 + $0x18] sm:$0xff] %v6495_v46  ;;  %v6257_v25 = vadd.f32 %v9979_v38, %v9683_v63  ;;  %v7414_v63 = vld [vmem:[#allocation3 + $0x40] sm:$0xff] }
 0x484   :  { %v5586_v32 = vadd.f32 %v9930_v1, %v5483_v3  ;;  %6557 = vst [vmem:[#allocation11 + $0x8] sm:$0xff] %v6493_v5  ;;  %6562 = vst [vmem:[#allocation11 + $0x30] sm:$0xff] %v6498_v34  ;;  %v6278_v7 = vadd.f32 %v9686_v42, %v9979_v38  ;;  %v6270_v22 = vadd.f32 %v9979_v38, %v9690_v61  ;;  %v5681_v24 = vmax.f32 %v5585_v8, 0.0  ;;  %v7421_v3 = vld [vmem:[#allocation3 + $0x90] sm:$0xff]  ;;  %v7422_v34 = vld [vmem:[#allocation3 + $0x80] sm:$0xff] }
 0x485   :  { %v5776_v21 = vmin.f32 %v5680_v53, 6.0  ;;  %6560 = vst [vmem:[#allocation11 + $0x20] sm:$0xff] %v6496_v58  ;;  %v6499_v62 = vadd.f32 %v7411_v26, %v6265_v13  ;;  %v6281_v30 = vadd.f32 %v9694_v31, %v9979_v38  ;;  %v6497_v60 = vadd.f32 %v7412_v10, %v6257_v25  ;;  %v10213_v53 = vld [vmem:[#allocation18_spill] sm:$0xff]  ;;  %v7423_v58 = vld [vmem:[#allocation3 + $0x98] sm:$0xff]  ;;  %v7425_v25 = vld [vmem:[#allocation3 + $0xb0] sm:$0xff] }
 0x486   :  { %v5682_v1 = vmax.f32 %v5586_v32, 0.0  ;;  %v6502_v59 = vadd.f32 %v7413_v40, %v6278_v7  ;;  %v6500_v18 = vadd.f32 %v7414_v63, %v6270_v22  ;;  %v5777_v23 = vmin.f32 %v5681_v24, 6.0  ;;  %v10214_v7 = vld [vmem:[#allocation21_spill] sm:$0xff]  ;;  %v7426_v22 = vld [vmem:[#allocation3 + $0xa0] sm:$0xff]  ;;  %v7428_v10 = vld [vmem:[#allocation3 + $0xa8] sm:$0xff] }
 0x487   :  { %v6031_v42 = vrot.slane %v5776_v21, 7  ;;  %6563 = vst [vmem:[#allocation11 + $0x38] sm:$0xff] %v6499_v62  ;;  %v6503_v61 = vadd.f32 %v7415_v16, %v6281_v30  ;;  %v6273_v33 = vadd.f32 %v9979_v38, %v9697_v47  ;;  %6561 = vst [vmem:[#allocation11 + $0x28] sm:$0xff] %v6497_v60  ;;  %v6294_v31 = vadd.f32 %v9702_v15, %v9979_v38  ;;  %v7418_v15 = vld [vmem:[#allocation3 + $0x60] sm:$0xff]  ;;  %v7427_v21 = vld [vmem:[#allocation3 + $0xb8] sm:$0xff] }
 0x488   :  { %v5778_v54 = vmin.f32 %v5682_v1, 6.0  ;;  %6566 = vst [vmem:[#allocation11 + $0x50] sm:$0xff] %v6502_v59  ;;  %6564 = vst [vmem:[#allocation11 + $0x40] sm:$0xff] %v6500_v18  ;;  %v6286_v12 = vadd.f32 %v9979_v38, %v9705_v44  ;;  %v6297_v48 = vadd.f32 %v9714_v51, %v9979_v38  ;;  %v6032_v2 = vrot.slane %v5777_v23, 7  ;;  %v7420_v51 = vld [vmem:[#allocation3 + $0x68] sm:$0xff]  ;;  %v10217_v40 = vld [vmem:[#allocation20_spill] sm:$0xff] }
 0x489   :  { %6567 = vst [vmem:[#allocation11 + $0x58] sm:$0xff] %v6503_v61  ;;  %v6501_v11 = vadd.f32 %v7416_v20, %v6273_v33  ;;  %v6289_v47 = vadd.f32 %v9979_v38, %v9720_v52  ;;  %v6310_v43 = vadd.f32 %v9724_v28, %v9979_v38  ;;  %v6506_v41 = vadd.f32 %v7417_v35, %v6294_v31  ;;  %v10216_v30 = vld [vmem:[#allocation23_spill] sm:$0xff]  ;;  %v10218_v63 = vld [vmem:[#allocation26_spill] sm:$0xff]  ;;  %v7429_v16 = vld [vmem:[#allocation3 + $0xd0] sm:$0xff] }
 0x48a   :  { %v6034_v27 = vrot.slane %v5778_v54, 7  ;;  %v6504_v0 = vadd.f32 %v7418_v15, %v6286_v12  ;;  %v6507_v44 = vadd.f32 %v7419_v45, %v6297_v48  ;;  %v6033_v37 = vsel %vm996_vm0, %v6031_v42, %v6032_v2  ;;  %v10219_v23 = vld [vmem:[#allocation22_spill] sm:$0xff]  ;;  %v10220_v31 = vld [vmem:[#allocation25_spill] sm:$0xff]  ;;  %v10221_v48 = vld [vmem:[#allocation24_spill] sm:$0xff] }
 0x48b   :  { %6565 = vst [vmem:[#allocation11 + $0x48] sm:$0xff] %v6501_v11  ;;  %v6505_v49 = vadd.f32 %v7420_v51, %v6289_v47  ;;  %v6510_v50 = vadd.f32 %v7421_v3, %v6310_v43  ;;  %v6302_v52 = vadd.f32 %v9979_v38, %v9729_v4  ;;  %6570 = vst [vmem:[#allocation11 + $0x70] sm:$0xff] %v6506_v41  ;;  %v7430_v33 = vld [vmem:[#allocation3 + $0xc0] sm:$0xff]  ;;  %v7431_v20 = vld [vmem:[#allocation3 + $0xd8] sm:$0xff] }
 0x48c   :  { %v6035_v46 = vsel %vm996_vm0, %v6032_v2, %v6034_v27  ;;  %6568 = vst [vmem:[#allocation11 + $0x60] sm:$0xff] %v6504_v0  ;;  %6571 = vst [vmem:[#allocation11 + $0x78] sm:$0xff] %v6507_v44  ;;  %v6313_v28 = vadd.f32 %v9733_v39, %v9979_v38  ;;  %v6305_v55 = vadd.f32 %v9979_v38, %v9736_v56  ;;  %v7424_v39 = vld [vmem:[#allocation3 + $0x88] sm:$0xff]  ;;  %v7433_v27 = vld [vmem:[#allocation3 + $0xf0] sm:$0xff] }
 0x48d   :  { %v6326_v5 = vadd.f32 %v9738_v29, %v9979_v38  ;;  %v6131_v36 = vpack.c.bf16 %v6035_v46, %v6033_v37  ;;  %6569 = vst [vmem:[#allocation11 + $0x68] sm:$0xff] %v6505_v49  ;;  %6574 = vst [vmem:[#allocation11 + $0x90] sm:$0xff] %v6510_v50  ;;  %v6508_v8 = vadd.f32 %v7422_v34, %v6302_v52  ;;  %v7432_v47 = vld [vmem:[#allocation3 + $0xc8] sm:$0xff]  ;;  %v10222_v41 = vld [vmem:[#allocation29_spill] sm:$0xff] }
 0x48e   :  { %v6318_v4 = vadd.f32 %v9979_v38, %v9742_v9  ;;  %v6329_v57 = vadd.f32 %v10213_v53, %v9979_v38  ;;  %v6511_v13 = vadd.f32 %v7423_v58, %v6313_v28  ;;  %v6509_v32 = vadd.f32 %v7424_v39, %v6305_v55  ;;  %v10215_v9 = vld [vmem:[#allocation19_spill] sm:$0xff]  ;;  %v7434_v0 = vld [vmem:[#allocation3 + $0xe0] sm:$0xff]  ;;  %v7435_v44 = vld [vmem:[#allocation3 + $0xf8] sm:$0xff] }
 0x48f   :  { %v6514_v56 = vadd.f32 %v7425_v25, %v6326_v5  ;;  %v6321_v29 = vadd.f32 %v9979_v38, %v10214_v7  ;;  %7360 = vmatmul.mubr.bf16.gmra.mrb[60].mxu1 %v6131_v36  ;;  %6572 = vst [vmem:[#allocation11 + $0x80] sm:$0xff] %v6508_v8  ;;  %v6342_v62 = vadd.f32 %v10215_v9, %v9979_v38  ;;  %v10223_v51 = vld [vmem:[#allocation27_spill] sm:$0xff]  ;;  %v10225_v28 = vld [vmem:[#allocation28_spill] sm:$0xff]  ;;  %v10227_v34 = vld [vmem:[#allocation30_spill] sm:$0xff] }
 0x490   :  { %v6512_v24 = vadd.f32 %v7426_v22, %v6318_v4  ;;  %v6515_v26 = vadd.f32 %v7427_v21, %v6329_v57  ;;  %v6334_v1 = vadd.f32 %v9979_v38, %v10216_v30  ;;  %6575 = vst [vmem:[#allocation11 + $0x98] sm:$0xff] %v6511_v13  ;;  %6573 = vst [vmem:[#allocation11 + $0x88] sm:$0xff] %v6509_v32  ;;  %v10224_v3 = vld [vmem:[#allocation31_spill] sm:$0xff]  ;;  %v10226_v5 = vld [vmem:[#allocation32_spill] sm:$0xff] }
 0x491   :  { %6578 = vst [vmem:[#allocation11 + $0xb0] sm:$0xff] %v6514_v56  ;;  %v6513_v60 = vadd.f32 %v7428_v10, %v6321_v29  ;;  %v6345_v59 = vadd.f32 %v10217_v40, %v9979_v38  ;;  %v6337_v18 = vadd.f32 %v9979_v38, %v10218_v63  ;;  %v6358_v42 = vadd.f32 %v10219_v23, %v9979_v38  ;;  %v7436_v52 = vld [vmem:[#allocation3 + $0xe8] sm:$0xff]  ;;  %v7437_v4 = vld [vmem:[#allocation3 + $0x110] sm:$0xff]  ;;  %v7438_v57 = vld [vmem:[#allocation3 + $0x100] sm:$0xff] }
 0x492   :  { %6576 = vst [vmem:[#allocation11 + $0xa0] sm:$0xff] %v6512_v24  ;;  %6579 = vst [vmem:[#allocation11 + $0xb8] sm:$0xff] %v6515_v26  ;;  %v6518_v61 = vadd.f32 %v7429_v16, %v6342_v62  ;;  %v6516_v54 = vadd.f32 %v7430_v33, %v6334_v1  ;;  %v6350_v12 = vadd.f32 %v9979_v38, %v10220_v31  ;;  %v10228_v13 = vld [vmem:[#allocation17_spill] sm:$0xff]  ;;  %v10229_v32 = vld [vmem:[#allocation16_spill] sm:$0xff] }
 0x493   :  { %v6361_v2 = vadd.f32 %v10221_v48, %v9979_v38  ;;  %6577 = vst [vmem:[#allocation11 + $0xa8] sm:$0xff] %v6513_v60  ;;  %v6519_v11 = vadd.f32 %v7431_v20, %v6345_v59  ;;  %v6517_v43 = vadd.f32 %v7432_v47, %v6337_v18  ;;  %v6522_v35 = vadd.f32 %v7433_v27, %v6358_v42  ;;  %v7439_v56 = vld [vmem:[#allocation3 + $0x118] sm:$0xff]  ;;  %v7440_v29 = vld [vmem:[#allocation3 + $0x108] sm:$0xff]  ;;  %v7441_v24 = vld [vmem:[#allocation3 + $0x130] sm:$0xff] }
 0x494   :  { %v6353_v15 = vadd.f32 %v9979_v38, %v10222_v41  ;;  %6582 = vst [vmem:[#allocation11 + $0xd0] sm:$0xff] %v6518_v61  ;;  %6580 = vst [vmem:[#allocation11 + $0xc0] sm:$0xff] %v6516_v54  ;;  %v6520_v45 = vadd.f32 %v7434_v0, %v6350_v12  ;;  %v6374_v49 = vadd.f32 %v10223_v51, %v9979_v38  ;;  %v10230_v26 = vld [vmem:[#allocation33_spill] sm:$0xff]  ;;  %v7442_v62 = vld [vmem:[#allocation3 + $0x120] sm:$0xff] }
 0x495   :  { %v6523_v37 = vadd.f32 %v7435_v44, %v6361_v2  ;;  %v6366_v50 = vadd.f32 %v9979_v38, %v10224_v3  ;;  %6583 = vst [vmem:[#allocation11 + $0xd8] sm:$0xff] %v6519_v11  ;;  %6581 = vst [vmem:[#allocation11 + $0xc8] sm:$0xff] %v6517_v43  ;;  %v6377_v55 = vadd.f32 %v10225_v28, %v9979_v38  ;;  %v7443_v1 = vld [vmem:[#allocation3 + $0x138] sm:$0xff]  ;;  %v7444_v59 = vld [vmem:[#allocation3 + $0x128] sm:$0xff] }
 0x496   :  { %6586 = vst [vmem:[#allocation11 + $0xf0] sm:$0xff] %v6522_v35  ;;  %v6521_v46 = vadd.f32 %v7436_v52, %v6353_v15  ;;  %v6369_v36 = vadd.f32 %v9979_v38, %v10226_v5  ;;  %v6390_v8 = vadd.f32 %v10227_v34, %v9979_v38  ;;  %6584 = vst [vmem:[#allocation11 + $0xe0] sm:$0xff] %v6520_v45  ;;  %v7445_v42 = vld [vmem:[#allocation3 + $0x150] sm:$0xff]  ;;  %v7446_v61 = vld [vmem:[#allocation3 + $0x140] sm:$0xff] }
 0x497   :  { %6587 = vst [vmem:[#allocation11 + $0xf8] sm:$0xff] %v6523_v37  ;;  %v6526_v53 = vadd.f32 %v7437_v4, %v6374_v49  ;;  %v6524_v58 = vadd.f32 %v7438_v57, %v6366_v50  ;;  %v6382_v39 = vadd.f32 %v9979_v38, %v10228_v13  ;;  %v6393_v25 = vadd.f32 %v10229_v32, %v9979_v38  ;;  %v7447_v33 = vld [vmem:[#allocation3 + $0x158] sm:$0xff]  ;;  %v7448_v54 = vld [vmem:[#allocation3 + $0x148] sm:$0xff]  ;;  %v7449_v20 = vld [vmem:[#allocation3 + $0x170] sm:$0xff] }
 0x498   :  { %6585 = vst [vmem:[#allocation11 + $0xe8] sm:$0xff] %v6521_v46  ;;  %v6527_v7 = vadd.f32 %v7439_v56, %v6377_v55  ;;  %v6525_v22 = vadd.f32 %v7440_v29, %v6369_v36  ;;  %v6530_v21 = vadd.f32 %v7441_v24, %v6390_v8  ;;  %v6385_v9 = vadd.f32 %v9979_v38, %v10230_v26  ;;  %v7450_v27 = vld [vmem:[#allocation3 + $0x160] sm:$0xff]  ;;  %v7451_v15 = vld [vmem:[#allocation3 + $0x178] sm:$0xff]  ;;  %v7452_v45 = vld [vmem:[#allocation3 + $0x168] sm:$0xff] }
 0x499   :  { %6590 = vst [vmem:[#allocation11 + $0x110] sm:$0xff] %v6526_v53  ;;  %6588 = vst [vmem:[#allocation11 + $0x100] sm:$0xff] %v6524_v58  ;;  %v6528_v30 = vadd.f32 %v7442_v62, %v6382_v39  ;;  %v6531_v10 = vadd.f32 %v7443_v1, %v6393_v25  ;;  %v6406_v60 = vadd.f32 %v9939_v6, %v9979_v38  ;;  %v7453_v52 = vld [vmem:[#allocation3 + $0x190] sm:$0xff]  ;;  %v7454_v5 = vld [vmem:[#allocation3 + $0x180] sm:$0xff] }
 0x49a   :  { %v6398_v40 = vadd.f32 %v9979_v38, %v9944_v14  ;;  %6591 = vst [vmem:[#allocation11 + $0x118] sm:$0xff] %v6527_v7  ;;  %6589 = vst [vmem:[#allocation11 + $0x108] sm:$0xff] %v6525_v22  ;;  %v6529_v63 = vadd.f32 %v7444_v59, %v6385_v9  ;;  %v6409_v18 = vadd.f32 %v9947_v17, %v9979_v38  ;;  %v7455_v8 = vld [vmem:[#allocation3 + $0x198] sm:$0xff]  ;;  %v7456_v53 = vld [vmem:[#allocation3 + $0x188] sm:$0xff] }
 0x49b   :  { %6594 = vst [vmem:[#allocation11 + $0x130] sm:$0xff] %v6530_v21  ;;  %v6401_v23 = vadd.f32 %v9979_v38, %v9950_v19  ;;  %6592 = vst [vmem:[#allocation11 + $0x120] sm:$0xff] %v6528_v30  ;;  %v6534_v16 = vadd.f32 %v7445_v42, %v6406_v60  ;;  %v7457_v56 = vld [vmem:[#allocation3 + $0x1b0] sm:$0xff]  ;;  %v7458_v24 = vld [vmem:[#allocation3 + $0x1a0] sm:$0xff] }
 0x49c   :  { %6595 = vst [vmem:[#allocation11 + $0x138] sm:$0xff] %v6531_v10  ;;  %v6532_v6 = vadd.f32 %v7446_v61, %v6398_v40  ;;  %6593 = vst [vmem:[#allocation11 + $0x128] sm:$0xff] %v6529_v63  ;;  %v6535_v14 = vadd.f32 %v7447_v33, %v6409_v18  ;;  %v7345_v12 = vpop.f32.mrb[44].mxu1  ;;  %v7459_v9 = vld [vmem:[#allocation3 + $0x1b8] sm:$0xff]  ;;  %v7460_v30 = vld [vmem:[#allocation3 + $0x1a8] sm:$0xff] }
 0x49d   :  { %v6533_v31 = vadd.f32 %v7448_v54, %v6401_v23  ;;  %6598 = vst [vmem:[#allocation11 + $0x150] sm:$0xff] %v6534_v16  ;;  %v6422_v17 = vadd.f32 %v7345_v12, %v9979_v38  ;;  %v6413_v48 = vpop.f32.mrb[45].mxu1  ;;  %v7461_v18 = vld [vmem:[#allocation3 + $0x1d0] sm:$0xff]  ;;  %v7462_v61 = vld [vmem:[#allocation3 + $0x1c0] sm:$0xff] }
 0x49e   :  { %6596 = vst [vmem:[#allocation11 + $0x140] sm:$0xff] %v6532_v6  ;;  %6599 = vst [vmem:[#allocation11 + $0x158] sm:$0xff] %v6535_v14  ;;  %v6414_v19 = vadd.f32 %v9979_v38, %v6413_v48  ;;  %v7346_v2 = vpop.f32.mrb[46].mxu1  ;;  %v7463_v14 = vld [vmem:[#allocation3 + $0x1d8] sm:$0xff] }
 0x49f   :  { %6597 = vst [vmem:[#allocation11 + $0x148] sm:$0xff] %v6533_v31  ;;  %v6538_v11 = vadd.f32 %v7449_v20, %v6422_v17  ;;  %v6425_v47 = vadd.f32 %v7346_v2, %v9979_v38  ;;  %v6416_v43 = vpop.f32.mrb[47].mxu1  ;;  %v7464_v31 = vld [vmem:[#allocation3 + $0x1c8] sm:$0xff] }
 0x4a0   :  { %v6536_v35 = vadd.f32 %v7450_v27, %v6414_v19  ;;  %v6417_v41 = vadd.f32 %v9979_v38, %v6416_v43 }
 0x4a1   :  { %6602 = vst [vmem:[#allocation11 + $0x170] sm:$0xff] %v6538_v11  ;;  %v6539_v0 = vadd.f32 %v7451_v15, %v6425_v47  ;;  %v7465_v11 = vld [vmem:[#allocation3 + $0x1f0] sm:$0xff] }
 0x4a2   :  { %6600 = vst [vmem:[#allocation11 + $0x160] sm:$0xff] %v6536_v35  ;;  %v6537_v44 = vadd.f32 %v7452_v45, %v6417_v41  ;;  %v7466_v35 = vld [vmem:[#allocation3 + $0x1e0] sm:$0xff] }
 0x4a3   :  { %6603 = vst [vmem:[#allocation11 + $0x178] sm:$0xff] %v6539_v0  ;;  %v7467_v0 = vld [vmem:[#allocation3 + $0x1f8] sm:$0xff] }
 0x4a4   :  { %6601 = vst [vmem:[#allocation11 + $0x168] sm:$0xff] %v6537_v44  ;;  %v7468_v44 = vld [vmem:[#allocation3 + $0x1e8] sm:$0xff] }
 0x4cc   :  { %v7349_v37 = vpop.f32.mrb[48].mxu1 }
 0x4cd   :  { %v6438_v51 = vadd.f32 %v7349_v37, %v9979_v38  ;;  %v6429_v49 = vpop.f32.mrb[49].mxu1 }
 0x4ce   :  { %v6430_v3 = vadd.f32 %v9979_v38, %v6429_v49  ;;  %v7350_v50 = vpop.f32.mrb[50].mxu1 }
 0x4cf   :  { %v6542_v46 = vadd.f32 %v7453_v52, %v6438_v51  ;;  %v6441_v28 = vadd.f32 %v7350_v50, %v9979_v38  ;;  %v6432_v55 = vpop.f32.mrb[51].mxu1 }
 0x4d0   :  { %v6540_v36 = vadd.f32 %v7454_v5, %v6430_v3  ;;  %v6433_v34 = vadd.f32 %v9979_v38, %v6432_v55 }
 0x4d1   :  { %6606 = vst [vmem:[#allocation11 + $0x190] sm:$0xff] %v6542_v46  ;;  %v6543_v4 = vadd.f32 %v7455_v8, %v6441_v28 }
 0x4d2   :  { %6604 = vst [vmem:[#allocation11 + $0x180] sm:$0xff] %v6540_v36  ;;  %v6541_v57 = vadd.f32 %v7456_v53, %v6433_v34 }
 0x4d3   :  { %6607 = vst [vmem:[#allocation11 + $0x198] sm:$0xff] %v6543_v4 }
 0x4d4   :  { %6605 = vst [vmem:[#allocation11 + $0x188] sm:$0xff] %v6541_v57 }
 0x4ff   :  { %v7353_v58 = vpop.f32.mrb[52].mxu1 }
 0x500   :  { %v6454_v13 = vadd.f32 %v7353_v58, %v9979_v38  ;;  %v6445_v39 = vpop.f32.mrb[53].mxu1 }
 0x501   :  { %v6446_v32 = vadd.f32 %v9979_v38, %v6445_v39  ;;  %v7354_v25 = vpop.f32.mrb[54].mxu1 }
 0x502   :  { %v6546_v7 = vadd.f32 %v7457_v56, %v6454_v13  ;;  %v6457_v29 = vadd.f32 %v7354_v25, %v9979_v38  ;;  %v6448_v22 = vpop.f32.mrb[55].mxu1 }
 0x503   :  { %v6544_v21 = vadd.f32 %v7458_v24, %v6446_v32  ;;  %v6449_v26 = vadd.f32 %v9979_v38, %v6448_v22 }
 0x504   :  { %6610 = vst [vmem:[#allocation11 + $0x1b0] sm:$0xff] %v6546_v7  ;;  %v6547_v62 = vadd.f32 %v7459_v9, %v6457_v29 }
 0x505   :  { %6608 = vst [vmem:[#allocation11 + $0x1a0] sm:$0xff] %v6544_v21  ;;  %v6545_v1 = vadd.f32 %v7460_v30, %v6449_v26 }
 0x506   :  { %6611 = vst [vmem:[#allocation11 + $0x1b8] sm:$0xff] %v6547_v62 }
 0x507   :  { %6609 = vst [vmem:[#allocation11 + $0x1a8] sm:$0xff] %v6545_v1 }
 0x52f   :  { %v7357_v10 = vpop.f32.mrb[56].mxu1 }
 0x530   :  { %v6470_v60 = vadd.f32 %v7357_v10, %v9979_v38  ;;  %v6461_v40 = vpop.f32.mrb[57].mxu1 }
 0x531   :  { %v6462_v59 = vadd.f32 %v9979_v38, %v6461_v40  ;;  %v7358_v63 = vpop.f32.mrb[58].mxu1 }
 0x532   :  { %v6550_v23 = vadd.f32 %v7461_v18, %v6470_v60  ;;  %v6473_v42 = vadd.f32 %v7358_v63, %v9979_v38  ;;  %v6464_v16 = vpop.f32.mrb[59].mxu1 }
 0x533   :  { %v6548_v6 = vadd.f32 %v7462_v61, %v6462_v59  ;;  %v6465_v33 = vadd.f32 %v9979_v38, %v6464_v16 }
 0x534   :  { %6614 = vst [vmem:[#allocation11 + $0x1d0] sm:$0xff] %v6550_v23  ;;  %v6551_v54 = vadd.f32 %v7463_v14, %v6473_v42 }
 0x535   :  { %6612 = vst [vmem:[#allocation11 + $0x1c0] sm:$0xff] %v6548_v6  ;;  %v6549_v12 = vadd.f32 %v7464_v31, %v6465_v33 }
 0x536   :  { %6615 = vst [vmem:[#allocation11 + $0x1d8] sm:$0xff] %v6551_v54 }
 0x537   :  { %6613 = vst [vmem:[#allocation11 + $0x1c8] sm:$0xff] %v6549_v12 }
 0x562   :  { %v7361_v17 = vpop.f32.mrb[60].mxu1 }
 0x563   :  { %v6486_v48 = vadd.f32 %v7361_v17, %v9979_v38  ;;  %v6477_v19 = vpop.f32.mrb[61].mxu1 }
 0x564   :  { %v6478_v2 = vadd.f32 %v9979_v38, %v6477_v19  ;;  %v7362_v20 = vpop.f32.mrb[62].mxu1 }
 0x565   :  { %v6554_v47 = vadd.f32 %v7465_v11, %v6486_v48  ;;  %v6489_v43 = vadd.f32 %v7362_v20, %v9979_v38  ;;  %v6480_v27 = vpop.f32.mrb[63].mxu1 }
 0x566   :  { %v6552_v41 = vadd.f32 %v7466_v35, %v6478_v2  ;;  %v6481_v15 = vadd.f32 %v9979_v38, %v6480_v27 }
 0x567   :  { %6618 = vst [vmem:[#allocation11 + $0x1f0] sm:$0xff] %v6554_v47  ;;  %v6555_v45 = vadd.f32 %v7467_v0, %v6489_v43 }
 0x568   :  { %6616 = vst [vmem:[#allocation11 + $0x1e0] sm:$0xff] %v6552_v41  ;;  %v6553_v37 = vadd.f32 %v7468_v44, %v6481_v15 }
 0x569   :  { %6619 = vst [vmem:[#allocation11 + $0x1f8] sm:$0xff] %v6555_v45 }
 0x56a   :  { %6617 = vst [vmem:[#allocation11 + $0x1e8] sm:$0xff] %v6553_v37 }
 0x56b   :  { %7568 = shalt.err (!%p7565_p8)
}
 0x56c   :  { %s7569_s30 = scalar_lea.hbm %s10123_s7, 8192 }
 0x56d   :  { %p7570_p9 = scmp.ne.s32.totalorder %s10123_s7, %s7569_s30  ;;  %p7573_p10 = scmp.lt.u32.totalorder %s7569_s30, %s10123_s7 }
 0x56f   :  { %p7575_p11 = pnand %p7573_p10, %p7570_p9 }
 0x571   :  { %7578 = shalt.err (!%p7575_p11)
}
 0x572   :  { %6631 = dma.vmem_to_hbm [thread:$0]  %s6626_s29, 8192, %s10123_s7, [#allocation5], %s7591_s1, %s7591_s1, %s7592_s25  }
 0x573   :  { %7585 = dma.done.wait [#allocation5], 8192  }
 0x574   :  { %7586 = vsyncadd [#allocation5], 4294959104 }
 0x575   :  { %6635 = vsyncpa [#allocation4], 1 }
 0x576   :  { %6636 = vsyncpa [#allocation7], 1 }
 0x577   :  { %6637 = vsyncpa [#allocation10], 1 }
 0x578   :  { %6638 = vsyncpa [#allocation5], 1 }

</bundles_post_ra>
